<compile_context>
chip_gen: v7x
topology: tpu7x:2x2x1
jax: 0.10.0
libtpu: 0.0.40
codegen_flags: <defaults>
</compile_context>

<pallas_src>
import jax
import jax.numpy as jnp
import numpy as np
from jax.experimental import pallas as pl
from jax.experimental.pallas import tpu as pltpu


# ----------------------------- Pallas kernels ------------------------------

def _conv_pool_relu_kernel(xe_ref, xo_ref, w_ref, bias_ref, o_ref):
    """Fused Conv2d(5x5, pad=2) + MaxPool2x2 + ReLU for one sample.

    xe_ref/xo_ref: (1, Hp/2, Wp*Cin)  even / odd rows of the padded image.
    w_ref:         (5, Wp*Cin, 2*(W/2)*Cout_pad) banded weights (tap dy major);
                   last axis = [pool-col px=0 block | px=1 block].
    bias_ref:      (1, (W/2)*Cout_pad) f32.
    o_ref:         (1, H/2, (W/2)*Cout_pad) bf16, lanes = j*Cout_pad + co.
    """
    h2 = o_ref.shape[1]
    n2 = o_ref.shape[2]
    xpar = (xe_ref[0], xo_ref[0])
    acc = []
    for py in range(2):                         # pool-row parity
        z = None
        for dy in range(5):                     # vertical conv tap
            t = py + dy
            lhs = xpar[t % 2][t // 2:t // 2 + h2, :]
            d = jnp.dot(lhs, w_ref[dy], preferred_element_type=jnp.float32)
            z = d if z is None else z + d
        acc.append(z)                           # (H/2, 2*n2) f32
    m = jnp.maximum(acc[0], acc[1])             # max over pool rows
    pooled = jnp.maximum(m[:, :n2], m[:, n2:])  # max over pool cols
    y = jnp.maximum(pooled + bias_ref[...], 0.0)
    o_ref[0] = y.astype(o_ref.dtype)


def _fc_kernel(x_ref, w1_ref, b1_ref, w2_ref, b2_ref, o_ref):
    # Linear -> Dropout (eval: identity) -> ReLU -> Linear -> ReLU
    h = jnp.dot(x_ref[...], w1_ref[...], preferred_element_type=jnp.float32)
    h = jnp.maximum(h + b1_ref[...], 0.0)
    y = jnp.dot(h.astype(w2_ref.dtype), w2_ref[...],
                preferred_element_type=jnp.float32)
    o_ref[...] = jnp.maximum(y + b2_ref[...], 0.0)


# ------------------------------ pallas_call glue ----------------------------

def _bytes(*arrs):
    return int(sum(a.size * a.dtype.itemsize for a in arrs))


def _conv_pool_relu(xe, xo, bw, bias):
    n, hp2, k = xe.shape
    n2 = bias.shape[1]
    h2 = hp2 - 2
    flops = 2 * n * 2 * 5 * h2 * k * (2 * n2)
    return pl.pallas_call(
        _conv_pool_relu_kernel,
        out_shape=jax.ShapeDtypeStruct((n, h2, n2), jnp.bfloat16),
        grid=(n,),
        in_specs=[
            pl.BlockSpec((1, hp2, k), lambda b: (b, 0, 0)),
            pl.BlockSpec((1, hp2, k), lambda b: (b, 0, 0)),
            pl.BlockSpec(bw.shape, lambda b: (0, 0, 0)),    # resident weights
            pl.BlockSpec(bias.shape, lambda b: (0, 0)),     # resident bias
        ],
        out_specs=pl.BlockSpec((1, h2, n2), lambda b: (b, 0, 0)),
        compiler_params=pltpu.CompilerParams(
            dimension_semantics=("parallel",),
            vmem_limit_bytes=32 * 1024 * 1024),
        cost_estimate=pl.CostEstimate(
            flops=flops, transcendentals=0,
            bytes_accessed=_bytes(xe, xo, bw, bias) + n * h2 * n2 * 2),
    )(xe, xo, bw, bias)


def _fc(x, w1, b1, w2, b2):
    n, kin = x.shape
    hid = w1.shape[1]
    nout = w2.shape[1]
    tm = min(128, n)
    flops = 2 * n * (kin * hid + hid * nout)
    return pl.pallas_call(
        _fc_kernel,
        out_shape=jax.ShapeDtypeStruct((n, nout), jnp.float32),
        grid=(pl.cdiv(n, tm),),
        in_specs=[
            pl.BlockSpec((tm, kin), lambda i: (i, 0)),
            pl.BlockSpec(w1.shape, lambda i: (0, 0)),
            pl.BlockSpec(b1.shape, lambda i: (0, 0)),
            pl.BlockSpec(w2.shape, lambda i: (0, 0)),
            pl.BlockSpec(b2.shape, lambda i: (0, 0)),
        ],
        out_specs=pl.BlockSpec((tm, nout), lambda i: (i, 0)),
        compiler_params=pltpu.CompilerParams(
            dimension_semantics=("parallel",),
            vmem_limit_bytes=32 * 1024 * 1024),
        cost_estimate=pl.CostEstimate(
            flops=flops, transcendentals=0,
            bytes_accessed=_bytes(x, w1, b1, w2, b2) + n * nout * 4),
    )(x, w1, b1, w2, b2)


# --------------------- init-time weight preparation -------------------------

def _round_up(x, m):
    return (x + m - 1) // m * m


def _channel_pad(cout, w_half):
    # smallest c >= cout such that the pooled output width w_half*c is a
    # multiple of 128 lanes (unmasked, lane-dense stores).
    c = cout
    while (w_half * c) % 128 != 0:
        c += 1
    return c


def _build_pool_banded_weight(wc, width, cin_pad, cout_pad):
    """Scatter a (Cout, Cin, 5, 5) conv weight into 5 banded matrices.

    With the padded image in row layout X[h, w*cin_pad + ci],
      sum_dy X[2i+py+dy, :] @ B[dy]
    gives the un-biased conv outputs at rows 2i+py for pool-column px=0
    (first half of the last axis) and px=1 (second half), laid out as lane
    index j*cout_pad + co (j = pooled column).
    """
    cout, cin, kh, kw = wc.shape
    assert kh == 5 and kw == 5
    wp, w2 = width + 4, width // 2
    wcp = np.zeros((cout_pad, cin_pad, 5, 5), np.float32)
    wcp[:cout, :cin] = wc
    b = np.zeros((2, 5, wp * cin_pad, w2 * cout_pad), np.float32)
    for px in range(2):
        for dy in range(5):
            for j in range(w2):
                for dx in range(5):
                    w_in = 2 * j + px + dx
                    b[px, dy,
                      w_in * cin_pad:(w_in + 1) * cin_pad,
                      j * cout_pad:(j + 1) * cout_pad] = wcp[:, :, dy, dx].T
    return np.concatenate([b[0], b[1]], axis=-1)   # (5, wp*cin_pad, 2*w2*cpad)


def _build_pool_bias(bias, width, cout_pad):
    bias = np.asarray(bias, np.float32)
    w2 = width // 2
    br = np.zeros((w2, cout_pad), np.float32)
    br[:, :bias.shape[0]] = bias[None, :]
    return br.reshape(1, w2 * cout_pad)


def prepare_inference_params(params, sample_shape, num_classes):
    """One-time lowering of PyTorch-layout params into kernel-ready arrays."""
    c, h, w = sample_shape
    assert h % 4 == 0 and w % 4 == 0
    conv1_w = np.asarray(params["conv1_w"], np.float32)      # (20, c, 5, 5)
    conv2_w = np.asarray(params["conv2_w"], np.float32)      # (50, 20, 5, 5)
    c1_out, c2_out = conv1_w.shape[0], conv2_w.shape[0]
    c1_pad = _channel_pad(c1_out, w // 2)
    c2_pad = _channel_pad(c2_out, w // 4)

    b1 = _build_pool_banded_weight(conv1_w, w, cin_pad=c, cout_pad=c1_pad)
    b2 = _build_pool_banded_weight(conv2_w, w // 2, cin_pad=c1_pad,
                                   cout_pad=c2_pad)

    fc1_w = np.asarray(params["fc1_w"], np.float32)          # (500, fc_in)
    fc1_b = np.asarray(params["fc1_b"], np.float32)
    fc2_w = np.asarray(params["fc2_w"], np.float32)          # (nc, 500)
    fc2_b = np.asarray(params["fc2_b"], np.float32)
    h4, w4 = h // 4, w // 4
    hid = fc1_w.shape[0]
    hid_pad = _round_up(hid, 128)
    out_pad = _round_up(num_classes, 128)

    # Fold the PyTorch NCHW .view() flatten permutation + channel padding into
    # fc1's weight (done once at init, zero per-forward cost).
    w1p = np.zeros((h4 * w4 * c2_pad, hid_pad), np.float32)
    for i in range(h4):
        for j in range(w4):
            for cc in range(c2_out):
                g = (i * w4 + j) * c2_pad + cc           # our flatten order
                f = cc * (h4 * w4) + i * w4 + j          # PyTorch flatten order
                w1p[g, :hid] = fc1_w[:, f]
    b1p = np.zeros((1, hid_pad), np.float32)
    b1p[0, :hid] = fc1_b
    w2p = np.zeros((hid_pad, out_pad), np.float32)
    w2p[:hid, :num_classes] = fc2_w.T
    b2p = np.zeros((1, out_pad), np.float32)
    b2p[0, :num_classes] = fc2_b

    bf = jnp.bfloat16
    return {
        "c1_bw": jnp.asarray(b1, bf),
        "c1_bias": jnp.asarray(_build_pool_bias(params["conv1_b"], w, c1_pad)),
        "c2_bw": jnp.asarray(b2, bf),
        "c2_bias": jnp.asarray(_build_pool_bias(params["conv2_b"], w // 2,
                                                c2_pad)),
        "fc1_w": jnp.asarray(w1p, bf),
        "fc1_b": jnp.asarray(b1p),
        "fc2_w": jnp.asarray(w2p, bf),
        "fc2_b": jnp.asarray(b2p),
    }


# ------------------------------ parameters ---------------------------------

def init_params(key, sample_shape, num_classes):
    c, h, w = sample_shape
    dims = [c, 20, 50]
    fc_in = h // 4 * w // 4 * dims[2]
    fc_dims = [fc_in, min(fc_in, 500), num_classes]
    ks = jax.random.split(key, 8)

    def uni(k, shape, fan_in):
        bound = 1.0 / np.sqrt(fan_in)
        return jax.random.uniform(k, shape, jnp.float32, -bound, bound)

    return {
        "conv1_w": uni(ks[0], (dims[1], dims[0], 5, 5), dims[0] * 25),
        "conv1_b": uni(ks[1], (dims[1],), dims[0] * 25),
        "conv2_w": uni(ks[2], (dims[2], dims[1], 5, 5), dims[1] * 25),
        "conv2_b": uni(ks[3], (dims[2],), dims[1] * 25),
        "fc1_w": uni(ks[4], (fc_dims[1], fc_dims[0]), fc_dims[0]),
        "fc1_b": uni(ks[5], (fc_dims[1],), fc_dims[0]),
        "fc2_w": uni(ks[6], (fc_dims[2], fc_dims[1]), fc_dims[1]),
        "fc2_b": uni(ks[7], (fc_dims[2],), fc_dims[1]),
    }


# ------------------------------- forward -----------------------------------

def _row_layout_split(x_rows):
    """(N, Hp, L) -> (even rows (N, Hp/2, L), odd rows (N, Hp/2, L))."""
    return x_rows[:, 0::2, :], x_rows[:, 1::2, :]


@jax.jit
def _infer_forward_padded(prep, x_nchw):
    n, c, h, w = x_nchw.shape
    c1_pad = prep["c1_bias"].shape[1] // (w // 2)

    # conv block 1: Conv2d(c->20, k5, p2) -> MaxPool2x2 -> ReLU
    x = jnp.transpose(x_nchw, (0, 2, 3, 1)).astype(jnp.bfloat16)     # NHWC
    xr = jnp.pad(x, ((0, 0), (2, 2), (2, 2), (0, 0)))
    xr = xr.reshape(n, h + 4, (w + 4) * c)                           # row layout
    xe, xo = _row_layout_split(xr)
    y1 = _conv_pool_relu(xe, xo, prep["c1_bw"], prep["c1_bias"])
    # y1: (N, H/2, (W/2)*c1_pad) -- already the row layout conv block 2 needs.

    # conv block 2: Conv2d(20->50, k5, p2) -> MaxPool2x2 -> ReLU
    y1p = jnp.pad(y1, ((0, 0), (2, 2), (2 * c1_pad, 2 * c1_pad)))
    xe2, xo2 = _row_layout_split(y1p)
    y2 = _conv_pool_relu(xe2, xo2, prep["c2_bw"], prep["c2_bias"])
    # y2: (N, H/4, (W/4)*c2_pad)

    # fc head (flatten permutation folded into fc1_w; Dropout is identity).
    flat = y2.reshape(n, -1)
    return _fc(flat, prep["fc1_w"], prep["fc1_b"],
               prep["fc2_w"], prep["fc2_b"])                         # (N, 128)


def infer_net_forward(prep, x_nchw, num_classes):
    return _infer_forward_padded(prep, x_nchw)[:, :num_classes]


def edl_forward(prep, x, num_classes, target=None, epoch=0):
    """EDL.forward in eval mode: returns (evidence, loss)."""
    evidence = infer_net_forward(prep, x, num_classes)
    # TODO(synk): the training-loss branch (cross_entropy / log / digamma /
    # mse + annealed KL) is only active when `target` is given; not kernelized
    # here -- eval forward returns loss=None, matching the PyTorch module.
    # TODO(synk): len(sample_shape)==1 (vector, conv-less) path not implemented.
    return evidence, None


# ---------------------------- pure-JAX reference ----------------------------

def reference_forward(params, x_nchw):
    hi = jax.lax.Precision.HIGHEST

    def conv_block(x, w, b):
        y = jax.lax.conv_general_dilated(
            x, w, (1, 1), ((2, 2), (2, 2)),
            dimension_numbers=("NCHW", "OIHW", "NCHW"), precision=hi)
        y = y + b.reshape(1, -1, 1, 1)
        y = jax.lax.reduce_window(y, -jnp.inf, jax.lax.max,
                                  (1, 1, 2, 2), (1, 1, 2, 2), "VALID")
        return jnp.maximum(y, 0.0)

    y = conv_block(x_nchw, params["conv1_w"], params["conv1_b"])
    y = conv_block(y, params["conv2_w"], params["conv2_b"])
    flat = y.reshape(y.shape[0], -1)
    h = jnp.maximum(jnp.dot(flat, params["fc1_w"].T, precision=hi)
                    + params["fc1_b"], 0.0)
    return jnp.maximum(jnp.dot(h, params["fc2_w"].T, precision=hi)
                       + params["fc2_b"], 0.0)


if __name__ == "__main__":
    sample_shape = (4, 16, 16)   # (C, H, W)
    num_classes = 10
    batch = 2

    key = jax.random.PRNGKey(0)
    pkey, xkey = jax.random.split(key)
    params = init_params(pkey, sample_shape, num_classes)
    prep = prepare_inference_params(params, sample_shape, num_classes)
    x = jax.random.normal(xkey, (batch,) + sample_shape, jnp.float32)

    evidence, loss = edl_forward(prep, x, num_classes)
    evidence = jax.block_until_ready(evidence)
    ref = jax.block_until_ready(reference_forward(params, x))

    assert evidence.shape == (batch, num_classes), evidence.shape
    assert loss is None
    # bf16 operands with f32 accumulation -> slightly looser tolerance vs f32.
    np.testing.assert_allclose(np.asarray(evidence, np.float32),
                               np.asarray(ref), rtol=2e-2, atol=2e-2)
    print("KERNEL_OK")
</pallas_src>

<mosaic_0001>
module attributes {stable_mosaic.version = 11 : i64} {
  func.func @_conv_pool_relu_kernel(%arg0: i32, %arg1: memref<1x10x80xbf16, #tpu.memory_space<vmem>>, %arg2: memref<1x10x80xbf16, #tpu.memory_space<vmem>>, %arg3: memref<5x80x512xbf16, #tpu.memory_space<vmem>>, %arg4: memref<1x256xf32, #tpu.memory_space<vmem>>, %arg5: memref<1x8x256xbf16, #tpu.memory_space<vmem>>) attributes {dimension_semantics = [#tpu.dimension_semantics<parallel>], iteration_bounds = array<i64: 2>, scalar_prefetch = 0 : i64, scratch_operands = 0 : i64, tpu.core_type = #tpu.core_type<tc>, window_params = [{transform_indices = @transform_0, window_bounds = array<i64: 1, 10, 80>}, {transform_indices = @transform_1, window_bounds = array<i64: 1, 10, 80>}, {pipeline_mode = #tpu.pipeline_mode<synchronous>, transform_indices = @transform_2, window_bounds = array<i64: 5, 80, 512>}, {pipeline_mode = #tpu.pipeline_mode<synchronous>, transform_indices = @transform_3, window_bounds = array<i64: 1, 256>}, {transform_indices = @transform_4, window_bounds = array<i64: 1, 8, 256>}]} {
    %c0 = arith.constant 0 : index
    %c0_0 = arith.constant 0 : index
    %c0_1 = arith.constant 0 : index
    %0 = vector.load %arg1[%c0, %c0_0, %c0_1] : memref<1x10x80xbf16, #tpu.memory_space<vmem>>, vector<1x10x80xbf16>
    %1 = vector.shape_cast %0 : vector<1x10x80xbf16> to vector<10x80xbf16>
    %c0_2 = arith.constant 0 : index
    %c0_3 = arith.constant 0 : index
    %c0_4 = arith.constant 0 : index
    %2 = vector.load %arg2[%c0_2, %c0_3, %c0_4] : memref<1x10x80xbf16, #tpu.memory_space<vmem>>, vector<1x10x80xbf16>
    %3 = vector.shape_cast %2 : vector<1x10x80xbf16> to vector<10x80xbf16>
    %4 = vector.extract_strided_slice %1 {offsets = [0, 0], sizes = [8, 80], strides = [1, 1]} : vector<10x80xbf16> to vector<8x80xbf16>
    %c0_5 = arith.constant 0 : index
    %c0_6 = arith.constant 0 : index
    %c0_7 = arith.constant 0 : index
    %5 = vector.load %arg3[%c0_5, %c0_6, %c0_7] : memref<5x80x512xbf16, #tpu.memory_space<vmem>>, vector<1x80x512xbf16>
    %6 = vector.shape_cast %5 : vector<1x80x512xbf16> to vector<80x512xbf16>
    %cst = arith.constant dense<0.000000e+00> : vector<8x512xf32>
    %7 = tpu.matmul %4, %6, %cst {dimension_numbers = #tpu.dot_dimension_numbers<[1], [0], [0], [1], [0, 0, 1, 1], [], []>} : vector<8x80xbf16>, vector<80x512xbf16>, vector<8x512xf32> -> vector<8x512xf32>
    %8 = vector.extract_strided_slice %3 {offsets = [0, 0], sizes = [8, 80], strides = [1, 1]} : vector<10x80xbf16> to vector<8x80xbf16>
    %c1 = arith.constant 1 : index
    %c0_8 = arith.constant 0 : index
    %c0_9 = arith.constant 0 : index
    %9 = vector.load %arg3[%c1, %c0_8, %c0_9] : memref<5x80x512xbf16, #tpu.memory_space<vmem>>, vector<1x80x512xbf16>
    %10 = vector.shape_cast %9 : vector<1x80x512xbf16> to vector<80x512xbf16>
    %cst_10 = arith.constant dense<0.000000e+00> : vector<8x512xf32>
    %11 = tpu.matmul %8, %10, %cst_10 {dimension_numbers = #tpu.dot_dimension_numbers<[1], [0], [0], [1], [0, 0, 1, 1], [], []>} : vector<8x80xbf16>, vector<80x512xbf16>, vector<8x512xf32> -> vector<8x512xf32>
    %12 = arith.addf %7, %11 : vector<8x512xf32>
    %13 = vector.extract_strided_slice %1 {offsets = [1, 0], sizes = [8, 80], strides = [1, 1]} : vector<10x80xbf16> to vector<8x80xbf16>
    %c2 = arith.constant 2 : index
    %c0_11 = arith.constant 0 : index
    %c0_12 = arith.constant 0 : index
    %14 = vector.load %arg3[%c2, %c0_11, %c0_12] : memref<5x80x512xbf16, #tpu.memory_space<vmem>>, vector<1x80x512xbf16>
    %15 = vector.shape_cast %14 : vector<1x80x512xbf16> to vector<80x512xbf16>
    %cst_13 = arith.constant dense<0.000000e+00> : vector<8x512xf32>
    %16 = tpu.matmul %13, %15, %cst_13 {dimension_numbers = #tpu.dot_dimension_numbers<[1], [0], [0], [1], [0, 0, 1, 1], [], []>} : vector<8x80xbf16>, vector<80x512xbf16>, vector<8x512xf32> -> vector<8x512xf32>
    %17 = arith.addf %12, %16 : vector<8x512xf32>
    %18 = vector.extract_strided_slice %3 {offsets = [1, 0], sizes = [8, 80], strides = [1, 1]} : vector<10x80xbf16> to vector<8x80xbf16>
    %c3 = arith.constant 3 : index
    %c0_14 = arith.constant 0 : index
    %c0_15 = arith.constant 0 : index
    %19 = vector.load %arg3[%c3, %c0_14, %c0_15] : memref<5x80x512xbf16, #tpu.memory_space<vmem>>, vector<1x80x512xbf16>
    %20 = vector.shape_cast %19 : vector<1x80x512xbf16> to vector<80x512xbf16>
    %cst_16 = arith.constant dense<0.000000e+00> : vector<8x512xf32>
    %21 = tpu.matmul %18, %20, %cst_16 {dimension_numbers = #tpu.dot_dimension_numbers<[1], [0], [0], [1], [0, 0, 1, 1], [], []>} : vector<8x80xbf16>, vector<80x512xbf16>, vector<8x512xf32> -> vector<8x512xf32>
    %22 = arith.addf %17, %21 : vector<8x512xf32>
    %23 = vector.extract_strided_slice %1 {offsets = [2, 0], sizes = [8, 80], strides = [1, 1]} : vector<10x80xbf16> to vector<8x80xbf16>
    %c4 = arith.constant 4 : index
    %c0_17 = arith.constant 0 : index
    %c0_18 = arith.constant 0 : index
    %24 = vector.load %arg3[%c4, %c0_17, %c0_18] : memref<5x80x512xbf16, #tpu.memory_space<vmem>>, vector<1x80x512xbf16>
    %25 = vector.shape_cast %24 : vector<1x80x512xbf16> to vector<80x512xbf16>
    %cst_19 = arith.constant dense<0.000000e+00> : vector<8x512xf32>
    %26 = tpu.matmul %23, %25, %cst_19 {dimension_numbers = #tpu.dot_dimension_numbers<[1], [0], [0], [1], [0, 0, 1, 1], [], []>} : vector<8x80xbf16>, vector<80x512xbf16>, vector<8x512xf32> -> vector<8x512xf32>
    %27 = arith.addf %22, %26 : vector<8x512xf32>
    %28 = vector.extract_strided_slice %3 {offsets = [0, 0], sizes = [8, 80], strides = [1, 1]} : vector<10x80xbf16> to vector<8x80xbf16>
    %c0_20 = arith.constant 0 : index
    %c0_21 = arith.constant 0 : index
    %c0_22 = arith.constant 0 : index
    %29 = vector.load %arg3[%c0_20, %c0_21, %c0_22] : memref<5x80x512xbf16, #tpu.memory_space<vmem>>, vector<1x80x512xbf16>
    %30 = vector.shape_cast %29 : vector<1x80x512xbf16> to vector<80x512xbf16>
    %cst_23 = arith.constant dense<0.000000e+00> : vector<8x512xf32>
    %31 = tpu.matmul %28, %30, %cst_23 {dimension_numbers = #tpu.dot_dimension_numbers<[1], [0], [0], [1], [0, 0, 1, 1], [], []>} : vector<8x80xbf16>, vector<80x512xbf16>, vector<8x512xf32> -> vector<8x512xf32>
    %32 = vector.extract_strided_slice %1 {offsets = [1, 0], sizes = [8, 80], strides = [1, 1]} : vector<10x80xbf16> to vector<8x80xbf16>
    %c1_24 = arith.constant 1 : index
    %c0_25 = arith.constant 0 : index
    %c0_26 = arith.constant 0 : index
    %33 = vector.load %arg3[%c1_24, %c0_25, %c0_26] : memref<5x80x512xbf16, #tpu.memory_space<vmem>>, vector<1x80x512xbf16>
    %34 = vector.shape_cast %33 : vector<1x80x512xbf16> to vector<80x512xbf16>
    %cst_27 = arith.constant dense<0.000000e+00> : vector<8x512xf32>
    %35 = tpu.matmul %32, %34, %cst_27 {dimension_numbers = #tpu.dot_dimension_numbers<[1], [0], [0], [1], [0, 0, 1, 1], [], []>} : vector<8x80xbf16>, vector<80x512xbf16>, vector<8x512xf32> -> vector<8x512xf32>
    %36 = arith.addf %31, %35 : vector<8x512xf32>
    %37 = vector.extract_strided_slice %3 {offsets = [1, 0], sizes = [8, 80], strides = [1, 1]} : vector<10x80xbf16> to vector<8x80xbf16>
    %c2_28 = arith.constant 2 : index
    %c0_29 = arith.constant 0 : index
    %c0_30 = arith.constant 0 : index
    %38 = vector.load %arg3[%c2_28, %c0_29, %c0_30] : memref<5x80x512xbf16, #tpu.memory_space<vmem>>, vector<1x80x512xbf16>
    %39 = vector.shape_cast %38 : vector<1x80x512xbf16> to vector<80x512xbf16>
    %cst_31 = arith.constant dense<0.000000e+00> : vector<8x512xf32>
    %40 = tpu.matmul %37, %39, %cst_31 {dimension_numbers = #tpu.dot_dimension_numbers<[1], [0], [0], [1], [0, 0, 1, 1], [], []>} : vector<8x80xbf16>, vector<80x512xbf16>, vector<8x512xf32> -> vector<8x512xf32>
    %41 = arith.addf %36, %40 : vector<8x512xf32>
    %42 = vector.extract_strided_slice %1 {offsets = [2, 0], sizes = [8, 80], strides = [1, 1]} : vector<10x80xbf16> to vector<8x80xbf16>
    %c3_32 = arith.constant 3 : index
    %c0_33 = arith.constant 0 : index
    %c0_34 = arith.constant 0 : index
    %43 = vector.load %arg3[%c3_32, %c0_33, %c0_34] : memref<5x80x512xbf16, #tpu.memory_space<vmem>>, vector<1x80x512xbf16>
    %44 = vector.shape_cast %43 : vector<1x80x512xbf16> to vector<80x512xbf16>
    %cst_35 = arith.constant dense<0.000000e+00> : vector<8x512xf32>
    %45 = tpu.matmul %42, %44, %cst_35 {dimension_numbers = #tpu.dot_dimension_numbers<[1], [0], [0], [1], [0, 0, 1, 1], [], []>} : vector<8x80xbf16>, vector<80x512xbf16>, vector<8x512xf32> -> vector<8x512xf32>
    %46 = arith.addf %41, %45 : vector<8x512xf32>
    %47 = vector.extract_strided_slice %3 {offsets = [2, 0], sizes = [8, 80], strides = [1, 1]} : vector<10x80xbf16> to vector<8x80xbf16>
    %c4_36 = arith.constant 4 : index
    %c0_37 = arith.constant 0 : index
    %c0_38 = arith.constant 0 : index
    %48 = vector.load %arg3[%c4_36, %c0_37, %c0_38] : memref<5x80x512xbf16, #tpu.memory_space<vmem>>, vector<1x80x512xbf16>
    %49 = vector.shape_cast %48 : vector<1x80x512xbf16> to vector<80x512xbf16>
    %cst_39 = arith.constant dense<0.000000e+00> : vector<8x512xf32>
    %50 = tpu.matmul %47, %49, %cst_39 {dimension_numbers = #tpu.dot_dimension_numbers<[1], [0], [0], [1], [0, 0, 1, 1], [], []>} : vector<8x80xbf16>, vector<80x512xbf16>, vector<8x512xf32> -> vector<8x512xf32>
    %51 = arith.addf %46, %50 : vector<8x512xf32>
    %52 = arith.maximumf %27, %51 : vector<8x512xf32>
    %53 = vector.extract_strided_slice %52 {offsets = [0, 0], sizes = [8, 256], strides = [1, 1]} : vector<8x512xf32> to vector<8x256xf32>
    %54 = vector.extract_strided_slice %52 {offsets = [0, 256], sizes = [8, 256], strides = [1, 1]} : vector<8x512xf32> to vector<8x256xf32>
    %55 = arith.maximumf %53, %54 : vector<8x256xf32>
    %c0_40 = arith.constant 0 : index
    %c0_41 = arith.constant 0 : index
    %56 = vector.load %arg4[%c0_40, %c0_41] : memref<1x256xf32, #tpu.memory_space<vmem>>, vector<1x256xf32>
    %57 = vector.broadcast %56 : vector<1x256xf32> to vector<8x256xf32>
    %58 = arith.addf %55, %57 : vector<8x256xf32>
    %cst_42 = arith.constant 0.000000e+00 : f32
    %59 = vector.broadcast %cst_42 : f32 to vector<8x256xf32>
    %60 = arith.maximumf %58, %59 : vector<8x256xf32>
    %61 = arith.truncf %60 : vector<8x256xf32> to vector<8x256xbf16>
    %c0_43 = arith.constant 0 : index
    %c0_44 = arith.constant 0 : index
    %c0_45 = arith.constant 0 : index
    %62 = vector.load %arg5[%c0_43, %c0_44, %c0_45] : memref<1x8x256xbf16, #tpu.memory_space<vmem>>, vector<1x8x256xbf16>
    %63 = vector.shape_cast %62 : vector<1x8x256xbf16> to vector<8x256xbf16>
    %64 = vector.shape_cast %61 : vector<8x256xbf16> to vector<1x8x256xbf16>
    tpu.vector_store %arg5[%c0_43, %c0_44, %c0_45], %64 {strides = array<i32>} : memref<1x8x256xbf16, #tpu.memory_space<vmem>>, vector<1x8x256xbf16>,
    return
  }
  func.func @transform_0(%arg0: i32) -> (i32, i32, i32) {
    %c0_i32 = arith.constant 0 : i32
    %c0_i32_0 = arith.constant 0 : i32
    %c0_i32_1 = arith.constant 0 : i32
    return %arg0, %c0_i32, %c0_i32_0 : i32, i32, i32
  }
  func.func @transform_1(%arg0: i32) -> (i32, i32, i32) {
    %c0_i32 = arith.constant 0 : i32
    %c0_i32_0 = arith.constant 0 : i32
    %c0_i32_1 = arith.constant 0 : i32
    return %arg0, %c0_i32, %c0_i32_0 : i32, i32, i32
  }
  func.func @transform_2(%arg0: i32) -> (i32, i32, i32) {
    %c0_i32 = arith.constant 0 : i32
    %c0_i32_0 = arith.constant 0 : i32
    %c0_i32_1 = arith.constant 0 : i32
    %c0_i32_2 = arith.constant 0 : i32
    return %c0_i32, %c0_i32_0, %c0_i32_1 : i32, i32, i32
  }
  func.func @transform_3(%arg0: i32) -> (i32, i32) {
    %c0_i32 = arith.constant 0 : i32
    %c0_i32_0 = arith.constant 0 : i32
    %c0_i32_1 = arith.constant 0 : i32
    return %c0_i32, %c0_i32_0 : i32, i32
  }
  func.func @transform_4(%arg0: i32) -> (i32, i32, i32) {
    %c0_i32 = arith.constant 0 : i32
    %c0_i32_0 = arith.constant 0 : i32
    %c0_i32_1 = arith.constant 0 : i32
    return %arg0, %c0_i32, %c0_i32_0 : i32, i32, i32
  }
}

module attributes {stable_mosaic.version = 11 : i64} {
  func.func @_conv_pool_relu_kernel(%arg0: i32, %arg1: memref<1x6x384xbf16, #tpu.memory_space<vmem>>, %arg2: memref<1x6x384xbf16, #tpu.memory_space<vmem>>, %arg3: memref<5x384x512xbf16, #tpu.memory_space<vmem>>, %arg4: memref<1x256xf32, #tpu.memory_space<vmem>>, %arg5: memref<1x4x256xbf16, #tpu.memory_space<vmem>>) attributes {dimension_semantics = [#tpu.dimension_semantics<parallel>], iteration_bounds = array<i64: 2>, scalar_prefetch = 0 : i64, scratch_operands = 0 : i64, tpu.core_type = #tpu.core_type<tc>, window_params = [{transform_indices = @transform_0, window_bounds = array<i64: 1, 6, 384>}, {transform_indices = @transform_1, window_bounds = array<i64: 1, 6, 384>}, {pipeline_mode = #tpu.pipeline_mode<synchronous>, transform_indices = @transform_2, window_bounds = array<i64: 5, 384, 512>}, {pipeline_mode = #tpu.pipeline_mode<synchronous>, transform_indices = @transform_3, window_bounds = array<i64: 1, 256>}, {transform_indices = @transform_4, window_bounds = array<i64: 1, 4, 256>}]} {
    %c0 = arith.constant 0 : index
    %c0_0 = arith.constant 0 : index
    %c0_1 = arith.constant 0 : index
    %0 = vector.load %arg1[%c0, %c0_0, %c0_1] : memref<1x6x384xbf16, #tpu.memory_space<vmem>>, vector<1x6x384xbf16>
    %1 = vector.shape_cast %0 : vector<1x6x384xbf16> to vector<6x384xbf16>
    %c0_2 = arith.constant 0 : index
    %c0_3 = arith.constant 0 : index
    %c0_4 = arith.constant 0 : index
    %2 = vector.load %arg2[%c0_2, %c0_3, %c0_4] : memref<1x6x384xbf16, #tpu.memory_space<vmem>>, vector<1x6x384xbf16>
    %3 = vector.shape_cast %2 : vector<1x6x384xbf16> to vector<6x384xbf16>
    %4 = vector.extract_strided_slice %1 {offsets = [0, 0], sizes = [4, 384], strides = [1, 1]} : vector<6x384xbf16> to vector<4x384xbf16>
    %c0_5 = arith.constant 0 : index
    %c0_6 = arith.constant 0 : index
    %c0_7 = arith.constant 0 : index
    %5 = vector.load %arg3[%c0_5, %c0_6, %c0_7] : memref<5x384x512xbf16, #tpu.memory_space<vmem>>, vector<1x384x512xbf16>
    %6 = vector.shape_cast %5 : vector<1x384x512xbf16> to vector<384x512xbf16>
    %cst = arith.constant dense<0.000000e+00> : vector<4x512xf32>
    %7 = tpu.matmul %4, %6, %cst {dimension_numbers = #tpu.dot_dimension_numbers<[1], [0], [0], [1], [0, 0, 1, 1], [], []>} : vector<4x384xbf16>, vector<384x512xbf16>, vector<4x512xf32> -> vector<4x512xf32>
    %8 = vector.extract_strided_slice %3 {offsets = [0, 0], sizes = [4, 384], strides = [1, 1]} : vector<6x384xbf16> to vector<4x384xbf16>
    %c1 = arith.constant 1 : index
    %c0_8 = arith.constant 0 : index
    %c0_9 = arith.constant 0 : index
    %9 = vector.load %arg3[%c1, %c0_8, %c0_9] : memref<5x384x512xbf16, #tpu.memory_space<vmem>>, vector<1x384x512xbf16>
    %10 = vector.shape_cast %9 : vector<1x384x512xbf16> to vector<384x512xbf16>
    %cst_10 = arith.constant dense<0.000000e+00> : vector<4x512xf32>
    %11 = tpu.matmul %8, %10, %cst_10 {dimension_numbers = #tpu.dot_dimension_numbers<[1], [0], [0], [1], [0, 0, 1, 1], [], []>} : vector<4x384xbf16>, vector<384x512xbf16>, vector<4x512xf32> -> vector<4x512xf32>
    %12 = arith.addf %7, %11 : vector<4x512xf32>
    %13 = vector.extract_strided_slice %1 {offsets = [1, 0], sizes = [4, 384], strides = [1, 1]} : vector<6x384xbf16> to vector<4x384xbf16>
    %c2 = arith.constant 2 : index
    %c0_11 = arith.constant 0 : index
    %c0_12 = arith.constant 0 : index
    %14 = vector.load %arg3[%c2, %c0_11, %c0_12] : memref<5x384x512xbf16, #tpu.memory_space<vmem>>, vector<1x384x512xbf16>
    %15 = vector.shape_cast %14 : vector<1x384x512xbf16> to vector<384x512xbf16>
    %cst_13 = arith.constant dense<0.000000e+00> : vector<4x512xf32>
    %16 = tpu.matmul %13, %15, %cst_13 {dimension_numbers = #tpu.dot_dimension_numbers<[1], [0], [0], [1], [0, 0, 1, 1], [], []>} : vector<4x384xbf16>, vector<384x512xbf16>, vector<4x512xf32> -> vector<4x512xf32>
    %17 = arith.addf %12, %16 : vector<4x512xf32>
    %18 = vector.extract_strided_slice %3 {offsets = [1, 0], sizes = [4, 384], strides = [1, 1]} : vector<6x384xbf16> to vector<4x384xbf16>
    %c3 = arith.constant 3 : index
    %c0_14 = arith.constant 0 : index
    %c0_15 = arith.constant 0 : index
    %19 = vector.load %arg3[%c3, %c0_14, %c0_15] : memref<5x384x512xbf16, #tpu.memory_space<vmem>>, vector<1x384x512xbf16>
    %20 = vector.shape_cast %19 : vector<1x384x512xbf16> to vector<384x512xbf16>
    %cst_16 = arith.constant dense<0.000000e+00> : vector<4x512xf32>
    %21 = tpu.matmul %18, %20, %cst_16 {dimension_numbers = #tpu.dot_dimension_numbers<[1], [0], [0], [1], [0, 0, 1, 1], [], []>} : vector<4x384xbf16>, vector<384x512xbf16>, vector<4x512xf32> -> vector<4x512xf32>
    %22 = arith.addf %17, %21 : vector<4x512xf32>
    %23 = vector.extract_strided_slice %1 {offsets = [2, 0], sizes = [4, 384], strides = [1, 1]} : vector<6x384xbf16> to vector<4x384xbf16>
    %c4 = arith.constant 4 : index
    %c0_17 = arith.constant 0 : index
    %c0_18 = arith.constant 0 : index
    %24 = vector.load %arg3[%c4, %c0_17, %c0_18] : memref<5x384x512xbf16, #tpu.memory_space<vmem>>, vector<1x384x512xbf16>
    %25 = vector.shape_cast %24 : vector<1x384x512xbf16> to vector<384x512xbf16>
    %cst_19 = arith.constant dense<0.000000e+00> : vector<4x512xf32>
    %26 = tpu.matmul %23, %25, %cst_19 {dimension_numbers = #tpu.dot_dimension_numbers<[1], [0], [0], [1], [0, 0, 1, 1], [], []>} : vector<4x384xbf16>, vector<384x512xbf16>, vector<4x512xf32> -> vector<4x512xf32>
    %27 = arith.addf %22, %26 : vector<4x512xf32>
    %28 = vector.extract_strided_slice %3 {offsets = [0, 0], sizes = [4, 384], strides = [1, 1]} : vector<6x384xbf16> to vector<4x384xbf16>
    %c0_20 = arith.constant 0 : index
    %c0_21 = arith.constant 0 : index
    %c0_22 = arith.constant 0 : index
    %29 = vector.load %arg3[%c0_20, %c0_21, %c0_22] : memref<5x384x512xbf16, #tpu.memory_space<vmem>>, vector<1x384x512xbf16>
    %30 = vector.shape_cast %29 : vector<1x384x512xbf16> to vector<384x512xbf16>
    %cst_23 = arith.constant dense<0.000000e+00> : vector<4x512xf32>
    %31 = tpu.matmul %28, %30, %cst_23 {dimension_numbers = #tpu.dot_dimension_numbers<[1], [0], [0], [1], [0, 0, 1, 1], [], []>} : vector<4x384xbf16>, vector<384x512xbf16>, vector<4x512xf32> -> vector<4x512xf32>
    %32 = vector.extract_strided_slice %1 {offsets = [1, 0], sizes = [4, 384], strides = [1, 1]} : vector<6x384xbf16> to vector<4x384xbf16>
    %c1_24 = arith.constant 1 : index
    %c0_25 = arith.constant 0 : index
    %c0_26 = arith.constant 0 : index
    %33 = vector.load %arg3[%c1_24, %c0_25, %c0_26] : memref<5x384x512xbf16, #tpu.memory_space<vmem>>, vector<1x384x512xbf16>
    %34 = vector.shape_cast %33 : vector<1x384x512xbf16> to vector<384x512xbf16>
    %cst_27 = arith.constant dense<0.000000e+00> : vector<4x512xf32>
    %35 = tpu.matmul %32, %34, %cst_27 {dimension_numbers = #tpu.dot_dimension_numbers<[1], [0], [0], [1], [0, 0, 1, 1], [], []>} : vector<4x384xbf16>, vector<384x512xbf16>, vector<4x512xf32> -> vector<4x512xf32>
    %36 = arith.addf %31, %35 : vector<4x512xf32>
    %37 = vector.extract_strided_slice %3 {offsets = [1, 0], sizes = [4, 384], strides = [1, 1]} : vector<6x384xbf16> to vector<4x384xbf16>
    %c2_28 = arith.constant 2 : index
    %c0_29 = arith.constant 0 : index
    %c0_30 = arith.constant 0 : index
    %38 = vector.load %arg3[%c2_28, %c0_29, %c0_30] : memref<5x384x512xbf16, #tpu.memory_space<vmem>>, vector<1x384x512xbf16>
    %39 = vector.shape_cast %38 : vector<1x384x512xbf16> to vector<384x512xbf16>
    %cst_31 = arith.constant dense<0.000000e+00> : vector<4x512xf32>
    %40 = tpu.matmul %37, %39, %cst_31 {dimension_numbers = #tpu.dot_dimension_numbers<[1], [0], [0], [1], [0, 0, 1, 1], [], []>} : vector<4x384xbf16>, vector<384x512xbf16>, vector<4x512xf32> -> vector<4x512xf32>
    %41 = arith.addf %36, %40 : vector<4x512xf32>
    %42 = vector.extract_strided_slice %1 {offsets = [2, 0], sizes = [4, 384], strides = [1, 1]} : vector<6x384xbf16> to vector<4x384xbf16>
    %c3_32 = arith.constant 3 : index
    %c0_33 = arith.constant 0 : index
    %c0_34 = arith.constant 0 : index
    %43 = vector.load %arg3[%c3_32, %c0_33, %c0_34] : memref<5x384x512xbf16, #tpu.memory_space<vmem>>, vector<1x384x512xbf16>
    %44 = vector.shape_cast %43 : vector<1x384x512xbf16> to vector<384x512xbf16>
    %cst_35 = arith.constant dense<0.000000e+00> : vector<4x512xf32>
    %45 = tpu.matmul %42, %44, %cst_35 {dimension_numbers = #tpu.dot_dimension_numbers<[1], [0], [0], [1], [0, 0, 1, 1], [], []>} : vector<4x384xbf16>, vector<384x512xbf16>, vector<4x512xf32> -> vector<4x512xf32>
    %46 = arith.addf %41, %45 : vector<4x512xf32>
    %47 = vector.extract_strided_slice %3 {offsets = [2, 0], sizes = [4, 384], strides = [1, 1]} : vector<6x384xbf16> to vector<4x384xbf16>
    %c4_36 = arith.constant 4 : index
    %c0_37 = arith.constant 0 : index
    %c0_38 = arith.constant 0 : index
    %48 = vector.load %arg3[%c4_36, %c0_37, %c0_38] : memref<5x384x512xbf16, #tpu.memory_space<vmem>>, vector<1x384x512xbf16>
    %49 = vector.shape_cast %48 : vector<1x384x512xbf16> to vector<384x512xbf16>
    %cst_39 = arith.constant dense<0.000000e+00> : vector<4x512xf32>
    %50 = tpu.matmul %47, %49, %cst_39 {dimension_numbers = #tpu.dot_dimension_numbers<[1], [0], [0], [1], [0, 0, 1, 1], [], []>} : vector<4x384xbf16>, vector<384x512xbf16>, vector<4x512xf32> -> vector<4x512xf32>
    %51 = arith.addf %46, %50 : vector<4x512xf32>
    %52 = arith.maximumf %27, %51 : vector<4x512xf32>
    %53 = vector.extract_strided_slice %52 {offsets = [0, 0], sizes = [4, 256], strides = [1, 1]} : vector<4x512xf32> to vector<4x256xf32>
    %54 = vector.extract_strided_slice %52 {offsets = [0, 256], sizes = [4, 256], strides = [1, 1]} : vector<4x512xf32> to vector<4x256xf32>
    %55 = arith.maximumf %53, %54 : vector<4x256xf32>
    %c0_40 = arith.constant 0 : index
    %c0_41 = arith.constant 0 : index
    %56 = vector.load %arg4[%c0_40, %c0_41] : memref<1x256xf32, #tpu.memory_space<vmem>>, vector<1x256xf32>
    %57 = vector.broadcast %56 : vector<1x256xf32> to vector<4x256xf32>
    %58 = arith.addf %55, %57 : vector<4x256xf32>
    %cst_42 = arith.constant 0.000000e+00 : f32
    %59 = vector.broadcast %cst_42 : f32 to vector<4x256xf32>
    %60 = arith.maximumf %58, %59 : vector<4x256xf32>
    %61 = arith.truncf %60 : vector<4x256xf32> to vector<4x256xbf16>
    %c0_43 = arith.constant 0 : index
    %c0_44 = arith.constant 0 : index
    %c0_45 = arith.constant 0 : index
    %62 = vector.load %arg5[%c0_43, %c0_44, %c0_45] : memref<1x4x256xbf16, #tpu.memory_space<vmem>>, vector<1x4x256xbf16>
    %63 = vector.shape_cast %62 : vector<1x4x256xbf16> to vector<4x256xbf16>
    %64 = vector.shape_cast %61 : vector<4x256xbf16> to vector<1x4x256xbf16>
    tpu.vector_store %arg5[%c0_43, %c0_44, %c0_45], %64 {strides = array<i32>} : memref<1x4x256xbf16, #tpu.memory_space<vmem>>, vector<1x4x256xbf16>,
    return
  }
  func.func @transform_0(%arg0: i32) -> (i32, i32, i32) {
    %c0_i32 = arith.constant 0 : i32
    %c0_i32_0 = arith.constant 0 : i32
    %c0_i32_1 = arith.constant 0 : i32
    return %arg0, %c0_i32, %c0_i32_0 : i32, i32, i32
  }
  func.func @transform_1(%arg0: i32) -> (i32, i32, i32) {
    %c0_i32 = arith.constant 0 : i32
    %c0_i32_0 = arith.constant 0 : i32
    %c0_i32_1 = arith.constant 0 : i32
    return %arg0, %c0_i32, %c0_i32_0 : i32, i32, i32
  }
  func.func @transform_2(%arg0: i32) -> (i32, i32, i32) {
    %c0_i32 = arith.constant 0 : i32
    %c0_i32_0 = arith.constant 0 : i32
    %c0_i32_1 = arith.constant 0 : i32
    %c0_i32_2 = arith.constant 0 : i32
    return %c0_i32, %c0_i32_0, %c0_i32_1 : i32, i32, i32
  }
  func.func @transform_3(%arg0: i32) -> (i32, i32) {
    %c0_i32 = arith.constant 0 : i32
    %c0_i32_0 = arith.constant 0 : i32
    %c0_i32_1 = arith.constant 0 : i32
    return %c0_i32, %c0_i32_0 : i32, i32
  }
  func.func @transform_4(%arg0: i32) -> (i32, i32, i32) {
    %c0_i32 = arith.constant 0 : i32
    %c0_i32_0 = arith.constant 0 : i32
    %c0_i32_1 = arith.constant 0 : i32
    return %arg0, %c0_i32, %c0_i32_0 : i32, i32, i32
  }
}

module attributes {stable_mosaic.version = 11 : i64} {
  func.func @_fc_kernel(%arg0: i32, %arg1: memref<2x1024xbf16, #tpu.memory_space<vmem>>, %arg2: memref<1024x512xbf16, #tpu.memory_space<vmem>>, %arg3: memref<1x512xf32, #tpu.memory_space<vmem>>, %arg4: memref<512x128xbf16, #tpu.memory_space<vmem>>, %arg5: memref<1x128xf32, #tpu.memory_space<vmem>>, %arg6: memref<2x128xf32, #tpu.memory_space<vmem>>) attributes {dimension_semantics = [#tpu.dimension_semantics<parallel>], iteration_bounds = array<i64: 1>, scalar_prefetch = 0 : i64, scratch_operands = 0 : i64, tpu.core_type = #tpu.core_type<tc>, window_params = [{transform_indices = @transform_0, window_bounds = array<i64: 2, 1024>}, {pipeline_mode = #tpu.pipeline_mode<synchronous>, transform_indices = @transform_1, window_bounds = array<i64: 1024, 512>}, {pipeline_mode = #tpu.pipeline_mode<synchronous>, transform_indices = @transform_2, window_bounds = array<i64: 1, 512>}, {pipeline_mode = #tpu.pipeline_mode<synchronous>, transform_indices = @transform_3, window_bounds = array<i64: 512, 128>}, {pipeline_mode = #tpu.pipeline_mode<synchronous>, transform_indices = @transform_4, window_bounds = array<i64: 1, 128>}, {transform_indices = @transform_5, window_bounds = array<i64: 2, 128>}]} {
    %c0 = arith.constant 0 : index
    %c0_0 = arith.constant 0 : index
    %0 = vector.load %arg1[%c0, %c0_0] : memref<2x1024xbf16, #tpu.memory_space<vmem>>, vector<2x1024xbf16>
    %c0_1 = arith.constant 0 : index
    %c0_2 = arith.constant 0 : index
    %1 = vector.load %arg2[%c0_1, %c0_2] : memref<1024x512xbf16, #tpu.memory_space<vmem>>, vector<1024x512xbf16>
    %cst = arith.constant dense<0.000000e+00> : vector<2x512xf32>
    %2 = tpu.matmul %0, %1, %cst {dimension_numbers = #tpu.dot_dimension_numbers<[1], [0], [0], [1], [0, 0, 1, 1], [], []>} : vector<2x1024xbf16>, vector<1024x512xbf16>, vector<2x512xf32> -> vector<2x512xf32>
    %c0_3 = arith.constant 0 : index
    %c0_4 = arith.constant 0 : index
    %3 = vector.load %arg3[%c0_3, %c0_4] : memref<1x512xf32, #tpu.memory_space<vmem>>, vector<1x512xf32>
    %4 = vector.broadcast %3 : vector<1x512xf32> to vector<2x512xf32>
    %5 = arith.addf %2, %4 : vector<2x512xf32>
    %cst_5 = arith.constant 0.000000e+00 : f32
    %6 = vector.broadcast %cst_5 : f32 to vector<2x512xf32>
    %7 = arith.maximumf %5, %6 : vector<2x512xf32>
    %8 = arith.truncf %7 : vector<2x512xf32> to vector<2x512xbf16>
    %c0_6 = arith.constant 0 : index
    %c0_7 = arith.constant 0 : index
    %9 = vector.load %arg4[%c0_6, %c0_7] : memref<512x128xbf16, #tpu.memory_space<vmem>>, vector<512x128xbf16>
    %cst_8 = arith.constant dense<0.000000e+00> : vector<2x128xf32>
    %10 = tpu.matmul %8, %9, %cst_8 {dimension_numbers = #tpu.dot_dimension_numbers<[1], [0], [0], [1], [0, 0, 1, 1], [], []>} : vector<2x512xbf16>, vector<512x128xbf16>, vector<2x128xf32> -> vector<2x128xf32>
    %c0_9 = arith.constant 0 : index
    %c0_10 = arith.constant 0 : index
    %11 = vector.load %arg5[%c0_9, %c0_10] : memref<1x128xf32, #tpu.memory_space<vmem>>, vector<1x128xf32>
    %12 = vector.broadcast %11 : vector<1x128xf32> to vector<2x128xf32>
    %13 = arith.addf %10, %12 : vector<2x128xf32>
    %cst_11 = arith.constant 0.000000e+00 : f32
    %14 = vector.broadcast %cst_11 : f32 to vector<2x128xf32>
    %15 = arith.maximumf %13, %14 : vector<2x128xf32>
    %c0_12 = arith.constant 0 : index
    %c0_13 = arith.constant 0 : index
    %16 = vector.load %arg6[%c0_12, %c0_13] : memref<2x128xf32, #tpu.memory_space<vmem>>, vector<2x128xf32>
    tpu.vector_store %arg6[%c0_12, %c0_13], %15 {strides = array<i32>} : memref<2x128xf32, #tpu.memory_space<vmem>>, vector<2x128xf32>,
    return
  }
  func.func @transform_0(%arg0: i32) -> (i32, i32) {
    %c0_i32 = arith.constant 0 : i32
    %c0_i32_0 = arith.constant 0 : i32
    return %arg0, %c0_i32 : i32, i32
  }
  func.func @transform_1(%arg0: i32) -> (i32, i32) {
    %c0_i32 = arith.constant 0 : i32
    %c0_i32_0 = arith.constant 0 : i32
    %c0_i32_1 = arith.constant 0 : i32
    return %c0_i32, %c0_i32_0 : i32, i32
  }
  func.func @transform_2(%arg0: i32) -> (i32, i32) {
    %c0_i32 = arith.constant 0 : i32
    %c0_i32_0 = arith.constant 0 : i32
    %c0_i32_1 = arith.constant 0 : i32
    return %c0_i32, %c0_i32_0 : i32, i32
  }
  func.func @transform_3(%arg0: i32) -> (i32, i32) {
    %c0_i32 = arith.constant 0 : i32
    %c0_i32_0 = arith.constant 0 : i32
    %c0_i32_1 = arith.constant 0 : i32
    return %c0_i32, %c0_i32_0 : i32, i32
  }
  func.func @transform_4(%arg0: i32) -> (i32, i32) {
    %c0_i32 = arith.constant 0 : i32
    %c0_i32_0 = arith.constant 0 : i32
    %c0_i32_1 = arith.constant 0 : i32
    return %c0_i32, %c0_i32_0 : i32, i32
  }
  func.func @transform_5(%arg0: i32) -> (i32, i32) {
    %c0_i32 = arith.constant 0 : i32
    %c0_i32_0 = arith.constant 0 : i32
    return %arg0, %c0_i32 : i32, i32
  }
}

</mosaic_0001>

<bundles_post_ra>
// kernel: _infer_forward_padded.3
= control target key start
LH: loop header
LB: loop body
LE: loop exit
PB: predicated region body
PF: predicated region fallthrough
CT: control target
= control target key end

     0   :  { %9 = vsyncpa [#allocation3], 0  ;;  %s2938_s0 = inlined_call_operand.vmem [shape: bf16[2,10,80], index: 0, kind: input, shape index: {}]   ;;  %s2939_s1 = inlined_call_operand.vmem [shape: bf16[2,10,80], index: 1, kind: input, shape index: {}]   ;;  %s2940_s2 = inlined_call_operand.hbm [shape: bf16[5,80,512], index: 2, kind: input, shape index: {}]   ;;  %s2941_s3 = inlined_call_operand.hbm [shape: f32[1,256], index: 3, kind: input, shape index: {}]   ;;  %s2942_s4 = inlined_call_operand.vmem [shape: bf16[2,8,256], index: 4, kind: output, shape index: {}]  }
   0x1   :  { %10 = vsyncpa [#allocation5], 0  ;;  %s2358_s15 = smov 0  }
   0x2 LB: > { %s2364_s16 = sadd.s32 4294967295, %s2326_s15   ;;  %p1866_p0 = scmp.ge.s32.totalorder %s2326_s15, 1  ;;  %s2326_s15 = sphi %s2358_s15, %s16_s15  }
   0x3   : > { %p141_p1 = scmp.lt.s32.totalorder %s2326_s15, 3  ;;  %s2328_s17 = smov [#allocation2]  }
   0x4   : > { %s153_s18 = sshll.u32 %s2328_s17, 4  ;;  %p2943_p3 = scmp.eq.s32.totalorder %s2364_s16, 0  ;;  %s154_s18 = int_to_ptr.vmem [resolvable:$true] %s153_s18 }
   0x5   : > { %p2368_p2 = pnand %p1866_p0, %p141_p1  ;;  %s2329_s20 = smov [#allocation4]  }
   0x6   : > { %s167_s21 = sshll.u32 %s2329_s20, 4  ;;  %s2256_s25 = scalar_lea.hbm %s2940_s2, 12800  ;;  %s2381_s21 = int_to_ptr.vmem [resolvable:$true] %s167_s21 }
   0x7   : > { %s2990_s19 = scalar_select %p2368_p2, 1, 0 }
   0x8   : > { %p2080_p4 = pneg %p2368_p2  ;;  %p2257_p6 = scmp.ne.s32.totalorder %s2940_s2, %s2256_s25 }
   0x9   : > { %p2263_p10 = scmp.lt.u32.totalorder %s2256_s25, %s2940_s2 }
   0xa   : > { %p2377_p5 = pnand %p2943_p3, %p2080_p4 }
   0xc   : > { %p2258_p7 = pneg %p2377_p5 }
   0xe   : > { %p2259_p8 = pnand %p2258_p7, %p2257_p6 }
  0x10   : > { %p2260_p9 = pneg %p2259_p8 }
  0x12   : > { %p2265_p11 = pnand %p2263_p10, %p2260_p9 }
  0x14   : > { %2268 = shalt.err (!%p2265_p11)
}
  0x15   : > { %s2269_s30 = scalar_lea.vmem %s154_s18, 12800  ;;  %p2277_p1 = scmp.lt.s32.totalorder %s154_s18, %s154_s18 }
  0x16   : > { %p2270_p12 = scmp.ne.s32.totalorder %s154_s18, %s2269_s30  ;;  %p2278_p4 = scmp.lt.s32.totalorder %s2269_s30, %s2269_s30 }
  0x18   : > { %p2272_p13 = pnand %p2270_p12, %p2258_p7  ;;  %p2279_p3 = por %p2278_p4, %p2277_p1 }
  0x1a   : > { %p2273_p0 = pneg %p2272_p13 }
  0x1c   : > { %p2280_p2 = pnand %p2279_p3, %p2273_p0 }
  0x1e   : > { %2283 = shalt.err (!%p2280_p2)
}
  0x1f   : > { %s2330_s5 = smov 256   ;;  %s2331_s6 = smov 16  }
  0x20   : > { %2083 = dma.hbm_to_vmem [thread:$0]  (!%p2377_p5), %s2940_s2, 12800, %s154_s18, [#allocation3], %s2330_s5, %s2330_s5, %s2331_s6  }
  0x21   : > { %s2284_s11 = scalar_lea.hbm %s2941_s3, 32 }
  0x22   : > { %p2285_p6 = scmp.ne.s32.totalorder %s2941_s3, %s2284_s11  ;;  %p2291_p8 = scmp.lt.u32.totalorder %s2284_s11, %s2941_s3 }
  0x24   : > { %p2287_p2 = pnand %p2285_p6, %p2258_p7 }
  0x26   : > { %p2288_p3 = pneg %p2287_p2 }
  0x28   : > { %p2293_p9 = pnand %p2291_p8, %p2288_p3 }
  0x2a   : > { %2296 = shalt.err (!%p2293_p9)
}
  0x2b   : > { %s2297_s18 = scalar_lea.vmem %s2381_s21, 32  ;;  %p2305_p13 = scmp.lt.s32.totalorder %s2381_s21, %s2381_s21 }
  0x2c   : > { %p2298_p10 = scmp.ne.s32.totalorder %s2381_s21, %s2297_s18  ;;  %p2306_p0 = scmp.lt.s32.totalorder %s2297_s18, %s2297_s18 }
  0x2e   : > { %p2300_p11 = pnand %p2298_p10, %p2258_p7  ;;  %p2307_p1 = por %p2306_p0, %p2305_p13 }
  0x30   : > { %p2301_p12 = pneg %p2300_p11 }
  0x32   : > { %p2308_p4 = pnand %p2307_p1, %p2301_p12 }
  0x34   : > { %2311 = shalt.err (!%p2308_p4)
}
  0x35   : > { %2086 = dma.hbm_to_vmem [thread:$0]  (!%p2377_p5), %s2941_s3, 32, %s2381_s21, [#allocation5]  }
  0x36   : > { %p2992_p6 = scmp.ne.s32.totalorder %s2990_s19, 0 }
  0x38   : > { %196 = sbr.rel (%p2992_p6) target bundleno = 495 (0x1ef), region = 36 }
  0x3f   : > { %p2993_p2 = scmp.eq.s32.totalorder %s2364_s16, 0 }
  0x41   : > { %2317 = dma.done.wait (%p2993_p2), [#allocation3], 12800   ;;  %p2994_p7 = pmov %p2993_p2 }
  0x42   : > { %p2995_p3 = pmov %p2993_p2 }
  0x43   : > { %2319 = vsyncadd (%p2994_p7), [#allocation3], 4294954496 }
  0x44   : > { %2321 = dma.done.wait (%p2995_p3), [#allocation5], 32   ;;  %p2996_p8 = pmov %p2993_p2 }
  0x45   : > { %v2945_v0 = vmov 0   ;;  %v2442_v1 = vld [vmem:[#allocation2 + $0xa4] ss:$16 sps:$4 sm:$0xff]   ;;  %v2444_v2 = vld [vmem:[#allocation2 + $0xac] ss:$16 sps:$4 sm:$0xff]   ;;  %p231_p5 = scmp.lt.s32.totalorder %s2364_s16, 1 }
  0x46   : > { %2323 = vsyncadd (%p2996_p8), [#allocation5], 4294967264  ;;  %428 = vmatprep.mubr.bf16.mxu0 %v2945_v0  ;;  %469 = vmatprep.mubr.bf16.mxu1 %v2945_v0  ;;  %v2447_v3 = vld [vmem:[#allocation2 + $0xa0] ss:$16 sps:$4 sm:$0xff]   ;;  %v2449_v4 = vld [vmem:[#allocation2 + $0xa8] ss:$16 sps:$4 sm:$0xff]  }
  0x47   : > { %396 = vmatprep.subr.bf16.mxu0 %v2442_v1  ;;  %437 = vmatprep.subr.bf16.mxu1 %v2444_v2  ;;  %v2452_v5 = vld [vmem:[#allocation2 + $0xc4] ss:$16 sps:$4 sm:$0xff]   ;;  %v2456_v6 = vld [vmem:[#allocation2 + $0xcc] ss:$16 sps:$4 sm:$0xff]   ;;  %v2458_v7 = vld [vmem:[#allocation2 + $0xc0] ss:$16 sps:$4 sm:$0xff]  }
  0x48   : > { %397 = vmatpush1.bf16.msra.mxu0 %v2447_v3  ;;  %438 = vmatpush1.bf16.msra.mxu1 %v2449_v4  ;;  %v2461_v8 = vld [vmem:[#allocation2 + $0xc8] ss:$16 sps:$4 sm:$0xff]   ;;  %v2464_v9 = vld [vmem:[#allocation2 + $0xe4] ss:$16 sps:$4 sm:$0xff]   ;;  %v2467_v10 = vld [vmem:[#allocation2 + $0xec] ss:$16 sps:$4 sm:$0xff]  }
  0x49   : > { %398 = vmatprep.subr.bf16.mxu0 %v2452_v5  ;;  %439 = vmatprep.subr.bf16.mxu1 %v2456_v6  ;;  %v2469_v11 = vld [vmem:[#allocation2 + $0xe0] ss:$16 sps:$4 sm:$0xff]   ;;  %v2471_v12 = vld [vmem:[#allocation2 + $0xe8] ss:$16 sps:$4 sm:$0xff]   ;;  %v2475_v13 = vld [vmem:[#allocation2 + $0x104] ss:$16 sps:$4 sm:$0xff]  }
  0x4a   : > { %v2479_v14 = vld [vmem:[#allocation2 + $0x10c] ss:$16 sps:$4 sm:$0xff]   ;;  %s3085_s16 = smov (!%p231_p5, %s2364_s16), 1  ;;  %v2482_v15 = vld [vmem:[#allocation2 + $0x100] ss:$16 sps:$4 sm:$0xff]   ;;  %vm392_vm0 = vcmask 654336  }
  0x4b   : > { %v2486_v16 = vld [vmem:[#allocation2 + $0x108] ss:$16 sps:$4 sm:$0xff]   ;;  %v2488_v17 = vld [vmem:[#allocation2 + $0x124] ss:$16 sps:$4 sm:$0xff]   ;;  %v2492_v18 = vld [vmem:[#allocation2 + $0x12c] ss:$16 sps:$4 sm:$0xff]  }
  0x4c   : > { %399 = vmatpush1.bf16.msra.mxu0 %v2458_v7  ;;  %440 = vmatpush1.bf16.msra.mxu1 %v2461_v8  ;;  %s2494_s19 = sshll.u32 %s3085_s16, 3  ;;  %v2498_v19 = vld [vmem:[#allocation2 + $0x120] ss:$16 sps:$4 sm:$0xff]   ;;  %v2500_v20 = vld [vmem:[#allocation2 + $0x128] ss:$16 sps:$4 sm:$0xff]  }
  0x4d   : > { %400 = vmatprep.subr.bf16.mxu0 %v2464_v9  ;;  %441 = vmatprep.subr.bf16.mxu1 %v2467_v10  ;;  %v2504_v21 = vld [vmem:[#allocation2 + $0x4] ss:$16 sps:$4 sm:$0xff]   ;;  %v2506_v22 = vld [vmem:[#allocation2 + $0xc] ss:$16 sps:$4 sm:$0xff]   ;;  %s2512_s22 = scalar_lea.vmem %s2939_s1, %s2494_s19  ;;  %v2514_v23 = vld [vmem:[#allocation2] ss:$16 sps:$4 sm:$0xff]   ;;  %s235_s26 = scalar_lea.vmem %s2938_s0, %s2494_s19 }
  0x4e   : > { %v2518_v24 = vld [vmem:[#allocation2 + $0x8] ss:$16 sps:$4 sm:$0xff]   ;;  %v2521_v25 = vld [vmem:[%s2512_s22] sm:$0xf]  ;;  %v2525_v26 = vld [vmem:[#allocation2 + $0x24] ss:$16 sps:$4 sm:$0xff]   ;;  %s245_s29 = scalar_lea.vmem %s2942_s4, %s2494_s19 }
  0x4f   : > { %v2527_v27 = vld [vmem:[#allocation2 + $0x2c] ss:$16 sps:$4 sm:$0xff]   ;;  %v2535_v28 = vld [vmem:[#allocation2 + $0x20] ss:$16 sps:$4 sm:$0xff]   ;;  %v2537_v29 = vld [vmem:[#allocation2 + $0x28] ss:$16 sps:$4 sm:$0xff]  }
  0x50   : > { %401 = vmatpush1.bf16.msra.mxu0 %v2469_v11  ;;  %442 = vmatpush1.bf16.msra.mxu1 %v2471_v12  ;;  %v2541_v30 = vld [vmem:[#allocation2 + $0x44] ss:$16 sps:$4 sm:$0xff]   ;;  %v2543_v31 = vld [vmem:[#allocation2 + $0x4c] ss:$16 sps:$4 sm:$0xff]   ;;  %v2549_v32 = vld [vmem:[#allocation2 + $0x40] ss:$16 sps:$4 sm:$0xff]  }
  0x51   : > { %402 = vmatprep.subr.bf16.mxu0 %v2475_v13  ;;  %443 = vmatprep.subr.bf16.mxu1 %v2479_v14  ;;  %v2551_v33 = vld [vmem:[#allocation2 + $0x48] ss:$16 sps:$4 sm:$0xff]   ;;  %v2555_v34 = vld [vmem:[#allocation2 + $0x64] ss:$16 sps:$4 sm:$0xff]   ;;  %v2557_v35 = vld [vmem:[#allocation2 + $0x6c] ss:$16 sps:$4 sm:$0xff]  }
  0x52   : > { %v2559_v36 = vld [vmem:[#allocation2 + $0x60] ss:$16 sps:$4 sm:$0xff]   ;;  %v2561_v37 = vld [vmem:[#allocation2 + $0x68] ss:$16 sps:$4 sm:$0xff]   ;;  %v2565_v38 = vld [vmem:[#allocation2 + $0x84] ss:$16 sps:$4 sm:$0xff]  }
  0x53   : > { %v2569_v39 = vld [vmem:[#allocation2 + $0x8c] ss:$16 sps:$4 sm:$0xff]   ;;  %v2571_v40 = vld [vmem:[#allocation2 + $0x80] ss:$16 sps:$4 sm:$0xff]   ;;  %v2573_v41 = vld [vmem:[#allocation2 + $0x88] ss:$16 sps:$4 sm:$0xff]  }
  0x54   : > { %403 = vmatpush1.bf16.msra.mxu0 %v2482_v15  ;;  %444 = vmatpush1.bf16.msra.mxu1 %v2486_v16  ;;  %v2577_v42 = vld [vmem:[#allocation2 + $0x144] ss:$16 sps:$4 sm:$0xff]   ;;  %v2585_v43 = vld [vmem:[#allocation2 + $0x14c] ss:$16 sps:$4 sm:$0xff]   ;;  %v2587_v44 = vld [vmem:[#allocation2 + $0x140] ss:$16 sps:$4 sm:$0xff]  }
  0x55   : > { %404 = vmatprep.subr.bf16.mxu0 %v2488_v17  ;;  %445 = vmatprep.subr.bf16.mxu1 %v2492_v18  ;;  %v2589_v45 = vld [vmem:[#allocation2 + $0x148] ss:$16 sps:$4 sm:$0xff]   ;;  %v247_v46 = vld [vmem:[%s235_s26] sm:$0xf]  ;;  %v2593_v47 = vld [vmem:[#allocation2 + $0x164] ss:$16 sps:$4 sm:$0xff]  }
  0x56   : > { %v2597_v48 = vld [vmem:[#allocation2 + $0x16c] ss:$16 sps:$4 sm:$0xff]   ;;  %v248_v49 = vld [vmem:[%s235_s26 + $0x4] sm:$0x1]  ;;  %v2601_v50 = vld [vmem:[#allocation2 + $0x160] ss:$16 sps:$4 sm:$0xff]  }
  0x57   : > { %v2603_v51 = vld [vmem:[#allocation2 + $0x168] ss:$16 sps:$4 sm:$0xff]   ;;  %v2607_v52 = vld [vmem:[#allocation2 + $0x184] ss:$16 sps:$4 sm:$0xff]   ;;  %v2611_v53 = vld [vmem:[#allocation2 + $0x18c] ss:$16 sps:$4 sm:$0xff]   ;;  %v2615_v54 = vcombine.low %v247_v46, %v248_v49 }
  0x58   : > { %405 = vmatpush1.bf16.msra.mxu0 %v2498_v19  ;;  %446 = vmatpush1.bf16.msra.mxu1 %v2500_v20  ;;  %2997 = vst [vmem:[#allocation8_spill] sm:$0xff] %v2603_v51  ;;  %2998 = vst [vmem:[#allocation9_spill] sm:$0xff] %v2607_v52  ;;  %v2617_v55 = vld [vmem:[#allocation2 + $0x180] ss:$16 sps:$4 sm:$0xff]   ;;  %v2619_v56 = vld [vmem:[#allocation2 + $0x188] ss:$16 sps:$4 sm:$0xff]  }
  0x59   : > { %581 = vmatprep.subr.bf16.mxu0 %v2504_v21  ;;  %622 = vmatprep.subr.bf16.mxu1 %v2506_v22  ;;  %2999 = vst [vmem:[#allocation10_spill] sm:$0xff] %v2611_v53  ;;  %3000 = vst [vmem:[#allocation11_spill] sm:$0xff] %v2617_v55  ;;  %v2623_v57 = vld [vmem:[#allocation2 + $0x1a4] ss:$16 sps:$4 sm:$0xff]   ;;  %v2627_v58 = vld [vmem:[#allocation2 + $0x1ac] ss:$16 sps:$4 sm:$0xff]  }
  0x5a   : > { %3001 = vst [vmem:[#allocation12_spill] sm:$0xff] %v2619_v56  ;;  %3002 = vst [vmem:[#allocation13_spill] sm:$0xff] %v2623_v57  ;;  %v692_v59 = vshll.u32 %v2615_v54, 16  ;;  %v2630_v60 = vld [vmem:[#allocation2 + $0x1a0] ss:$16 sps:$4 sm:$0xff]  }
  0x5b   : > { %1899 = vmatmul.mubr.msk.bf16.vlgmr.msra.gmra.mrb[0].mxu0 %vm392_vm0, %v2521_v25  ;;  %1900 = vmatmul.mubr.msk.bf16.vlgmr.msra.gmra.mrb[0].mxu1 %vm392_vm0, %v2521_v25  ;;  %3003 = vst [vmem:[#allocation14_spill] sm:$0xff] %v2627_v58  ;;  %3004 = vst [vmem:[#allocation15_spill] sm:$0xff] %v2630_v60  ;;  %v2632_v61 = vld [vmem:[#allocation2 + $0x1a8] ss:$16 sps:$4 sm:$0xff]   ;;  %v2636_v62 = vld [vmem:[#allocation2 + $0x1c4] ss:$16 sps:$4 sm:$0xff]  }
  0x5c   : > { %582 = vmatpush1.bf16.msra.mxu0 %v2514_v23  ;;  %623 = vmatpush1.bf16.msra.mxu1 %v2518_v24  ;;  %3005 = vst [vmem:[#allocation16_spill] sm:$0xff] %v2632_v61  ;;  %3006 = vst [vmem:[#allocation17_spill] sm:$0xff] %v2636_v62  ;;  %v2640_v63 = vld [vmem:[#allocation2 + $0x1cc] ss:$16 sps:$4 sm:$0xff]   ;;  %v694_v49 = vrot.slane %v692_v59, 1 }
  0x5d   : > { %583 = vmatprep.subr.bf16.mxu0 %v2525_v26  ;;  %624 = vmatprep.subr.bf16.mxu1 %v2527_v27  ;;  %3007 = vst [vmem:[#allocation18_spill] sm:$0xff] %v2640_v63  ;;  %v2657_v59 = vld [vmem:[#allocation2 + $0x1e8] ss:$16 sps:$4 sm:$0xff]  }
  0x5e   : > { %613 = vmatprep.mubr.bf16.mxu0 %v2945_v0  ;;  %654 = vmatprep.mubr.bf16.mxu1 %v2945_v0  ;;  %3013 = vst [vmem:[#allocation24_spill] sm:$0xff] %v2657_v59 }
  0x60   : > { %584 = vmatpush1.bf16.msra.mxu0 %v2535_v28  ;;  %625 = vmatpush1.bf16.msra.mxu1 %v2537_v29 }
  0x61   : > { %585 = vmatprep.subr.bf16.mxu0 %v2541_v30  ;;  %626 = vmatprep.subr.bf16.mxu1 %v2543_v31 }
  0x64   : > { %586 = vmatpush1.bf16.msra.mxu0 %v2549_v32  ;;  %627 = vmatpush1.bf16.msra.mxu1 %v2551_v33 }
  0x65   : > { %587 = vmatprep.subr.bf16.mxu0 %v2555_v34  ;;  %628 = vmatprep.subr.bf16.mxu1 %v2557_v35 }
  0x68   : > { %588 = vmatpush1.bf16.msra.mxu0 %v2559_v36  ;;  %629 = vmatpush1.bf16.msra.mxu1 %v2561_v37 }
  0x69   : > { %589 = vmatprep.subr.bf16.mxu0 %v2565_v38  ;;  %630 = vmatprep.subr.bf16.mxu1 %v2569_v39 }
  0x6c   : > { %590 = vmatpush1.bf16.msra.mxu0 %v2571_v40  ;;  %631 = vmatpush1.bf16.msra.mxu1 %v2573_v41 }
  0x6d   : > { %799 = vmatprep.subr.bf16.mxu0 %v2577_v42  ;;  %840 = vmatprep.subr.bf16.mxu1 %v2585_v43 }
  0x6f   : > { %1921 = vmatmul.mubr.msk.bf16.vlgmr.msra.gmra.mrb[0].mxu0 %vm392_vm0, %v247_v46  ;;  %1922 = vmatmul.mubr.msk.bf16.vlgmr.msra.gmra.mrb[0].mxu1 %vm392_vm0, %v247_v46  ;;  %v690_v46 = vshrl.u32 %v2615_v54, 16 }
  0x70   : > { %800 = vmatpush1.bf16.msra.mxu0 %v2587_v44  ;;  %841 = vmatpush1.bf16.msra.mxu1 %v2589_v45 }
  0x71   : > { %801 = vmatprep.subr.bf16.mxu0 %v2593_v47  ;;  %842 = vmatprep.subr.bf16.mxu1 %v2597_v48 }
  0x72   : > { %831 = vmatprep.mubr.bf16.mxu0 %v2945_v0  ;;  %872 = vmatprep.mubr.bf16.mxu1 %v2945_v0  ;;  %v2643_v0 = vld [vmem:[#allocation2 + $0x1c0] ss:$16 sps:$4 sm:$0xff]  }
  0x73   : > { %3008 = vst [vmem:[#allocation19_spill] sm:$0xff] %v2643_v0 }
  0x74   : > { %802 = vmatpush1.bf16.msra.mxu0 %v2601_v50  ;;  %843 = vmatpush1.bf16.msra.mxu1 %v2603_v51 }
  0x75   : > { %803 = vmatprep.subr.bf16.mxu0 %v2607_v52  ;;  %844 = vmatprep.subr.bf16.mxu1 %v2611_v53  ;;  %v2645_v53 = vld [vmem:[#allocation2 + $0x1c8] ss:$16 sps:$4 sm:$0xff]  }
  0x76   : > { %3009 = vst [vmem:[#allocation20_spill] sm:$0xff] %v2645_v53 }
  0x78   : > { %804 = vmatpush1.bf16.msra.mxu0 %v2617_v55  ;;  %845 = vmatpush1.bf16.msra.mxu1 %v2619_v56  ;;  %v2649_v56 = vld [vmem:[#allocation2 + $0x1e4] ss:$16 sps:$4 sm:$0xff]   ;;  %v2659_v55 = vor.u32 %v694_v49, %v690_v46  ;;  %v2674_v46 = vld [vmem:[#allocation2 + $0x200] ss:$16 sps:$4 sm:$0xff]   ;;  %v2676_v49 = vld [vmem:[#allocation2 + $0x208] ss:$16 sps:$4 sm:$0xff]  }
  0x79   : > { %805 = vmatprep.subr.bf16.mxu0 %v2623_v57  ;;  %846 = vmatprep.subr.bf16.mxu1 %v2627_v58  ;;  %3010 = vst [vmem:[#allocation21_spill] sm:$0xff] %v2649_v56  ;;  %v2653_v58 = vld [vmem:[#allocation2 + $0x1ec] ss:$16 sps:$4 sm:$0xff]   ;;  %v2655_v57 = vld [vmem:[#allocation2 + $0x1e0] ss:$16 sps:$4 sm:$0xff]   ;;  %3016 = vst [vmem:[#allocation27_spill] sm:$0xff] %v2674_v46 }
  0x7a   : > { %3011 = vst [vmem:[#allocation22_spill] sm:$0xff] %v2653_v58  ;;  %3012 = vst [vmem:[#allocation23_spill] sm:$0xff] %v2655_v57 }
  0x7b   : > { %3017 = vst [vmem:[#allocation28_spill] sm:$0xff] %v2676_v49 }
  0x7c   : > { %806 = vmatpush1.bf16.msra.mxu0 %v2630_v60  ;;  %847 = vmatpush1.bf16.msra.mxu1 %v2632_v61  ;;  %v2663_v60 = vld [vmem:[#allocation2 + $0x204] ss:$16 sps:$4 sm:$0xff]  }
  0x7d   : > { %807 = vmatprep.subr.bf16.mxu0 %v2636_v62  ;;  %848 = vmatprep.subr.bf16.mxu1 %v2640_v63  ;;  %3014 = vst [vmem:[#allocation25_spill] sm:$0xff] %v2663_v60  ;;  %v2667_v62 = vld [vmem:[#allocation2 + $0x20c] ss:$16 sps:$4 sm:$0xff]   ;;  %v250_v63 = vld [vmem:[%s2512_s22 + $0x4] sm:$0x1] }
  0x7e   : > { %3015 = vst [vmem:[#allocation26_spill] sm:$0xff] %v2667_v62 }
  0x80   : > { %808 = vmatpush1.bf16.msra.mxu0 %v2643_v0  ;;  %849 = vmatpush1.bf16.msra.mxu1 %v2645_v53  ;;  %v3020_v53 = vmov 0   ;;  %v2689_v0 = vcombine.low %v2521_v25, %v250_v63  ;;  %v2706_v63 = vld [vmem:[#allocation2 + $0x240] ss:$16 sps:$4 sm:$0xff]  }
  0x81   : > { %1021 = vmatprep.subr.bf16.mxu0 %v2649_v56  ;;  %1062 = vmatprep.subr.bf16.mxu1 %v2653_v58  ;;  %v2680_v56 = vld [vmem:[#allocation2 + $0x224] ss:$16 sps:$4 sm:$0xff]   ;;  %v2684_v58 = vld [vmem:[#allocation2 + $0x22c] ss:$16 sps:$4 sm:$0xff]  }
  0x82   : > { %3018 = vst [vmem:[#allocation29_spill] sm:$0xff] %v2680_v56  ;;  %3019 = vst [vmem:[#allocation30_spill] sm:$0xff] %v2684_v58  ;;  %v914_v61 = vshll.u32 %v2689_v0, 16 }
  0x83   : > { %1944 = vmatmul.mubr.msk.bf16.vlgmr.msra.gmra.mrb[0].mxu0 %vm392_vm0, %v2659_v55  ;;  %1945 = vmatmul.mubr.msk.bf16.vlgmr.msra.gmra.mrb[0].mxu1 %vm392_vm0, %v2659_v55  ;;  %3021 = vst [vmem:[#allocation31_spill] sm:$0xff] %v2689_v0 }
  0x84   : > { %1022 = vmatpush1.bf16.msra.mxu0 %v2655_v57  ;;  %1063 = vmatpush1.bf16.msra.mxu1 %v2657_v59  ;;  %v2693_v59 = vld [vmem:[#allocation2 + $0x220] ss:$16 sps:$4 sm:$0xff]   ;;  %v2695_v57 = vld [vmem:[#allocation2 + $0x228] ss:$16 sps:$4 sm:$0xff]   ;;  %v916_v52 = vrot.slane %v914_v61, 1 }
  0x85   : > { %1023 = vmatprep.subr.bf16.mxu0 %v2663_v60  ;;  %1064 = vmatprep.subr.bf16.mxu1 %v2667_v62  ;;  %3022 = vst [vmem:[#allocation32_spill] sm:$0xff] %v2693_v59  ;;  %3023 = vst [vmem:[#allocation33_spill] sm:$0xff] %v2695_v57  ;;  %v2699_v62 = vld [vmem:[#allocation2 + $0x244] ss:$16 sps:$4 sm:$0xff]   ;;  %v2701_v60 = vld [vmem:[#allocation2 + $0x24c] ss:$16 sps:$4 sm:$0xff]  }
  0x86   : > { %1053 = vmatprep.mubr.bf16.mxu0 %v3020_v53  ;;  %1094 = vmatprep.mubr.bf16.mxu1 %v3020_v53  ;;  %3024 = vst [vmem:[#allocation34_spill] sm:$0xff] %v2699_v62  ;;  %3025 = vst [vmem:[#allocation35_spill] sm:$0xff] %v2701_v60  ;;  %v2733_v61 = vld [vmem:[#allocation2 + $0x280] ss:$16 sps:$4 sm:$0xff]  }
  0x87   : > { %3031 = vst [vmem:[#allocation41_spill] sm:$0xff] %v2733_v61 }
  0x88   : > { %1024 = vmatpush1.bf16.msra.mxu0 %v2674_v46  ;;  %1065 = vmatpush1.bf16.msra.mxu1 %v2676_v49  ;;  %v2708_v49 = vld [vmem:[#allocation2 + $0x248] ss:$16 sps:$4 sm:$0xff]   ;;  %v912_v46 = vshrl.u32 %v2689_v0, 16 }
  0x89   : > { %1025 = vmatprep.subr.bf16.mxu0 %v2680_v56  ;;  %1066 = vmatprep.subr.bf16.mxu1 %v2684_v58  ;;  %v2712_v56 = vld [vmem:[#allocation2 + $0x264] ss:$16 sps:$4 sm:$0xff]   ;;  %v2714_v58 = vld [vmem:[#allocation2 + $0x26c] ss:$16 sps:$4 sm:$0xff]   ;;  %v2735_v0 = vld [vmem:[#allocation2 + $0x288] ss:$16 sps:$4 sm:$0xff]  }
  0x8a   : > { %3026 = vst [vmem:[#allocation36_spill] sm:$0xff] %v2712_v56  ;;  %3027 = vst [vmem:[#allocation37_spill] sm:$0xff] %v2714_v58  ;;  %v2729_v51 = vor.u32 %v916_v52, %v912_v46  ;;  %v2749_v52 = vld [vmem:[#allocation2 + $0x2a0] ss:$16 sps:$4 sm:$0xff]   ;;  %v2751_v46 = vld [vmem:[#allocation2 + $0x2a8] ss:$16 sps:$4 sm:$0xff]  }
  0x8b   : > { %3032 = vst [vmem:[#allocation42_spill] sm:$0xff] %v2735_v0  ;;  %3035 = vst [vmem:[#allocation45_spill] sm:$0xff] %v2749_v52 }
  0x8c   : > { %1026 = vmatpush1.bf16.msra.mxu0 %v2693_v59  ;;  %1067 = vmatpush1.bf16.msra.mxu1 %v2695_v57  ;;  %v2719_v57 = vld [vmem:[#allocation2 + $0x260] ss:$16 sps:$4 sm:$0xff]   ;;  %v2721_v59 = vld [vmem:[#allocation2 + $0x268] ss:$16 sps:$4 sm:$0xff]   ;;  %3036 = vst [vmem:[#allocation46_spill] sm:$0xff] %v2751_v46 }
  0x8d   : > { %1027 = vmatprep.subr.bf16.mxu0 %v2699_v62  ;;  %1068 = vmatprep.subr.bf16.mxu1 %v2701_v60  ;;  %3028 = vst [vmem:[#allocation38_spill] sm:$0xff] %v2721_v59  ;;  %v2725_v60 = vld [vmem:[#allocation2 + $0x284] ss:$16 sps:$4 sm:$0xff]   ;;  %v2727_v62 = vld [vmem:[#allocation2 + $0x28c] ss:$16 sps:$4 sm:$0xff]  }
  0x8e   : > { %3029 = vst [vmem:[#allocation39_spill] sm:$0xff] %v2725_v60  ;;  %3030 = vst [vmem:[#allocation40_spill] sm:$0xff] %v2727_v62 }
  0x90   : > { %1028 = vmatpush1.bf16.msra.mxu0 %v2706_v63  ;;  %1069 = vmatpush1.bf16.msra.mxu1 %v2708_v49 }
  0x91   : > { %1029 = vmatprep.subr.bf16.mxu0 %v2712_v56  ;;  %1070 = vmatprep.subr.bf16.mxu1 %v2714_v58  ;;  %v2739_v56 = vld [vmem:[#allocation2 + $0x2a4] ss:$16 sps:$4 sm:$0xff]   ;;  %v2741_v58 = vld [vmem:[#allocation2 + $0x2ac] ss:$16 sps:$4 sm:$0xff]  }
  0x92   : > { %3033 = vst [vmem:[#allocation43_spill] sm:$0xff] %v2739_v56  ;;  %3034 = vst [vmem:[#allocation44_spill] sm:$0xff] %v2741_v58 }
  0x94   : > { %1030 = vmatpush1.bf16.msra.mxu0 %v2719_v57  ;;  %1071 = vmatpush1.bf16.msra.mxu1 %v2721_v59  ;;  %v2775_v59 = vld [vmem:[#allocation2 + $0x2e0] ss:$16 sps:$4 sm:$0xff]  }
  0x95   : > { %1232 = vmatprep.subr.bf16.mxu0 %v2725_v60  ;;  %1273 = vmatprep.subr.bf16.mxu1 %v2727_v62  ;;  %v2755_v62 = vld [vmem:[#allocation2 + $0x2c4] ss:$16 sps:$4 sm:$0xff]   ;;  %v2757_v60 = vld [vmem:[#allocation2 + $0x2cc] ss:$16 sps:$4 sm:$0xff]  }
  0x96   : > { %3037 = vst [vmem:[#allocation47_spill] sm:$0xff] %v2755_v62  ;;  %3038 = vst [vmem:[#allocation48_spill] sm:$0xff] %v2757_v60 }
  0x97   : > { %1967 = vmatmul.mubr.msk.bf16.vlgmr.msra.gmra.mrb[0].mxu0 %vm392_vm0, %v2729_v51  ;;  %1968 = vmatmul.mubr.msk.bf16.vlgmr.msra.gmra.mrb[0].mxu1 %vm392_vm0, %v2729_v51 }
  0x98   : > { %1233 = vmatpush1.bf16.msra.mxu0 %v2733_v61  ;;  %1274 = vmatpush1.bf16.msra.mxu1 %v2735_v0  ;;  %v2763_v0 = vld [vmem:[#allocation2 + $0x2c0] ss:$16 sps:$4 sm:$0xff]   ;;  %v2765_v61 = vld [vmem:[#allocation2 + $0x2c8] ss:$16 sps:$4 sm:$0xff]  }
  0x99   : > { %1234 = vmatprep.subr.bf16.mxu0 %v2739_v56  ;;  %1275 = vmatprep.subr.bf16.mxu1 %v2741_v58  ;;  %3039 = vst [vmem:[#allocation49_spill] sm:$0xff] %v2763_v0  ;;  %v2769_v58 = vld [vmem:[#allocation2 + $0x2e4] ss:$16 sps:$4 sm:$0xff]   ;;  %v2771_v56 = vld [vmem:[#allocation2 + $0x2ec] ss:$16 sps:$4 sm:$0xff]  }
  0x9a   : > { %1264 = vmatprep.mubr.bf16.mxu0 %v3020_v53  ;;  %1305 = vmatprep.mubr.bf16.mxu1 %v3020_v53  ;;  %3040 = vst [vmem:[#allocation50_spill] sm:$0xff] %v2769_v58 }
  0x9c   : > { %1235 = vmatpush1.bf16.msra.mxu0 %v2749_v52  ;;  %1276 = vmatpush1.bf16.msra.mxu1 %v2751_v46  ;;  %v2777_v52 = vld [vmem:[#allocation2 + $0x2e8] ss:$16 sps:$4 sm:$0xff]   ;;  %v2781_v46 = vld [vmem:[#allocation2 + $0x304] ss:$16 sps:$4 sm:$0xff]  }
  0x9d   : > { %1236 = vmatprep.subr.bf16.mxu0 %v2755_v62  ;;  %1277 = vmatprep.subr.bf16.mxu1 %v2757_v60  ;;  %v2783_v62 = vld [vmem:[#allocation2 + $0x30c] ss:$16 sps:$4 sm:$0xff]   ;;  %v2787_v60 = vld [vmem:[#allocation2 + $0x300] ss:$16 sps:$4 sm:$0xff]  }
  0xa0   : > { %1237 = vmatpush1.bf16.msra.mxu0 %v2763_v0  ;;  %1278 = vmatpush1.bf16.msra.mxu1 %v2765_v61  ;;  %v2789_v0 = vld [vmem:[#allocation2 + $0x308] ss:$16 sps:$4 sm:$0xff]  }
  0xa1   : > { %1238 = vmatprep.subr.bf16.mxu0 %v2769_v58  ;;  %1279 = vmatprep.subr.bf16.mxu1 %v2771_v56  ;;  %v2794_v58 = vrot.slane %v2615_v54, 1 }
  0xa4   : > { %1239 = vmatpush1.bf16.msra.mxu0 %v2775_v59  ;;  %1280 = vmatpush1.bf16.msra.mxu1 %v2777_v52 }
  0xa5   : > { %1240 = vmatprep.subr.bf16.mxu0 %v2781_v46  ;;  %1281 = vmatprep.subr.bf16.mxu1 %v2783_v62 }
  0xa8   : > { %1241 = vmatpush1.bf16.msra.mxu0 %v2787_v60  ;;  %1282 = vmatpush1.bf16.msra.mxu1 %v2789_v0 }
  0xa9   : > { %1318 = vmatprep.subr.bf16.mxu0 %v2442_v1  ;;  %1359 = vmatprep.subr.bf16.mxu1 %v2444_v2  ;;  %v3041_v1 = vld [vmem:[#allocation8_spill] sm:$0xff]  ;;  %v3042_v2 = vld [vmem:[#allocation9_spill] sm:$0xff] }
  0xab   : > { %1989 = vmatmul.mubr.msk.bf16.vlgmr.msra.gmra.mrb[0].mxu0 %vm392_vm0, %v2794_v58  ;;  %1990 = vmatmul.mubr.msk.bf16.vlgmr.msra.gmra.mrb[0].mxu1 %vm392_vm0, %v2794_v58 }
  0xac   : > { %1319 = vmatpush1.bf16.msra.mxu0 %v2447_v3  ;;  %1360 = vmatpush1.bf16.msra.mxu1 %v2449_v4  ;;  %v3043_v3 = vld [vmem:[#allocation10_spill] sm:$0xff]  ;;  %v3044_v4 = vld [vmem:[#allocation11_spill] sm:$0xff] }
  0xad   : > { %1320 = vmatprep.subr.bf16.mxu0 %v2452_v5  ;;  %1361 = vmatprep.subr.bf16.mxu1 %v2456_v6  ;;  %v3045_v5 = vld [vmem:[#allocation12_spill] sm:$0xff]  ;;  %v3046_v6 = vld [vmem:[#allocation13_spill] sm:$0xff] }
  0xae   : > { %1350 = vmatprep.mubr.bf16.mxu0 %v3020_v53  ;;  %1391 = vmatprep.mubr.bf16.mxu1 %v3020_v53 }
  0xb0   : > { %1321 = vmatpush1.bf16.msra.mxu0 %v2458_v7  ;;  %1362 = vmatpush1.bf16.msra.mxu1 %v2461_v8  ;;  %v3047_v7 = vld [vmem:[#allocation14_spill] sm:$0xff]  ;;  %v3048_v8 = vld [vmem:[#allocation15_spill] sm:$0xff] }
  0xb1   : > { %1322 = vmatprep.subr.bf16.mxu0 %v2464_v9  ;;  %1363 = vmatprep.subr.bf16.mxu1 %v2467_v10  ;;  %v3049_v9 = vld [vmem:[#allocation16_spill] sm:$0xff]  ;;  %v3050_v10 = vld [vmem:[#allocation17_spill] sm:$0xff] }
  0xb4   : > { %1323 = vmatpush1.bf16.msra.mxu0 %v2469_v11  ;;  %1364 = vmatpush1.bf16.msra.mxu1 %v2471_v12  ;;  %v3051_v11 = vld [vmem:[#allocation18_spill] sm:$0xff]  ;;  %v3052_v12 = vld [vmem:[#allocation19_spill] sm:$0xff] }
  0xb5   : > { %1324 = vmatprep.subr.bf16.mxu0 %v2475_v13  ;;  %1365 = vmatprep.subr.bf16.mxu1 %v2479_v14  ;;  %v3053_v13 = vld [vmem:[#allocation20_spill] sm:$0xff]  ;;  %v3054_v14 = vld [vmem:[#allocation21_spill] sm:$0xff] }
  0xb8   : > { %1325 = vmatpush1.bf16.msra.mxu0 %v2482_v15  ;;  %1366 = vmatpush1.bf16.msra.mxu1 %v2486_v16  ;;  %v3055_v15 = vld [vmem:[#allocation22_spill] sm:$0xff]  ;;  %v3056_v16 = vld [vmem:[#allocation23_spill] sm:$0xff] }
  0xb9   : > { %1326 = vmatprep.subr.bf16.mxu0 %v2488_v17  ;;  %1367 = vmatprep.subr.bf16.mxu1 %v2492_v18  ;;  %v3057_v17 = vld [vmem:[#allocation24_spill] sm:$0xff]  ;;  %v3058_v18 = vld [vmem:[#allocation25_spill] sm:$0xff] }
  0xbc   : > { %1327 = vmatpush1.bf16.msra.mxu0 %v2498_v19  ;;  %1368 = vmatpush1.bf16.msra.mxu1 %v2500_v20  ;;  %v3059_v19 = vld [vmem:[#allocation26_spill] sm:$0xff]  ;;  %v3060_v20 = vld [vmem:[#allocation27_spill] sm:$0xff] }
  0xbd   : > { %1400 = vmatprep.subr.bf16.mxu0 %v2504_v21  ;;  %1441 = vmatprep.subr.bf16.mxu1 %v2506_v22  ;;  %v3061_v21 = vld [vmem:[#allocation28_spill] sm:$0xff]  ;;  %v3062_v22 = vld [vmem:[#allocation29_spill] sm:$0xff] }
  0xbf   : > { %1991 = vmatmul.mubr.msk.bf16.vlgmr.msra.gmra.mrb[4].mxu0 %vm392_vm0, %v2659_v55  ;;  %1992 = vmatmul.mubr.msk.bf16.vlgmr.msra.gmra.mrb[4].mxu1 %vm392_vm0, %v2659_v55 }
  0xc0   : > { %1401 = vmatpush1.bf16.msra.mxu0 %v2514_v23  ;;  %1442 = vmatpush1.bf16.msra.mxu1 %v2518_v24  ;;  %v3063_v23 = vld [vmem:[#allocation30_spill] sm:$0xff]  ;;  %v3064_v24 = vld [vmem:[#allocation32_spill] sm:$0xff] }
  0xc1   : > { %1402 = vmatprep.subr.bf16.mxu0 %v2525_v26  ;;  %1443 = vmatprep.subr.bf16.mxu1 %v2527_v27  ;;  %v3066_v26 = vld [vmem:[#allocation34_spill] sm:$0xff]  ;;  %v3067_v27 = vld [vmem:[#allocation35_spill] sm:$0xff] }
  0xc2   : > { %1432 = vmatprep.mubr.bf16.mxu0 %v3020_v53  ;;  %1473 = vmatprep.mubr.bf16.mxu1 %v3020_v53 }
  0xc4   : > { %1403 = vmatpush1.bf16.msra.mxu0 %v2535_v28  ;;  %1444 = vmatpush1.bf16.msra.mxu1 %v2537_v29  ;;  %v3068_v28 = vld [vmem:[#allocation36_spill] sm:$0xff]  ;;  %v3069_v29 = vld [vmem:[#allocation37_spill] sm:$0xff] }
  0xc5   : > { %1404 = vmatprep.subr.bf16.mxu0 %v2541_v30  ;;  %1445 = vmatprep.subr.bf16.mxu1 %v2543_v31  ;;  %v3070_v30 = vld [vmem:[#allocation38_spill] sm:$0xff]  ;;  %v3071_v31 = vld [vmem:[#allocation39_spill] sm:$0xff] }
  0xc8   : > { %1405 = vmatpush1.bf16.msra.mxu0 %v2549_v32  ;;  %1446 = vmatpush1.bf16.msra.mxu1 %v2551_v33  ;;  %v3072_v32 = vld [vmem:[#allocation40_spill] sm:$0xff]  ;;  %v3073_v33 = vld [vmem:[#allocation41_spill] sm:$0xff] }
  0xc9   : > { %1406 = vmatprep.subr.bf16.mxu0 %v2555_v34  ;;  %1447 = vmatprep.subr.bf16.mxu1 %v2557_v35  ;;  %v3074_v34 = vld [vmem:[#allocation42_spill] sm:$0xff]  ;;  %v3075_v35 = vld [vmem:[#allocation43_spill] sm:$0xff] }
  0xcc   : > { %1407 = vmatpush1.bf16.msra.mxu0 %v2559_v36  ;;  %1448 = vmatpush1.bf16.msra.mxu1 %v2561_v37  ;;  %v3076_v36 = vld [vmem:[#allocation44_spill] sm:$0xff]  ;;  %v3077_v37 = vld [vmem:[#allocation45_spill] sm:$0xff] }
  0xcd   : > { %1408 = vmatprep.subr.bf16.mxu0 %v2565_v38  ;;  %1449 = vmatprep.subr.bf16.mxu1 %v2569_v39  ;;  %v3078_v38 = vld [vmem:[#allocation46_spill] sm:$0xff]  ;;  %v3079_v39 = vld [vmem:[#allocation47_spill] sm:$0xff] }
  0xd0   : > { %1409 = vmatpush1.bf16.msra.mxu0 %v2571_v40  ;;  %1450 = vmatpush1.bf16.msra.mxu1 %v2573_v41  ;;  %v3080_v40 = vld [vmem:[#allocation48_spill] sm:$0xff]  ;;  %v3081_v41 = vld [vmem:[#allocation49_spill] sm:$0xff] }
  0xd1   : > { %1482 = vmatprep.subr.bf16.mxu0 %v2577_v42  ;;  %1523 = vmatprep.subr.bf16.mxu1 %v2585_v43  ;;  %v3082_v42 = vld [vmem:[#allocation50_spill] sm:$0xff]  ;;  %v3083_v43 = vld [vmem:[#allocation31_spill] sm:$0xff] }
  0xd3   : > { %1993 = vmatmul.mubr.msk.bf16.vlgmr.msra.gmra.mrb[4].mxu0 %vm392_vm0, %v2521_v25  ;;  %1994 = vmatmul.mubr.msk.bf16.vlgmr.msra.gmra.mrb[4].mxu1 %vm392_vm0, %v2521_v25  ;;  %v3065_v25 = vld [vmem:[#allocation33_spill] sm:$0xff] }
  0xd4   : > { %1483 = vmatpush1.bf16.msra.mxu0 %v2587_v44  ;;  %1524 = vmatpush1.bf16.msra.mxu1 %v2589_v45  ;;  %v1654_v44 = vrot.slane %v3083_v43, 1 }
  0xd5   : > { %1484 = vmatprep.subr.bf16.mxu0 %v2593_v47  ;;  %1525 = vmatprep.subr.bf16.mxu1 %v2597_v48 }
  0xd6   : > { %1514 = vmatprep.mubr.bf16.mxu0 %v3020_v53  ;;  %1555 = vmatprep.mubr.bf16.mxu1 %v3020_v53 }
  0xd8   : > { %1485 = vmatpush1.bf16.msra.mxu0 %v2601_v50  ;;  %1526 = vmatpush1.bf16.msra.mxu1 %v3041_v1 }
  0xd9   : > { %1486 = vmatprep.subr.bf16.mxu0 %v3042_v2  ;;  %1527 = vmatprep.subr.bf16.mxu1 %v3043_v3 }
  0xdc   : > { %1487 = vmatpush1.bf16.msra.mxu0 %v3044_v4  ;;  %1528 = vmatpush1.bf16.msra.mxu1 %v3045_v5 }
  0xdd   : > { %1488 = vmatprep.subr.bf16.mxu0 %v3046_v6  ;;  %1529 = vmatprep.subr.bf16.mxu1 %v3047_v7 }
  0xe0   : > { %1489 = vmatpush1.bf16.msra.mxu0 %v3048_v8  ;;  %1530 = vmatpush1.bf16.msra.mxu1 %v3049_v9 }
  0xe1   : > { %1490 = vmatprep.subr.bf16.mxu0 %v3050_v10  ;;  %1531 = vmatprep.subr.bf16.mxu1 %v3051_v11 }
  0xe4   : > { %1491 = vmatpush1.bf16.msra.mxu0 %v3052_v12  ;;  %1532 = vmatpush1.bf16.msra.mxu1 %v3053_v13 }
  0xe5   : > { %1568 = vmatprep.subr.bf16.mxu0 %v3054_v14  ;;  %1609 = vmatprep.subr.bf16.mxu1 %v3055_v15 }
  0xe7   : > { %1995 = vmatmul.mubr.msk.bf16.vlgmr.msra.gmra.mrb[4].mxu0 %vm392_vm0, %v2729_v51  ;;  %1996 = vmatmul.mubr.msk.bf16.vlgmr.msra.gmra.mrb[4].mxu1 %vm392_vm0, %v2729_v51 }
  0xe8   : > { %1569 = vmatpush1.bf16.msra.mxu0 %v3056_v16  ;;  %1610 = vmatpush1.bf16.msra.mxu1 %v3057_v17 }
  0xe9   : > { %1570 = vmatprep.subr.bf16.mxu0 %v3058_v18  ;;  %1611 = vmatprep.subr.bf16.mxu1 %v3059_v19 }
  0xea   : > { %1600 = vmatprep.mubr.bf16.mxu0 %v3020_v53  ;;  %1641 = vmatprep.mubr.bf16.mxu1 %v3020_v53 }
  0xec   : > { %1571 = vmatpush1.bf16.msra.mxu0 %v3060_v20  ;;  %1612 = vmatpush1.bf16.msra.mxu1 %v3061_v21 }
  0xed   : > { %1572 = vmatprep.subr.bf16.mxu0 %v3062_v22  ;;  %1613 = vmatprep.subr.bf16.mxu1 %v3063_v23 }
  0xf0   : > { %1573 = vmatpush1.bf16.msra.mxu0 %v3064_v24  ;;  %1614 = vmatpush1.bf16.msra.mxu1 %v3065_v25 }
  0xf1   : > { %1574 = vmatprep.subr.bf16.mxu0 %v3066_v26  ;;  %1615 = vmatprep.subr.bf16.mxu1 %v3067_v27 }
  0xf4   : > { %1575 = vmatpush1.bf16.msra.mxu0 %v2706_v63  ;;  %1616 = vmatpush1.bf16.msra.mxu1 %v2708_v49 }
  0xf5   : > { %1576 = vmatprep.subr.bf16.mxu0 %v3068_v28  ;;  %1617 = vmatprep.subr.bf16.mxu1 %v3069_v29 }
  0xf8   : > { %1577 = vmatpush1.bf16.msra.mxu0 %v2719_v57  ;;  %1618 = vmatpush1.bf16.msra.mxu1 %v3070_v30 }
  0xf9   : > { %1658 = vmatprep.subr.bf16.mxu0 %v3071_v31  ;;  %1699 = vmatprep.subr.bf16.mxu1 %v3072_v32 }
  0xfb   : > { %1997 = vmatmul.mubr.msk.bf16.vlgmr.msra.gmra.mrb[4].mxu0 %vm392_vm0, %v2794_v58  ;;  %1998 = vmatmul.mubr.msk.bf16.vlgmr.msra.gmra.mrb[4].mxu1 %vm392_vm0, %v2794_v58 }
  0xfc   : > { %1659 = vmatpush1.bf16.msra.mxu0 %v3073_v33  ;;  %1700 = vmatpush1.bf16.msra.mxu1 %v3074_v34 }
  0xfd   : > { %1660 = vmatprep.subr.bf16.mxu0 %v3075_v35  ;;  %1701 = vmatprep.subr.bf16.mxu1 %v3076_v36 }
  0xfe   : > { %1690 = vmatprep.mubr.bf16.mxu0 %v3020_v53  ;;  %1731 = vmatprep.mubr.bf16.mxu1 %v3020_v53 }
 0x100   : > { %1661 = vmatpush1.bf16.msra.mxu0 %v3077_v37  ;;  %1702 = vmatpush1.bf16.msra.mxu1 %v3078_v38 }
 0x101   : > { %1662 = vmatprep.subr.bf16.mxu0 %v3079_v39  ;;  %1703 = vmatprep.subr.bf16.mxu1 %v3080_v40 }
 0x104   : > { %1663 = vmatpush1.bf16.msra.mxu0 %v3081_v41  ;;  %1704 = vmatpush1.bf16.msra.mxu1 %v2765_v61 }
 0x105   : > { %1664 = vmatprep.subr.bf16.mxu0 %v3082_v42  ;;  %1705 = vmatprep.subr.bf16.mxu1 %v2771_v56  ;;  %v1752_v56 = vlaneseq }
 0x107   : > { %v1753_v57 = vshrl.u32 %v1752_v56, 7 }
 0x108   : > { %1665 = vmatpush1.bf16.msra.mxu0 %v2775_v59  ;;  %1706 = vmatpush1.bf16.msra.mxu1 %v2777_v52 }
 0x109   : > { %1666 = vmatprep.subr.bf16.mxu0 %v2781_v46  ;;  %1707 = vmatprep.subr.bf16.mxu1 %v2783_v62  ;;  %v1754_v58 = vsub.s32 0, %v1753_v57  ;;  %v1750_v62 = vld [vmem:[#allocation4] sm:$0x3]  ;;  %v1758_v59 = vsub.s32 1, %v1753_v57 }
 0x10b   : > { %v1755_v61 = vrot.slane %v1750_v62, %v1754_v58  ;;  %v1759_v3 = vrot.slane %v1750_v62, %v1758_v59 }
 0x10c   : > { %1667 = vmatpush1.bf16.msra.mxu0 %v2787_v60  ;;  %1708 = vmatpush1.bf16.msra.mxu1 %v2789_v0 }
 0x10f   : > { %1999 = vmatmul.mubr.msk.bf16.vlgmr.msra.gmra.mrb[4].mxu0 %vm392_vm0, %v1654_v44  ;;  %2000 = vmatmul.mubr.msk.bf16.vlgmr.msra.gmra.mrb[4].mxu1 %vm392_vm0, %v1654_v44 }
 0x17e   : > { %v1266_v45 = vpop.f32.mrb[0].mxu0  ;;  %v1307_v47 = vpop.f32.mrb[0].mxu1 }
 0x17f   : > { %v1268_v48 = vpop.f32.mrb[1].mxu0  ;;  %v1309_v50 = vpop.f32.mrb[1].mxu1 }
 0x180   : > { %v1270_v51 = vpop.f32.mrb[2].mxu0  ;;  %v1311_v53 = vpop.f32.mrb[2].mxu1 }
 0x181   : > { %v1271_v54 = vpop.f32.mrb[3].mxu0  ;;  %v1312_v55 = vpop.f32.mrb[3].mxu1 }
 0x1e2   : > { %v1692_v60 = vpop.f32.mrb[4].mxu0  ;;  %v1733_v49 = vpop.f32.mrb[4].mxu1 }
 0x1e3   : > { %v1744_v0 = vmax.f32 %v1266_v45, %v1692_v60  ;;  %v1746_v63 = vmax.f32 %v1307_v47, %v1733_v49  ;;  %v1694_v52 = vpop.f32.mrb[5].mxu0  ;;  %v1735_v46 = vpop.f32.mrb[5].mxu1 }
 0x1e4   : > { %v1745_v1 = vmax.f32 %v1268_v48, %v1694_v52  ;;  %v1747_v2 = vmax.f32 %v1309_v50, %v1735_v46  ;;  %v1696_v4 = vpop.f32.mrb[6].mxu0  ;;  %v1737_v5 = vpop.f32.mrb[6].mxu1 }
 0x1e5   : > { %v1748_v6 = vmax.f32 %v1744_v0, %v1746_v63  ;;  %v1697_v7 = vpop.f32.mrb[7].mxu0  ;;  %v1738_v8 = vpop.f32.mrb[7].mxu1 }
 0x1e6   : > { %v1749_v9 = vmax.f32 %v1745_v1, %v1747_v2 }
 0x1e7   : > { %v1762_v10 = vadd.f32 %v1755_v61, %v1748_v6 }
 0x1e8   : > { %v1763_v11 = vadd.f32 %v1759_v3, %v1749_v9 }
 0x1e9   : > { %v1764_v12 = vmax.f32 %v1762_v10, 0.0 }
 0x1ea   : > { %v1765_v13 = vmax.f32 %v1763_v11, 0.0 }
 0x1ec   : > { %v2007_v14 = vpack.c.bf16 %v1765_v13, %v1764_v12 }
 0x1ee   : > { %1774 = vst [vmem:[%s245_s29] sm:$0xff] %v2007_v14 }
 0x1ef PF: > { %s16_s15 = sadd.s32 1, %s2326_s15  }
 0x1f0   : > { %p13_p9 = scmp.ge.s32.totalorder %s16_s15, 4  }
 0x1f2   :  { %15 = sbr.rel (!%p13_p9) target bundleno = 2 (0x2), region = 82 }
 0x1f9   :  { %1796 = vsyncpa [#allocation3], 1 }
 0x1fa   :  { %1798 = vsyncpa [#allocation3 + $0x1], 1 }
 0x1fb   :  { %1799 = vsyncpa [#allocation5], 1 }

// kernel: _infer_forward_padded.5
= control target key start
LH: loop header
LB: loop body
LE: loop exit
PB: predicated region body
PF: predicated region fallthrough
CT: control target
= control target key end

     0   :  { %v281_v36 = vlaneseq  ;;  %v3138_v37 = vmov 1966171168   ;;  %s4088_s0 = inlined_call_operand.vmem [shape: bf16[2,1024], index: 0, kind: input, shape index: {}]   ;;  %s4089_s1 = inlined_call_operand.vmem [shape: bf16[1024,512], index: 1, kind: input, shape index: {}]   ;;  %s4090_s2 = inlined_call_operand.vmem [shape: f32[1,512], index: 2, kind: input, shape index: {}]   ;;  %s4091_s3 = inlined_call_operand.vmem [shape: bf16[512,128], index: 3, kind: input, shape index: {}]   ;;  %s4092_s4 = inlined_call_operand.vmem [shape: f32[1,128], index: 4, kind: input, shape index: {}]   ;;  %s4093_s5 = inlined_call_operand.hbm [shape: f32[2,128], index: 5, kind: output, shape index: {}]  }
   0x1   :  { %v2697_v0 = vld [vmem:[%s4089_s1 + $0x4] ss:$16 sps:$4 sm:$0xff]   ;;  %v2699_v1 = vld [vmem:[%s4089_s1 + $0xc] ss:$16 sps:$4 sm:$0xff]   ;;  %v2701_v2 = vld [vmem:[%s4089_s1] ss:$16 sps:$4 sm:$0xff]   ;;  %v304_v38 = vunpack.c.l.s4 %v3138_v37 }
   0x2   :  { %1639 = vmatprep.subr.bf16.mxu0 %v2697_v0  ;;  %v2702_v3 = vld [vmem:[%s4089_s1 + $0x8] ss:$16 sps:$4 sm:$0xff]   ;;  %1803 = vmatprep.subr.bf16.mxu1 %v2699_v1  ;;  %v2703_v4 = vld [vmem:[%s4089_s1 + $0x24] ss:$16 sps:$4 sm:$0xff]   ;;  %v2705_v5 = vld [vmem:[%s4089_s1 + $0x2c] ss:$16 sps:$4 sm:$0xff]  }
   0x3   :  { %1640 = vmatpush1.bf16.msra.mxu0 %v2701_v2  ;;  %1804 = vmatpush1.bf16.msra.mxu1 %v2702_v3  ;;  %v2707_v6 = vld [vmem:[%s4089_s1 + $0x20] ss:$16 sps:$4 sm:$0xff]   ;;  %v2708_v7 = vld [vmem:[%s4089_s1 + $0x28] ss:$16 sps:$4 sm:$0xff]   ;;  %v2709_v8 = vld [vmem:[%s4089_s1 + $0x44] ss:$16 sps:$4 sm:$0xff]   ;;  %v305_v43 = vunpack.c.0.s8 %v304_v38 }
   0x4   :  { %1641 = vmatprep.subr.bf16.mxu0 %v2703_v4  ;;  %1805 = vmatprep.subr.bf16.mxu1 %v2705_v5  ;;  %v2711_v9 = vld [vmem:[%s4089_s1 + $0x4c] ss:$16 sps:$4 sm:$0xff]   ;;  %v2713_v10 = vld [vmem:[%s4089_s1 + $0x40] ss:$16 sps:$4 sm:$0xff]   ;;  %v2714_v11 = vld [vmem:[%s4089_s1 + $0x48] ss:$16 sps:$4 sm:$0xff]  }
   0x5   :  { %v2715_v12 = vld [vmem:[%s4089_s1 + $0x64] ss:$16 sps:$4 sm:$0xff]   ;;  %v2717_v13 = vld [vmem:[%s4089_s1 + $0x6c] ss:$16 sps:$4 sm:$0xff]   ;;  %v2719_v14 = vld [vmem:[%s4089_s1 + $0x60] ss:$16 sps:$4 sm:$0xff]  }
   0x6   :  { %v2720_v15 = vld [vmem:[%s4089_s1 + $0x68] ss:$16 sps:$4 sm:$0xff]   ;;  %v2721_v16 = vld [vmem:[%s4089_s1 + $0x84] ss:$16 sps:$4 sm:$0xff]   ;;  %v2723_v17 = vld [vmem:[%s4089_s1 + $0x8c] ss:$16 sps:$4 sm:$0xff]  }
   0x7   :  { %1642 = vmatpush1.bf16.msra.mxu0 %v2707_v6  ;;  %1806 = vmatpush1.bf16.msra.mxu1 %v2708_v7  ;;  %v2725_v18 = vld [vmem:[%s4089_s1 + $0x80] ss:$16 sps:$4 sm:$0xff]   ;;  %v2726_v19 = vld [vmem:[%s4089_s1 + $0x88] ss:$16 sps:$4 sm:$0xff]   ;;  %v2727_v20 = vld [vmem:[%s4089_s1 + $0xa4] ss:$16 sps:$4 sm:$0xff]  }
   0x8   :  { %1643 = vmatprep.subr.bf16.mxu0 %v2709_v8  ;;  %1807 = vmatprep.subr.bf16.mxu1 %v2711_v9  ;;  %v2729_v21 = vld [vmem:[%s4089_s1 + $0xac] ss:$16 sps:$4 sm:$0xff]   ;;  %v2731_v22 = vld [vmem:[%s4089_s1 + $0xa0] ss:$16 sps:$4 sm:$0xff]   ;;  %v2732_v23 = vld [vmem:[%s4089_s1 + $0xa8] ss:$16 sps:$4 sm:$0xff]  }
   0x9   :  { %v2733_v24 = vld [vmem:[%s4089_s1 + $0xc4] ss:$16 sps:$4 sm:$0xff]   ;;  %v2735_v25 = vld [vmem:[%s4089_s1 + $0xcc] ss:$16 sps:$4 sm:$0xff]   ;;  %v2737_v26 = vld [vmem:[%s4089_s1 + $0xc0] ss:$16 sps:$4 sm:$0xff]  }
   0xa   :  { %v2738_v27 = vld [vmem:[%s4089_s1 + $0xc8] ss:$16 sps:$4 sm:$0xff]   ;;  %v2739_v28 = vld [vmem:[%s4089_s1 + $0xe4] ss:$16 sps:$4 sm:$0xff]   ;;  %v2741_v29 = vld [vmem:[%s4089_s1 + $0xec] ss:$16 sps:$4 sm:$0xff]  }
   0xb   :  { %1644 = vmatpush1.bf16.msra.mxu0 %v2713_v10  ;;  %1808 = vmatpush1.bf16.msra.mxu1 %v2714_v11  ;;  %v2743_v30 = vld [vmem:[%s4089_s1 + $0xe0] ss:$16 sps:$4 sm:$0xff]   ;;  %v2744_v31 = vld [vmem:[%s4089_s1 + $0xe8] ss:$16 sps:$4 sm:$0xff]   ;;  %v2745_v32 = vld [vmem:[%s4089_s1 + $0x104] ss:$16 sps:$4 sm:$0xff]  }
   0xc   :  { %1645 = vmatprep.subr.bf16.mxu0 %v2715_v12  ;;  %1809 = vmatprep.subr.bf16.mxu1 %v2717_v13  ;;  %v2747_v33 = vld [vmem:[%s4089_s1 + $0x10c] ss:$16 sps:$4 sm:$0xff]   ;;  %v2749_v34 = vld [vmem:[%s4089_s1 + $0x100] ss:$16 sps:$4 sm:$0xff]   ;;  %v2750_v35 = vld [vmem:[%s4089_s1 + $0x108] ss:$16 sps:$4 sm:$0xff]  }
   0xd   :  { %v2751_v39 = vld [vmem:[%s4089_s1 + $0x124] ss:$16 sps:$4 sm:$0xff]   ;;  %v2753_v40 = vld [vmem:[%s4089_s1 + $0x12c] ss:$16 sps:$4 sm:$0xff]   ;;  %v2755_v41 = vld [vmem:[%s4089_s1 + $0x120] ss:$16 sps:$4 sm:$0xff]  }
   0xe   :  { %v3287_v42 = vshrl.u32 %v281_v36, 7  ;;  %v2756_v44 = vld [vmem:[%s4089_s1 + $0x128] ss:$16 sps:$4 sm:$0xff]   ;;  %v2757_v45 = vld [vmem:[%s4089_s1 + $0x144] ss:$16 sps:$4 sm:$0xff]  }
   0xf   :  { %1646 = vmatpush1.bf16.msra.mxu0 %v2719_v14  ;;  %1810 = vmatpush1.bf16.msra.mxu1 %v2720_v15  ;;  %v2759_v46 = vld [vmem:[%s4089_s1 + $0x14c] ss:$16 sps:$4 sm:$0xff]   ;;  %v2761_v47 = vld [vmem:[%s4089_s1 + $0x140] ss:$16 sps:$4 sm:$0xff]   ;;  %v2762_v48 = vld [vmem:[%s4089_s1 + $0x148] ss:$16 sps:$4 sm:$0xff]  }
  0x10   :  { %1647 = vmatprep.subr.bf16.mxu0 %v2721_v16  ;;  %1811 = vmatprep.subr.bf16.mxu1 %v2723_v17  ;;  %v3305_v49 = vsub.s32 %v305_v43, %v3287_v42  ;;  %v2763_v50 = vld [vmem:[%s4089_s1 + $0x164] ss:$16 sps:$4 sm:$0xff]   ;;  %v2765_v51 = vld [vmem:[%s4089_s1 + $0x16c] ss:$16 sps:$4 sm:$0xff]   ;;  %v2767_v53 = vld [vmem:[%s4089_s1 + $0x160] ss:$16 sps:$4 sm:$0xff]  }
  0x11   :  { %v22_v52 = vld [vmem:[%s4088_s0] sm:$0xff]  ;;  %v2768_v55 = vld [vmem:[%s4089_s1 + $0x168] ss:$16 sps:$4 sm:$0xff]   ;;  %v2771_v57 = vld [vmem:[%s4089_s1 + $0x18c] ss:$16 sps:$4 sm:$0xff]  }
  0x12   :  { %v309_v54 = vrot.slane %v22_v52, %v3305_v49  ;;  %v2769_v56 = vld [vmem:[%s4089_s1 + $0x184] ss:$16 sps:$4 sm:$0xff]   ;;  %v2773_v59 = vld [vmem:[%s4089_s1 + $0x180] ss:$16 sps:$4 sm:$0xff]   ;;  %v2774_v61 = vld [vmem:[%s4089_s1 + $0x188] ss:$16 sps:$4 sm:$0xff]   ;;  %v302_v9 = vcombine.high %v22_v52, %v22_v52 }
  0x13   :  { %1648 = vmatpush1.bf16.msra.mxu0 %v2725_v18  ;;  %1812 = vmatpush1.bf16.msra.mxu1 %v2726_v19  ;;  %v2775_v62 = vld [vmem:[%s4089_s1 + $0x1a4] ss:$16 sps:$4 sm:$0xff]   ;;  %v2777_v63 = vld [vmem:[%s4089_s1 + $0x1ac] ss:$16 sps:$4 sm:$0xff]   ;;  %v2779_v0 = vld [vmem:[%s4089_s1 + $0x1a0] ss:$16 sps:$4 sm:$0xff]  }
  0x14   :  { %1649 = vmatprep.subr.bf16.mxu0 %v2727_v20  ;;  %1813 = vmatprep.subr.bf16.mxu1 %v2729_v21  ;;  %v317_v58 = vcombine.high %v309_v54, %v309_v54  ;;  %v2780_v1 = vld [vmem:[%s4089_s1 + $0x1a8] ss:$16 sps:$4 sm:$0xff]   ;;  %v2781_v2 = vld [vmem:[%s4089_s1 + $0x1c4] ss:$16 sps:$4 sm:$0xff]   ;;  %v2783_v3 = vld [vmem:[%s4089_s1 + $0x1cc] ss:$16 sps:$4 sm:$0xff]   ;;  %v316_v13 = vrot.slane %v302_v9, %v3305_v49  ;;  %v3383_v15 = vrot.slane %v309_v54, %v3305_v49 }
  0x15   :  { %v2785_v4 = vld [vmem:[%s4089_s1 + $0x1c0] ss:$16 sps:$4 sm:$0xff]   ;;  %v2786_v5 = vld [vmem:[%s4089_s1 + $0x1c8] ss:$16 sps:$4 sm:$0xff]   ;;  %v2787_v6 = vld [vmem:[%s4089_s1 + $0x1e4] ss:$16 sps:$4 sm:$0xff]  }
  0x16   :  { %v339_v60 = vrot.slane %v317_v58, %v3305_v49  ;;  %v2789_v7 = vld [vmem:[%s4089_s1 + $0x1ec] ss:$16 sps:$4 sm:$0xff]   ;;  %v2791_v8 = vld [vmem:[%s4089_s1 + $0x1e0] ss:$16 sps:$4 sm:$0xff]   ;;  %v2792_v10 = vld [vmem:[%s4089_s1 + $0x1e8] ss:$16 sps:$4 sm:$0xff]   ;;  %v318_v16 = vcombine.high %v316_v13, %v316_v13  ;;  %v3398_v21 = vrot.slane %v316_v13, %v3305_v49 }
  0x17   :  { %1650 = vmatpush1.bf16.msra.mxu0 %v2731_v22  ;;  %1814 = vmatpush1.bf16.msra.mxu1 %v2732_v23  ;;  %v2795_v11 = vld [vmem:[%s4089_s1 + $0x204] ss:$16 sps:$4 sm:$0xff]   ;;  %v2798_v12 = vld [vmem:[%s4089_s1 + $0x20c] ss:$16 sps:$4 sm:$0xff]   ;;  %v2793_v14 = vld [vmem:[%s4089_s1 + $0x200] ss:$16 sps:$4 sm:$0xff]  }
  0x18   :  { %1651 = vmatprep.subr.bf16.mxu0 %v2733_v24  ;;  %1815 = vmatprep.subr.bf16.mxu1 %v2735_v25  ;;  %v2796_v17 = vld [vmem:[%s4089_s1 + $0x208] ss:$16 sps:$4 sm:$0xff]   ;;  %v2801_v18 = vld [vmem:[%s4089_s1 + $0x224] ss:$16 sps:$4 sm:$0xff]   ;;  %v2804_v19 = vld [vmem:[%s4089_s1 + $0x22c] ss:$16 sps:$4 sm:$0xff]   ;;  %v3395_v20 = vrot.slane %v318_v16, %v3305_v49  ;;  %v349_v22 = vcombine.high %v339_v60, %v339_v60 }
  0x19   :  { %1671 = vmatprep.mubr.bf16.mxu0 %v339_v60  ;;  %1835 = vmatprep.mubr.bf16.mxu1 %v339_v60  ;;  %v2799_v23 = vld [vmem:[%s4089_s1 + $0x220] ss:$16 sps:$4 sm:$0xff]   ;;  %v2802_v24 = vld [vmem:[%s4089_s1 + $0x228] ss:$16 sps:$4 sm:$0xff]   ;;  %v2807_v25 = vld [vmem:[%s4089_s1 + $0x244] ss:$16 sps:$4 sm:$0xff]  }
  0x1a   :  { %v2820_v36 = vld [vmem:[%s4089_s1 + $0x288] ss:$16 sps:$4 sm:$0xff]   ;;  %v2825_v37 = vld [vmem:[%s4089_s1 + $0x2a4] ss:$16 sps:$4 sm:$0xff]   ;;  %v2828_v38 = vld [vmem:[%s4089_s1 + $0x2ac] ss:$16 sps:$4 sm:$0xff]  }
  0x1b   :  { %1652 = vmatpush1.bf16.msra.mxu0 %v2737_v26  ;;  %1816 = vmatpush1.bf16.msra.mxu1 %v2738_v27  ;;  %v2810_v26 = vld [vmem:[%s4089_s1 + $0x24c] ss:$16 sps:$4 sm:$0xff]   ;;  %v2805_v27 = vld [vmem:[%s4089_s1 + $0x240] ss:$16 sps:$4 sm:$0xff]   ;;  %v2838_v49 = vld [vmem:[%s4089_s1 + $0x2e8] ss:$16 sps:$4 sm:$0xff]  }
  0x1c   :  { %1653 = vmatprep.subr.bf16.mxu0 %v2739_v28  ;;  %1817 = vmatprep.subr.bf16.mxu1 %v2741_v29  ;;  %v2808_v28 = vld [vmem:[%s4089_s1 + $0x248] ss:$16 sps:$4 sm:$0xff]   ;;  %v2813_v29 = vld [vmem:[%s4089_s1 + $0x264] ss:$16 sps:$4 sm:$0xff]   ;;  %v2834_v43 = vld [vmem:[%s4089_s1 + $0x2cc] ss:$16 sps:$4 sm:$0xff]  }
  0x1d   :  { %v2841_v52 = vld [vmem:[%s4089_s1 + $0x300] ss:$16 sps:$4 sm:$0xff]   ;;  %v2849_v54 = vld [vmem:[%s4089_s1 + $0x324] ss:$16 sps:$4 sm:$0xff]   ;;  %v2874_v9 = vld [vmem:[%s4089_s1 + $0x3a8] ss:$16 sps:$4 sm:$0xff]  }
  0x1e   :  { %v2855_v58 = vld [vmem:[%s4089_s1 + $0x344] ss:$16 sps:$4 sm:$0xff]   ;;  %v2853_v60 = vld [vmem:[%s4089_s1 + $0x340] ss:$16 sps:$4 sm:$0xff]   ;;  %v2880_v13 = vld [vmem:[%s4089_s1 + $0x3c8] ss:$16 sps:$4 sm:$0xff]  }
  0x1f   :  { %1654 = vmatpush1.bf16.msra.mxu0 %v2743_v30  ;;  %1818 = vmatpush1.bf16.msra.mxu1 %v2744_v31  ;;  %v2816_v30 = vld [vmem:[%s4089_s1 + $0x26c] ss:$16 sps:$4 sm:$0xff]   ;;  %v2811_v31 = vld [vmem:[%s4089_s1 + $0x260] ss:$16 sps:$4 sm:$0xff]  }
  0x20   :  { %1655 = vmatprep.subr.bf16.mxu0 %v2745_v32  ;;  %1819 = vmatprep.subr.bf16.mxu1 %v2747_v33  ;;  %v2814_v32 = vld [vmem:[%s4089_s1 + $0x268] ss:$16 sps:$4 sm:$0xff]   ;;  %v2819_v33 = vld [vmem:[%s4089_s1 + $0x284] ss:$16 sps:$4 sm:$0xff]   ;;  %v2888_v16 = vld [vmem:[%s4089_s1 + $0x3ec] ss:$16 sps:$4 sm:$0xff]  }
  0x23   :  { %1656 = vmatpush1.bf16.msra.mxu0 %v2749_v34  ;;  %1820 = vmatpush1.bf16.msra.mxu1 %v2750_v35  ;;  %v2822_v34 = vld [vmem:[%s4089_s1 + $0x28c] ss:$16 sps:$4 sm:$0xff]   ;;  %v2817_v35 = vld [vmem:[%s4089_s1 + $0x280] ss:$16 sps:$4 sm:$0xff]  }
  0x24   :  { %1657 = vmatprep.subr.bf16.mxu0 %v2751_v39  ;;  %1821 = vmatprep.subr.bf16.mxu1 %v2753_v40  ;;  %v2823_v39 = vld [vmem:[%s4089_s1 + $0x2a0] ss:$16 sps:$4 sm:$0xff]   ;;  %v2826_v40 = vld [vmem:[%s4089_s1 + $0x2a8] ss:$16 sps:$4 sm:$0xff]  }
  0x27   :  { %1658 = vmatpush1.bf16.msra.mxu0 %v2755_v41  ;;  %1822 = vmatpush1.bf16.msra.mxu1 %v2756_v44  ;;  %v2831_v41 = vld [vmem:[%s4089_s1 + $0x2c4] ss:$16 sps:$4 sm:$0xff]   ;;  %v2829_v44 = vld [vmem:[%s4089_s1 + $0x2c0] ss:$16 sps:$4 sm:$0xff]  }
  0x28   :  { %1659 = vmatprep.subr.bf16.mxu0 %v2757_v45  ;;  %1823 = vmatprep.subr.bf16.mxu1 %v2759_v46  ;;  %v2832_v45 = vld [vmem:[%s4089_s1 + $0x2c8] ss:$16 sps:$4 sm:$0xff]   ;;  %v2837_v46 = vld [vmem:[%s4089_s1 + $0x2e4] ss:$16 sps:$4 sm:$0xff]  }
  0x2b   :  { %1660 = vmatpush1.bf16.msra.mxu0 %v2761_v47  ;;  %1824 = vmatpush1.bf16.msra.mxu1 %v2762_v48  ;;  %v2840_v47 = vld [vmem:[%s4089_s1 + $0x2ec] ss:$16 sps:$4 sm:$0xff]   ;;  %v2835_v48 = vld [vmem:[%s4089_s1 + $0x2e0] ss:$16 sps:$4 sm:$0xff]  }
  0x2c   :  { %1661 = vmatprep.subr.bf16.mxu0 %v2763_v50  ;;  %1825 = vmatprep.subr.bf16.mxu1 %v2765_v51  ;;  %v2843_v50 = vld [vmem:[%s4089_s1 + $0x304] ss:$16 sps:$4 sm:$0xff]   ;;  %v2846_v51 = vld [vmem:[%s4089_s1 + $0x30c] ss:$16 sps:$4 sm:$0xff]  }
  0x2f   :  { %1662 = vmatpush1.bf16.msra.mxu0 %v2767_v53  ;;  %1826 = vmatpush1.bf16.msra.mxu1 %v2768_v55  ;;  %v2844_v53 = vld [vmem:[%s4089_s1 + $0x308] ss:$16 sps:$4 sm:$0xff]   ;;  %v2852_v55 = vld [vmem:[%s4089_s1 + $0x32c] ss:$16 sps:$4 sm:$0xff]  }
  0x30   :  { %1663 = vmatprep.subr.bf16.mxu0 %v2769_v56  ;;  %1827 = vmatprep.subr.bf16.mxu1 %v2771_v57  ;;  %v2847_v56 = vld [vmem:[%s4089_s1 + $0x320] ss:$16 sps:$4 sm:$0xff]   ;;  %v2850_v57 = vld [vmem:[%s4089_s1 + $0x328] ss:$16 sps:$4 sm:$0xff]  }
  0x33   :  { %1664 = vmatpush1.bf16.msra.mxu0 %v2773_v59  ;;  %1828 = vmatpush1.bf16.msra.mxu1 %v2774_v61  ;;  %v2858_v59 = vld [vmem:[%s4089_s1 + $0x34c] ss:$16 sps:$4 sm:$0xff]   ;;  %v2856_v61 = vld [vmem:[%s4089_s1 + $0x348] ss:$16 sps:$4 sm:$0xff]  }
  0x34   :  { %1665 = vmatprep.subr.bf16.mxu0 %v2775_v62  ;;  %1829 = vmatprep.subr.bf16.mxu1 %v2777_v63  ;;  %v2861_v62 = vld [vmem:[%s4089_s1 + $0x364] ss:$16 sps:$4 sm:$0xff]   ;;  %v2864_v63 = vld [vmem:[%s4089_s1 + $0x36c] ss:$16 sps:$4 sm:$0xff]  }
  0x37   :  { %1666 = vmatpush1.bf16.msra.mxu0 %v2779_v0  ;;  %1830 = vmatpush1.bf16.msra.mxu1 %v2780_v1  ;;  %v2859_v0 = vld [vmem:[%s4089_s1 + $0x360] ss:$16 sps:$4 sm:$0xff]   ;;  %v2862_v1 = vld [vmem:[%s4089_s1 + $0x368] ss:$16 sps:$4 sm:$0xff]  }
  0x38   :  { %1667 = vmatprep.subr.bf16.mxu0 %v2781_v2  ;;  %1831 = vmatprep.subr.bf16.mxu1 %v2783_v3  ;;  %v2867_v2 = vld [vmem:[%s4089_s1 + $0x384] ss:$16 sps:$4 sm:$0xff]   ;;  %v2870_v3 = vld [vmem:[%s4089_s1 + $0x38c] ss:$16 sps:$4 sm:$0xff]  }
  0x3b   :  { %1668 = vmatpush1.bf16.msra.mxu0 %v2785_v4  ;;  %1832 = vmatpush1.bf16.msra.mxu1 %v2786_v5  ;;  %v2865_v4 = vld [vmem:[%s4089_s1 + $0x380] ss:$16 sps:$4 sm:$0xff]   ;;  %v2868_v5 = vld [vmem:[%s4089_s1 + $0x388] ss:$16 sps:$4 sm:$0xff]  }
  0x3c   :  { %1669 = vmatprep.subr.bf16.mxu0 %v2787_v6  ;;  %1833 = vmatprep.subr.bf16.mxu1 %v2789_v7  ;;  %v2873_v6 = vld [vmem:[%s4089_s1 + $0x3a4] ss:$16 sps:$4 sm:$0xff]   ;;  %v2876_v7 = vld [vmem:[%s4089_s1 + $0x3ac] ss:$16 sps:$4 sm:$0xff]  }
  0x3f   :  { %1670 = vmatpush1.bf16.msra.mxu0 %v2791_v8  ;;  %1834 = vmatpush1.bf16.msra.mxu1 %v2792_v10  ;;  %v2871_v8 = vld [vmem:[%s4089_s1 + $0x3a0] ss:$16 sps:$4 sm:$0xff]   ;;  %v2879_v10 = vld [vmem:[%s4089_s1 + $0x3c4] ss:$16 sps:$4 sm:$0xff]  }
  0x40   :  { %1680 = vmatprep.subr.bf16.mxu0 %v2795_v11  ;;  %1844 = vmatprep.subr.bf16.mxu1 %v2798_v12  ;;  %v2882_v11 = vld [vmem:[%s4089_s1 + $0x3cc] ss:$16 sps:$4 sm:$0xff]   ;;  %v2877_v12 = vld [vmem:[%s4089_s1 + $0x3c0] ss:$16 sps:$4 sm:$0xff]  }
  0x42   :  { %1672 = vmatmul.mubr.bf16.vlgmr.msra.gmra.mrb[0].mxu0 %v3383_v15  ;;  %1836 = vmatmul.mubr.bf16.vlgmr.msra.gmra.mrb[0].mxu1 %v3383_v15 }
  0x43   :  { %1681 = vmatpush1.bf16.msra.mxu0 %v2793_v14  ;;  %1845 = vmatpush1.bf16.msra.mxu1 %v2796_v17  ;;  %v2885_v14 = vld [vmem:[%s4089_s1 + $0x3e4] ss:$16 sps:$4 sm:$0xff]   ;;  %v2883_v17 = vld [vmem:[%s4089_s1 + $0x3e0] ss:$16 sps:$4 sm:$0xff]  }
  0x44   :  { %1682 = vmatprep.subr.bf16.mxu0 %v2801_v18  ;;  %1846 = vmatprep.subr.bf16.mxu1 %v2804_v19  ;;  %v2886_v18 = vld [vmem:[%s4089_s1 + $0x3e8] ss:$16 sps:$4 sm:$0xff]   ;;  %v2891_v19 = vld [vmem:[%s4089_s1 + $0x404] ss:$16 sps:$4 sm:$0xff]  }
  0x45   :  { %1712 = vmatprep.mubr.bf16.mxu0 %v349_v22  ;;  %1876 = vmatprep.mubr.bf16.mxu1 %v349_v22  ;;  %v2894_v22 = vld [vmem:[%s4089_s1 + $0x40c] ss:$16 sps:$4 sm:$0xff]  }
  0x47   :  { %1683 = vmatpush1.bf16.msra.mxu0 %v2799_v23  ;;  %1847 = vmatpush1.bf16.msra.mxu1 %v2802_v24  ;;  %v2889_v23 = vld [vmem:[%s4089_s1 + $0x400] ss:$16 sps:$4 sm:$0xff]   ;;  %v347_v24 = vcombine.high %v3383_v15, %v3383_v15 }
  0x48   :  { %1684 = vmatprep.subr.bf16.mxu0 %v2807_v25  ;;  %1848 = vmatprep.subr.bf16.mxu1 %v2810_v26  ;;  %v2892_v25 = vld [vmem:[%s4089_s1 + $0x408] ss:$16 sps:$4 sm:$0xff]   ;;  %v2897_v26 = vld [vmem:[%s4089_s1 + $0x424] ss:$16 sps:$4 sm:$0xff]   ;;  %v2895_v15 = vld [vmem:[%s4089_s1 + $0x420] ss:$16 sps:$4 sm:$0xff]  }
  0x4b   :  { %1685 = vmatpush1.bf16.msra.mxu0 %v2805_v27  ;;  %1849 = vmatpush1.bf16.msra.mxu1 %v2808_v28  ;;  %v2900_v27 = vld [vmem:[%s4089_s1 + $0x42c] ss:$16 sps:$4 sm:$0xff]   ;;  %v2898_v28 = vld [vmem:[%s4089_s1 + $0x428] ss:$16 sps:$4 sm:$0xff]  }
  0x4c   :  { %1686 = vmatprep.subr.bf16.mxu0 %v2813_v29  ;;  %1850 = vmatprep.subr.bf16.mxu1 %v2816_v30  ;;  %v2903_v29 = vld [vmem:[%s4089_s1 + $0x444] ss:$16 sps:$4 sm:$0xff]   ;;  %v2906_v30 = vld [vmem:[%s4089_s1 + $0x44c] ss:$16 sps:$4 sm:$0xff]  }
  0x4f   :  { %1687 = vmatpush1.bf16.msra.mxu0 %v2811_v31  ;;  %1851 = vmatpush1.bf16.msra.mxu1 %v2814_v32  ;;  %v2901_v31 = vld [vmem:[%s4089_s1 + $0x440] ss:$16 sps:$4 sm:$0xff]   ;;  %v2904_v32 = vld [vmem:[%s4089_s1 + $0x448] ss:$16 sps:$4 sm:$0xff]  }
  0x50   :  { %1688 = vmatprep.subr.bf16.mxu0 %v2819_v33  ;;  %1852 = vmatprep.subr.bf16.mxu1 %v2822_v34  ;;  %v2909_v33 = vld [vmem:[%s4089_s1 + $0x464] ss:$16 sps:$4 sm:$0xff]   ;;  %v2912_v34 = vld [vmem:[%s4089_s1 + $0x46c] ss:$16 sps:$4 sm:$0xff]  }
  0x53   :  { %1689 = vmatpush1.bf16.msra.mxu0 %v2817_v35  ;;  %1853 = vmatpush1.bf16.msra.mxu1 %v2820_v36  ;;  %v2907_v35 = vld [vmem:[%s4089_s1 + $0x460] ss:$16 sps:$4 sm:$0xff]   ;;  %v2910_v36 = vld [vmem:[%s4089_s1 + $0x468] ss:$16 sps:$4 sm:$0xff]  }
  0x54   :  { %1690 = vmatprep.subr.bf16.mxu0 %v2825_v37  ;;  %1854 = vmatprep.subr.bf16.mxu1 %v2828_v38  ;;  %v2915_v37 = vld [vmem:[%s4089_s1 + $0x484] ss:$16 sps:$4 sm:$0xff]   ;;  %v2918_v38 = vld [vmem:[%s4089_s1 + $0x48c] ss:$16 sps:$4 sm:$0xff]  }
  0x57   :  { %1691 = vmatpush1.bf16.msra.mxu0 %v2823_v39  ;;  %1855 = vmatpush1.bf16.msra.mxu1 %v2826_v40  ;;  %v2913_v39 = vld [vmem:[%s4089_s1 + $0x480] ss:$16 sps:$4 sm:$0xff]   ;;  %v2916_v40 = vld [vmem:[%s4089_s1 + $0x488] ss:$16 sps:$4 sm:$0xff]  }
  0x58   :  { %1692 = vmatprep.subr.bf16.mxu0 %v2831_v41  ;;  %1856 = vmatprep.subr.bf16.mxu1 %v2834_v43  ;;  %v2921_v41 = vld [vmem:[%s4089_s1 + $0x4a4] ss:$16 sps:$4 sm:$0xff]   ;;  %v2924_v43 = vld [vmem:[%s4089_s1 + $0x4ac] ss:$16 sps:$4 sm:$0xff]  }
  0x5b   :  { %1693 = vmatpush1.bf16.msra.mxu0 %v2829_v44  ;;  %1857 = vmatpush1.bf16.msra.mxu1 %v2832_v45  ;;  %v2919_v44 = vld [vmem:[%s4089_s1 + $0x4a0] ss:$16 sps:$4 sm:$0xff]   ;;  %v2922_v45 = vld [vmem:[%s4089_s1 + $0x4a8] ss:$16 sps:$4 sm:$0xff]  }
  0x5c   :  { %1694 = vmatprep.subr.bf16.mxu0 %v2837_v46  ;;  %1858 = vmatprep.subr.bf16.mxu1 %v2840_v47  ;;  %v2927_v46 = vld [vmem:[%s4089_s1 + $0x4c4] ss:$16 sps:$4 sm:$0xff]   ;;  %v2930_v47 = vld [vmem:[%s4089_s1 + $0x4cc] ss:$16 sps:$4 sm:$0xff]  }
  0x5f   :  { %1695 = vmatpush1.bf16.msra.mxu0 %v2835_v48  ;;  %1859 = vmatpush1.bf16.msra.mxu1 %v2838_v49  ;;  %v2925_v48 = vld [vmem:[%s4089_s1 + $0x4c0] ss:$16 sps:$4 sm:$0xff]   ;;  %v2928_v49 = vld [vmem:[%s4089_s1 + $0x4c8] ss:$16 sps:$4 sm:$0xff]  }
  0x60   :  { %1696 = vmatprep.subr.bf16.mxu0 %v2843_v50  ;;  %1860 = vmatprep.subr.bf16.mxu1 %v2846_v51  ;;  %v2933_v50 = vld [vmem:[%s4089_s1 + $0x4e4] ss:$16 sps:$4 sm:$0xff]   ;;  %v2936_v51 = vld [vmem:[%s4089_s1 + $0x4ec] ss:$16 sps:$4 sm:$0xff]  }
  0x63   :  { %1697 = vmatpush1.bf16.msra.mxu0 %v2841_v52  ;;  %1861 = vmatpush1.bf16.msra.mxu1 %v2844_v53  ;;  %v2931_v52 = vld [vmem:[%s4089_s1 + $0x4e0] ss:$16 sps:$4 sm:$0xff]   ;;  %v2934_v53 = vld [vmem:[%s4089_s1 + $0x4e8] ss:$16 sps:$4 sm:$0xff]  }
  0x64   :  { %1698 = vmatprep.subr.bf16.mxu0 %v2849_v54  ;;  %1862 = vmatprep.subr.bf16.mxu1 %v2852_v55  ;;  %v2939_v54 = vld [vmem:[%s4089_s1 + $0x504] ss:$16 sps:$4 sm:$0xff]   ;;  %v2942_v55 = vld [vmem:[%s4089_s1 + $0x50c] ss:$16 sps:$4 sm:$0xff]  }
  0x67   :  { %1699 = vmatpush1.bf16.msra.mxu0 %v2847_v56  ;;  %1863 = vmatpush1.bf16.msra.mxu1 %v2850_v57  ;;  %v2937_v56 = vld [vmem:[%s4089_s1 + $0x500] ss:$16 sps:$4 sm:$0xff]   ;;  %v2940_v57 = vld [vmem:[%s4089_s1 + $0x508] ss:$16 sps:$4 sm:$0xff]  }
  0x68   :  { %1700 = vmatprep.subr.bf16.mxu0 %v2855_v58  ;;  %1864 = vmatprep.subr.bf16.mxu1 %v2858_v59  ;;  %v2945_v58 = vld [vmem:[%s4089_s1 + $0x524] ss:$16 sps:$4 sm:$0xff]   ;;  %v2948_v59 = vld [vmem:[%s4089_s1 + $0x52c] ss:$16 sps:$4 sm:$0xff]  }
  0x6b   :  { %1701 = vmatpush1.bf16.msra.mxu0 %v2853_v60  ;;  %1865 = vmatpush1.bf16.msra.mxu1 %v2856_v61  ;;  %v2943_v60 = vld [vmem:[%s4089_s1 + $0x520] ss:$16 sps:$4 sm:$0xff]   ;;  %v2946_v61 = vld [vmem:[%s4089_s1 + $0x528] ss:$16 sps:$4 sm:$0xff]  }
  0x6c   :  { %1702 = vmatprep.subr.bf16.mxu0 %v2861_v62  ;;  %1866 = vmatprep.subr.bf16.mxu1 %v2864_v63  ;;  %v2951_v62 = vld [vmem:[%s4089_s1 + $0x544] ss:$16 sps:$4 sm:$0xff]   ;;  %v2954_v63 = vld [vmem:[%s4089_s1 + $0x54c] ss:$16 sps:$4 sm:$0xff]  }
  0x6f   :  { %1703 = vmatpush1.bf16.msra.mxu0 %v2859_v0  ;;  %1867 = vmatpush1.bf16.msra.mxu1 %v2862_v1  ;;  %v2949_v0 = vld [vmem:[%s4089_s1 + $0x540] ss:$16 sps:$4 sm:$0xff]   ;;  %v2952_v1 = vld [vmem:[%s4089_s1 + $0x548] ss:$16 sps:$4 sm:$0xff]  }
  0x70   :  { %1704 = vmatprep.subr.bf16.mxu0 %v2867_v2  ;;  %1868 = vmatprep.subr.bf16.mxu1 %v2870_v3  ;;  %v2957_v2 = vld [vmem:[%s4089_s1 + $0x564] ss:$16 sps:$4 sm:$0xff]   ;;  %v2960_v3 = vld [vmem:[%s4089_s1 + $0x56c] ss:$16 sps:$4 sm:$0xff]  }
  0x73   :  { %1705 = vmatpush1.bf16.msra.mxu0 %v2865_v4  ;;  %1869 = vmatpush1.bf16.msra.mxu1 %v2868_v5  ;;  %v2955_v4 = vld [vmem:[%s4089_s1 + $0x560] ss:$16 sps:$4 sm:$0xff]   ;;  %v2958_v5 = vld [vmem:[%s4089_s1 + $0x568] ss:$16 sps:$4 sm:$0xff]  }
  0x74   :  { %1706 = vmatprep.subr.bf16.mxu0 %v2873_v6  ;;  %1870 = vmatprep.subr.bf16.mxu1 %v2876_v7  ;;  %v2963_v6 = vld [vmem:[%s4089_s1 + $0x584] ss:$16 sps:$4 sm:$0xff]   ;;  %v2966_v7 = vld [vmem:[%s4089_s1 + $0x58c] ss:$16 sps:$4 sm:$0xff]  }
  0x77   :  { %1707 = vmatpush1.bf16.msra.mxu0 %v2871_v8  ;;  %1871 = vmatpush1.bf16.msra.mxu1 %v2874_v9  ;;  %v2961_v8 = vld [vmem:[%s4089_s1 + $0x580] ss:$16 sps:$4 sm:$0xff]   ;;  %v2964_v9 = vld [vmem:[%s4089_s1 + $0x588] ss:$16 sps:$4 sm:$0xff]  }
  0x78   :  { %1708 = vmatprep.subr.bf16.mxu0 %v2879_v10  ;;  %1872 = vmatprep.subr.bf16.mxu1 %v2882_v11  ;;  %v2969_v10 = vld [vmem:[%s4089_s1 + $0x5a4] ss:$16 sps:$4 sm:$0xff]   ;;  %v2972_v11 = vld [vmem:[%s4089_s1 + $0x5ac] ss:$16 sps:$4 sm:$0xff]  }
  0x7b   :  { %1709 = vmatpush1.bf16.msra.mxu0 %v2877_v12  ;;  %1873 = vmatpush1.bf16.msra.mxu1 %v2880_v13  ;;  %v2967_v12 = vld [vmem:[%s4089_s1 + $0x5a0] ss:$16 sps:$4 sm:$0xff]   ;;  %v2970_v13 = vld [vmem:[%s4089_s1 + $0x5a8] ss:$16 sps:$4 sm:$0xff]  }
  0x7c   :  { %1710 = vmatprep.subr.bf16.mxu0 %v2885_v14  ;;  %1874 = vmatprep.subr.bf16.mxu1 %v2888_v16  ;;  %v2975_v14 = vld [vmem:[%s4089_s1 + $0x5c4] ss:$16 sps:$4 sm:$0xff]   ;;  %v2978_v16 = vld [vmem:[%s4089_s1 + $0x5cc] ss:$16 sps:$4 sm:$0xff]  }
  0x7f   :  { %1711 = vmatpush1.bf16.msra.mxu0 %v2883_v17  ;;  %1875 = vmatpush1.bf16.msra.mxu1 %v2886_v18  ;;  %v2973_v17 = vld [vmem:[%s4089_s1 + $0x5c0] ss:$16 sps:$4 sm:$0xff]   ;;  %v2976_v18 = vld [vmem:[%s4089_s1 + $0x5c8] ss:$16 sps:$4 sm:$0xff]  }
  0x80   :  { %1721 = vmatprep.subr.bf16.mxu0 %v2891_v19  ;;  %1885 = vmatprep.subr.bf16.mxu1 %v2894_v22  ;;  %v2981_v19 = vld [vmem:[%s4089_s1 + $0x5e4] ss:$16 sps:$4 sm:$0xff]   ;;  %v2984_v22 = vld [vmem:[%s4089_s1 + $0x5ec] ss:$16 sps:$4 sm:$0xff]  }
  0x82   :  { %1713 = vmatmul.mubr.bf16.vlgmr.msra.gmra.mrb[0].mxu0 %v347_v24  ;;  %1877 = vmatmul.mubr.bf16.vlgmr.msra.gmra.mrb[0].mxu1 %v347_v24  ;;  %v2982_v24 = vld [vmem:[%s4089_s1 + $0x5e8] ss:$16 sps:$4 sm:$0xff]  }
  0x83   :  { %1722 = vmatpush1.bf16.msra.mxu0 %v2889_v23  ;;  %1886 = vmatpush1.bf16.msra.mxu1 %v2892_v25  ;;  %v2979_v23 = vld [vmem:[%s4089_s1 + $0x5e0] ss:$16 sps:$4 sm:$0xff]   ;;  %v2988_v25 = vld [vmem:[%s4089_s1 + $0x604] ss:$16 sps:$4 sm:$0xff]  }
  0x84   :  { %1723 = vmatprep.subr.bf16.mxu0 %v2897_v26  ;;  %1887 = vmatprep.subr.bf16.mxu1 %v2900_v27  ;;  %v2991_v26 = vld [vmem:[%s4089_s1 + $0x60c] ss:$16 sps:$4 sm:$0xff]   ;;  %v2986_v27 = vld [vmem:[%s4089_s1 + $0x600] ss:$16 sps:$4 sm:$0xff]  }
  0x85   :  { %1753 = vmatprep.mubr.bf16.mxu0 %v3395_v20  ;;  %1917 = vmatprep.mubr.bf16.mxu1 %v3395_v20 }
  0x87   :  { %1724 = vmatpush1.bf16.msra.mxu0 %v2895_v15  ;;  %1888 = vmatpush1.bf16.msra.mxu1 %v2898_v28  ;;  %v2989_v15 = vld [vmem:[%s4089_s1 + $0x608] ss:$16 sps:$4 sm:$0xff]   ;;  %v2994_v28 = vld [vmem:[%s4089_s1 + $0x624] ss:$16 sps:$4 sm:$0xff]  }
  0x88   :  { %1725 = vmatprep.subr.bf16.mxu0 %v2903_v29  ;;  %1889 = vmatprep.subr.bf16.mxu1 %v2906_v30  ;;  %v2997_v29 = vld [vmem:[%s4089_s1 + $0x62c] ss:$16 sps:$4 sm:$0xff]   ;;  %v2992_v30 = vld [vmem:[%s4089_s1 + $0x620] ss:$16 sps:$4 sm:$0xff]  }
  0x8b   :  { %1726 = vmatpush1.bf16.msra.mxu0 %v2901_v31  ;;  %1890 = vmatpush1.bf16.msra.mxu1 %v2904_v32  ;;  %v2995_v31 = vld [vmem:[%s4089_s1 + $0x628] ss:$16 sps:$4 sm:$0xff]   ;;  %v350_v32 = vcombine.high %v3395_v20, %v3395_v20  ;;  %v2998_v20 = vld [vmem:[%s4089_s1 + $0x640] ss:$16 sps:$4 sm:$0xff]  }
  0x8c   :  { %1727 = vmatprep.subr.bf16.mxu0 %v2909_v33  ;;  %1891 = vmatprep.subr.bf16.mxu1 %v2912_v34  ;;  %v3000_v33 = vld [vmem:[%s4089_s1 + $0x644] ss:$16 sps:$4 sm:$0xff]   ;;  %v3003_v34 = vld [vmem:[%s4089_s1 + $0x64c] ss:$16 sps:$4 sm:$0xff]  }
  0x8f   :  { %1728 = vmatpush1.bf16.msra.mxu0 %v2907_v35  ;;  %1892 = vmatpush1.bf16.msra.mxu1 %v2910_v36  ;;  %v3001_v35 = vld [vmem:[%s4089_s1 + $0x648] ss:$16 sps:$4 sm:$0xff]  }
  0x90   :  { %1729 = vmatprep.subr.bf16.mxu0 %v2915_v37  ;;  %1893 = vmatprep.subr.bf16.mxu1 %v2918_v38 }
  0x93   :  { %1730 = vmatpush1.bf16.msra.mxu0 %v2913_v39  ;;  %1894 = vmatpush1.bf16.msra.mxu1 %v2916_v40 }
  0x94   :  { %1731 = vmatprep.subr.bf16.mxu0 %v2921_v41  ;;  %1895 = vmatprep.subr.bf16.mxu1 %v2924_v43 }
  0x97   :  { %1732 = vmatpush1.bf16.msra.mxu0 %v2919_v44  ;;  %1896 = vmatpush1.bf16.msra.mxu1 %v2922_v45 }
  0x98   :  { %1733 = vmatprep.subr.bf16.mxu0 %v2927_v46  ;;  %1897 = vmatprep.subr.bf16.mxu1 %v2930_v47 }
  0x9b   :  { %1734 = vmatpush1.bf16.msra.mxu0 %v2925_v48  ;;  %1898 = vmatpush1.bf16.msra.mxu1 %v2928_v49 }
  0x9c   :  { %1735 = vmatprep.subr.bf16.mxu0 %v2933_v50  ;;  %1899 = vmatprep.subr.bf16.mxu1 %v2936_v51 }
  0x9f   :  { %1736 = vmatpush1.bf16.msra.mxu0 %v2931_v52  ;;  %1900 = vmatpush1.bf16.msra.mxu1 %v2934_v53 }
  0xa0   :  { %1737 = vmatprep.subr.bf16.mxu0 %v2939_v54  ;;  %1901 = vmatprep.subr.bf16.mxu1 %v2942_v55 }
  0xa3   :  { %1738 = vmatpush1.bf16.msra.mxu0 %v2937_v56  ;;  %1902 = vmatpush1.bf16.msra.mxu1 %v2940_v57 }
  0xa4   :  { %1739 = vmatprep.subr.bf16.mxu0 %v2945_v58  ;;  %1903 = vmatprep.subr.bf16.mxu1 %v2948_v59 }
  0xa7   :  { %1740 = vmatpush1.bf16.msra.mxu0 %v2943_v60  ;;  %1904 = vmatpush1.bf16.msra.mxu1 %v2946_v61 }
  0xa8   :  { %1741 = vmatprep.subr.bf16.mxu0 %v2951_v62  ;;  %1905 = vmatprep.subr.bf16.mxu1 %v2954_v63 }
  0xab   :  { %1742 = vmatpush1.bf16.msra.mxu0 %v2949_v0  ;;  %1906 = vmatpush1.bf16.msra.mxu1 %v2952_v1 }
  0xac   :  { %1743 = vmatprep.subr.bf16.mxu0 %v2957_v2  ;;  %1907 = vmatprep.subr.bf16.mxu1 %v2960_v3 }
  0xaf   :  { %1744 = vmatpush1.bf16.msra.mxu0 %v2955_v4  ;;  %1908 = vmatpush1.bf16.msra.mxu1 %v2958_v5 }
  0xb0   :  { %1745 = vmatprep.subr.bf16.mxu0 %v2963_v6  ;;  %1909 = vmatprep.subr.bf16.mxu1 %v2966_v7 }
  0xb3   :  { %1746 = vmatpush1.bf16.msra.mxu0 %v2961_v8  ;;  %1910 = vmatpush1.bf16.msra.mxu1 %v2964_v9 }
  0xb4   :  { %1747 = vmatprep.subr.bf16.mxu0 %v2969_v10  ;;  %1911 = vmatprep.subr.bf16.mxu1 %v2972_v11 }
  0xb7   :  { %1748 = vmatpush1.bf16.msra.mxu0 %v2967_v12  ;;  %1912 = vmatpush1.bf16.msra.mxu1 %v2970_v13 }
  0xb8   :  { %1749 = vmatprep.subr.bf16.mxu0 %v2975_v14  ;;  %1913 = vmatprep.subr.bf16.mxu1 %v2978_v16 }
  0xbb   :  { %1750 = vmatpush1.bf16.msra.mxu0 %v2973_v17  ;;  %1914 = vmatpush1.bf16.msra.mxu1 %v2976_v18 }
  0xbc   :  { %1751 = vmatprep.subr.bf16.mxu0 %v2981_v19  ;;  %1915 = vmatprep.subr.bf16.mxu1 %v2984_v22 }
  0xbf   :  { %1752 = vmatpush1.bf16.msra.mxu0 %v2979_v23  ;;  %1916 = vmatpush1.bf16.msra.mxu1 %v2982_v24 }
  0xc0   :  { %1762 = vmatprep.subr.bf16.mxu0 %v2988_v25  ;;  %1926 = vmatprep.subr.bf16.mxu1 %v2991_v26 }
  0xc2   :  { %1754 = vmatmul.mubr.bf16.vlgmr.msra.gmra.mrb[0].mxu0 %v3398_v21  ;;  %1918 = vmatmul.mubr.bf16.vlgmr.msra.gmra.mrb[0].mxu1 %v3398_v21 }
  0xc3   :  { %1763 = vmatpush1.bf16.msra.mxu0 %v2986_v27  ;;  %1927 = vmatpush1.bf16.msra.mxu1 %v2989_v15 }
  0xc4   :  { %1764 = vmatprep.subr.bf16.mxu0 %v2994_v28  ;;  %1928 = vmatprep.subr.bf16.mxu1 %v2997_v29 }
  0xc5   :  { %1794 = vmatprep.mubr.bf16.mxu0 %v350_v32  ;;  %1958 = vmatprep.mubr.bf16.mxu1 %v350_v32 }
  0xc7   :  { %1765 = vmatpush1.bf16.msra.mxu0 %v2992_v30  ;;  %1929 = vmatpush1.bf16.msra.mxu1 %v2995_v31 }
  0xc8   :  { %10 = vsyncpa [#allocation3], 0  ;;  %1766 = vmatprep.subr.bf16.mxu0 %v3000_v33  ;;  %1930 = vmatprep.subr.bf16.mxu1 %v3003_v34  ;;  %v3006_v36 = vld [vmem:[%s4089_s1 + $0x664] ss:$16 sps:$4 sm:$0xff]   ;;  %v3009_v37 = vld [vmem:[%s4089_s1 + $0x66c] ss:$16 sps:$4 sm:$0xff]   ;;  %v348_v29 = vcombine.high %v3398_v21, %v3398_v21 }
  0xc9   :  { %v3004_v38 = vld [vmem:[%s4089_s1 + $0x660] ss:$16 sps:$4 sm:$0xff]   ;;  %v3007_v39 = vld [vmem:[%s4089_s1 + $0x668] ss:$16 sps:$4 sm:$0xff]   ;;  %v3012_v40 = vld [vmem:[%s4089_s1 + $0x684] ss:$16 sps:$4 sm:$0xff]  }
  0xca   :  { %v3015_v41 = vld [vmem:[%s4089_s1 + $0x68c] ss:$16 sps:$4 sm:$0xff]   ;;  %v3010_v43 = vld [vmem:[%s4089_s1 + $0x680] ss:$16 sps:$4 sm:$0xff]   ;;  %v3013_v44 = vld [vmem:[%s4089_s1 + $0x688] ss:$16 sps:$4 sm:$0xff]  }
  0xcb   :  { %1767 = vmatpush1.bf16.msra.mxu0 %v2998_v20  ;;  %1931 = vmatpush1.bf16.msra.mxu1 %v3001_v35  ;;  %v3018_v45 = vld [vmem:[%s4089_s1 + $0x6a4] ss:$16 sps:$4 sm:$0xff]   ;;  %v3021_v46 = vld [vmem:[%s4089_s1 + $0x6ac] ss:$16 sps:$4 sm:$0xff]   ;;  %v3016_v47 = vld [vmem:[%s4089_s1 + $0x6a0] ss:$16 sps:$4 sm:$0xff]  }
  0xcc   :  { %1768 = vmatprep.subr.bf16.mxu0 %v3006_v36  ;;  %1932 = vmatprep.subr.bf16.mxu1 %v3009_v37  ;;  %v3019_v48 = vld [vmem:[%s4089_s1 + $0x6a8] ss:$16 sps:$4 sm:$0xff]   ;;  %v3024_v49 = vld [vmem:[%s4089_s1 + $0x6c4] ss:$16 sps:$4 sm:$0xff]   ;;  %v3027_v50 = vld [vmem:[%s4089_s1 + $0x6cc] ss:$16 sps:$4 sm:$0xff]  }
  0xcd   :  { %v3022_v51 = vld [vmem:[%s4089_s1 + $0x6c0] ss:$16 sps:$4 sm:$0xff]   ;;  %v3025_v52 = vld [vmem:[%s4089_s1 + $0x6c8] ss:$16 sps:$4 sm:$0xff]   ;;  %v3030_v53 = vld [vmem:[%s4089_s1 + $0x6e4] ss:$16 sps:$4 sm:$0xff]  }
  0xce   :  { %v3033_v54 = vld [vmem:[%s4089_s1 + $0x6ec] ss:$16 sps:$4 sm:$0xff]   ;;  %v3028_v55 = vld [vmem:[%s4089_s1 + $0x6e0] ss:$16 sps:$4 sm:$0xff]   ;;  %v3031_v56 = vld [vmem:[%s4089_s1 + $0x6e8] ss:$16 sps:$4 sm:$0xff]  }
  0xcf   :  { %1769 = vmatpush1.bf16.msra.mxu0 %v3004_v38  ;;  %1933 = vmatpush1.bf16.msra.mxu1 %v3007_v39  ;;  %v3036_v57 = vld [vmem:[%s4089_s1 + $0x704] ss:$16 sps:$4 sm:$0xff]   ;;  %v3039_v58 = vld [vmem:[%s4089_s1 + $0x70c] ss:$16 sps:$4 sm:$0xff]   ;;  %v3034_v59 = vld [vmem:[%s4089_s1 + $0x700] ss:$16 sps:$4 sm:$0xff]  }
  0xd0   :  { %1770 = vmatprep.subr.bf16.mxu0 %v3012_v40  ;;  %1934 = vmatprep.subr.bf16.mxu1 %v3015_v41  ;;  %v3037_v60 = vld [vmem:[%s4089_s1 + $0x708] ss:$16 sps:$4 sm:$0xff]   ;;  %v3042_v61 = vld [vmem:[%s4089_s1 + $0x724] ss:$16 sps:$4 sm:$0xff]   ;;  %v3045_v62 = vld [vmem:[%s4089_s1 + $0x72c] ss:$16 sps:$4 sm:$0xff]  }
  0xd1   :  { %v3040_v63 = vld [vmem:[%s4089_s1 + $0x720] ss:$16 sps:$4 sm:$0xff]   ;;  %v3043_v0 = vld [vmem:[%s4089_s1 + $0x728] ss:$16 sps:$4 sm:$0xff]   ;;  %v3048_v1 = vld [vmem:[%s4089_s1 + $0x744] ss:$16 sps:$4 sm:$0xff]  }
  0xd2   :  { %v3051_v2 = vld [vmem:[%s4089_s1 + $0x74c] ss:$16 sps:$4 sm:$0xff]   ;;  %v3046_v3 = vld [vmem:[%s4089_s1 + $0x740] ss:$16 sps:$4 sm:$0xff]   ;;  %v3049_v4 = vld [vmem:[%s4089_s1 + $0x748] ss:$16 sps:$4 sm:$0xff]  }
  0xd3   :  { %1771 = vmatpush1.bf16.msra.mxu0 %v3010_v43  ;;  %1935 = vmatpush1.bf16.msra.mxu1 %v3013_v44  ;;  %v3054_v5 = vld [vmem:[%s4089_s1 + $0x764] ss:$16 sps:$4 sm:$0xff]   ;;  %v3057_v6 = vld [vmem:[%s4089_s1 + $0x76c] ss:$16 sps:$4 sm:$0xff]   ;;  %v3052_v7 = vld [vmem:[%s4089_s1 + $0x760] ss:$16 sps:$4 sm:$0xff]  }
  0xd4   :  { %1772 = vmatprep.subr.bf16.mxu0 %v3018_v45  ;;  %1936 = vmatprep.subr.bf16.mxu1 %v3021_v46  ;;  %v3055_v8 = vld [vmem:[%s4089_s1 + $0x768] ss:$16 sps:$4 sm:$0xff]   ;;  %v3060_v9 = vld [vmem:[%s4089_s1 + $0x784] ss:$16 sps:$4 sm:$0xff]   ;;  %v3063_v10 = vld [vmem:[%s4089_s1 + $0x78c] ss:$16 sps:$4 sm:$0xff]  }
  0xd5   :  { %v3058_v11 = vld [vmem:[%s4089_s1 + $0x780] ss:$16 sps:$4 sm:$0xff]   ;;  %v3061_v12 = vld [vmem:[%s4089_s1 + $0x788] ss:$16 sps:$4 sm:$0xff]   ;;  %v3066_v13 = vld [vmem:[%s4089_s1 + $0x7a4] ss:$16 sps:$4 sm:$0xff]  }
  0xd6   :  { %v3069_v14 = vld [vmem:[%s4089_s1 + $0x7ac] ss:$16 sps:$4 sm:$0xff]   ;;  %v3064_v16 = vld [vmem:[%s4089_s1 + $0x7a0] ss:$16 sps:$4 sm:$0xff]   ;;  %v3067_v17 = vld [vmem:[%s4089_s1 + $0x7a8] ss:$16 sps:$4 sm:$0xff]  }
  0xd7   :  { %1773 = vmatpush1.bf16.msra.mxu0 %v3016_v47  ;;  %1937 = vmatpush1.bf16.msra.mxu1 %v3019_v48  ;;  %v3072_v18 = vld [vmem:[%s4089_s1 + $0x7c4] ss:$16 sps:$4 sm:$0xff]   ;;  %v3075_v19 = vld [vmem:[%s4089_s1 + $0x7cc] ss:$16 sps:$4 sm:$0xff]   ;;  %v3070_v22 = vld [vmem:[%s4089_s1 + $0x7c0] ss:$16 sps:$4 sm:$0xff]  }
  0xd8   :  { %1774 = vmatprep.subr.bf16.mxu0 %v3024_v49  ;;  %1938 = vmatprep.subr.bf16.mxu1 %v3027_v50  ;;  %v3073_v23 = vld [vmem:[%s4089_s1 + $0x7c8] ss:$16 sps:$4 sm:$0xff]   ;;  %v3078_v24 = vld [vmem:[%s4089_s1 + $0x7e4] ss:$16 sps:$4 sm:$0xff]   ;;  %v3081_v25 = vld [vmem:[%s4089_s1 + $0x7ec] ss:$16 sps:$4 sm:$0xff]  }
  0xd9   :  { %v3076_v26 = vld [vmem:[%s4089_s1 + $0x7e0] ss:$16 sps:$4 sm:$0xff]   ;;  %v3079_v27 = vld [vmem:[%s4089_s1 + $0x7e8] ss:$16 sps:$4 sm:$0xff]   ;;  %s3139_s26 = smov [#allocation2]  }
  0xda   :  { %v3082_v15 = vld [vmem:[%s4091_s3 + $0x40] sm:$0xff]   ;;  %v3086_v32 = vld [vmem:[%s4091_s3 + $0x48] sm:$0xff]   ;;  %v3090_v20 = vld [vmem:[%s4091_s3 + $0x50] sm:$0xff]   ;;  %s2326_s27 = sshll.u32 %s3139_s26, 4  ;;  %s2327_s27 = int_to_ptr.vmem [resolvable:$true] %s2326_s27 }
  0xdb   :  { %1775 = vmatpush1.bf16.msra.mxu0 %v3022_v51  ;;  %1939 = vmatpush1.bf16.msra.mxu1 %v3025_v52  ;;  %v3083_v28 = vld [vmem:[%s4091_s3 + $0xc0] sm:$0xff]   ;;  %v3087_v21 = vld [vmem:[%s4091_s3 + $0xc8] sm:$0xff]   ;;  %v3091_v35 = vld [vmem:[%s4091_s3 + $0xd0] sm:$0xff]   ;;  %s3114_s28 = scalar_lea.vmem %s2327_s27, 32  ;;  %p3119_p1 = scmp.lt.s32.totalorder %s2327_s27, %s2327_s27 }
  0xdc   :  { %1776 = vmatprep.subr.bf16.mxu0 %v3030_v53  ;;  %1940 = vmatprep.subr.bf16.mxu1 %v3033_v54  ;;  %v3084_v30 = vld [vmem:[%s4091_s3] sm:$0xff]   ;;  %v3088_v33 = vld [vmem:[%s4091_s3 + $0x8] sm:$0xff]   ;;  %v3092_v36 = vld [vmem:[%s4091_s3 + $0x10] sm:$0xff]   ;;  %p3115_p0 = scmp.ne.s32.totalorder %s2327_s27, %s3114_s28  ;;  %p3120_p2 = scmp.lt.s32.totalorder %s3114_s28, %s3114_s28 }
  0xdd   :  { %v3085_v31 = vld [vmem:[%s4091_s3 + $0x80] sm:$0xff]   ;;  %v3089_v34 = vld [vmem:[%s4091_s3 + $0x88] sm:$0xff]   ;;  %v3093_v37 = vld [vmem:[%s4091_s3 + $0x90] sm:$0xff]  }
  0xde   :  { %v3094_v38 = vld [vmem:[%s4091_s3 + $0x58] sm:$0xff]   ;;  %v3098_v43 = vld [vmem:[%s4091_s3 + $0x60] sm:$0xff]   ;;  %v3102_v47 = vld [vmem:[%s4091_s3 + $0x68] sm:$0xff]   ;;  %p3121_p3 = por %p3120_p2, %p3119_p1 }
  0xdf   :  { %1777 = vmatpush1.bf16.msra.mxu0 %v3028_v55  ;;  %1941 = vmatpush1.bf16.msra.mxu1 %v3031_v56  ;;  %v3095_v39 = vld [vmem:[%s4091_s3 + $0xd8] sm:$0xff]   ;;  %v3099_v44 = vld [vmem:[%s4091_s3 + $0xe0] sm:$0xff]   ;;  %v3103_v48 = vld [vmem:[%s4091_s3 + $0xe8] sm:$0xff]  }
  0xe0   :  { %1778 = vmatprep.subr.bf16.mxu0 %v3036_v57  ;;  %1942 = vmatprep.subr.bf16.mxu1 %v3039_v58  ;;  %v3096_v40 = vld [vmem:[%s4091_s3 + $0x18] sm:$0xff]   ;;  %v3100_v45 = vld [vmem:[%s4091_s3 + $0x20] sm:$0xff]   ;;  %v3104_v49 = vld [vmem:[%s4091_s3 + $0x28] sm:$0xff]   ;;  %p3122_p4 = pnand %p3121_p3, %p3115_p0 }
  0xe1   :  { %v3097_v41 = vld [vmem:[%s4091_s3 + $0x98] sm:$0xff]   ;;  %v3101_v46 = vld [vmem:[%s4091_s3 + $0xa0] sm:$0xff]   ;;  %v3105_v50 = vld [vmem:[%s4091_s3 + $0xa8] sm:$0xff]  }
  0xe2   :  { %v3106_v51 = vld [vmem:[%s4091_s3 + $0x70] sm:$0xff]   ;;  %v3110_v55 = vld [vmem:[%s4091_s3 + $0x78] sm:$0xff]  }
  0xe3   :  { %1779 = vmatpush1.bf16.msra.mxu0 %v3034_v59  ;;  %1943 = vmatpush1.bf16.msra.mxu1 %v3037_v60  ;;  %v3107_v52 = vld [vmem:[%s4091_s3 + $0xf0] sm:$0xff]   ;;  %v3111_v56 = vld [vmem:[%s4091_s3 + $0xf8] sm:$0xff]   ;;  %v283_v59 = vsub.s32 0, %v3287_v42  ;;  %v291_v60 = vsub.s32 2, %v3287_v42 }
  0xe4   :  { %1780 = vmatprep.subr.bf16.mxu0 %v3042_v61  ;;  %1944 = vmatprep.subr.bf16.mxu1 %v3045_v62  ;;  %v3108_v53 = vld [vmem:[%s4091_s3 + $0x30] sm:$0xff]   ;;  %v3112_v57 = vld [vmem:[%s4091_s3 + $0x38] sm:$0xff]   ;;  %v279_v61 = vld [vmem:[%s4090_s2] sm:$0xf]  ;;  %v287_v62 = vsub.s32 1, %v3287_v42 }
  0xe5   :  { %v3109_v54 = vld [vmem:[%s4091_s3 + $0xb0] sm:$0xff]   ;;  %v3113_v58 = vld [vmem:[%s4091_s3 + $0xb8] sm:$0xff]  }
  0xe7   :  { %1781 = vmatpush1.bf16.msra.mxu0 %v3040_v63  ;;  %1945 = vmatpush1.bf16.msra.mxu1 %v3043_v0  ;;  %v295_v63 = vsub.s32 3, %v3287_v42  ;;  %v284_v0 = vrot.slane %v279_v61, %v283_v59 }
  0xe8   :  { %1782 = vmatprep.subr.bf16.mxu0 %v3048_v1  ;;  %1946 = vmatprep.subr.bf16.mxu1 %v3051_v2  ;;  %v292_v1 = vrot.slane %v279_v61, %v291_v60  ;;  %v288_v2 = vrot.slane %v279_v61, %v287_v62 }
  0xeb   :  { %1783 = vmatpush1.bf16.msra.mxu0 %v3046_v3  ;;  %1947 = vmatpush1.bf16.msra.mxu1 %v3049_v4  ;;  %v296_v3 = vrot.slane %v279_v61, %v295_v63 }
  0xec   :  { %1784 = vmatprep.subr.bf16.mxu0 %v3054_v5  ;;  %1948 = vmatprep.subr.bf16.mxu1 %v3057_v6 }
  0xef   :  { %1785 = vmatpush1.bf16.msra.mxu0 %v3052_v7  ;;  %1949 = vmatpush1.bf16.msra.mxu1 %v3055_v8 }
  0xf0   :  { %1786 = vmatprep.subr.bf16.mxu0 %v3060_v9  ;;  %1950 = vmatprep.subr.bf16.mxu1 %v3063_v10 }
  0xf3   :  { %1787 = vmatpush1.bf16.msra.mxu0 %v3058_v11  ;;  %1951 = vmatpush1.bf16.msra.mxu1 %v3061_v12 }
  0xf4   :  { %1788 = vmatprep.subr.bf16.mxu0 %v3066_v13  ;;  %1952 = vmatprep.subr.bf16.mxu1 %v3069_v14 }
  0xf7   :  { %1789 = vmatpush1.bf16.msra.mxu0 %v3064_v16  ;;  %1953 = vmatpush1.bf16.msra.mxu1 %v3067_v17 }
  0xf8   :  { %1790 = vmatprep.subr.bf16.mxu0 %v3072_v18  ;;  %1954 = vmatprep.subr.bf16.mxu1 %v3075_v19 }
  0xfb   :  { %1791 = vmatpush1.bf16.msra.mxu0 %v3070_v22  ;;  %1955 = vmatpush1.bf16.msra.mxu1 %v3073_v23 }
  0xfc   :  { %1792 = vmatprep.subr.bf16.mxu0 %v3078_v24  ;;  %1956 = vmatprep.subr.bf16.mxu1 %v3081_v25 }
  0xff   :  { %1793 = vmatpush1.bf16.msra.mxu0 %v3076_v26  ;;  %1957 = vmatpush1.bf16.msra.mxu1 %v3079_v27 }
 0x100   :  { %2623 = vmatprep.subr.bf16.mxu0 %v3082_v15  ;;  %2645 = vmatprep.subr.bf16.mxu1 %v3083_v28  ;;  %v2590_v15 = vld [vmem:[%s4092_s4] ss:$0 sm:$0xff] }
 0x102   :  { %1795 = vmatmul.mubr.bf16.vlgmr.msra.gmra.mrb[0].mxu0 %v348_v29  ;;  %1959 = vmatmul.mubr.bf16.vlgmr.msra.gmra.mrb[0].mxu1 %v348_v29 }
 0x103   :  { %2624 = vmatpush3.bf16.msra.mxu0 %v3084_v30  ;;  %2646 = vmatpush3.bf16.msra.mxu1 %v3085_v31 }
 0x104   :  { %2625 = vmatprep.subr.bf16.mxu0 %v3086_v32  ;;  %2647 = vmatprep.subr.bf16.mxu1 %v3087_v21 }
 0x107   :  { %2626 = vmatpush3.bf16.msra.mxu0 %v3088_v33  ;;  %2648 = vmatpush3.bf16.msra.mxu1 %v3089_v34 }
 0x108   :  { %2627 = vmatprep.subr.bf16.mxu0 %v3090_v20  ;;  %2649 = vmatprep.subr.bf16.mxu1 %v3091_v35 }
 0x10b   :  { %2628 = vmatpush3.bf16.msra.mxu0 %v3092_v36  ;;  %2650 = vmatpush3.bf16.msra.mxu1 %v3093_v37 }
 0x10c   :  { %2629 = vmatprep.subr.bf16.mxu0 %v3094_v38  ;;  %2651 = vmatprep.subr.bf16.mxu1 %v3095_v39 }
 0x10f   :  { %2630 = vmatpush3.bf16.msra.mxu0 %v3096_v40  ;;  %2652 = vmatpush3.bf16.msra.mxu1 %v3097_v41 }
 0x110   :  { %2631 = vmatprep.subr.bf16.mxu0 %v3098_v43  ;;  %2653 = vmatprep.subr.bf16.mxu1 %v3099_v44 }
 0x113   :  { %2632 = vmatpush3.bf16.msra.mxu0 %v3100_v45  ;;  %2654 = vmatpush3.bf16.msra.mxu1 %v3101_v46 }
 0x114   :  { %2633 = vmatprep.subr.bf16.mxu0 %v3102_v47  ;;  %2655 = vmatprep.subr.bf16.mxu1 %v3103_v48 }
 0x117   :  { %2634 = vmatpush3.bf16.msra.mxu0 %v3104_v49  ;;  %2656 = vmatpush3.bf16.msra.mxu1 %v3105_v50 }
 0x118   :  { %2635 = vmatprep.subr.bf16.mxu0 %v3106_v51  ;;  %2657 = vmatprep.subr.bf16.mxu1 %v3107_v52 }
 0x11b   :  { %2636 = vmatpush3.bf16.msra.mxu0 %v3108_v53  ;;  %2658 = vmatpush3.bf16.msra.mxu1 %v3109_v54 }
 0x11c   :  { %2637 = vmatprep.subr.bf16.mxu0 %v3110_v55  ;;  %2659 = vmatprep.subr.bf16.mxu1 %v3111_v56 }
 0x11f   :  { %2638 = vmatpush3.bf16.msra.mxu0 %v3112_v57  ;;  %2660 = vmatpush3.bf16.msra.mxu1 %v3113_v58 }
 0x1d5   :  { %v1796_v4 = vpop.f32.mrb[0].mxu0  ;;  %v1960_v5 = vpop.f32.mrb[0].mxu1 }
 0x1d6   :  { %v2667_v6 = vadd.f32 %v1796_v4, %v284_v0  ;;  %v2669_v7 = vadd.f32 %v1960_v5, %v292_v1  ;;  %v1798_v8 = vpop.f32.mrb[1].mxu0  ;;  %v1962_v9 = vpop.f32.mrb[1].mxu1 }
 0x1d7   :  { %v2668_v10 = vadd.f32 %v1798_v8, %v288_v2  ;;  %v2670_v11 = vadd.f32 %v1962_v9, %v296_v3  ;;  %v1800_v12 = vpop.f32.mrb[2].mxu0  ;;  %v1964_v13 = vpop.f32.mrb[2].mxu1 }
 0x1d8   :  { %v1967_v14 = vmax.f32 %v2667_v6, 0.0  ;;  %v1969_v16 = vmax.f32 %v2669_v7, 0.0  ;;  %v1801_v17 = vpop.f32.mrb[3].mxu0  ;;  %v1965_v18 = vpop.f32.mrb[3].mxu1 }
 0x1d9   :  { %v1968_v19 = vmax.f32 %v2668_v10, 0.0  ;;  %v1970_v42 = vmax.f32 %v2670_v11, 0.0 }
 0x1da   :  { %v1971_v24 = vpack.c.bf16 %v1967_v14, %v1967_v14  ;;  %v1973_v25 = vpack.c.bf16 %v1969_v16, %v1969_v16 }
 0x1db   :  { %v1972_v22 = vpack.c.bf16 %v1968_v19, %v1968_v19  ;;  %v1974_v23 = vpack.c.bf16 %v1970_v42, %v1970_v42 }
 0x1dd   :  { %2270 = vmatprep.mubr.bf16.mxu0 %v1972_v22  ;;  %2310 = vmatprep.mubr.bf16.mxu1 %v1974_v23 }
 0x1de   :  { %2271 = vmatmul.mubr.bf16.vlgmr.msra.gmra.mrb[4].mxu0 %v1971_v24  ;;  %2311 = vmatmul.mubr.bf16.vlgmr.msra.gmra.mrb[4].mxu1 %v1973_v25 }
 0x2b1   :  { %v2639_v26 = vpop.f32.mrb[4].mxu0  ;;  %v2661_v27 = vpop.f32.mrb[4].mxu1 }
 0x2b2   :  { %v2640_v28 = vpop.f32.mrb[5].mxu0  ;;  %v2662_v29 = vpop.f32.mrb[5].mxu1 }
 0x2b3   :  { %v2641_v30 = vadd.f32 %v2640_v28, %v2639_v26  ;;  %v2663_v31 = vadd.f32 %v2662_v29, %v2661_v27  ;;  %v2642_v32 = vpop.f32.mrb[6].mxu0  ;;  %v2664_v21 = vpop.f32.mrb[6].mxu1 }
 0x2b4   :  { %v2643_v33 = vpop.f32.mrb[7].mxu0  ;;  %v2665_v34 = vpop.f32.mrb[7].mxu1 }
 0x2b5   :  { %v2273_v20 = vadd.f32 %v2641_v30, %v2590_v15 }
 0x2b7   :  { %v2313_v35 = vadd.f32 %v2663_v31, %v2273_v20 }
 0x2b9   :  { %v2318_v36 = vmax.f32 %v2313_v35, 0.0 }
 0x2bb   :  { %2319 = vst [vmem:[#allocation2] sm:$0x3] %v2318_v36 }
 0x2bc   :  { %3125 = shalt.err (!%p3122_p4)
}
 0x2bd   :  { %s3126_s30 = scalar_lea.hbm %s4093_s5, 32 }
 0x2be   :  { %p3127_p5 = scmp.ne.s32.totalorder %s4093_s5, %s3126_s30  ;;  %p3130_p6 = scmp.lt.u32.totalorder %s3126_s30, %s4093_s5 }
 0x2c0   :  { %p3132_p7 = pnand %p3130_p6, %p3127_p5 }
 0x2c2   :  { %3135 = shalt.err (!%p3132_p7)
}
 0x2c3   :  { %2329 = dma.vmem_to_hbm [thread:$0]  %s2327_s27, 32, %s4093_s5, [#allocation3]  }
 0x2c4   :  { %3136 = dma.done.wait [#allocation3], 32  }
 0x2c5   :  { %3137 = vsyncadd [#allocation3], 4294967264 }
 0x2c6   :  { %2333 = vsyncpa [#allocation3], 1 }

// kernel: _infer_forward_padded.4
= control target key start
LH: loop header
LB: loop body
LE: loop exit
PB: predicated region body
PF: predicated region fallthrough
CT: control target
= control target key end

     0   :  { %9 = vsyncpa [#allocation3], 0  ;;  %s7249_s0 = inlined_call_operand.vmem [shape: bf16[2,6,384], index: 0, kind: input, shape index: {}]   ;;  %s7250_s1 = inlined_call_operand.vmem [shape: bf16[2,6,384], index: 1, kind: input, shape index: {}]   ;;  %s7251_s2 = inlined_call_operand.hbm [shape: bf16[5,384,512], index: 2, kind: input, shape index: {}]   ;;  %s7252_s3 = inlined_call_operand.hbm [shape: f32[1,256], index: 3, kind: input, shape index: {}]   ;;  %s7253_s4 = inlined_call_operand.vmem [shape: bf16[2,4,256], index: 4, kind: output, shape index: {}]  }
   0x1   :  { %10 = vsyncpa [#allocation5], 0  ;;  %s6998_s15 = smov 0  }
   0x2 LB: > { %s7004_s16 = sadd.s32 4294967295, %s6966_s15   ;;  %p5008_p0 = scmp.ge.s32.totalorder %s6966_s15, 1  ;;  %s6966_s15 = sphi %s6998_s15, %s16_s15  }
   0x3   : > { %p141_p1 = scmp.lt.s32.totalorder %s6966_s15, 3  ;;  %s6968_s17 = smov [#allocation2]  }
   0x4   : > { %s153_s18 = sshll.u32 %s6968_s17, 4  ;;  %p7254_p3 = scmp.eq.s32.totalorder %s7004_s16, 0  ;;  %s154_s18 = int_to_ptr.vmem [resolvable:$true] %s153_s18 }
   0x5   : > { %p7008_p2 = pnand %p5008_p0, %p141_p1  ;;  %s6969_s20 = smov [#allocation4]  }
   0x6   : > { %s167_s21 = sshll.u32 %s6969_s20, 4  ;;  %s6896_s25 = scalar_lea.hbm %s7251_s2, 61440  ;;  %s7021_s21 = int_to_ptr.vmem [resolvable:$true] %s167_s21 }
   0x7   : > { %s7256_s19 = scalar_select %p7008_p2, 1, 0 }
   0x8   : > { %p5663_p4 = pneg %p7008_p2  ;;  %p6897_p6 = scmp.ne.s32.totalorder %s7251_s2, %s6896_s25 }
   0x9   : > { %p6903_p10 = scmp.lt.u32.totalorder %s6896_s25, %s7251_s2 }
   0xa   : > { %p7017_p5 = pnand %p7254_p3, %p5663_p4 }
   0xc   : > { %p6898_p7 = pneg %p7017_p5 }
   0xe   : > { %p6899_p8 = pnand %p6898_p7, %p6897_p6 }
  0x10   : > { %p6900_p9 = pneg %p6899_p8 }
  0x12   : > { %p6905_p11 = pnand %p6903_p10, %p6900_p9 }
  0x14   : > { %6908 = shalt.err (!%p6905_p11)
}
  0x15   : > { %s6909_s30 = scalar_lea.vmem %s154_s18, 61440  ;;  %p6917_p1 = scmp.lt.s32.totalorder %s154_s18, %s154_s18 }
  0x16   : > { %p6910_p12 = scmp.ne.s32.totalorder %s154_s18, %s6909_s30  ;;  %p6918_p4 = scmp.lt.s32.totalorder %s6909_s30, %s6909_s30 }
  0x18   : > { %p6912_p13 = pnand %p6910_p12, %p6898_p7  ;;  %p6919_p3 = por %p6918_p4, %p6917_p1 }
  0x1a   : > { %p6913_p0 = pneg %p6912_p13 }
  0x1c   : > { %p6920_p2 = pnand %p6919_p3, %p6913_p0 }
  0x1e   : > { %6923 = shalt.err (!%p6920_p2)
}
  0x1f   : > { %s6970_s5 = smov 256   ;;  %s6971_s6 = smov 16  }
  0x20   : > { %5666 = dma.hbm_to_vmem [thread:$0]  (!%p7017_p5), %s7251_s2, 61440, %s154_s18, [#allocation3], %s6970_s5, %s6970_s5, %s6971_s6  }
  0x21   : > { %s6924_s11 = scalar_lea.hbm %s7252_s3, 32 }
  0x22   : > { %p6925_p6 = scmp.ne.s32.totalorder %s7252_s3, %s6924_s11  ;;  %p6931_p8 = scmp.lt.u32.totalorder %s6924_s11, %s7252_s3 }
  0x24   : > { %p6927_p2 = pnand %p6925_p6, %p6898_p7 }
  0x26   : > { %p6928_p3 = pneg %p6927_p2 }
  0x28   : > { %p6933_p9 = pnand %p6931_p8, %p6928_p3 }
  0x2a   : > { %6936 = shalt.err (!%p6933_p9)
}
  0x2b   : > { %s6937_s18 = scalar_lea.vmem %s7021_s21, 32  ;;  %p6945_p13 = scmp.lt.s32.totalorder %s7021_s21, %s7021_s21 }
  0x2c   : > { %p6938_p10 = scmp.ne.s32.totalorder %s7021_s21, %s6937_s18  ;;  %p6946_p0 = scmp.lt.s32.totalorder %s6937_s18, %s6937_s18 }
  0x2e   : > { %p6940_p11 = pnand %p6938_p10, %p6898_p7  ;;  %p6947_p1 = por %p6946_p0, %p6945_p13 }
  0x30   : > { %p6941_p12 = pneg %p6940_p11 }
  0x32   : > { %p6948_p4 = pnand %p6947_p1, %p6941_p12 }
  0x34   : > { %6951 = shalt.err (!%p6948_p4)
}
  0x35   : > { %5669 = dma.hbm_to_vmem [thread:$0]  (!%p7017_p5), %s7252_s3, 32, %s7021_s21, [#allocation5]  }
  0x36   : > { %p7258_p6 = scmp.ne.s32.totalorder %s7256_s19, 0 }
  0x37   : > { %p7259_p2 = scmp.eq.s32.totalorder (!%p7258_p6), %s7004_s16, 0 }
  0x38   : > { %196 = sbr.rel (%p7258_p6) target bundleno = 1252 (0x4e4), region = 36 }
  0x3f   : > { %6957 = dma.done.wait (%p7259_p2), [#allocation3], 61440   ;;  %p7260_p7 = pmov %p7259_p2 }
  0x40   : > { %p7261_p3 = pmov %p7259_p2 }
  0x41   : > { %6959 = vsyncadd (%p7260_p7), [#allocation3], 4294905856 }
  0x42   : > { %6961 = dma.done.wait (%p7261_p3), [#allocation5], 32   ;;  %p7262_p8 = pmov %p7259_p2 }
  0x43   : > { %v5687_v0 = vld [vmem:[#allocation2 + $0x304] ss:$16 sps:$4 sm:$0xff]   ;;  %v5689_v1 = vld [vmem:[#allocation2 + $0x30c] ss:$16 sps:$4 sm:$0xff]   ;;  %v5691_v2 = vld [vmem:[#allocation2 + $0x300] ss:$16 sps:$4 sm:$0xff]  }
  0x44   : > { %6963 = vsyncadd (%p7262_p8), [#allocation5], 4294967264  ;;  %935 = vmatprep.subr.bf16.mxu0 %v5687_v0  ;;  %v5692_v3 = vld [vmem:[#allocation2 + $0x308] ss:$16 sps:$4 sm:$0xff]   ;;  %1017 = vmatprep.subr.bf16.mxu1 %v5689_v1  ;;  %v5693_v4 = vld [vmem:[#allocation2 + $0x324] ss:$16 sps:$4 sm:$0xff]  }
  0x45   : > { %936 = vmatpush1.bf16.msra.mxu0 %v5691_v2  ;;  %1018 = vmatpush1.bf16.msra.mxu1 %v5692_v3  ;;  %v5695_v5 = vld [vmem:[#allocation2 + $0x32c] ss:$16 sps:$4 sm:$0xff]   ;;  %v5697_v6 = vld [vmem:[#allocation2 + $0x320] ss:$16 sps:$4 sm:$0xff]   ;;  %v5698_v7 = vld [vmem:[#allocation2 + $0x328] ss:$16 sps:$4 sm:$0xff]  }
  0x46   : > { %937 = vmatprep.subr.bf16.mxu0 %v5693_v4  ;;  %1019 = vmatprep.subr.bf16.mxu1 %v5695_v5  ;;  %v5699_v8 = vld [vmem:[#allocation2 + $0x344] ss:$16 sps:$4 sm:$0xff]   ;;  %v5701_v9 = vld [vmem:[#allocation2 + $0x34c] ss:$16 sps:$4 sm:$0xff]   ;;  %v5703_v10 = vld [vmem:[#allocation2 + $0x340] ss:$16 sps:$4 sm:$0xff]  }
  0x47   : > { %v5704_v11 = vld [vmem:[#allocation2 + $0x348] ss:$16 sps:$4 sm:$0xff]   ;;  %v5705_v12 = vld [vmem:[#allocation2 + $0x364] ss:$16 sps:$4 sm:$0xff]   ;;  %v5707_v13 = vld [vmem:[#allocation2 + $0x36c] ss:$16 sps:$4 sm:$0xff]  }
  0x48   : > { %v5709_v14 = vld [vmem:[#allocation2 + $0x360] ss:$16 sps:$4 sm:$0xff]   ;;  %v5710_v15 = vld [vmem:[#allocation2 + $0x368] ss:$16 sps:$4 sm:$0xff]   ;;  %v5711_v16 = vld [vmem:[#allocation2 + $0x384] ss:$16 sps:$4 sm:$0xff]  }
  0x49   : > { %938 = vmatpush1.bf16.msra.mxu0 %v5697_v6  ;;  %1020 = vmatpush1.bf16.msra.mxu1 %v5698_v7  ;;  %v5713_v17 = vld [vmem:[#allocation2 + $0x38c] ss:$16 sps:$4 sm:$0xff]   ;;  %v5715_v18 = vld [vmem:[#allocation2 + $0x380] ss:$16 sps:$4 sm:$0xff]   ;;  %v5716_v19 = vld [vmem:[#allocation2 + $0x388] ss:$16 sps:$4 sm:$0xff]  }
  0x4a   : > { %939 = vmatprep.subr.bf16.mxu0 %v5699_v8  ;;  %1021 = vmatprep.subr.bf16.mxu1 %v5701_v9  ;;  %v5717_v20 = vld [vmem:[#allocation2 + $0x3a4] ss:$16 sps:$4 sm:$0xff]   ;;  %v5719_v21 = vld [vmem:[#allocation2 + $0x3ac] ss:$16 sps:$4 sm:$0xff]   ;;  %v5721_v22 = vld [vmem:[#allocation2 + $0x3a0] ss:$16 sps:$4 sm:$0xff]  }
  0x4b   : > { %v5722_v23 = vld [vmem:[#allocation2 + $0x3a8] ss:$16 sps:$4 sm:$0xff]   ;;  %v5723_v24 = vld [vmem:[#allocation2 + $0x3c4] ss:$16 sps:$4 sm:$0xff]   ;;  %v5725_v25 = vld [vmem:[#allocation2 + $0x3cc] ss:$16 sps:$4 sm:$0xff]  }
  0x4c   : > { %v5727_v26 = vld [vmem:[#allocation2 + $0x3c0] ss:$16 sps:$4 sm:$0xff]   ;;  %v5728_v27 = vld [vmem:[#allocation2 + $0x3c8] ss:$16 sps:$4 sm:$0xff]   ;;  %v5729_v28 = vld [vmem:[#allocation2 + $0x3e4] ss:$16 sps:$4 sm:$0xff]  }
  0x4d   : > { %940 = vmatpush1.bf16.msra.mxu0 %v5703_v10  ;;  %1022 = vmatpush1.bf16.msra.mxu1 %v5704_v11  ;;  %v5731_v29 = vld [vmem:[#allocation2 + $0x3ec] ss:$16 sps:$4 sm:$0xff]   ;;  %v5733_v30 = vld [vmem:[#allocation2 + $0x3e0] ss:$16 sps:$4 sm:$0xff]   ;;  %p231_p5 = scmp.lt.s32.totalorder %s7004_s16, 1 }
  0x4e   : > { %941 = vmatprep.subr.bf16.mxu0 %v5705_v12  ;;  %1023 = vmatprep.subr.bf16.mxu1 %v5707_v13  ;;  %v5734_v31 = vld [vmem:[#allocation2 + $0x3e8] ss:$16 sps:$4 sm:$0xff]   ;;  %v5735_v32 = vld [vmem:[#allocation2 + $0x404] ss:$16 sps:$4 sm:$0xff]   ;;  %v5737_v33 = vld [vmem:[#allocation2 + $0x40c] ss:$16 sps:$4 sm:$0xff]  }
  0x4f   : > { %v5739_v34 = vld [vmem:[#allocation2 + $0x400] ss:$16 sps:$4 sm:$0xff]   ;;  %v5740_v35 = vld [vmem:[#allocation2 + $0x408] ss:$16 sps:$4 sm:$0xff]   ;;  %s7264_s16 = smov (!%p231_p5, %s7004_s16), 1  ;;  %v6972_v13 = vmov 0  }
  0x50   : > { %v5741_v36 = vld [vmem:[#allocation2 + $0x424] ss:$16 sps:$4 sm:$0xff]   ;;  %v5743_v37 = vld [vmem:[#allocation2 + $0x42c] ss:$16 sps:$4 sm:$0xff]   ;;  %v5745_v38 = vld [vmem:[#allocation2 + $0x420] ss:$16 sps:$4 sm:$0xff]  }
  0x51   : > { %942 = vmatpush1.bf16.msra.mxu0 %v5709_v14  ;;  %1024 = vmatpush1.bf16.msra.mxu1 %v5710_v15  ;;  %s5654_s19 = smul.u32 12, %s7264_s16  ;;  %v5746_v39 = vld [vmem:[#allocation2 + $0x428] ss:$16 sps:$4 sm:$0xff]   ;;  %v5747_v40 = vld [vmem:[#allocation2 + $0x444] ss:$16 sps:$4 sm:$0xff]   ;;  %s5509_s28 = sshll.u32 %s7264_s16, 2 }
  0x52   : > { %943 = vmatprep.subr.bf16.mxu0 %v5711_v16  ;;  %1025 = vmatprep.subr.bf16.mxu1 %v5713_v17  ;;  %v5749_v41 = vld [vmem:[#allocation2 + $0x44c] ss:$16 sps:$4 sm:$0xff]   ;;  %v5751_v42 = vld [vmem:[#allocation2 + $0x440] ss:$16 sps:$4 sm:$0xff]   ;;  %v5752_v43 = vld [vmem:[#allocation2 + $0x448] ss:$16 sps:$4 sm:$0xff]   ;;  %s245_s5 = scalar_lea.vmem %s7253_s4, %s5509_s28 }
  0x53   : > { %s7090_s24 = scalar_lea.vmem %s7250_s1, %s5654_s19  ;;  %v5753_v44 = vld [vmem:[#allocation2 + $0x464] ss:$16 sps:$4 sm:$0xff]   ;;  %v5755_v45 = vld [vmem:[#allocation2 + $0x46c] ss:$16 sps:$4 sm:$0xff]   ;;  %v5757_v47 = vld [vmem:[#allocation2 + $0x460] ss:$16 sps:$4 sm:$0xff]   ;;  %s7109_s27 = scalar_lea.vmem %s7249_s0, %s5654_s19 }
  0x54   : > { %v249_v46 = vld [vmem:[%s7090_s24] sm:$0x77]  ;;  %v5758_v49 = vld [vmem:[#allocation2 + $0x468] ss:$16 sps:$4 sm:$0xff]   ;;  %v5761_v51 = vld [vmem:[#allocation2 + $0x48c] ss:$16 sps:$4 sm:$0xff]  }
  0x55   : > { %944 = vmatpush1.bf16.msra.mxu0 %v5715_v18  ;;  %1026 = vmatpush1.bf16.msra.mxu1 %v5716_v19  ;;  %v7093_v48 = vcombine.high %v249_v46, %v249_v46  ;;  %v5759_v50 = vld [vmem:[#allocation2 + $0x484] ss:$16 sps:$4 sm:$0xff]   ;;  %v5763_v52 = vld [vmem:[#allocation2 + $0x480] ss:$16 sps:$4 sm:$0xff]   ;;  %v5764_v53 = vld [vmem:[#allocation2 + $0x488] ss:$16 sps:$4 sm:$0xff]   ;;  %v7097_v5 = vcombine.low %v249_v46, %v249_v46 }
  0x56   : > { %945 = vmatprep.subr.bf16.mxu0 %v5717_v20  ;;  %1027 = vmatprep.subr.bf16.mxu1 %v5719_v21  ;;  %v5765_v54 = vld [vmem:[#allocation2 + $0x4a4] ss:$16 sps:$4 sm:$0xff]   ;;  %v5767_v55 = vld [vmem:[#allocation2 + $0x4ac] ss:$16 sps:$4 sm:$0xff]   ;;  %v5769_v56 = vld [vmem:[#allocation2 + $0x4a0] ss:$16 sps:$4 sm:$0xff]  }
  0x57   : > { %967 = vmatprep.mubr.bf16.mxu0 %v7093_v48  ;;  %1049 = vmatprep.mubr.bf16.mxu1 %v7093_v48  ;;  %v5770_v57 = vld [vmem:[#allocation2 + $0x4a8] ss:$16 sps:$4 sm:$0xff]   ;;  %v5771_v58 = vld [vmem:[#allocation2 + $0x4c4] ss:$16 sps:$4 sm:$0xff]   ;;  %v5773_v59 = vld [vmem:[#allocation2 + $0x4cc] ss:$16 sps:$4 sm:$0xff]  }
  0x58   : > { %v5775_v60 = vld [vmem:[#allocation2 + $0x4c0] ss:$16 sps:$4 sm:$0xff]   ;;  %v5776_v61 = vld [vmem:[#allocation2 + $0x4c8] ss:$16 sps:$4 sm:$0xff]   ;;  %v5777_v62 = vld [vmem:[#allocation2 + $0x4e4] ss:$16 sps:$4 sm:$0xff]  }
  0x59   : > { %946 = vmatpush1.bf16.msra.mxu0 %v5721_v22  ;;  %1028 = vmatpush1.bf16.msra.mxu1 %v5722_v23  ;;  %v5779_v63 = vld [vmem:[#allocation2 + $0x4ec] ss:$16 sps:$4 sm:$0xff]   ;;  %v5781_v0 = vld [vmem:[#allocation2 + $0x4e0] ss:$16 sps:$4 sm:$0xff]   ;;  %v5782_v1 = vld [vmem:[#allocation2 + $0x4e8] ss:$16 sps:$4 sm:$0xff]  }
  0x5a   : > { %947 = vmatprep.subr.bf16.mxu0 %v5723_v24  ;;  %1029 = vmatprep.subr.bf16.mxu1 %v5725_v25  ;;  %v5786_v2 = vld [vmem:[#allocation2 + $0x504] ss:$16 sps:$4 sm:$0xff]   ;;  %v5789_v3 = vld [vmem:[#allocation2 + $0x50c] ss:$16 sps:$4 sm:$0xff]   ;;  %v5784_v4 = vld [vmem:[#allocation2 + $0x500] ss:$16 sps:$4 sm:$0xff]  }
  0x5b   : > { %v5787_v6 = vld [vmem:[#allocation2 + $0x508] ss:$16 sps:$4 sm:$0xff]   ;;  %v5793_v7 = vld [vmem:[#allocation2 + $0x524] ss:$16 sps:$4 sm:$0xff]   ;;  %v5796_v8 = vld [vmem:[#allocation2 + $0x52c] ss:$16 sps:$4 sm:$0xff]  }
  0x5c   : > { %v5791_v9 = vld [vmem:[#allocation2 + $0x520] ss:$16 sps:$4 sm:$0xff]   ;;  %v5794_v10 = vld [vmem:[#allocation2 + $0x528] ss:$16 sps:$4 sm:$0xff]   ;;  %v5799_v11 = vld [vmem:[#allocation2 + $0x544] ss:$16 sps:$4 sm:$0xff]  }
  0x5d   : > { %948 = vmatpush1.bf16.msra.mxu0 %v5727_v26  ;;  %1030 = vmatpush1.bf16.msra.mxu1 %v5728_v27  ;;  %v5802_v12 = vld [vmem:[#allocation2 + $0x54c] ss:$16 sps:$4 sm:$0xff]   ;;  %v5797_v14 = vld [vmem:[#allocation2 + $0x540] ss:$16 sps:$4 sm:$0xff]   ;;  %v5800_v15 = vld [vmem:[#allocation2 + $0x548] ss:$16 sps:$4 sm:$0xff]  }
  0x5e   : > { %949 = vmatprep.subr.bf16.mxu0 %v5729_v28  ;;  %1031 = vmatprep.subr.bf16.mxu1 %v5731_v29  ;;  %v5805_v16 = vld [vmem:[#allocation2 + $0x564] ss:$16 sps:$4 sm:$0xff]   ;;  %v5808_v17 = vld [vmem:[#allocation2 + $0x56c] ss:$16 sps:$4 sm:$0xff]   ;;  %v5803_v18 = vld [vmem:[#allocation2 + $0x560] ss:$16 sps:$4 sm:$0xff]  }
  0x5f   : > { %v5806_v19 = vld [vmem:[#allocation2 + $0x568] ss:$16 sps:$4 sm:$0xff]   ;;  %v5811_v20 = vld [vmem:[#allocation2 + $0x584] ss:$16 sps:$4 sm:$0xff]   ;;  %v5814_v21 = vld [vmem:[#allocation2 + $0x58c] ss:$16 sps:$4 sm:$0xff]  }
  0x60   : > { %v5809_v22 = vld [vmem:[#allocation2 + $0x580] ss:$16 sps:$4 sm:$0xff]   ;;  %v5812_v23 = vld [vmem:[#allocation2 + $0x588] ss:$16 sps:$4 sm:$0xff]   ;;  %v5817_v24 = vld [vmem:[#allocation2 + $0x5a4] ss:$16 sps:$4 sm:$0xff]  }
  0x61   : > { %950 = vmatpush1.bf16.msra.mxu0 %v5733_v30  ;;  %1032 = vmatpush1.bf16.msra.mxu1 %v5734_v31  ;;  %v5820_v25 = vld [vmem:[#allocation2 + $0x5ac] ss:$16 sps:$4 sm:$0xff]   ;;  %v5815_v26 = vld [vmem:[#allocation2 + $0x5a0] ss:$16 sps:$4 sm:$0xff]   ;;  %v5818_v27 = vld [vmem:[#allocation2 + $0x5a8] ss:$16 sps:$4 sm:$0xff]  }
  0x62   : > { %951 = vmatprep.subr.bf16.mxu0 %v5735_v32  ;;  %1033 = vmatprep.subr.bf16.mxu1 %v5737_v33  ;;  %v5823_v28 = vld [vmem:[#allocation2 + $0x5c4] ss:$16 sps:$4 sm:$0xff]   ;;  %v5826_v29 = vld [vmem:[#allocation2 + $0x5cc] ss:$16 sps:$4 sm:$0xff]   ;;  %v5821_v30 = vld [vmem:[#allocation2 + $0x5c0] ss:$16 sps:$4 sm:$0xff]  }
  0x63   : > { %v5824_v31 = vld [vmem:[#allocation2 + $0x5c8] ss:$16 sps:$4 sm:$0xff]   ;;  %v5829_v32 = vld [vmem:[#allocation2 + $0x5e4] ss:$16 sps:$4 sm:$0xff]   ;;  %v5832_v33 = vld [vmem:[#allocation2 + $0x5ec] ss:$16 sps:$4 sm:$0xff]  }
  0x64   : > { %v5851_v46 = vld [vmem:[#allocation2 + $0x4c] ss:$16 sps:$4 sm:$0xff]  }
  0x65   : > { %952 = vmatpush1.bf16.msra.mxu0 %v5739_v34  ;;  %1034 = vmatpush1.bf16.msra.mxu1 %v5740_v35  ;;  %v5827_v34 = vld [vmem:[#allocation2 + $0x5e0] ss:$16 sps:$4 sm:$0xff]   ;;  %v5830_v35 = vld [vmem:[#allocation2 + $0x5e8] ss:$16 sps:$4 sm:$0xff]  }
  0x66   : > { %953 = vmatprep.subr.bf16.mxu0 %v5741_v36  ;;  %1035 = vmatprep.subr.bf16.mxu1 %v5743_v37  ;;  %v5835_v36 = vld [vmem:[#allocation2 + $0x4] ss:$16 sps:$4 sm:$0xff]   ;;  %v5838_v37 = vld [vmem:[#allocation2 + $0xc] ss:$16 sps:$4 sm:$0xff]  }
  0x69   : > { %954 = vmatpush1.bf16.msra.mxu0 %v5745_v38  ;;  %1036 = vmatpush1.bf16.msra.mxu1 %v5746_v39  ;;  %v5833_v38 = vld [vmem:[#allocation2] ss:$16 sps:$4 sm:$0xff]   ;;  %v5839_v39 = vld [vmem:[%s7090_s24 + $0x8] ss:$0 sps:$4 sm:$0x77]  }
  0x6a   : > { %955 = vmatprep.subr.bf16.mxu0 %v5747_v40  ;;  %1037 = vmatprep.subr.bf16.mxu1 %v5749_v41  ;;  %v5836_v40 = vld [vmem:[#allocation2 + $0x8] ss:$16 sps:$4 sm:$0xff]   ;;  %v5842_v41 = vld [vmem:[#allocation2 + $0x24] ss:$16 sps:$4 sm:$0xff]  }
  0x6d   : > { %956 = vmatpush1.bf16.msra.mxu0 %v5751_v42  ;;  %1038 = vmatpush1.bf16.msra.mxu1 %v5752_v43  ;;  %v5845_v42 = vld [vmem:[#allocation2 + $0x2c] ss:$16 sps:$4 sm:$0xff]   ;;  %v5840_v43 = vld [vmem:[#allocation2 + $0x20] ss:$16 sps:$4 sm:$0xff]  }
  0x6e   : > { %957 = vmatprep.subr.bf16.mxu0 %v5753_v44  ;;  %1039 = vmatprep.subr.bf16.mxu1 %v5755_v45  ;;  %v5843_v44 = vld [vmem:[#allocation2 + $0x28] ss:$16 sps:$4 sm:$0xff]   ;;  %v5848_v45 = vld [vmem:[#allocation2 + $0x44] ss:$16 sps:$4 sm:$0xff]  }
  0x71   : > { %958 = vmatpush1.bf16.msra.mxu0 %v5757_v47  ;;  %1040 = vmatpush1.bf16.msra.mxu1 %v5758_v49  ;;  %v5846_v47 = vld [vmem:[#allocation2 + $0x40] ss:$16 sps:$4 sm:$0xff]   ;;  %v5849_v49 = vld [vmem:[#allocation2 + $0x48] ss:$16 sps:$4 sm:$0xff]  }
  0x72   : > { %959 = vmatprep.subr.bf16.mxu0 %v5759_v50  ;;  %1041 = vmatprep.subr.bf16.mxu1 %v5761_v51  ;;  %v5854_v50 = vld [vmem:[#allocation2 + $0x64] ss:$16 sps:$4 sm:$0xff]   ;;  %v5857_v51 = vld [vmem:[#allocation2 + $0x6c] ss:$16 sps:$4 sm:$0xff]  }
  0x75   : > { %960 = vmatpush1.bf16.msra.mxu0 %v5763_v52  ;;  %1042 = vmatpush1.bf16.msra.mxu1 %v5764_v53  ;;  %v5852_v52 = vld [vmem:[#allocation2 + $0x60] ss:$16 sps:$4 sm:$0xff]   ;;  %v5855_v53 = vld [vmem:[#allocation2 + $0x68] ss:$16 sps:$4 sm:$0xff]  }
  0x76   : > { %961 = vmatprep.subr.bf16.mxu0 %v5765_v54  ;;  %1043 = vmatprep.subr.bf16.mxu1 %v5767_v55  ;;  %v7112_v54 = vld [vmem:[%s7109_s27] sm:$0x77] }
  0x77   : > { %v5860_v55 = vld [vmem:[#allocation2 + $0x84] ss:$16 sps:$4 sm:$0xff]  }
  0x79   : > { %962 = vmatpush1.bf16.msra.mxu0 %v5769_v56  ;;  %1044 = vmatpush1.bf16.msra.mxu1 %v5770_v57  ;;  %v7116_v56 = vcombine.high %v7112_v54, %v7112_v54  ;;  %v5863_v57 = vld [vmem:[#allocation2 + $0x8c] ss:$16 sps:$4 sm:$0xff]  }
  0x7a   : > { %963 = vmatprep.subr.bf16.mxu0 %v5771_v58  ;;  %1045 = vmatprep.subr.bf16.mxu1 %v5773_v59  ;;  %v5858_v58 = vld [vmem:[#allocation2 + $0x80] ss:$16 sps:$4 sm:$0xff]   ;;  %v5861_v59 = vld [vmem:[#allocation2 + $0x88] ss:$16 sps:$4 sm:$0xff]  }
  0x7d   : > { %964 = vmatpush1.bf16.msra.mxu0 %v5775_v60  ;;  %1046 = vmatpush1.bf16.msra.mxu1 %v5776_v61  ;;  %v5866_v60 = vld [vmem:[#allocation2 + $0xa4] ss:$16 sps:$4 sm:$0xff]   ;;  %v5869_v61 = vld [vmem:[#allocation2 + $0xac] ss:$16 sps:$4 sm:$0xff]  }
  0x7e   : > { %965 = vmatprep.subr.bf16.mxu0 %v5777_v62  ;;  %1047 = vmatprep.subr.bf16.mxu1 %v5779_v63  ;;  %v5864_v62 = vld [vmem:[#allocation2 + $0xa0] ss:$16 sps:$4 sm:$0xff]   ;;  %v5867_v63 = vld [vmem:[#allocation2 + $0xa8] ss:$16 sps:$4 sm:$0xff]  }
  0x81   : > { %966 = vmatpush1.bf16.msra.mxu0 %v5781_v0  ;;  %1048 = vmatpush1.bf16.msra.mxu1 %v5782_v1  ;;  %v5872_v0 = vld [vmem:[#allocation2 + $0xc4] ss:$16 sps:$4 sm:$0xff]   ;;  %v5875_v1 = vld [vmem:[#allocation2 + $0xcc] ss:$16 sps:$4 sm:$0xff]  }
  0x82   : > { %976 = vmatprep.subr.bf16.mxu0 %v5786_v2  ;;  %1058 = vmatprep.subr.bf16.mxu1 %v5789_v3  ;;  %v5870_v2 = vld [vmem:[#allocation2 + $0xc0] ss:$16 sps:$4 sm:$0xff]   ;;  %v5873_v3 = vld [vmem:[#allocation2 + $0xc8] ss:$16 sps:$4 sm:$0xff]  }
  0x84   : > { %968 = vmatmul.mubr.bf16.vlgmr.msra.gmra.mrb[0].mxu0 %v7097_v5  ;;  %1050 = vmatmul.mubr.bf16.vlgmr.msra.gmra.mrb[0].mxu1 %v7097_v5 }
  0x85   : > { %977 = vmatpush1.bf16.msra.mxu0 %v5784_v4  ;;  %1059 = vmatpush1.bf16.msra.mxu1 %v5787_v6  ;;  %v5878_v4 = vld [vmem:[#allocation2 + $0xe4] ss:$16 sps:$4 sm:$0xff]   ;;  %v5881_v6 = vld [vmem:[#allocation2 + $0xec] ss:$16 sps:$4 sm:$0xff]  }
  0x86   : > { %978 = vmatprep.subr.bf16.mxu0 %v5793_v7  ;;  %1060 = vmatprep.subr.bf16.mxu1 %v5796_v8  ;;  %v5876_v7 = vld [vmem:[#allocation2 + $0xe0] ss:$16 sps:$4 sm:$0xff]   ;;  %v5879_v8 = vld [vmem:[#allocation2 + $0xe8] ss:$16 sps:$4 sm:$0xff]  }
  0x87   : > { %1008 = vmatprep.mubr.bf16.mxu0 %v6972_v13  ;;  %1090 = vmatprep.mubr.bf16.mxu1 %v6972_v13 }
  0x89   : > { %979 = vmatpush1.bf16.msra.mxu0 %v5791_v9  ;;  %1061 = vmatpush1.bf16.msra.mxu1 %v5794_v10  ;;  %v5884_v9 = vld [vmem:[#allocation2 + $0x104] ss:$16 sps:$4 sm:$0xff]   ;;  %v5887_v10 = vld [vmem:[#allocation2 + $0x10c] ss:$16 sps:$4 sm:$0xff]  }
  0x8a   : > { %980 = vmatprep.subr.bf16.mxu0 %v5799_v11  ;;  %1062 = vmatprep.subr.bf16.mxu1 %v5802_v12  ;;  %v5882_v11 = vld [vmem:[#allocation2 + $0x100] ss:$16 sps:$4 sm:$0xff]   ;;  %v5885_v12 = vld [vmem:[#allocation2 + $0x108] ss:$16 sps:$4 sm:$0xff]  }
  0x8d   : > { %981 = vmatpush1.bf16.msra.mxu0 %v5797_v14  ;;  %1063 = vmatpush1.bf16.msra.mxu1 %v5800_v15  ;;  %v5890_v14 = vld [vmem:[#allocation2 + $0x124] ss:$16 sps:$4 sm:$0xff]   ;;  %v5893_v15 = vld [vmem:[#allocation2 + $0x12c] ss:$16 sps:$4 sm:$0xff]  }
  0x8e   : > { %982 = vmatprep.subr.bf16.mxu0 %v5805_v16  ;;  %1064 = vmatprep.subr.bf16.mxu1 %v5808_v17  ;;  %v5888_v16 = vld [vmem:[#allocation2 + $0x120] ss:$16 sps:$4 sm:$0xff]   ;;  %v5891_v17 = vld [vmem:[#allocation2 + $0x128] ss:$16 sps:$4 sm:$0xff]  }
  0x91   : > { %983 = vmatpush1.bf16.msra.mxu0 %v5803_v18  ;;  %1065 = vmatpush1.bf16.msra.mxu1 %v5806_v19  ;;  %v5896_v18 = vld [vmem:[#allocation2 + $0x144] ss:$16 sps:$4 sm:$0xff]   ;;  %v5899_v19 = vld [vmem:[#allocation2 + $0x14c] ss:$16 sps:$4 sm:$0xff]  }
  0x92   : > { %984 = vmatprep.subr.bf16.mxu0 %v5811_v20  ;;  %1066 = vmatprep.subr.bf16.mxu1 %v5814_v21  ;;  %v5894_v20 = vld [vmem:[#allocation2 + $0x140] ss:$16 sps:$4 sm:$0xff]   ;;  %v5897_v21 = vld [vmem:[#allocation2 + $0x148] ss:$16 sps:$4 sm:$0xff]  }
  0x95   : > { %985 = vmatpush1.bf16.msra.mxu0 %v5809_v22  ;;  %1067 = vmatpush1.bf16.msra.mxu1 %v5812_v23  ;;  %v5902_v22 = vld [vmem:[#allocation2 + $0x164] ss:$16 sps:$4 sm:$0xff]   ;;  %v5905_v23 = vld [vmem:[#allocation2 + $0x16c] ss:$16 sps:$4 sm:$0xff]  }
  0x96   : > { %986 = vmatprep.subr.bf16.mxu0 %v5817_v24  ;;  %1068 = vmatprep.subr.bf16.mxu1 %v5820_v25  ;;  %v5900_v24 = vld [vmem:[#allocation2 + $0x160] ss:$16 sps:$4 sm:$0xff]   ;;  %v5903_v25 = vld [vmem:[#allocation2 + $0x168] ss:$16 sps:$4 sm:$0xff]  }
  0x99   : > { %987 = vmatpush1.bf16.msra.mxu0 %v5815_v26  ;;  %1069 = vmatpush1.bf16.msra.mxu1 %v5818_v27  ;;  %v5908_v26 = vld [vmem:[#allocation2 + $0x184] ss:$16 sps:$4 sm:$0xff]   ;;  %v5911_v27 = vld [vmem:[#allocation2 + $0x18c] ss:$16 sps:$4 sm:$0xff]  }
  0x9a   : > { %988 = vmatprep.subr.bf16.mxu0 %v5823_v28  ;;  %1070 = vmatprep.subr.bf16.mxu1 %v5826_v29  ;;  %v5906_v28 = vld [vmem:[#allocation2 + $0x180] ss:$16 sps:$4 sm:$0xff]   ;;  %v5909_v29 = vld [vmem:[#allocation2 + $0x188] ss:$16 sps:$4 sm:$0xff]  }
  0x9d   : > { %989 = vmatpush1.bf16.msra.mxu0 %v5821_v30  ;;  %1071 = vmatpush1.bf16.msra.mxu1 %v5824_v31  ;;  %v5914_v30 = vld [vmem:[#allocation2 + $0x1a4] ss:$16 sps:$4 sm:$0xff]   ;;  %v5917_v31 = vld [vmem:[#allocation2 + $0x1ac] ss:$16 sps:$4 sm:$0xff]  }
  0x9e   : > { %990 = vmatprep.subr.bf16.mxu0 %v5829_v32  ;;  %1072 = vmatprep.subr.bf16.mxu1 %v5832_v33  ;;  %v5912_v32 = vld [vmem:[#allocation2 + $0x1a0] ss:$16 sps:$4 sm:$0xff]   ;;  %v5915_v33 = vld [vmem:[#allocation2 + $0x1a8] ss:$16 sps:$4 sm:$0xff]  }
  0xa1   : > { %991 = vmatpush1.bf16.msra.mxu0 %v5827_v34  ;;  %1073 = vmatpush1.bf16.msra.mxu1 %v5830_v35  ;;  %v5920_v34 = vld [vmem:[#allocation2 + $0x1c4] ss:$16 sps:$4 sm:$0xff]   ;;  %v5923_v35 = vld [vmem:[#allocation2 + $0x1cc] ss:$16 sps:$4 sm:$0xff]  }
  0xa2   : > { %1590 = vmatprep.subr.bf16.mxu0 %v5835_v36  ;;  %1672 = vmatprep.subr.bf16.mxu1 %v5838_v37  ;;  %v5918_v36 = vld [vmem:[#allocation2 + $0x1c0] ss:$16 sps:$4 sm:$0xff]   ;;  %v5921_v37 = vld [vmem:[#allocation2 + $0x1c8] ss:$16 sps:$4 sm:$0xff]  }
  0xa4   : > { %1009 = vmatmul.mubr.bf16.vlgmr.msra.gmra.mrb[0].mxu0 %v5839_v39  ;;  %1091 = vmatmul.mubr.bf16.vlgmr.msra.gmra.mrb[0].mxu1 %v5839_v39  ;;  %v5929_v39 = vld [vmem:[#allocation2 + $0x1ec] ss:$16 sps:$4 sm:$0xff]  }
  0xa5   : > { %1591 = vmatpush1.bf16.msra.mxu0 %v5833_v38  ;;  %1673 = vmatpush1.bf16.msra.mxu1 %v5836_v40  ;;  %v5926_v38 = vld [vmem:[#allocation2 + $0x1e4] ss:$16 sps:$4 sm:$0xff]   ;;  %v5924_v40 = vld [vmem:[#allocation2 + $0x1e0] ss:$16 sps:$4 sm:$0xff]  }
  0xa6   : > { %1592 = vmatprep.subr.bf16.mxu0 %v5842_v41  ;;  %1674 = vmatprep.subr.bf16.mxu1 %v5845_v42  ;;  %v5927_v41 = vld [vmem:[#allocation2 + $0x1e8] ss:$16 sps:$4 sm:$0xff]   ;;  %v5933_v42 = vld [vmem:[#allocation2 + $0x204] ss:$16 sps:$4 sm:$0xff]  }
  0xa7   : > { %1622 = vmatprep.mubr.bf16.mxu0 %v7116_v56  ;;  %1704 = vmatprep.mubr.bf16.mxu1 %v7116_v56 }
  0xa9   : > { %1593 = vmatpush1.bf16.msra.mxu0 %v5840_v43  ;;  %1675 = vmatpush1.bf16.msra.mxu1 %v5843_v44  ;;  %v5936_v43 = vld [vmem:[#allocation2 + $0x20c] ss:$16 sps:$4 sm:$0xff]   ;;  %v7122_v44 = vcombine.low %v7112_v54, %v7112_v54  ;;  %v5944_v54 = vld [vmem:[#allocation2 + $0x240] ss:$16 sps:$4 sm:$0xff]  }
  0xaa   : > { %1594 = vmatprep.subr.bf16.mxu0 %v5848_v45  ;;  %1676 = vmatprep.subr.bf16.mxu1 %v5851_v46  ;;  %v5931_v45 = vld [vmem:[#allocation2 + $0x200] ss:$16 sps:$4 sm:$0xff]   ;;  %v5934_v46 = vld [vmem:[#allocation2 + $0x208] ss:$16 sps:$4 sm:$0xff]  }
  0xad   : > { %1595 = vmatpush1.bf16.msra.mxu0 %v5846_v47  ;;  %1677 = vmatpush1.bf16.msra.mxu1 %v5849_v49  ;;  %v5940_v47 = vld [vmem:[#allocation2 + $0x224] ss:$16 sps:$4 sm:$0xff]   ;;  %v5943_v49 = vld [vmem:[#allocation2 + $0x22c] ss:$16 sps:$4 sm:$0xff]  }
  0xae   : > { %1596 = vmatprep.subr.bf16.mxu0 %v5854_v50  ;;  %1678 = vmatprep.subr.bf16.mxu1 %v5857_v51  ;;  %v5938_v50 = vld [vmem:[#allocation2 + $0x220] ss:$16 sps:$4 sm:$0xff]   ;;  %v5941_v51 = vld [vmem:[#allocation2 + $0x228] ss:$16 sps:$4 sm:$0xff]  }
  0xb1   : > { %1597 = vmatpush1.bf16.msra.mxu0 %v5852_v52  ;;  %1679 = vmatpush1.bf16.msra.mxu1 %v5855_v53  ;;  %v5946_v52 = vld [vmem:[#allocation2 + $0x244] ss:$16 sps:$4 sm:$0xff]   ;;  %v5949_v53 = vld [vmem:[#allocation2 + $0x24c] ss:$16 sps:$4 sm:$0xff]  }
  0xb2   : > { %1598 = vmatprep.subr.bf16.mxu0 %v5860_v55  ;;  %1680 = vmatprep.subr.bf16.mxu1 %v5863_v57  ;;  %v5947_v55 = vld [vmem:[#allocation2 + $0x248] ss:$16 sps:$4 sm:$0xff]   ;;  %v5952_v57 = vld [vmem:[#allocation2 + $0x264] ss:$16 sps:$4 sm:$0xff]  }
  0xb5   : > { %1599 = vmatpush1.bf16.msra.mxu0 %v5858_v58  ;;  %1681 = vmatpush1.bf16.msra.mxu1 %v5861_v59  ;;  %v5955_v58 = vld [vmem:[#allocation2 + $0x26c] ss:$16 sps:$4 sm:$0xff]   ;;  %v5950_v59 = vld [vmem:[#allocation2 + $0x260] ss:$16 sps:$4 sm:$0xff]  }
  0xb6   : > { %1600 = vmatprep.subr.bf16.mxu0 %v5866_v60  ;;  %1682 = vmatprep.subr.bf16.mxu1 %v5869_v61  ;;  %v5953_v60 = vld [vmem:[#allocation2 + $0x268] ss:$16 sps:$4 sm:$0xff]   ;;  %v5958_v61 = vld [vmem:[#allocation2 + $0x284] ss:$16 sps:$4 sm:$0xff]  }
  0xb9   : > { %1601 = vmatpush1.bf16.msra.mxu0 %v5864_v62  ;;  %1683 = vmatpush1.bf16.msra.mxu1 %v5867_v63  ;;  %v5961_v62 = vld [vmem:[#allocation2 + $0x28c] ss:$16 sps:$4 sm:$0xff]   ;;  %v5956_v63 = vld [vmem:[#allocation2 + $0x280] ss:$16 sps:$4 sm:$0xff]  }
  0xba   : > { %1602 = vmatprep.subr.bf16.mxu0 %v5872_v0  ;;  %1684 = vmatprep.subr.bf16.mxu1 %v5875_v1  ;;  %v5959_v0 = vld [vmem:[#allocation2 + $0x288] ss:$16 sps:$4 sm:$0xff]   ;;  %v5964_v1 = vld [vmem:[#allocation2 + $0x2a4] ss:$16 sps:$4 sm:$0xff]  }
  0xbd   : > { %1603 = vmatpush1.bf16.msra.mxu0 %v5870_v2  ;;  %1685 = vmatpush1.bf16.msra.mxu1 %v5873_v3  ;;  %v5967_v2 = vld [vmem:[#allocation2 + $0x2ac] ss:$16 sps:$4 sm:$0xff]   ;;  %v5962_v3 = vld [vmem:[#allocation2 + $0x2a0] ss:$16 sps:$4 sm:$0xff]  }
  0xbe   : > { %1604 = vmatprep.subr.bf16.mxu0 %v5878_v4  ;;  %1686 = vmatprep.subr.bf16.mxu1 %v5881_v6  ;;  %v5965_v4 = vld [vmem:[#allocation2 + $0x2a8] ss:$16 sps:$4 sm:$0xff]   ;;  %v5970_v6 = vld [vmem:[#allocation2 + $0x2c4] ss:$16 sps:$4 sm:$0xff]  }
  0xc1   : > { %1605 = vmatpush1.bf16.msra.mxu0 %v5876_v7  ;;  %1687 = vmatpush1.bf16.msra.mxu1 %v5879_v8  ;;  %v5973_v7 = vld [vmem:[#allocation2 + $0x2cc] ss:$16 sps:$4 sm:$0xff]   ;;  %v5968_v8 = vld [vmem:[#allocation2 + $0x2c0] ss:$16 sps:$4 sm:$0xff]  }
  0xc2   : > { %1606 = vmatprep.subr.bf16.mxu0 %v5884_v9  ;;  %1688 = vmatprep.subr.bf16.mxu1 %v5887_v10  ;;  %v5971_v9 = vld [vmem:[#allocation2 + $0x2c8] ss:$16 sps:$4 sm:$0xff]   ;;  %v5976_v10 = vld [vmem:[#allocation2 + $0x2e4] ss:$16 sps:$4 sm:$0xff]  }
  0xc5   : > { %1607 = vmatpush1.bf16.msra.mxu0 %v5882_v11  ;;  %1689 = vmatpush1.bf16.msra.mxu1 %v5885_v12  ;;  %v5979_v11 = vld [vmem:[#allocation2 + $0x2ec] ss:$16 sps:$4 sm:$0xff]   ;;  %v1861_v12 = vshll.u32 %v7116_v56, 16 }
  0xc6   : > { %1608 = vmatprep.subr.bf16.mxu0 %v5890_v14  ;;  %1690 = vmatprep.subr.bf16.mxu1 %v5893_v15  ;;  %v5974_v14 = vld [vmem:[#allocation2 + $0x2e0] ss:$16 sps:$4 sm:$0xff]   ;;  %v5977_v15 = vld [vmem:[#allocation2 + $0x2e8] ss:$16 sps:$4 sm:$0xff]  }
  0xc9   : > { %1609 = vmatpush1.bf16.msra.mxu0 %v5888_v16  ;;  %1691 = vmatpush1.bf16.msra.mxu1 %v5891_v17  ;;  %v5982_v16 = vld [vmem:[#allocation2 + $0x604] ss:$16 sps:$4 sm:$0xff]   ;;  %v5985_v17 = vld [vmem:[#allocation2 + $0x60c] ss:$16 sps:$4 sm:$0xff]  }
  0xca   : > { %1610 = vmatprep.subr.bf16.mxu0 %v5896_v18  ;;  %1692 = vmatprep.subr.bf16.mxu1 %v5899_v19  ;;  %v1859_v18 = vshrl.u32 %v7116_v56, 16  ;;  %v1863_v19 = vrot.slane %v1861_v12, 1  ;;  %v6061_v12 = vld [vmem:[#allocation2 + $0x7a4] ss:$16 sps:$4 sm:$0xff]  }
  0xcd   : > { %1611 = vmatpush1.bf16.msra.mxu0 %v5894_v20  ;;  %1693 = vmatpush1.bf16.msra.mxu1 %v5897_v21  ;;  %v7131_v20 = vld [vmem:[%s7109_s27 + $0x8] ss:$0 sps:$4 sm:$0x77]   ;;  %v5980_v21 = vld [vmem:[#allocation2 + $0x600] ss:$16 sps:$4 sm:$0xff]  }
  0xce   : > { %1612 = vmatprep.subr.bf16.mxu0 %v5902_v22  ;;  %1694 = vmatprep.subr.bf16.mxu1 %v5905_v23  ;;  %v5983_v22 = vld [vmem:[#allocation2 + $0x608] ss:$16 sps:$4 sm:$0xff]   ;;  %v5989_v23 = vld [vmem:[#allocation2 + $0x624] ss:$16 sps:$4 sm:$0xff]  }
  0xd1   : > { %1613 = vmatpush1.bf16.msra.mxu0 %v5900_v24  ;;  %1695 = vmatpush1.bf16.msra.mxu1 %v5903_v25  ;;  %v5992_v24 = vld [vmem:[#allocation2 + $0x62c] ss:$16 sps:$4 sm:$0xff]   ;;  %v7133_v25 = vor.u32 %v1863_v19, %v1859_v18  ;;  %v1854_v19 = vshll.u32 %v7122_v44, 16 }
  0xd2   : > { %1614 = vmatprep.subr.bf16.mxu0 %v5908_v26  ;;  %1696 = vmatprep.subr.bf16.mxu1 %v5911_v27  ;;  %v5987_v26 = vld [vmem:[#allocation2 + $0x620] ss:$16 sps:$4 sm:$0xff]   ;;  %v5990_v27 = vld [vmem:[#allocation2 + $0x628] ss:$16 sps:$4 sm:$0xff]   ;;  %v6070_v18 = vld [vmem:[#allocation2 + $0x7cc] ss:$16 sps:$4 sm:$0xff]  }
  0xd5   : > { %1615 = vmatpush1.bf16.msra.mxu0 %v5906_v28  ;;  %1697 = vmatpush1.bf16.msra.mxu1 %v5909_v29  ;;  %v5995_v28 = vld [vmem:[#allocation2 + $0x644] ss:$16 sps:$4 sm:$0xff]   ;;  %v5998_v29 = vld [vmem:[#allocation2 + $0x64c] ss:$16 sps:$4 sm:$0xff]  }
  0xd6   : > { %1616 = vmatprep.subr.bf16.mxu0 %v5914_v30  ;;  %1698 = vmatprep.subr.bf16.mxu1 %v5917_v31  ;;  %v5993_v30 = vld [vmem:[#allocation2 + $0x640] ss:$16 sps:$4 sm:$0xff]   ;;  %v5996_v31 = vld [vmem:[#allocation2 + $0x648] ss:$16 sps:$4 sm:$0xff]  }
  0xd9   : > { %1617 = vmatpush1.bf16.msra.mxu0 %v5912_v32  ;;  %1699 = vmatpush1.bf16.msra.mxu1 %v5915_v33  ;;  %v6001_v32 = vld [vmem:[#allocation2 + $0x664] ss:$16 sps:$4 sm:$0xff]   ;;  %v6004_v33 = vld [vmem:[#allocation2 + $0x66c] ss:$16 sps:$4 sm:$0xff]  }
  0xda   : > { %1618 = vmatprep.subr.bf16.mxu0 %v5920_v34  ;;  %1700 = vmatprep.subr.bf16.mxu1 %v5923_v35  ;;  %v5999_v34 = vld [vmem:[#allocation2 + $0x660] ss:$16 sps:$4 sm:$0xff]   ;;  %v6002_v35 = vld [vmem:[#allocation2 + $0x668] ss:$16 sps:$4 sm:$0xff]  }
  0xdd   : > { %1619 = vmatpush1.bf16.msra.mxu0 %v5918_v36  ;;  %1701 = vmatpush1.bf16.msra.mxu1 %v5921_v37  ;;  %v6007_v36 = vld [vmem:[#allocation2 + $0x684] ss:$16 sps:$4 sm:$0xff]   ;;  %v6010_v37 = vld [vmem:[#allocation2 + $0x68c] ss:$16 sps:$4 sm:$0xff]  }
  0xde   : > { %1620 = vmatprep.subr.bf16.mxu0 %v5926_v38  ;;  %1702 = vmatprep.subr.bf16.mxu1 %v5929_v39  ;;  %v6005_v38 = vld [vmem:[#allocation2 + $0x680] ss:$16 sps:$4 sm:$0xff]   ;;  %v6008_v39 = vld [vmem:[#allocation2 + $0x688] ss:$16 sps:$4 sm:$0xff]  }
  0xe1   : > { %1621 = vmatpush1.bf16.msra.mxu0 %v5924_v40  ;;  %1703 = vmatpush1.bf16.msra.mxu1 %v5927_v41  ;;  %v6013_v40 = vld [vmem:[#allocation2 + $0x6a4] ss:$16 sps:$4 sm:$0xff]   ;;  %v6016_v41 = vld [vmem:[#allocation2 + $0x6ac] ss:$16 sps:$4 sm:$0xff]  }
  0xe2   : > { %1631 = vmatprep.subr.bf16.mxu0 %v5933_v42  ;;  %1713 = vmatprep.subr.bf16.mxu1 %v5936_v43  ;;  %v6011_v42 = vld [vmem:[#allocation2 + $0x6a0] ss:$16 sps:$4 sm:$0xff]   ;;  %v6014_v43 = vld [vmem:[#allocation2 + $0x6a8] ss:$16 sps:$4 sm:$0xff]  }
  0xe4   : > { %1623 = vmatmul.mubr.bf16.vlgmr.msra.gmra.mrb[0].mxu0 %v7122_v44  ;;  %1705 = vmatmul.mubr.bf16.vlgmr.msra.gmra.mrb[0].mxu1 %v7122_v44 }
  0xe5   : > { %1632 = vmatpush1.bf16.msra.mxu0 %v5931_v45  ;;  %1714 = vmatpush1.bf16.msra.mxu1 %v5934_v46  ;;  %v6019_v45 = vld [vmem:[#allocation2 + $0x6c4] ss:$16 sps:$4 sm:$0xff]   ;;  %v6022_v46 = vld [vmem:[#allocation2 + $0x6cc] ss:$16 sps:$4 sm:$0xff]  }
  0xe6   : > { %1633 = vmatprep.subr.bf16.mxu0 %v5940_v47  ;;  %1715 = vmatprep.subr.bf16.mxu1 %v5943_v49  ;;  %v6017_v47 = vld [vmem:[#allocation2 + $0x6c0] ss:$16 sps:$4 sm:$0xff]   ;;  %v6020_v49 = vld [vmem:[#allocation2 + $0x6c8] ss:$16 sps:$4 sm:$0xff]  }
  0xe7   : > { %1663 = vmatprep.mubr.bf16.mxu0 %v6972_v13  ;;  %1745 = vmatprep.mubr.bf16.mxu1 %v6972_v13 }
  0xe9   : > { %1634 = vmatpush1.bf16.msra.mxu0 %v5938_v50  ;;  %1716 = vmatpush1.bf16.msra.mxu1 %v5941_v51  ;;  %v6025_v50 = vld [vmem:[#allocation2 + $0x6e4] ss:$16 sps:$4 sm:$0xff]   ;;  %v6028_v51 = vld [vmem:[#allocation2 + $0x6ec] ss:$16 sps:$4 sm:$0xff]  }
  0xea   : > { %1635 = vmatprep.subr.bf16.mxu0 %v5946_v52  ;;  %1717 = vmatprep.subr.bf16.mxu1 %v5949_v53  ;;  %v6023_v52 = vld [vmem:[#allocation2 + $0x6e0] ss:$16 sps:$4 sm:$0xff]   ;;  %v6026_v53 = vld [vmem:[#allocation2 + $0x6e8] ss:$16 sps:$4 sm:$0xff]  }
  0xed   : > { %1636 = vmatpush1.bf16.msra.mxu0 %v5944_v54  ;;  %1718 = vmatpush1.bf16.msra.mxu1 %v5947_v55  ;;  %v6031_v54 = vld [vmem:[#allocation2 + $0x704] ss:$16 sps:$4 sm:$0xff]   ;;  %v6034_v55 = vld [vmem:[#allocation2 + $0x70c] ss:$16 sps:$4 sm:$0xff]  }
  0xee   : > { %1637 = vmatprep.subr.bf16.mxu0 %v5952_v57  ;;  %1719 = vmatprep.subr.bf16.mxu1 %v5955_v58  ;;  %v6029_v57 = vld [vmem:[#allocation2 + $0x700] ss:$16 sps:$4 sm:$0xff]   ;;  %v6032_v58 = vld [vmem:[#allocation2 + $0x708] ss:$16 sps:$4 sm:$0xff]  }
  0xf1   : > { %1638 = vmatpush1.bf16.msra.mxu0 %v5950_v59  ;;  %1720 = vmatpush1.bf16.msra.mxu1 %v5953_v60  ;;  %v6037_v59 = vld [vmem:[#allocation2 + $0x724] ss:$16 sps:$4 sm:$0xff]   ;;  %v6040_v60 = vld [vmem:[#allocation2 + $0x72c] ss:$16 sps:$4 sm:$0xff]  }
  0xf2   : > { %1639 = vmatprep.subr.bf16.mxu0 %v5958_v61  ;;  %1721 = vmatprep.subr.bf16.mxu1 %v5961_v62  ;;  %v6035_v61 = vld [vmem:[#allocation2 + $0x720] ss:$16 sps:$4 sm:$0xff]   ;;  %v6038_v62 = vld [vmem:[#allocation2 + $0x728] ss:$16 sps:$4 sm:$0xff]  }
  0xf5   : > { %1640 = vmatpush1.bf16.msra.mxu0 %v5956_v63  ;;  %1722 = vmatpush1.bf16.msra.mxu1 %v5959_v0  ;;  %v6043_v63 = vld [vmem:[#allocation2 + $0x744] ss:$16 sps:$4 sm:$0xff]   ;;  %v6046_v0 = vld [vmem:[#allocation2 + $0x74c] ss:$16 sps:$4 sm:$0xff]  }
  0xf6   : > { %1641 = vmatprep.subr.bf16.mxu0 %v5964_v1  ;;  %1723 = vmatprep.subr.bf16.mxu1 %v5967_v2  ;;  %v6041_v1 = vld [vmem:[#allocation2 + $0x740] ss:$16 sps:$4 sm:$0xff]   ;;  %v6044_v2 = vld [vmem:[#allocation2 + $0x748] ss:$16 sps:$4 sm:$0xff]  }
  0xf9   : > { %1642 = vmatpush1.bf16.msra.mxu0 %v5962_v3  ;;  %1724 = vmatpush1.bf16.msra.mxu1 %v5965_v4  ;;  %v6049_v3 = vld [vmem:[#allocation2 + $0x764] ss:$16 sps:$4 sm:$0xff]   ;;  %v6052_v4 = vld [vmem:[#allocation2 + $0x76c] ss:$16 sps:$4 sm:$0xff]  }
  0xfa   : > { %1643 = vmatprep.subr.bf16.mxu0 %v5970_v6  ;;  %1725 = vmatprep.subr.bf16.mxu1 %v5973_v7  ;;  %v6047_v6 = vld [vmem:[#allocation2 + $0x760] ss:$16 sps:$4 sm:$0xff]   ;;  %v6050_v7 = vld [vmem:[#allocation2 + $0x768] ss:$16 sps:$4 sm:$0xff]  }
  0xfd   : > { %1644 = vmatpush1.bf16.msra.mxu0 %v5968_v8  ;;  %1726 = vmatpush1.bf16.msra.mxu1 %v5971_v9  ;;  %v6055_v8 = vld [vmem:[#allocation2 + $0x784] ss:$16 sps:$4 sm:$0xff]   ;;  %v6058_v9 = vld [vmem:[#allocation2 + $0x78c] ss:$16 sps:$4 sm:$0xff]  }
  0xfe   : > { %1645 = vmatprep.subr.bf16.mxu0 %v5976_v10  ;;  %1727 = vmatprep.subr.bf16.mxu1 %v5979_v11  ;;  %v6053_v10 = vld [vmem:[#allocation2 + $0x780] ss:$16 sps:$4 sm:$0xff]   ;;  %v6056_v11 = vld [vmem:[#allocation2 + $0x788] ss:$16 sps:$4 sm:$0xff]  }
 0x101   : > { %1646 = vmatpush1.bf16.msra.mxu0 %v5974_v14  ;;  %1728 = vmatpush1.bf16.msra.mxu1 %v5977_v15  ;;  %v6064_v14 = vld [vmem:[#allocation2 + $0x7ac] ss:$16 sps:$4 sm:$0xff]   ;;  %v6059_v15 = vld [vmem:[#allocation2 + $0x7a0] ss:$16 sps:$4 sm:$0xff]  }
 0x102   : > { %2355 = vmatprep.subr.bf16.mxu0 %v5982_v16  ;;  %2437 = vmatprep.subr.bf16.mxu1 %v5985_v17  ;;  %v6062_v16 = vld [vmem:[#allocation2 + $0x7a8] ss:$16 sps:$4 sm:$0xff]   ;;  %v6067_v17 = vld [vmem:[#allocation2 + $0x7c4] ss:$16 sps:$4 sm:$0xff]  }
 0x104   : > { %1664 = vmatmul.mubr.bf16.vlgmr.msra.gmra.mrb[0].mxu0 %v7131_v20  ;;  %1746 = vmatmul.mubr.bf16.vlgmr.msra.gmra.mrb[0].mxu1 %v7131_v20 }
 0x105   : > { %2356 = vmatpush1.bf16.msra.mxu0 %v5980_v21  ;;  %2438 = vmatpush1.bf16.msra.mxu1 %v5983_v22  ;;  %v6065_v21 = vld [vmem:[#allocation2 + $0x7c0] ss:$16 sps:$4 sm:$0xff]   ;;  %v6068_v22 = vld [vmem:[#allocation2 + $0x7c8] ss:$16 sps:$4 sm:$0xff]  }
 0x106   : > { %2357 = vmatprep.subr.bf16.mxu0 %v5989_v23  ;;  %2439 = vmatprep.subr.bf16.mxu1 %v5992_v24  ;;  %v6073_v23 = vld [vmem:[#allocation2 + $0x7e4] ss:$16 sps:$4 sm:$0xff]   ;;  %v6076_v24 = vld [vmem:[#allocation2 + $0x7ec] ss:$16 sps:$4 sm:$0xff]  }
 0x107   : > { %2387 = vmatprep.mubr.bf16.mxu0 %v7133_v25  ;;  %2469 = vmatprep.mubr.bf16.mxu1 %v7133_v25 }
 0x109   : > { %2358 = vmatpush1.bf16.msra.mxu0 %v5987_v26  ;;  %2440 = vmatpush1.bf16.msra.mxu1 %v5990_v27  ;;  %v1852_v26 = vshrl.u32 %v7122_v44, 16  ;;  %v1856_v27 = vrot.slane %v1854_v19, 1  ;;  %v6139_v19 = vld [vmem:[#allocation2 + $0x944] ss:$16 sps:$4 sm:$0xff]  }
 0x10a   : > { %2359 = vmatprep.subr.bf16.mxu0 %v5995_v28  ;;  %2441 = vmatprep.subr.bf16.mxu1 %v5998_v29  ;;  %v6071_v28 = vld [vmem:[#allocation2 + $0x7e0] ss:$16 sps:$4 sm:$0xff]   ;;  %v6074_v29 = vld [vmem:[#allocation2 + $0x7e8] ss:$16 sps:$4 sm:$0xff]  }
 0x10d   : > { %2360 = vmatpush1.bf16.msra.mxu0 %v5993_v30  ;;  %2442 = vmatpush1.bf16.msra.mxu1 %v5996_v31  ;;  %v6079_v30 = vld [vmem:[#allocation2 + $0x804] ss:$16 sps:$4 sm:$0xff]   ;;  %v6082_v31 = vld [vmem:[#allocation2 + $0x80c] ss:$16 sps:$4 sm:$0xff]  }
 0x10e   : > { %2361 = vmatprep.subr.bf16.mxu0 %v6001_v32  ;;  %2443 = vmatprep.subr.bf16.mxu1 %v6004_v33  ;;  %v7141_v32 = vor.u32 %v1856_v27, %v1852_v26  ;;  %v6077_v33 = vld [vmem:[#allocation2 + $0x800] ss:$16 sps:$4 sm:$0xff]   ;;  %v6148_v26 = vld [vmem:[#allocation2 + $0x96c] ss:$16 sps:$4 sm:$0xff]  }
 0x10f   : > { %v6143_v27 = vld [vmem:[#allocation2 + $0x960] ss:$16 sps:$4 sm:$0xff]  }
 0x111   : > { %2362 = vmatpush1.bf16.msra.mxu0 %v5999_v34  ;;  %2444 = vmatpush1.bf16.msra.mxu1 %v6002_v35  ;;  %v6080_v34 = vld [vmem:[#allocation2 + $0x808] ss:$16 sps:$4 sm:$0xff]   ;;  %v6085_v35 = vld [vmem:[#allocation2 + $0x824] ss:$16 sps:$4 sm:$0xff]  }
 0x112   : > { %2363 = vmatprep.subr.bf16.mxu0 %v6007_v36  ;;  %2445 = vmatprep.subr.bf16.mxu1 %v6010_v37  ;;  %v6088_v36 = vld [vmem:[#allocation2 + $0x82c] ss:$16 sps:$4 sm:$0xff]   ;;  %v6083_v37 = vld [vmem:[#allocation2 + $0x820] ss:$16 sps:$4 sm:$0xff]  }
 0x115   : > { %2364 = vmatpush1.bf16.msra.mxu0 %v6005_v38  ;;  %2446 = vmatpush1.bf16.msra.mxu1 %v6008_v39  ;;  %v6086_v38 = vld [vmem:[#allocation2 + $0x828] ss:$16 sps:$4 sm:$0xff]   ;;  %v6091_v39 = vld [vmem:[#allocation2 + $0x844] ss:$16 sps:$4 sm:$0xff]  }
 0x116   : > { %2365 = vmatprep.subr.bf16.mxu0 %v6013_v40  ;;  %2447 = vmatprep.subr.bf16.mxu1 %v6016_v41  ;;  %v6094_v40 = vld [vmem:[#allocation2 + $0x84c] ss:$16 sps:$4 sm:$0xff]   ;;  %v6089_v41 = vld [vmem:[#allocation2 + $0x840] ss:$16 sps:$4 sm:$0xff]  }
 0x119   : > { %2366 = vmatpush1.bf16.msra.mxu0 %v6011_v42  ;;  %2448 = vmatpush1.bf16.msra.mxu1 %v6014_v43  ;;  %v6092_v42 = vld [vmem:[#allocation2 + $0x848] ss:$16 sps:$4 sm:$0xff]   ;;  %v6097_v43 = vld [vmem:[#allocation2 + $0x864] ss:$16 sps:$4 sm:$0xff]  }
 0x11a   : > { %2367 = vmatprep.subr.bf16.mxu0 %v6019_v45  ;;  %2449 = vmatprep.subr.bf16.mxu1 %v6022_v46  ;;  %v6100_v45 = vld [vmem:[#allocation2 + $0x86c] ss:$16 sps:$4 sm:$0xff]   ;;  %v6095_v46 = vld [vmem:[#allocation2 + $0x860] ss:$16 sps:$4 sm:$0xff]  }
 0x11d   : > { %2368 = vmatpush1.bf16.msra.mxu0 %v6017_v47  ;;  %2450 = vmatpush1.bf16.msra.mxu1 %v6020_v49  ;;  %v6098_v47 = vld [vmem:[#allocation2 + $0x868] ss:$16 sps:$4 sm:$0xff]   ;;  %v6103_v49 = vld [vmem:[#allocation2 + $0x884] ss:$16 sps:$4 sm:$0xff]  }
 0x11e   : > { %2369 = vmatprep.subr.bf16.mxu0 %v6025_v50  ;;  %2451 = vmatprep.subr.bf16.mxu1 %v6028_v51  ;;  %v6106_v50 = vld [vmem:[#allocation2 + $0x88c] ss:$16 sps:$4 sm:$0xff]   ;;  %v6101_v51 = vld [vmem:[#allocation2 + $0x880] ss:$16 sps:$4 sm:$0xff]  }
 0x121   : > { %2370 = vmatpush1.bf16.msra.mxu0 %v6023_v52  ;;  %2452 = vmatpush1.bf16.msra.mxu1 %v6026_v53  ;;  %v6104_v52 = vld [vmem:[#allocation2 + $0x888] ss:$16 sps:$4 sm:$0xff]   ;;  %v6109_v53 = vld [vmem:[#allocation2 + $0x8a4] ss:$16 sps:$4 sm:$0xff]  }
 0x122   : > { %2371 = vmatprep.subr.bf16.mxu0 %v6031_v54  ;;  %2453 = vmatprep.subr.bf16.mxu1 %v6034_v55  ;;  %v6112_v54 = vld [vmem:[#allocation2 + $0x8ac] ss:$16 sps:$4 sm:$0xff]   ;;  %v6107_v55 = vld [vmem:[#allocation2 + $0x8a0] ss:$16 sps:$4 sm:$0xff]  }
 0x125   : > { %2372 = vmatpush1.bf16.msra.mxu0 %v6029_v57  ;;  %2454 = vmatpush1.bf16.msra.mxu1 %v6032_v58  ;;  %v6110_v57 = vld [vmem:[#allocation2 + $0x8a8] ss:$16 sps:$4 sm:$0xff]   ;;  %v6115_v58 = vld [vmem:[#allocation2 + $0x8c4] ss:$16 sps:$4 sm:$0xff]  }
 0x126   : > { %2373 = vmatprep.subr.bf16.mxu0 %v6037_v59  ;;  %2455 = vmatprep.subr.bf16.mxu1 %v6040_v60  ;;  %v6118_v59 = vld [vmem:[#allocation2 + $0x8cc] ss:$16 sps:$4 sm:$0xff]   ;;  %v1868_v60 = vshll.u32 %v7131_v20, 16 }
 0x129   : > { %2374 = vmatpush1.bf16.msra.mxu0 %v6035_v61  ;;  %2456 = vmatpush1.bf16.msra.mxu1 %v6038_v62  ;;  %v6113_v61 = vld [vmem:[#allocation2 + $0x8c0] ss:$16 sps:$4 sm:$0xff]   ;;  %v6116_v62 = vld [vmem:[#allocation2 + $0x8c8] ss:$16 sps:$4 sm:$0xff]  }
 0x12a   : > { %2375 = vmatprep.subr.bf16.mxu0 %v6043_v63  ;;  %2457 = vmatprep.subr.bf16.mxu1 %v6046_v0  ;;  %v6121_v63 = vld [vmem:[#allocation2 + $0x8e4] ss:$16 sps:$4 sm:$0xff]   ;;  %v6124_v0 = vld [vmem:[#allocation2 + $0x8ec] ss:$16 sps:$4 sm:$0xff]  }
 0x12d   : > { %2376 = vmatpush1.bf16.msra.mxu0 %v6041_v1  ;;  %2458 = vmatpush1.bf16.msra.mxu1 %v6044_v2  ;;  %v2630_v1 = vshll.u32 %v7093_v48, 16  ;;  %v1866_v2 = vshrl.u32 %v7131_v20, 16  ;;  %v6133_v20 = vld [vmem:[#allocation2 + $0x924] ss:$16 sps:$4 sm:$0xff]  }
 0x12e   : > { %2377 = vmatprep.subr.bf16.mxu0 %v6049_v3  ;;  %2459 = vmatprep.subr.bf16.mxu1 %v6052_v4  ;;  %v1870_v3 = vrot.slane %v1868_v60, 1  ;;  %v6119_v4 = vld [vmem:[#allocation2 + $0x8e0] ss:$16 sps:$4 sm:$0xff]   ;;  %v6188_v60 = vld [vmem:[#allocation2 + $0xa48] ss:$16 sps:$4 sm:$0xff]  }
 0x131   : > { %2378 = vmatpush1.bf16.msra.mxu0 %v6047_v6  ;;  %2460 = vmatpush1.bf16.msra.mxu1 %v6050_v7  ;;  %v6122_v6 = vld [vmem:[#allocation2 + $0x8e8] ss:$16 sps:$4 sm:$0xff]   ;;  %v6127_v7 = vld [vmem:[#allocation2 + $0x904] ss:$16 sps:$4 sm:$0xff]  }
 0x132   : > { %2379 = vmatprep.subr.bf16.mxu0 %v6055_v8  ;;  %2461 = vmatprep.subr.bf16.mxu1 %v6058_v9  ;;  %v6130_v8 = vld [vmem:[#allocation2 + $0x90c] ss:$16 sps:$4 sm:$0xff]   ;;  %v2628_v9 = vshrl.u32 %v7093_v48, 16 }
 0x135   : > { %2380 = vmatpush1.bf16.msra.mxu0 %v6053_v10  ;;  %2462 = vmatpush1.bf16.msra.mxu1 %v6056_v11  ;;  %v2632_v10 = vrot.slane %v2630_v1, 1  ;;  %v7151_v11 = vor.u32 %v1870_v3, %v1866_v2  ;;  %v6199_v1 = vld [vmem:[#allocation2 + $0xa84] ss:$16 sps:$4 sm:$0xff]   ;;  %v6202_v2 = vld [vmem:[#allocation2 + $0xa8c] ss:$16 sps:$4 sm:$0xff]  }
 0x136   : > { %2381 = vmatprep.subr.bf16.mxu0 %v6061_v12  ;;  %2463 = vmatprep.subr.bf16.mxu1 %v6064_v14  ;;  %v6125_v12 = vld [vmem:[#allocation2 + $0x900] ss:$16 sps:$4 sm:$0xff]   ;;  %v6128_v14 = vld [vmem:[#allocation2 + $0x908] ss:$16 sps:$4 sm:$0xff]  }
 0x137   : > { %v6197_v3 = vld [vmem:[#allocation2 + $0xa80] ss:$16 sps:$4 sm:$0xff]  }
 0x139   : > { %2382 = vmatpush1.bf16.msra.mxu0 %v6059_v15  ;;  %2464 = vmatpush1.bf16.msra.mxu1 %v6062_v16  ;;  %v6136_v15 = vld [vmem:[#allocation2 + $0x92c] ss:$16 sps:$4 sm:$0xff]   ;;  %v7153_v16 = vor.u32 %v2632_v10, %v2628_v9  ;;  %v6206_v9 = vld [vmem:[#allocation2 + $0xaa8] ss:$16 sps:$4 sm:$0xff]   ;;  %v6211_v10 = vld [vmem:[#allocation2 + $0xac4] ss:$16 sps:$4 sm:$0xff]  }
 0x13a   : > { %2383 = vmatprep.subr.bf16.mxu0 %v6067_v17  ;;  %2465 = vmatprep.subr.bf16.mxu1 %v6070_v18  ;;  %v6131_v17 = vld [vmem:[#allocation2 + $0x920] ss:$16 sps:$4 sm:$0xff]   ;;  %v6134_v18 = vld [vmem:[#allocation2 + $0x928] ss:$16 sps:$4 sm:$0xff]  }
 0x13d   : > { %2384 = vmatpush1.bf16.msra.mxu0 %v6065_v21  ;;  %2466 = vmatpush1.bf16.msra.mxu1 %v6068_v22  ;;  %v6142_v21 = vld [vmem:[#allocation2 + $0x94c] ss:$16 sps:$4 sm:$0xff]   ;;  %v6137_v22 = vld [vmem:[#allocation2 + $0x940] ss:$16 sps:$4 sm:$0xff]  }
 0x13e   : > { %2385 = vmatprep.subr.bf16.mxu0 %v6073_v23  ;;  %2467 = vmatprep.subr.bf16.mxu1 %v6076_v24  ;;  %v6140_v23 = vld [vmem:[#allocation2 + $0x948] ss:$16 sps:$4 sm:$0xff]   ;;  %v6145_v24 = vld [vmem:[#allocation2 + $0x964] ss:$16 sps:$4 sm:$0xff]  }
 0x141   : > { %2386 = vmatpush1.bf16.msra.mxu0 %v6071_v28  ;;  %2468 = vmatpush1.bf16.msra.mxu1 %v6074_v29  ;;  %v6146_v28 = vld [vmem:[#allocation2 + $0x968] ss:$16 sps:$4 sm:$0xff]   ;;  %v6151_v29 = vld [vmem:[#allocation2 + $0x984] ss:$16 sps:$4 sm:$0xff]  }
 0x142   : > { %2396 = vmatprep.subr.bf16.mxu0 %v6079_v30  ;;  %2478 = vmatprep.subr.bf16.mxu1 %v6082_v31  ;;  %v6154_v30 = vld [vmem:[#allocation2 + $0x98c] ss:$16 sps:$4 sm:$0xff]   ;;  %v6149_v31 = vld [vmem:[#allocation2 + $0x980] ss:$16 sps:$4 sm:$0xff]  }
 0x144   : > { %2388 = vmatmul.mubr.bf16.vlgmr.msra.gmra.mrb[0].mxu0 %v7141_v32  ;;  %2470 = vmatmul.mubr.bf16.vlgmr.msra.gmra.mrb[0].mxu1 %v7141_v32 }
 0x145   : > { %2397 = vmatpush1.bf16.msra.mxu0 %v6077_v33  ;;  %2479 = vmatpush1.bf16.msra.mxu1 %v6080_v34  ;;  %v6152_v33 = vld [vmem:[#allocation2 + $0x988] ss:$16 sps:$4 sm:$0xff]   ;;  %v6157_v34 = vld [vmem:[#allocation2 + $0x9a4] ss:$16 sps:$4 sm:$0xff]  }
 0x146   : > { %2398 = vmatprep.subr.bf16.mxu0 %v6085_v35  ;;  %2480 = vmatprep.subr.bf16.mxu1 %v6088_v36  ;;  %v6160_v35 = vld [vmem:[#allocation2 + $0x9ac] ss:$16 sps:$4 sm:$0xff]   ;;  %v6155_v36 = vld [vmem:[#allocation2 + $0x9a0] ss:$16 sps:$4 sm:$0xff]  }
 0x147   : > { %2428 = vmatprep.mubr.bf16.mxu0 %v6972_v13  ;;  %2510 = vmatprep.mubr.bf16.mxu1 %v6972_v13 }
 0x149   : > { %2399 = vmatpush1.bf16.msra.mxu0 %v6083_v37  ;;  %2481 = vmatpush1.bf16.msra.mxu1 %v6086_v38  ;;  %v6158_v37 = vld [vmem:[#allocation2 + $0x9a8] ss:$16 sps:$4 sm:$0xff]   ;;  %v6163_v38 = vld [vmem:[#allocation2 + $0x9c4] ss:$16 sps:$4 sm:$0xff]  }
 0x14a   : > { %2400 = vmatprep.subr.bf16.mxu0 %v6091_v39  ;;  %2482 = vmatprep.subr.bf16.mxu1 %v6094_v40  ;;  %v6166_v39 = vld [vmem:[#allocation2 + $0x9cc] ss:$16 sps:$4 sm:$0xff]   ;;  %v6161_v40 = vld [vmem:[#allocation2 + $0x9c0] ss:$16 sps:$4 sm:$0xff]  }
 0x14d   : > { %2401 = vmatpush1.bf16.msra.mxu0 %v6089_v41  ;;  %2483 = vmatpush1.bf16.msra.mxu1 %v6092_v42  ;;  %v6164_v41 = vld [vmem:[#allocation2 + $0x9c8] ss:$16 sps:$4 sm:$0xff]   ;;  %v6169_v42 = vld [vmem:[#allocation2 + $0x9e4] ss:$16 sps:$4 sm:$0xff]  }
 0x14e   : > { %2402 = vmatprep.subr.bf16.mxu0 %v6097_v43  ;;  %2484 = vmatprep.subr.bf16.mxu1 %v6100_v45  ;;  %v6172_v43 = vld [vmem:[#allocation2 + $0x9ec] ss:$16 sps:$4 sm:$0xff]   ;;  %v6167_v45 = vld [vmem:[#allocation2 + $0x9e0] ss:$16 sps:$4 sm:$0xff]  }
 0x151   : > { %2403 = vmatpush1.bf16.msra.mxu0 %v6095_v46  ;;  %2485 = vmatpush1.bf16.msra.mxu1 %v6098_v47  ;;  %v6170_v46 = vld [vmem:[#allocation2 + $0x9e8] ss:$16 sps:$4 sm:$0xff]   ;;  %v6175_v47 = vld [vmem:[#allocation2 + $0xa04] ss:$16 sps:$4 sm:$0xff]  }
 0x152   : > { %2404 = vmatprep.subr.bf16.mxu0 %v6103_v49  ;;  %2486 = vmatprep.subr.bf16.mxu1 %v6106_v50  ;;  %v6178_v49 = vld [vmem:[#allocation2 + $0xa0c] ss:$16 sps:$4 sm:$0xff]   ;;  %v6173_v50 = vld [vmem:[#allocation2 + $0xa00] ss:$16 sps:$4 sm:$0xff]  }
 0x155   : > { %2405 = vmatpush1.bf16.msra.mxu0 %v6101_v51  ;;  %2487 = vmatpush1.bf16.msra.mxu1 %v6104_v52  ;;  %v6176_v51 = vld [vmem:[#allocation2 + $0xa08] ss:$16 sps:$4 sm:$0xff]   ;;  %v6181_v52 = vld [vmem:[#allocation2 + $0xa24] ss:$16 sps:$4 sm:$0xff]  }
 0x156   : > { %2406 = vmatprep.subr.bf16.mxu0 %v6109_v53  ;;  %2488 = vmatprep.subr.bf16.mxu1 %v6112_v54  ;;  %v6184_v53 = vld [vmem:[#allocation2 + $0xa2c] ss:$16 sps:$4 sm:$0xff]   ;;  %v6179_v54 = vld [vmem:[#allocation2 + $0xa20] ss:$16 sps:$4 sm:$0xff]  }
 0x159   : > { %2407 = vmatpush1.bf16.msra.mxu0 %v6107_v55  ;;  %2489 = vmatpush1.bf16.msra.mxu1 %v6110_v57  ;;  %v6182_v55 = vld [vmem:[#allocation2 + $0xa28] ss:$16 sps:$4 sm:$0xff]   ;;  %v6187_v57 = vld [vmem:[#allocation2 + $0xa44] ss:$16 sps:$4 sm:$0xff]  }
 0x15a   : > { %2408 = vmatprep.subr.bf16.mxu0 %v6115_v58  ;;  %2490 = vmatprep.subr.bf16.mxu1 %v6118_v59  ;;  %v6190_v58 = vld [vmem:[#allocation2 + $0xa4c] ss:$16 sps:$4 sm:$0xff]   ;;  %v6185_v59 = vld [vmem:[#allocation2 + $0xa40] ss:$16 sps:$4 sm:$0xff]  }
 0x15d   : > { %2409 = vmatpush1.bf16.msra.mxu0 %v6113_v61  ;;  %2491 = vmatpush1.bf16.msra.mxu1 %v6116_v62  ;;  %v6193_v61 = vld [vmem:[#allocation2 + $0xa64] ss:$16 sps:$4 sm:$0xff]   ;;  %v6196_v62 = vld [vmem:[#allocation2 + $0xa6c] ss:$16 sps:$4 sm:$0xff]  }
 0x15e   : > { %2410 = vmatprep.subr.bf16.mxu0 %v6121_v63  ;;  %2492 = vmatprep.subr.bf16.mxu1 %v6124_v0  ;;  %v6191_v63 = vld [vmem:[#allocation2 + $0xa60] ss:$16 sps:$4 sm:$0xff]   ;;  %v6194_v0 = vld [vmem:[#allocation2 + $0xa68] ss:$16 sps:$4 sm:$0xff]  }
 0x161   : > { %2411 = vmatpush1.bf16.msra.mxu0 %v6119_v4  ;;  %2493 = vmatpush1.bf16.msra.mxu1 %v6122_v6  ;;  %v6200_v4 = vld [vmem:[#allocation2 + $0xa88] ss:$16 sps:$4 sm:$0xff]   ;;  %v6205_v6 = vld [vmem:[#allocation2 + $0xaa4] ss:$16 sps:$4 sm:$0xff]  }
 0x162   : > { %3124 = vmatprep.subr.bf16.mxu0 %v6127_v7  ;;  %3206 = vmatprep.subr.bf16.mxu1 %v6130_v8  ;;  %v6208_v7 = vld [vmem:[#allocation2 + $0xaac] ss:$16 sps:$4 sm:$0xff]   ;;  %v6203_v8 = vld [vmem:[#allocation2 + $0xaa0] ss:$16 sps:$4 sm:$0xff]  }
 0x164   : > { %2429 = vmatmul.mubr.bf16.vlgmr.msra.gmra.mrb[0].mxu0 %v7151_v11  ;;  %2511 = vmatmul.mubr.bf16.vlgmr.msra.gmra.mrb[0].mxu1 %v7151_v11 }
 0x165   : > { %3125 = vmatpush1.bf16.msra.mxu0 %v6125_v12  ;;  %3207 = vmatpush1.bf16.msra.mxu1 %v6128_v14  ;;  %v6214_v12 = vld [vmem:[#allocation2 + $0xacc] ss:$16 sps:$4 sm:$0xff]   ;;  %v2623_v14 = vshll.u32 %v7097_v5, 16 }
 0x166   : > { %3126 = vmatprep.subr.bf16.mxu0 %v6133_v20  ;;  %3208 = vmatprep.subr.bf16.mxu1 %v6136_v15  ;;  %v6209_v20 = vld [vmem:[#allocation2 + $0xac0] ss:$16 sps:$4 sm:$0xff]   ;;  %v6212_v15 = vld [vmem:[#allocation2 + $0xac8] ss:$16 sps:$4 sm:$0xff]  }
 0x167   : > { %3156 = vmatprep.mubr.bf16.mxu0 %v7153_v16  ;;  %3238 = vmatprep.mubr.bf16.mxu1 %v7153_v16 }
 0x169   : > { %3127 = vmatpush1.bf16.msra.mxu0 %v6131_v17  ;;  %3209 = vmatpush1.bf16.msra.mxu1 %v6134_v18  ;;  %v6217_v17 = vld [vmem:[#allocation2 + $0xae4] ss:$16 sps:$4 sm:$0xff]   ;;  %v6220_v18 = vld [vmem:[#allocation2 + $0xaec] ss:$16 sps:$4 sm:$0xff]  }
 0x16a   : > { %3128 = vmatprep.subr.bf16.mxu0 %v6139_v19  ;;  %3210 = vmatprep.subr.bf16.mxu1 %v6142_v21  ;;  %v2621_v19 = vshrl.u32 %v7097_v5, 16  ;;  %v2625_v21 = vrot.slane %v2623_v14, 1  ;;  %v6278_v14 = vld [vmem:[#allocation2 + $0xc28] ss:$16 sps:$4 sm:$0xff]  }
 0x16d   : > { %3129 = vmatpush1.bf16.msra.mxu0 %v6137_v22  ;;  %3211 = vmatpush1.bf16.msra.mxu1 %v6140_v23  ;;  %v6215_v22 = vld [vmem:[#allocation2 + $0xae0] ss:$16 sps:$4 sm:$0xff]   ;;  %v6218_v23 = vld [vmem:[#allocation2 + $0xae8] ss:$16 sps:$4 sm:$0xff]  }
 0x16e   : > { %3130 = vmatprep.subr.bf16.mxu0 %v6145_v24  ;;  %3212 = vmatprep.subr.bf16.mxu1 %v6148_v26  ;;  %v6223_v24 = vld [vmem:[#allocation2 + $0xb04] ss:$16 sps:$4 sm:$0xff]   ;;  %v6226_v26 = vld [vmem:[#allocation2 + $0xb0c] ss:$16 sps:$4 sm:$0xff]  }
 0x171   : > { %3131 = vmatpush1.bf16.msra.mxu0 %v6143_v27  ;;  %3213 = vmatpush1.bf16.msra.mxu1 %v6146_v28  ;;  %v7161_v27 = vor.u32 %v2625_v21, %v2621_v19  ;;  %v6221_v28 = vld [vmem:[#allocation2 + $0xb00] ss:$16 sps:$4 sm:$0xff]   ;;  %v6292_v19 = vld [vmem:[#allocation2 + $0xc6c] ss:$16 sps:$4 sm:$0xff]  }
 0x172   : > { %3132 = vmatprep.subr.bf16.mxu0 %v6151_v29  ;;  %3214 = vmatprep.subr.bf16.mxu1 %v6154_v30  ;;  %v6224_v29 = vld [vmem:[#allocation2 + $0xb08] ss:$16 sps:$4 sm:$0xff]   ;;  %v6229_v30 = vld [vmem:[#allocation2 + $0xb24] ss:$16 sps:$4 sm:$0xff]   ;;  %v6287_v21 = vld [vmem:[#allocation2 + $0xc60] ss:$16 sps:$4 sm:$0xff]  }
 0x175   : > { %3133 = vmatpush1.bf16.msra.mxu0 %v6149_v31  ;;  %3215 = vmatpush1.bf16.msra.mxu1 %v6152_v33  ;;  %v6232_v31 = vld [vmem:[#allocation2 + $0xb2c] ss:$16 sps:$4 sm:$0xff]   ;;  %v6227_v33 = vld [vmem:[#allocation2 + $0xb20] ss:$16 sps:$4 sm:$0xff]  }
 0x176   : > { %3134 = vmatprep.subr.bf16.mxu0 %v6157_v34  ;;  %3216 = vmatprep.subr.bf16.mxu1 %v6160_v35  ;;  %v6230_v34 = vld [vmem:[#allocation2 + $0xb28] ss:$16 sps:$4 sm:$0xff]   ;;  %v6235_v35 = vld [vmem:[#allocation2 + $0xb44] ss:$16 sps:$4 sm:$0xff]  }
 0x179   : > { %3135 = vmatpush1.bf16.msra.mxu0 %v6155_v36  ;;  %3217 = vmatpush1.bf16.msra.mxu1 %v6158_v37  ;;  %v6238_v36 = vld [vmem:[#allocation2 + $0xb4c] ss:$16 sps:$4 sm:$0xff]   ;;  %v6233_v37 = vld [vmem:[#allocation2 + $0xb40] ss:$16 sps:$4 sm:$0xff]  }
 0x17a   : > { %3136 = vmatprep.subr.bf16.mxu0 %v6163_v38  ;;  %3218 = vmatprep.subr.bf16.mxu1 %v6166_v39  ;;  %v6236_v38 = vld [vmem:[#allocation2 + $0xb48] ss:$16 sps:$4 sm:$0xff]   ;;  %v6241_v39 = vld [vmem:[#allocation2 + $0xb64] ss:$16 sps:$4 sm:$0xff]  }
 0x17d   : > { %3137 = vmatpush1.bf16.msra.mxu0 %v6161_v40  ;;  %3219 = vmatpush1.bf16.msra.mxu1 %v6164_v41  ;;  %v6244_v40 = vld [vmem:[#allocation2 + $0xb6c] ss:$16 sps:$4 sm:$0xff]   ;;  %v6239_v41 = vld [vmem:[#allocation2 + $0xb60] ss:$16 sps:$4 sm:$0xff]  }
 0x17e   : > { %3138 = vmatprep.subr.bf16.mxu0 %v6169_v42  ;;  %3220 = vmatprep.subr.bf16.mxu1 %v6172_v43  ;;  %v6242_v42 = vld [vmem:[#allocation2 + $0xb68] ss:$16 sps:$4 sm:$0xff]   ;;  %v6247_v43 = vld [vmem:[#allocation2 + $0xb84] ss:$16 sps:$4 sm:$0xff]  }
 0x181   : > { %3139 = vmatpush1.bf16.msra.mxu0 %v6167_v45  ;;  %3221 = vmatpush1.bf16.msra.mxu1 %v6170_v46  ;;  %v6250_v45 = vld [vmem:[#allocation2 + $0xb8c] ss:$16 sps:$4 sm:$0xff]   ;;  %v6245_v46 = vld [vmem:[#allocation2 + $0xb80] ss:$16 sps:$4 sm:$0xff]  }
 0x182   : > { %3140 = vmatprep.subr.bf16.mxu0 %v6175_v47  ;;  %3222 = vmatprep.subr.bf16.mxu1 %v6178_v49  ;;  %v6248_v47 = vld [vmem:[#allocation2 + $0xb88] ss:$16 sps:$4 sm:$0xff]   ;;  %v6253_v49 = vld [vmem:[#allocation2 + $0xba4] ss:$16 sps:$4 sm:$0xff]  }
 0x185   : > { %3141 = vmatpush1.bf16.msra.mxu0 %v6173_v50  ;;  %3223 = vmatpush1.bf16.msra.mxu1 %v6176_v51  ;;  %v6256_v50 = vld [vmem:[#allocation2 + $0xbac] ss:$16 sps:$4 sm:$0xff]   ;;  %v6251_v51 = vld [vmem:[#allocation2 + $0xba0] ss:$16 sps:$4 sm:$0xff]  }
 0x186   : > { %3142 = vmatprep.subr.bf16.mxu0 %v6181_v52  ;;  %3224 = vmatprep.subr.bf16.mxu1 %v6184_v53  ;;  %v6254_v52 = vld [vmem:[#allocation2 + $0xba8] ss:$16 sps:$4 sm:$0xff]   ;;  %v6259_v53 = vld [vmem:[#allocation2 + $0xbc4] ss:$16 sps:$4 sm:$0xff]  }
 0x189   : > { %3143 = vmatpush1.bf16.msra.mxu0 %v6179_v54  ;;  %3225 = vmatpush1.bf16.msra.mxu1 %v6182_v55  ;;  %v6262_v54 = vld [vmem:[#allocation2 + $0xbcc] ss:$16 sps:$4 sm:$0xff]   ;;  %v7168_v55 = vld [vmem:[%s7090_s24 + $0x8] ss:$0 sps:$4 sm:$0x77]  }
 0x18a   : > { %3144 = vmatprep.subr.bf16.mxu0 %v6187_v57  ;;  %3226 = vmatprep.subr.bf16.mxu1 %v6190_v58  ;;  %v2637_v57 = vshll.u32 %v7168_v55, 16  ;;  %v6257_v58 = vld [vmem:[#allocation2 + $0xbc0] ss:$16 sps:$4 sm:$0xff]  }
 0x18d   : > { %3145 = vmatpush1.bf16.msra.mxu0 %v6185_v59  ;;  %3227 = vmatpush1.bf16.msra.mxu1 %v6188_v60  ;;  %v6260_v59 = vld [vmem:[#allocation2 + $0xbc8] ss:$16 sps:$4 sm:$0xff]   ;;  %v6265_v60 = vld [vmem:[#allocation2 + $0xbe4] ss:$16 sps:$4 sm:$0xff]  }
 0x18e   : > { %3146 = vmatprep.subr.bf16.mxu0 %v6193_v61  ;;  %3228 = vmatprep.subr.bf16.mxu1 %v6196_v62  ;;  %v6268_v61 = vld [vmem:[#allocation2 + $0xbec] ss:$16 sps:$4 sm:$0xff]   ;;  %v2635_v62 = vshrl.u32 %v7168_v55, 16 }
 0x191   : > { %3147 = vmatpush1.bf16.msra.mxu0 %v6191_v63  ;;  %3229 = vmatpush1.bf16.msra.mxu1 %v6194_v0  ;;  %v2639_v63 = vrot.slane %v2637_v57, 1  ;;  %v6263_v0 = vld [vmem:[#allocation2 + $0xbe0] ss:$16 sps:$4 sm:$0xff]   ;;  %v6332_v57 = vld [vmem:[#allocation2 + $0xd48] ss:$16 sps:$4 sm:$0xff]  }
 0x192   : > { %3148 = vmatprep.subr.bf16.mxu0 %v6199_v1  ;;  %3230 = vmatprep.subr.bf16.mxu1 %v6202_v2  ;;  %v6266_v1 = vld [vmem:[#allocation2 + $0xbe8] ss:$16 sps:$4 sm:$0xff]   ;;  %v6271_v2 = vld [vmem:[#allocation2 + $0xc04] ss:$16 sps:$4 sm:$0xff]  }
 0x195   : > { %3149 = vmatpush1.bf16.msra.mxu0 %v6197_v3  ;;  %3231 = vmatpush1.bf16.msra.mxu1 %v6200_v4  ;;  %v6274_v3 = vld [vmem:[#allocation2 + $0xc0c] ss:$16 sps:$4 sm:$0xff]   ;;  %v7172_v4 = vor.u32 %v2639_v63, %v2635_v62  ;;  %v6343_v62 = vld [vmem:[#allocation2 + $0xd84] ss:$16 sps:$4 sm:$0xff]  }
 0x196   : > { %3150 = vmatprep.subr.bf16.mxu0 %v6205_v6  ;;  %3232 = vmatprep.subr.bf16.mxu1 %v6208_v7  ;;  %v6269_v6 = vld [vmem:[#allocation2 + $0xc00] ss:$16 sps:$4 sm:$0xff]   ;;  %v6272_v7 = vld [vmem:[#allocation2 + $0xc08] ss:$16 sps:$4 sm:$0xff]   ;;  %v6346_v63 = vld [vmem:[#allocation2 + $0xd8c] ss:$16 sps:$4 sm:$0xff]  }
 0x199   : > { %3151 = vmatpush1.bf16.msra.mxu0 %v6203_v8  ;;  %3233 = vmatpush1.bf16.msra.mxu1 %v6206_v9  ;;  %v6277_v8 = vld [vmem:[#allocation2 + $0xc24] ss:$16 sps:$4 sm:$0xff]   ;;  %v6280_v9 = vld [vmem:[#allocation2 + $0xc2c] ss:$16 sps:$4 sm:$0xff]  }
 0x19a   : > { %3152 = vmatprep.subr.bf16.mxu0 %v6211_v10  ;;  %3234 = vmatprep.subr.bf16.mxu1 %v6214_v12  ;;  %v7175_v10 = vrot.slane %v7116_v56, 1  ;;  %v6275_v12 = vld [vmem:[#allocation2 + $0xc20] ss:$16 sps:$4 sm:$0xff]  }
 0x19b   : > { %v6281_v56 = vld [vmem:[#allocation2 + $0xc40] ss:$16 sps:$4 sm:$0xff]  }
 0x19d   : > { %3153 = vmatpush1.bf16.msra.mxu0 %v6209_v20  ;;  %3235 = vmatpush1.bf16.msra.mxu1 %v6212_v15  ;;  %v6283_v20 = vld [vmem:[#allocation2 + $0xc44] ss:$16 sps:$4 sm:$0xff]   ;;  %v6286_v15 = vld [vmem:[#allocation2 + $0xc4c] ss:$16 sps:$4 sm:$0xff]  }
 0x19e   : > { %3154 = vmatprep.subr.bf16.mxu0 %v6217_v17  ;;  %3236 = vmatprep.subr.bf16.mxu1 %v6220_v18  ;;  %v6284_v17 = vld [vmem:[#allocation2 + $0xc48] ss:$16 sps:$4 sm:$0xff]   ;;  %v6289_v18 = vld [vmem:[#allocation2 + $0xc64] ss:$16 sps:$4 sm:$0xff]  }
 0x1a1   : > { %3155 = vmatpush1.bf16.msra.mxu0 %v6215_v22  ;;  %3237 = vmatpush1.bf16.msra.mxu1 %v6218_v23  ;;  %v6290_v22 = vld [vmem:[#allocation2 + $0xc68] ss:$16 sps:$4 sm:$0xff]   ;;  %v6295_v23 = vld [vmem:[#allocation2 + $0xc84] ss:$16 sps:$4 sm:$0xff]  }
 0x1a2   : > { %3165 = vmatprep.subr.bf16.mxu0 %v6223_v24  ;;  %3247 = vmatprep.subr.bf16.mxu1 %v6226_v26  ;;  %v6298_v24 = vld [vmem:[#allocation2 + $0xc8c] ss:$16 sps:$4 sm:$0xff]   ;;  %v6293_v26 = vld [vmem:[#allocation2 + $0xc80] ss:$16 sps:$4 sm:$0xff]  }
 0x1a4   : > { %3157 = vmatmul.mubr.bf16.vlgmr.msra.gmra.mrb[0].mxu0 %v7161_v27  ;;  %3239 = vmatmul.mubr.bf16.vlgmr.msra.gmra.mrb[0].mxu1 %v7161_v27 }
 0x1a5   : > { %3166 = vmatpush1.bf16.msra.mxu0 %v6221_v28  ;;  %3248 = vmatpush1.bf16.msra.mxu1 %v6224_v29  ;;  %v6296_v28 = vld [vmem:[#allocation2 + $0xc88] ss:$16 sps:$4 sm:$0xff]   ;;  %v6301_v29 = vld [vmem:[#allocation2 + $0xca4] ss:$16 sps:$4 sm:$0xff]  }
 0x1a6   : > { %3167 = vmatprep.subr.bf16.mxu0 %v6229_v30  ;;  %3249 = vmatprep.subr.bf16.mxu1 %v6232_v31  ;;  %v6304_v30 = vld [vmem:[#allocation2 + $0xcac] ss:$16 sps:$4 sm:$0xff]   ;;  %v6299_v31 = vld [vmem:[#allocation2 + $0xca0] ss:$16 sps:$4 sm:$0xff]  }
 0x1a7   : > { %3197 = vmatprep.mubr.bf16.mxu0 %v6972_v13  ;;  %3279 = vmatprep.mubr.bf16.mxu1 %v6972_v13 }
 0x1a9   : > { %3168 = vmatpush1.bf16.msra.mxu0 %v6227_v33  ;;  %3250 = vmatpush1.bf16.msra.mxu1 %v6230_v34  ;;  %v6302_v33 = vld [vmem:[#allocation2 + $0xca8] ss:$16 sps:$4 sm:$0xff]   ;;  %v6307_v34 = vld [vmem:[#allocation2 + $0xcc4] ss:$16 sps:$4 sm:$0xff]  }
 0x1aa   : > { %3169 = vmatprep.subr.bf16.mxu0 %v6235_v35  ;;  %3251 = vmatprep.subr.bf16.mxu1 %v6238_v36  ;;  %v6310_v35 = vld [vmem:[#allocation2 + $0xccc] ss:$16 sps:$4 sm:$0xff]   ;;  %v6305_v36 = vld [vmem:[#allocation2 + $0xcc0] ss:$16 sps:$4 sm:$0xff]  }
 0x1ad   : > { %3170 = vmatpush1.bf16.msra.mxu0 %v6233_v37  ;;  %3252 = vmatpush1.bf16.msra.mxu1 %v6236_v38  ;;  %v6308_v37 = vld [vmem:[#allocation2 + $0xcc8] ss:$16 sps:$4 sm:$0xff]   ;;  %v6313_v38 = vld [vmem:[#allocation2 + $0xce4] ss:$16 sps:$4 sm:$0xff]  }
 0x1ae   : > { %3171 = vmatprep.subr.bf16.mxu0 %v6241_v39  ;;  %3253 = vmatprep.subr.bf16.mxu1 %v6244_v40  ;;  %v6316_v39 = vld [vmem:[#allocation2 + $0xcec] ss:$16 sps:$4 sm:$0xff]   ;;  %v6311_v40 = vld [vmem:[#allocation2 + $0xce0] ss:$16 sps:$4 sm:$0xff]  }
 0x1b1   : > { %3172 = vmatpush1.bf16.msra.mxu0 %v6239_v41  ;;  %3254 = vmatpush1.bf16.msra.mxu1 %v6242_v42  ;;  %v6314_v41 = vld [vmem:[#allocation2 + $0xce8] ss:$16 sps:$4 sm:$0xff]   ;;  %v6319_v42 = vld [vmem:[#allocation2 + $0xd04] ss:$16 sps:$4 sm:$0xff]  }
 0x1b2   : > { %3173 = vmatprep.subr.bf16.mxu0 %v6247_v43  ;;  %3255 = vmatprep.subr.bf16.mxu1 %v6250_v45  ;;  %v6322_v43 = vld [vmem:[#allocation2 + $0xd0c] ss:$16 sps:$4 sm:$0xff]   ;;  %v6317_v45 = vld [vmem:[#allocation2 + $0xd00] ss:$16 sps:$4 sm:$0xff]  }
 0x1b5   : > { %3174 = vmatpush1.bf16.msra.mxu0 %v6245_v46  ;;  %3256 = vmatpush1.bf16.msra.mxu1 %v6248_v47  ;;  %v6320_v46 = vld [vmem:[#allocation2 + $0xd08] ss:$16 sps:$4 sm:$0xff]   ;;  %v6325_v47 = vld [vmem:[#allocation2 + $0xd24] ss:$16 sps:$4 sm:$0xff]  }
 0x1b6   : > { %3175 = vmatprep.subr.bf16.mxu0 %v6253_v49  ;;  %3257 = vmatprep.subr.bf16.mxu1 %v6256_v50  ;;  %v6328_v49 = vld [vmem:[#allocation2 + $0xd2c] ss:$16 sps:$4 sm:$0xff]   ;;  %v6323_v50 = vld [vmem:[#allocation2 + $0xd20] ss:$16 sps:$4 sm:$0xff]  }
 0x1b9   : > { %3176 = vmatpush1.bf16.msra.mxu0 %v6251_v51  ;;  %3258 = vmatpush1.bf16.msra.mxu1 %v6254_v52  ;;  %v6326_v51 = vld [vmem:[#allocation2 + $0xd28] ss:$16 sps:$4 sm:$0xff]   ;;  %v6331_v52 = vld [vmem:[#allocation2 + $0xd44] ss:$16 sps:$4 sm:$0xff]  }
 0x1ba   : > { %3177 = vmatprep.subr.bf16.mxu0 %v6259_v53  ;;  %3259 = vmatprep.subr.bf16.mxu1 %v6262_v54  ;;  %v6334_v53 = vld [vmem:[#allocation2 + $0xd4c] ss:$16 sps:$4 sm:$0xff]   ;;  %v6329_v54 = vld [vmem:[#allocation2 + $0xd40] ss:$16 sps:$4 sm:$0xff]  }
 0x1bd   : > { %3178 = vmatpush1.bf16.msra.mxu0 %v6257_v58  ;;  %3260 = vmatpush1.bf16.msra.mxu1 %v6260_v59  ;;  %v6337_v58 = vld [vmem:[#allocation2 + $0xd64] ss:$16 sps:$4 sm:$0xff]   ;;  %v6340_v59 = vld [vmem:[#allocation2 + $0xd6c] ss:$16 sps:$4 sm:$0xff]  }
 0x1be   : > { %3179 = vmatprep.subr.bf16.mxu0 %v6265_v60  ;;  %3261 = vmatprep.subr.bf16.mxu1 %v6268_v61  ;;  %v6335_v60 = vld [vmem:[#allocation2 + $0xd60] ss:$16 sps:$4 sm:$0xff]   ;;  %v6338_v61 = vld [vmem:[#allocation2 + $0xd68] ss:$16 sps:$4 sm:$0xff]  }
 0x1c1   : > { %3180 = vmatpush1.bf16.msra.mxu0 %v6263_v0  ;;  %3262 = vmatpush1.bf16.msra.mxu1 %v6266_v1  ;;  %v6341_v0 = vld [vmem:[#allocation2 + $0xd80] ss:$16 sps:$4 sm:$0xff]   ;;  %v6344_v1 = vld [vmem:[#allocation2 + $0xd88] ss:$16 sps:$4 sm:$0xff]  }
 0x1c2   : > { %3875 = vmatprep.subr.bf16.mxu0 %v6271_v2  ;;  %3957 = vmatprep.subr.bf16.mxu1 %v6274_v3  ;;  %v6349_v2 = vld [vmem:[#allocation2 + $0xda4] ss:$16 sps:$4 sm:$0xff]   ;;  %v6352_v3 = vld [vmem:[#allocation2 + $0xdac] ss:$16 sps:$4 sm:$0xff]  }
 0x1c4   : > { %3198 = vmatmul.mubr.bf16.vlgmr.msra.gmra.mrb[0].mxu0 %v7172_v4  ;;  %3280 = vmatmul.mubr.bf16.vlgmr.msra.gmra.mrb[0].mxu1 %v7172_v4 }
 0x1c5   : > { %3876 = vmatpush1.bf16.msra.mxu0 %v6269_v6  ;;  %3958 = vmatpush1.bf16.msra.mxu1 %v6272_v7  ;;  %v6347_v6 = vld [vmem:[#allocation2 + $0xda0] ss:$16 sps:$4 sm:$0xff]   ;;  %v6350_v7 = vld [vmem:[#allocation2 + $0xda8] ss:$16 sps:$4 sm:$0xff]  }
 0x1c6   : > { %3877 = vmatprep.subr.bf16.mxu0 %v6277_v8  ;;  %3959 = vmatprep.subr.bf16.mxu1 %v6280_v9  ;;  %v6355_v8 = vld [vmem:[#allocation2 + $0xdc4] ss:$16 sps:$4 sm:$0xff]   ;;  %v6358_v9 = vld [vmem:[#allocation2 + $0xdcc] ss:$16 sps:$4 sm:$0xff]  }
 0x1c7   : > { %3907 = vmatprep.mubr.bf16.mxu0 %v7175_v10  ;;  %3989 = vmatprep.mubr.bf16.mxu1 %v7175_v10 }
 0x1c9   : > { %3878 = vmatpush1.bf16.msra.mxu0 %v6275_v12  ;;  %3960 = vmatpush1.bf16.msra.mxu1 %v6278_v14  ;;  %v6353_v12 = vld [vmem:[#allocation2 + $0xdc0] ss:$16 sps:$4 sm:$0xff]   ;;  %v6356_v14 = vld [vmem:[#allocation2 + $0xdc8] ss:$16 sps:$4 sm:$0xff]  }
 0x1ca   : > { %3879 = vmatprep.subr.bf16.mxu0 %v6283_v20  ;;  %3961 = vmatprep.subr.bf16.mxu1 %v6286_v15  ;;  %v6361_v20 = vld [vmem:[#allocation2 + $0xde4] ss:$16 sps:$4 sm:$0xff]   ;;  %v6364_v15 = vld [vmem:[#allocation2 + $0xdec] ss:$16 sps:$4 sm:$0xff]  }
 0x1cd   : > { %3880 = vmatpush1.bf16.msra.mxu0 %v6281_v56  ;;  %3962 = vmatpush1.bf16.msra.mxu1 %v6284_v17  ;;  %v6359_v56 = vld [vmem:[#allocation2 + $0xde0] ss:$16 sps:$4 sm:$0xff]   ;;  %v6362_v17 = vld [vmem:[#allocation2 + $0xde8] ss:$16 sps:$4 sm:$0xff]  }
 0x1ce   : > { %3881 = vmatprep.subr.bf16.mxu0 %v6289_v18  ;;  %3963 = vmatprep.subr.bf16.mxu1 %v6292_v19  ;;  %v6367_v18 = vld [vmem:[#allocation2 + $0xe04] ss:$16 sps:$4 sm:$0xff]   ;;  %v6370_v19 = vld [vmem:[#allocation2 + $0xe0c] ss:$16 sps:$4 sm:$0xff]  }
 0x1d1   : > { %3882 = vmatpush1.bf16.msra.mxu0 %v6287_v21  ;;  %3964 = vmatpush1.bf16.msra.mxu1 %v6290_v22  ;;  %v7182_v21 = vrot.slane %v7122_v44, 1  ;;  %v6365_v22 = vld [vmem:[#allocation2 + $0xe00] ss:$16 sps:$4 sm:$0xff]   ;;  %v6379_v44 = vld [vmem:[#allocation2 + $0xe44] ss:$16 sps:$4 sm:$0xff]  }
 0x1d2   : > { %3883 = vmatprep.subr.bf16.mxu0 %v6295_v23  ;;  %3965 = vmatprep.subr.bf16.mxu1 %v6298_v24  ;;  %v6368_v23 = vld [vmem:[#allocation2 + $0xe08] ss:$16 sps:$4 sm:$0xff]   ;;  %v6373_v24 = vld [vmem:[#allocation2 + $0xe24] ss:$16 sps:$4 sm:$0xff]  }
 0x1d5   : > { %3884 = vmatpush1.bf16.msra.mxu0 %v6293_v26  ;;  %3966 = vmatpush1.bf16.msra.mxu1 %v6296_v28  ;;  %v6376_v26 = vld [vmem:[#allocation2 + $0xe2c] ss:$16 sps:$4 sm:$0xff]   ;;  %v6371_v28 = vld [vmem:[#allocation2 + $0xe20] ss:$16 sps:$4 sm:$0xff]  }
 0x1d6   : > { %3885 = vmatprep.subr.bf16.mxu0 %v6301_v29  ;;  %3967 = vmatprep.subr.bf16.mxu1 %v6304_v30  ;;  %v6374_v29 = vld [vmem:[#allocation2 + $0xe28] ss:$16 sps:$4 sm:$0xff]   ;;  %v6382_v30 = vld [vmem:[#allocation2 + $0xe4c] ss:$16 sps:$4 sm:$0xff]  }
 0x1d9   : > { %3886 = vmatpush1.bf16.msra.mxu0 %v6299_v31  ;;  %3968 = vmatpush1.bf16.msra.mxu1 %v6302_v33  ;;  %v6377_v31 = vld [vmem:[#allocation2 + $0xe40] ss:$16 sps:$4 sm:$0xff]   ;;  %v6380_v33 = vld [vmem:[#allocation2 + $0xe48] ss:$16 sps:$4 sm:$0xff]  }
 0x1da   : > { %3887 = vmatprep.subr.bf16.mxu0 %v6307_v34  ;;  %3969 = vmatprep.subr.bf16.mxu1 %v6310_v35  ;;  %v6385_v34 = vld [vmem:[#allocation2 + $0xe64] ss:$16 sps:$4 sm:$0xff]   ;;  %v6388_v35 = vld [vmem:[#allocation2 + $0xe6c] ss:$16 sps:$4 sm:$0xff]  }
 0x1dd   : > { %3888 = vmatpush1.bf16.msra.mxu0 %v6305_v36  ;;  %3970 = vmatpush1.bf16.msra.mxu1 %v6308_v37  ;;  %v6383_v36 = vld [vmem:[#allocation2 + $0xe60] ss:$16 sps:$4 sm:$0xff]   ;;  %v6386_v37 = vld [vmem:[#allocation2 + $0xe68] ss:$16 sps:$4 sm:$0xff]  }
 0x1de   : > { %3889 = vmatprep.subr.bf16.mxu0 %v6313_v38  ;;  %3971 = vmatprep.subr.bf16.mxu1 %v6316_v39  ;;  %v6391_v38 = vld [vmem:[#allocation2 + $0xe84] ss:$16 sps:$4 sm:$0xff]   ;;  %v6394_v39 = vld [vmem:[#allocation2 + $0xe8c] ss:$16 sps:$4 sm:$0xff]  }
 0x1e1   : > { %3890 = vmatpush1.bf16.msra.mxu0 %v6311_v40  ;;  %3972 = vmatpush1.bf16.msra.mxu1 %v6314_v41  ;;  %v6389_v40 = vld [vmem:[#allocation2 + $0xe80] ss:$16 sps:$4 sm:$0xff]   ;;  %v6392_v41 = vld [vmem:[#allocation2 + $0xe88] ss:$16 sps:$4 sm:$0xff]  }
 0x1e2   : > { %3891 = vmatprep.subr.bf16.mxu0 %v6319_v42  ;;  %3973 = vmatprep.subr.bf16.mxu1 %v6322_v43  ;;  %v6397_v42 = vld [vmem:[#allocation2 + $0xea4] ss:$16 sps:$4 sm:$0xff]   ;;  %v6400_v43 = vld [vmem:[#allocation2 + $0xeac] ss:$16 sps:$4 sm:$0xff]  }
 0x1e5   : > { %3892 = vmatpush1.bf16.msra.mxu0 %v6317_v45  ;;  %3974 = vmatpush1.bf16.msra.mxu1 %v6320_v46  ;;  %v6395_v45 = vld [vmem:[#allocation2 + $0xea0] ss:$16 sps:$4 sm:$0xff]   ;;  %v6398_v46 = vld [vmem:[#allocation2 + $0xea8] ss:$16 sps:$4 sm:$0xff]  }
 0x1e6   : > { %3893 = vmatprep.subr.bf16.mxu0 %v6325_v47  ;;  %3975 = vmatprep.subr.bf16.mxu1 %v6328_v49  ;;  %v6403_v47 = vld [vmem:[#allocation2 + $0xec4] ss:$16 sps:$4 sm:$0xff]   ;;  %v6406_v49 = vld [vmem:[#allocation2 + $0xecc] ss:$16 sps:$4 sm:$0xff]  }
 0x1e9   : > { %3894 = vmatpush1.bf16.msra.mxu0 %v6323_v50  ;;  %3976 = vmatpush1.bf16.msra.mxu1 %v6326_v51  ;;  %v6401_v50 = vld [vmem:[#allocation2 + $0xec0] ss:$16 sps:$4 sm:$0xff]   ;;  %v6404_v51 = vld [vmem:[#allocation2 + $0xec8] ss:$16 sps:$4 sm:$0xff]  }
 0x1ea   : > { %3895 = vmatprep.subr.bf16.mxu0 %v6331_v52  ;;  %3977 = vmatprep.subr.bf16.mxu1 %v6334_v53  ;;  %v6409_v52 = vld [vmem:[#allocation2 + $0xee4] ss:$16 sps:$4 sm:$0xff]   ;;  %v6412_v53 = vld [vmem:[#allocation2 + $0xeec] ss:$16 sps:$4 sm:$0xff]  }
 0x1ed   : > { %3896 = vmatpush1.bf16.msra.mxu0 %v6329_v54  ;;  %3978 = vmatpush1.bf16.msra.mxu1 %v6332_v57  ;;  %v6407_v54 = vld [vmem:[#allocation2 + $0xee0] ss:$16 sps:$4 sm:$0xff]   ;;  %v6410_v57 = vld [vmem:[#allocation2 + $0xee8] ss:$16 sps:$4 sm:$0xff]  }
 0x1ee   : > { %3897 = vmatprep.subr.bf16.mxu0 %v6337_v58  ;;  %3979 = vmatprep.subr.bf16.mxu1 %v6340_v59  ;;  %v6414_v58 = vld [vmem:[%s7109_s27 + $0x8] ss:$0 sps:$4 sm:$0x77]  }
 0x1ef   : > { %v7189_v59 = vrot.slane %v6414_v58, 1  ;;  %v6466_v58 = vld [vmem:[#allocation2 + $0x488] ss:$16 sps:$4 sm:$0xff]  }
 0x1f1   : > { %3898 = vmatpush1.bf16.msra.mxu0 %v6335_v60  ;;  %3980 = vmatpush1.bf16.msra.mxu1 %v6338_v61  ;;  %v6415_v60 = vld [vmem:[#allocation2 + $0x304] ss:$16 sps:$4 sm:$0xff]   ;;  %v6416_v61 = vld [vmem:[#allocation2 + $0x30c] ss:$16 sps:$4 sm:$0xff]  }
 0x1f2   : > { %3899 = vmatprep.subr.bf16.mxu0 %v6343_v62  ;;  %3981 = vmatprep.subr.bf16.mxu1 %v6346_v63  ;;  %v6417_v62 = vld [vmem:[#allocation2 + $0x300] ss:$16 sps:$4 sm:$0xff]   ;;  %v6418_v63 = vld [vmem:[#allocation2 + $0x308] ss:$16 sps:$4 sm:$0xff]  }
 0x1f5   : > { %3900 = vmatpush1.bf16.msra.mxu0 %v6341_v0  ;;  %3982 = vmatpush1.bf16.msra.mxu1 %v6344_v1  ;;  %v6419_v0 = vld [vmem:[#allocation2 + $0x324] ss:$16 sps:$4 sm:$0xff]   ;;  %v6420_v1 = vld [vmem:[#allocation2 + $0x32c] ss:$16 sps:$4 sm:$0xff]  }
 0x1f6   : > { %3901 = vmatprep.subr.bf16.mxu0 %v6349_v2  ;;  %3983 = vmatprep.subr.bf16.mxu1 %v6352_v3  ;;  %v6421_v2 = vld [vmem:[#allocation2 + $0x320] ss:$16 sps:$4 sm:$0xff]   ;;  %v6422_v3 = vld [vmem:[#allocation2 + $0x328] ss:$16 sps:$4 sm:$0xff]  }
 0x1f9   : > { %3902 = vmatpush1.bf16.msra.mxu0 %v6347_v6  ;;  %3984 = vmatpush1.bf16.msra.mxu1 %v6350_v7  ;;  %v6423_v6 = vld [vmem:[#allocation2 + $0x344] ss:$16 sps:$4 sm:$0xff]   ;;  %v6424_v7 = vld [vmem:[#allocation2 + $0x34c] ss:$16 sps:$4 sm:$0xff]  }
 0x1fa   : > { %3903 = vmatprep.subr.bf16.mxu0 %v6355_v8  ;;  %3985 = vmatprep.subr.bf16.mxu1 %v6358_v9  ;;  %v6425_v8 = vld [vmem:[#allocation2 + $0x340] ss:$16 sps:$4 sm:$0xff]   ;;  %v6426_v9 = vld [vmem:[#allocation2 + $0x348] ss:$16 sps:$4 sm:$0xff]  }
 0x1fd   : > { %3904 = vmatpush1.bf16.msra.mxu0 %v6353_v12  ;;  %3986 = vmatpush1.bf16.msra.mxu1 %v6356_v14  ;;  %v6427_v12 = vld [vmem:[#allocation2 + $0x364] ss:$16 sps:$4 sm:$0xff]   ;;  %v6428_v14 = vld [vmem:[#allocation2 + $0x36c] ss:$16 sps:$4 sm:$0xff]  }
 0x1fe   : > { %3905 = vmatprep.subr.bf16.mxu0 %v6361_v20  ;;  %3987 = vmatprep.subr.bf16.mxu1 %v6364_v15  ;;  %v6429_v20 = vld [vmem:[#allocation2 + $0x360] ss:$16 sps:$4 sm:$0xff]   ;;  %v6430_v15 = vld [vmem:[#allocation2 + $0x368] ss:$16 sps:$4 sm:$0xff]  }
 0x201   : > { %3906 = vmatpush1.bf16.msra.mxu0 %v6359_v56  ;;  %3988 = vmatpush1.bf16.msra.mxu1 %v6362_v17  ;;  %v6432_v56 = vld [vmem:[#allocation2 + $0x38c] ss:$16 sps:$4 sm:$0xff]   ;;  %v6433_v17 = vld [vmem:[#allocation2 + $0x380] ss:$16 sps:$4 sm:$0xff]  }
 0x202   : > { %3916 = vmatprep.subr.bf16.mxu0 %v6367_v18  ;;  %3998 = vmatprep.subr.bf16.mxu1 %v6370_v19  ;;  %v6434_v18 = vld [vmem:[#allocation2 + $0x388] ss:$16 sps:$4 sm:$0xff]   ;;  %v6435_v19 = vld [vmem:[#allocation2 + $0x3a4] ss:$16 sps:$4 sm:$0xff]  }
 0x204   : > { %3908 = vmatmul.mubr.bf16.vlgmr.msra.gmra.mrb[0].mxu0 %v7182_v21  ;;  %3990 = vmatmul.mubr.bf16.vlgmr.msra.gmra.mrb[0].mxu1 %v7182_v21 }
 0x205   : > { %3917 = vmatpush1.bf16.msra.mxu0 %v6365_v22  ;;  %3999 = vmatpush1.bf16.msra.mxu1 %v6368_v23  ;;  %v6436_v22 = vld [vmem:[#allocation2 + $0x3ac] ss:$16 sps:$4 sm:$0xff]   ;;  %v6437_v23 = vld [vmem:[#allocation2 + $0x3a0] ss:$16 sps:$4 sm:$0xff]  }
 0x206   : > { %3918 = vmatprep.subr.bf16.mxu0 %v6373_v24  ;;  %4000 = vmatprep.subr.bf16.mxu1 %v6376_v26  ;;  %v6438_v24 = vld [vmem:[#allocation2 + $0x3a8] ss:$16 sps:$4 sm:$0xff]   ;;  %v6439_v26 = vld [vmem:[#allocation2 + $0x3c4] ss:$16 sps:$4 sm:$0xff]  }
 0x207   : > { %3948 = vmatprep.mubr.bf16.mxu0 %v6972_v13  ;;  %4030 = vmatprep.mubr.bf16.mxu1 %v6972_v13 }
 0x209   : > { %3919 = vmatpush1.bf16.msra.mxu0 %v6371_v28  ;;  %4001 = vmatpush1.bf16.msra.mxu1 %v6374_v29  ;;  %v6440_v28 = vld [vmem:[#allocation2 + $0x3cc] ss:$16 sps:$4 sm:$0xff]   ;;  %v6441_v29 = vld [vmem:[#allocation2 + $0x3c0] ss:$16 sps:$4 sm:$0xff]  }
 0x20a   : > { %3920 = vmatprep.subr.bf16.mxu0 %v6379_v44  ;;  %4002 = vmatprep.subr.bf16.mxu1 %v6382_v30  ;;  %v6442_v44 = vld [vmem:[#allocation2 + $0x3c8] ss:$16 sps:$4 sm:$0xff]   ;;  %v6443_v30 = vld [vmem:[#allocation2 + $0x3e4] ss:$16 sps:$4 sm:$0xff]  }
 0x20d   : > { %3921 = vmatpush1.bf16.msra.mxu0 %v6377_v31  ;;  %4003 = vmatpush1.bf16.msra.mxu1 %v6380_v33  ;;  %v6444_v31 = vld [vmem:[#allocation2 + $0x3ec] ss:$16 sps:$4 sm:$0xff]   ;;  %v6445_v33 = vld [vmem:[#allocation2 + $0x3e0] ss:$16 sps:$4 sm:$0xff]  }
 0x20e   : > { %3922 = vmatprep.subr.bf16.mxu0 %v6385_v34  ;;  %4004 = vmatprep.subr.bf16.mxu1 %v6388_v35  ;;  %v6446_v34 = vld [vmem:[#allocation2 + $0x3e8] ss:$16 sps:$4 sm:$0xff]   ;;  %v6447_v35 = vld [vmem:[#allocation2 + $0x404] ss:$16 sps:$4 sm:$0xff]  }
 0x211   : > { %3923 = vmatpush1.bf16.msra.mxu0 %v6383_v36  ;;  %4005 = vmatpush1.bf16.msra.mxu1 %v6386_v37  ;;  %v6448_v36 = vld [vmem:[#allocation2 + $0x40c] ss:$16 sps:$4 sm:$0xff]   ;;  %v6449_v37 = vld [vmem:[#allocation2 + $0x400] ss:$16 sps:$4 sm:$0xff]  }
 0x212   : > { %3924 = vmatprep.subr.bf16.mxu0 %v6391_v38  ;;  %4006 = vmatprep.subr.bf16.mxu1 %v6394_v39  ;;  %v6450_v38 = vld [vmem:[#allocation2 + $0x408] ss:$16 sps:$4 sm:$0xff]   ;;  %v6451_v39 = vld [vmem:[#allocation2 + $0x424] ss:$16 sps:$4 sm:$0xff]  }
 0x215   : > { %3925 = vmatpush1.bf16.msra.mxu0 %v6389_v40  ;;  %4007 = vmatpush1.bf16.msra.mxu1 %v6392_v41  ;;  %v6452_v40 = vld [vmem:[#allocation2 + $0x42c] ss:$16 sps:$4 sm:$0xff]   ;;  %v6453_v41 = vld [vmem:[#allocation2 + $0x420] ss:$16 sps:$4 sm:$0xff]  }
 0x216   : > { %3926 = vmatprep.subr.bf16.mxu0 %v6397_v42  ;;  %4008 = vmatprep.subr.bf16.mxu1 %v6400_v43  ;;  %v6454_v42 = vld [vmem:[#allocation2 + $0x428] ss:$16 sps:$4 sm:$0xff]   ;;  %v6455_v43 = vld [vmem:[#allocation2 + $0x444] ss:$16 sps:$4 sm:$0xff]  }
 0x219   : > { %3927 = vmatpush1.bf16.msra.mxu0 %v6395_v45  ;;  %4009 = vmatpush1.bf16.msra.mxu1 %v6398_v46  ;;  %v6456_v45 = vld [vmem:[#allocation2 + $0x44c] ss:$16 sps:$4 sm:$0xff]   ;;  %v6457_v46 = vld [vmem:[#allocation2 + $0x440] ss:$16 sps:$4 sm:$0xff]  }
 0x21a   : > { %3928 = vmatprep.subr.bf16.mxu0 %v6403_v47  ;;  %4010 = vmatprep.subr.bf16.mxu1 %v6406_v49  ;;  %v6458_v47 = vld [vmem:[#allocation2 + $0x448] ss:$16 sps:$4 sm:$0xff]   ;;  %v6459_v49 = vld [vmem:[#allocation2 + $0x464] ss:$16 sps:$4 sm:$0xff]  }
 0x21d   : > { %3929 = vmatpush1.bf16.msra.mxu0 %v6401_v50  ;;  %4011 = vmatpush1.bf16.msra.mxu1 %v6404_v51  ;;  %v6460_v50 = vld [vmem:[#allocation2 + $0x46c] ss:$16 sps:$4 sm:$0xff]   ;;  %v6461_v51 = vld [vmem:[#allocation2 + $0x460] ss:$16 sps:$4 sm:$0xff]  }
 0x21e   : > { %3930 = vmatprep.subr.bf16.mxu0 %v6409_v52  ;;  %4012 = vmatprep.subr.bf16.mxu1 %v6412_v53  ;;  %v6462_v52 = vld [vmem:[#allocation2 + $0x468] ss:$16 sps:$4 sm:$0xff]   ;;  %v6463_v53 = vld [vmem:[#allocation2 + $0x484] ss:$16 sps:$4 sm:$0xff]  }
 0x221   : > { %3931 = vmatpush1.bf16.msra.mxu0 %v6407_v54  ;;  %4013 = vmatpush1.bf16.msra.mxu1 %v6410_v57  ;;  %v6464_v54 = vld [vmem:[#allocation2 + $0x48c] ss:$16 sps:$4 sm:$0xff]   ;;  %v6465_v57 = vld [vmem:[#allocation2 + $0x480] ss:$16 sps:$4 sm:$0xff]  }
 0x222   : > { %4043 = vmatprep.subr.bf16.mxu0 %v6415_v60  ;;  %4125 = vmatprep.subr.bf16.mxu1 %v6416_v61  ;;  %v6467_v60 = vld [vmem:[#allocation2 + $0x4a4] ss:$16 sps:$4 sm:$0xff]   ;;  %v6468_v61 = vld [vmem:[#allocation2 + $0x4ac] ss:$16 sps:$4 sm:$0xff]  }
 0x224   : > { %3949 = vmatmul.mubr.bf16.vlgmr.msra.gmra.mrb[0].mxu0 %v7189_v59  ;;  %4031 = vmatmul.mubr.bf16.vlgmr.msra.gmra.mrb[0].mxu1 %v7189_v59 }
 0x225   : > { %4044 = vmatpush1.bf16.msra.mxu0 %v6417_v62  ;;  %4126 = vmatpush1.bf16.msra.mxu1 %v6418_v63  ;;  %v6469_v62 = vld [vmem:[#allocation2 + $0x4a0] ss:$16 sps:$4 sm:$0xff]   ;;  %v6470_v63 = vld [vmem:[#allocation2 + $0x4a8] ss:$16 sps:$4 sm:$0xff]  }
 0x226   : > { %4045 = vmatprep.subr.bf16.mxu0 %v6419_v0  ;;  %4127 = vmatprep.subr.bf16.mxu1 %v6420_v1  ;;  %v6471_v0 = vld [vmem:[#allocation2 + $0x4c4] ss:$16 sps:$4 sm:$0xff]   ;;  %v6472_v1 = vld [vmem:[#allocation2 + $0x4cc] ss:$16 sps:$4 sm:$0xff]  }
 0x227   : > { %4075 = vmatprep.mubr.bf16.mxu0 %v7133_v25  ;;  %4157 = vmatprep.mubr.bf16.mxu1 %v7133_v25  ;;  %v6431_v25 = vld [vmem:[#allocation2 + $0x384] ss:$16 sps:$4 sm:$0xff]  }
 0x229   : > { %4046 = vmatpush1.bf16.msra.mxu0 %v6421_v2  ;;  %4128 = vmatpush1.bf16.msra.mxu1 %v6422_v3  ;;  %v6473_v2 = vld [vmem:[#allocation2 + $0x4c0] ss:$16 sps:$4 sm:$0xff]   ;;  %v6474_v3 = vld [vmem:[#allocation2 + $0x4c8] ss:$16 sps:$4 sm:$0xff]  }
 0x22a   : > { %4047 = vmatprep.subr.bf16.mxu0 %v6423_v6  ;;  %4129 = vmatprep.subr.bf16.mxu1 %v6424_v7  ;;  %v6475_v6 = vld [vmem:[#allocation2 + $0x4e4] ss:$16 sps:$4 sm:$0xff]   ;;  %v6476_v7 = vld [vmem:[#allocation2 + $0x4ec] ss:$16 sps:$4 sm:$0xff]  }
 0x22d   : > { %4048 = vmatpush1.bf16.msra.mxu0 %v6425_v8  ;;  %4130 = vmatpush1.bf16.msra.mxu1 %v6426_v9  ;;  %v6477_v8 = vld [vmem:[#allocation2 + $0x4e0] ss:$16 sps:$4 sm:$0xff]   ;;  %v6478_v9 = vld [vmem:[#allocation2 + $0x4e8] ss:$16 sps:$4 sm:$0xff]  }
 0x22e   : > { %4049 = vmatprep.subr.bf16.mxu0 %v6427_v12  ;;  %4131 = vmatprep.subr.bf16.mxu1 %v6428_v14  ;;  %v6479_v12 = vld [vmem:[#allocation2 + $0x504] ss:$16 sps:$4 sm:$0xff]   ;;  %v6480_v14 = vld [vmem:[#allocation2 + $0x50c] ss:$16 sps:$4 sm:$0xff]  }
 0x231   : > { %4050 = vmatpush1.bf16.msra.mxu0 %v6429_v20  ;;  %4132 = vmatpush1.bf16.msra.mxu1 %v6430_v15  ;;  %v6481_v20 = vld [vmem:[#allocation2 + $0x500] ss:$16 sps:$4 sm:$0xff]   ;;  %v6482_v15 = vld [vmem:[#allocation2 + $0x508] ss:$16 sps:$4 sm:$0xff]  }
 0x232   : > { %4051 = vmatprep.subr.bf16.mxu0 %v6431_v25  ;;  %4133 = vmatprep.subr.bf16.mxu1 %v6432_v56  ;;  %v6483_v25 = vld [vmem:[#allocation2 + $0x524] ss:$16 sps:$4 sm:$0xff]   ;;  %v6484_v56 = vld [vmem:[#allocation2 + $0x52c] ss:$16 sps:$4 sm:$0xff]  }
 0x235   : > { %4052 = vmatpush1.bf16.msra.mxu0 %v6433_v17  ;;  %4134 = vmatpush1.bf16.msra.mxu1 %v6434_v18  ;;  %v6485_v17 = vld [vmem:[#allocation2 + $0x520] ss:$16 sps:$4 sm:$0xff]   ;;  %v6486_v18 = vld [vmem:[#allocation2 + $0x528] ss:$16 sps:$4 sm:$0xff]  }
 0x236   : > { %4053 = vmatprep.subr.bf16.mxu0 %v6435_v19  ;;  %4135 = vmatprep.subr.bf16.mxu1 %v6436_v22  ;;  %v6487_v19 = vld [vmem:[#allocation2 + $0x544] ss:$16 sps:$4 sm:$0xff]   ;;  %v6488_v22 = vld [vmem:[#allocation2 + $0x54c] ss:$16 sps:$4 sm:$0xff]  }
 0x239   : > { %4054 = vmatpush1.bf16.msra.mxu0 %v6437_v23  ;;  %4136 = vmatpush1.bf16.msra.mxu1 %v6438_v24  ;;  %v6490_v23 = vld [vmem:[#allocation2 + $0x548] ss:$16 sps:$4 sm:$0xff]   ;;  %v6491_v24 = vld [vmem:[#allocation2 + $0x564] ss:$16 sps:$4 sm:$0xff]  }
 0x23a   : > { %4055 = vmatprep.subr.bf16.mxu0 %v6439_v26  ;;  %4137 = vmatprep.subr.bf16.mxu1 %v6440_v28  ;;  %v6492_v26 = vld [vmem:[#allocation2 + $0x56c] ss:$16 sps:$4 sm:$0xff]   ;;  %v6493_v28 = vld [vmem:[#allocation2 + $0x560] ss:$16 sps:$4 sm:$0xff]  }
 0x23d   : > { %4056 = vmatpush1.bf16.msra.mxu0 %v6441_v29  ;;  %4138 = vmatpush1.bf16.msra.mxu1 %v6442_v44  ;;  %v6494_v29 = vld [vmem:[#allocation2 + $0x568] ss:$16 sps:$4 sm:$0xff]   ;;  %v6495_v44 = vld [vmem:[#allocation2 + $0x584] ss:$16 sps:$4 sm:$0xff]  }
 0x23e   : > { %4057 = vmatprep.subr.bf16.mxu0 %v6443_v30  ;;  %4139 = vmatprep.subr.bf16.mxu1 %v6444_v31  ;;  %v6496_v30 = vld [vmem:[#allocation2 + $0x58c] ss:$16 sps:$4 sm:$0xff]   ;;  %v6497_v31 = vld [vmem:[#allocation2 + $0x580] ss:$16 sps:$4 sm:$0xff]  }
 0x241   : > { %4058 = vmatpush1.bf16.msra.mxu0 %v6445_v33  ;;  %4140 = vmatpush1.bf16.msra.mxu1 %v6446_v34  ;;  %v6498_v33 = vld [vmem:[#allocation2 + $0x588] ss:$16 sps:$4 sm:$0xff]   ;;  %v6499_v34 = vld [vmem:[#allocation2 + $0x5a4] ss:$16 sps:$4 sm:$0xff]  }
 0x242   : > { %4059 = vmatprep.subr.bf16.mxu0 %v6447_v35  ;;  %4141 = vmatprep.subr.bf16.mxu1 %v6448_v36  ;;  %v6500_v35 = vld [vmem:[#allocation2 + $0x5ac] ss:$16 sps:$4 sm:$0xff]   ;;  %v6501_v36 = vld [vmem:[#allocation2 + $0x5a0] ss:$16 sps:$4 sm:$0xff]  }
 0x245   : > { %4060 = vmatpush1.bf16.msra.mxu0 %v6449_v37  ;;  %4142 = vmatpush1.bf16.msra.mxu1 %v6450_v38  ;;  %v6502_v37 = vld [vmem:[#allocation2 + $0x5a8] ss:$16 sps:$4 sm:$0xff]   ;;  %v6503_v38 = vld [vmem:[#allocation2 + $0x5c4] ss:$16 sps:$4 sm:$0xff]  }
 0x246   : > { %4061 = vmatprep.subr.bf16.mxu0 %v6451_v39  ;;  %4143 = vmatprep.subr.bf16.mxu1 %v6452_v40  ;;  %v6504_v39 = vld [vmem:[#allocation2 + $0x5cc] ss:$16 sps:$4 sm:$0xff]   ;;  %v6505_v40 = vld [vmem:[#allocation2 + $0x5c0] ss:$16 sps:$4 sm:$0xff]  }
 0x249   : > { %4062 = vmatpush1.bf16.msra.mxu0 %v6453_v41  ;;  %4144 = vmatpush1.bf16.msra.mxu1 %v6454_v42  ;;  %v6506_v41 = vld [vmem:[#allocation2 + $0x5c8] ss:$16 sps:$4 sm:$0xff]   ;;  %v6507_v42 = vld [vmem:[#allocation2 + $0x5e4] ss:$16 sps:$4 sm:$0xff]  }
 0x24a   : > { %4063 = vmatprep.subr.bf16.mxu0 %v6455_v43  ;;  %4145 = vmatprep.subr.bf16.mxu1 %v6456_v45  ;;  %v6508_v43 = vld [vmem:[#allocation2 + $0x5ec] ss:$16 sps:$4 sm:$0xff]   ;;  %v6509_v45 = vld [vmem:[#allocation2 + $0x5e0] ss:$16 sps:$4 sm:$0xff]  }
 0x24d   : > { %4064 = vmatpush1.bf16.msra.mxu0 %v6457_v46  ;;  %4146 = vmatpush1.bf16.msra.mxu1 %v6458_v47  ;;  %v6510_v46 = vld [vmem:[#allocation2 + $0x5e8] ss:$16 sps:$4 sm:$0xff]   ;;  %v6511_v47 = vld [vmem:[#allocation2 + $0x4] ss:$16 sps:$4 sm:$0xff]  }
 0x24e   : > { %4065 = vmatprep.subr.bf16.mxu0 %v6459_v49  ;;  %4147 = vmatprep.subr.bf16.mxu1 %v6460_v50  ;;  %v6512_v49 = vld [vmem:[#allocation2 + $0xc] ss:$16 sps:$4 sm:$0xff]   ;;  %v6513_v50 = vld [vmem:[#allocation2] ss:$16 sps:$4 sm:$0xff]  }
 0x251   : > { %4066 = vmatpush1.bf16.msra.mxu0 %v6461_v51  ;;  %4148 = vmatpush1.bf16.msra.mxu1 %v6462_v52  ;;  %v6514_v51 = vld [vmem:[#allocation2 + $0x8] ss:$16 sps:$4 sm:$0xff]   ;;  %v6515_v52 = vld [vmem:[#allocation2 + $0x24] ss:$16 sps:$4 sm:$0xff]  }
 0x252   : > { %4067 = vmatprep.subr.bf16.mxu0 %v6463_v53  ;;  %4149 = vmatprep.subr.bf16.mxu1 %v6464_v54  ;;  %v6516_v53 = vld [vmem:[#allocation2 + $0x2c] ss:$16 sps:$4 sm:$0xff]   ;;  %v6517_v54 = vld [vmem:[#allocation2 + $0x20] ss:$16 sps:$4 sm:$0xff]  }
 0x255   : > { %4068 = vmatpush1.bf16.msra.mxu0 %v6465_v57  ;;  %4150 = vmatpush1.bf16.msra.mxu1 %v6466_v58  ;;  %v6518_v57 = vld [vmem:[#allocation2 + $0x28] ss:$16 sps:$4 sm:$0xff]   ;;  %v6519_v58 = vld [vmem:[#allocation2 + $0x44] ss:$16 sps:$4 sm:$0xff]  }
 0x256   : > { %4069 = vmatprep.subr.bf16.mxu0 %v6467_v60  ;;  %4151 = vmatprep.subr.bf16.mxu1 %v6468_v61  ;;  %v6520_v60 = vld [vmem:[#allocation2 + $0x4c] ss:$16 sps:$4 sm:$0xff]   ;;  %v6522_v61 = vld [vmem:[#allocation2 + $0x48] ss:$16 sps:$4 sm:$0xff]  }
 0x259   : > { %4070 = vmatpush1.bf16.msra.mxu0 %v6469_v62  ;;  %4152 = vmatpush1.bf16.msra.mxu1 %v6470_v63  ;;  %v6523_v62 = vld [vmem:[#allocation2 + $0x64] ss:$16 sps:$4 sm:$0xff]   ;;  %v6524_v63 = vld [vmem:[#allocation2 + $0x6c] ss:$16 sps:$4 sm:$0xff]  }
 0x25a   : > { %4071 = vmatprep.subr.bf16.mxu0 %v6471_v0  ;;  %4153 = vmatprep.subr.bf16.mxu1 %v6472_v1  ;;  %v6525_v0 = vld [vmem:[#allocation2 + $0x60] ss:$16 sps:$4 sm:$0xff]   ;;  %v6526_v1 = vld [vmem:[#allocation2 + $0x68] ss:$16 sps:$4 sm:$0xff]  }
 0x25d   : > { %4072 = vmatpush1.bf16.msra.mxu0 %v6473_v2  ;;  %4154 = vmatpush1.bf16.msra.mxu1 %v6474_v3  ;;  %v6527_v2 = vld [vmem:[#allocation2 + $0x84] ss:$16 sps:$4 sm:$0xff]   ;;  %v6528_v3 = vld [vmem:[#allocation2 + $0x8c] ss:$16 sps:$4 sm:$0xff]  }
 0x25e   : > { %4073 = vmatprep.subr.bf16.mxu0 %v6475_v6  ;;  %4155 = vmatprep.subr.bf16.mxu1 %v6476_v7  ;;  %v6529_v6 = vld [vmem:[#allocation2 + $0x80] ss:$16 sps:$4 sm:$0xff]   ;;  %v6530_v7 = vld [vmem:[#allocation2 + $0x88] ss:$16 sps:$4 sm:$0xff]  }
 0x261   : > { %4074 = vmatpush1.bf16.msra.mxu0 %v6477_v8  ;;  %4156 = vmatpush1.bf16.msra.mxu1 %v6478_v9  ;;  %v6531_v8 = vld [vmem:[#allocation2 + $0xa4] ss:$16 sps:$4 sm:$0xff]   ;;  %v6532_v9 = vld [vmem:[#allocation2 + $0xac] ss:$16 sps:$4 sm:$0xff]  }
 0x262   : > { %4084 = vmatprep.subr.bf16.mxu0 %v6479_v12  ;;  %4166 = vmatprep.subr.bf16.mxu1 %v6480_v14  ;;  %v6533_v12 = vld [vmem:[#allocation2 + $0xa0] ss:$16 sps:$4 sm:$0xff]   ;;  %v6534_v14 = vld [vmem:[#allocation2 + $0xa8] ss:$16 sps:$4 sm:$0xff]  }
 0x264   : > { %4076 = vmatmul.mubr.bf16.vlgmr.msra.gmra.mrb[4].mxu0 %v7141_v32  ;;  %4158 = vmatmul.mubr.bf16.vlgmr.msra.gmra.mrb[4].mxu1 %v7141_v32  ;;  %v6489_v32 = vld [vmem:[#allocation2 + $0x540] ss:$16 sps:$4 sm:$0xff]  }
 0x265   : > { %4085 = vmatpush1.bf16.msra.mxu0 %v6481_v20  ;;  %4167 = vmatpush1.bf16.msra.mxu1 %v6482_v15  ;;  %v6535_v20 = vld [vmem:[#allocation2 + $0xc4] ss:$16 sps:$4 sm:$0xff]   ;;  %v6536_v15 = vld [vmem:[#allocation2 + $0xcc] ss:$16 sps:$4 sm:$0xff]  }
 0x266   : > { %4086 = vmatprep.subr.bf16.mxu0 %v6483_v25  ;;  %4168 = vmatprep.subr.bf16.mxu1 %v6484_v56  ;;  %v6537_v25 = vld [vmem:[#allocation2 + $0xc0] ss:$16 sps:$4 sm:$0xff]   ;;  %v6538_v56 = vld [vmem:[#allocation2 + $0xc8] ss:$16 sps:$4 sm:$0xff]  }
 0x267   : > { %4116 = vmatprep.mubr.bf16.mxu0 %v6972_v13  ;;  %4198 = vmatprep.mubr.bf16.mxu1 %v6972_v13 }
 0x269   : > { %4087 = vmatpush1.bf16.msra.mxu0 %v6485_v17  ;;  %4169 = vmatpush1.bf16.msra.mxu1 %v6486_v18  ;;  %v6539_v17 = vld [vmem:[#allocation2 + $0xe4] ss:$16 sps:$4 sm:$0xff]   ;;  %v6540_v18 = vld [vmem:[#allocation2 + $0xec] ss:$16 sps:$4 sm:$0xff]  }
 0x26a   : > { %4088 = vmatprep.subr.bf16.mxu0 %v6487_v19  ;;  %4170 = vmatprep.subr.bf16.mxu1 %v6488_v22  ;;  %v6541_v19 = vld [vmem:[#allocation2 + $0xe0] ss:$16 sps:$4 sm:$0xff]   ;;  %v6542_v22 = vld [vmem:[#allocation2 + $0xe8] ss:$16 sps:$4 sm:$0xff]  }
 0x26d   : > { %4089 = vmatpush1.bf16.msra.mxu0 %v6489_v32  ;;  %4171 = vmatpush1.bf16.msra.mxu1 %v6490_v23  ;;  %v6543_v32 = vld [vmem:[#allocation2 + $0x104] ss:$16 sps:$4 sm:$0xff]   ;;  %v6544_v23 = vld [vmem:[#allocation2 + $0x10c] ss:$16 sps:$4 sm:$0xff]  }
 0x26e   : > { %4090 = vmatprep.subr.bf16.mxu0 %v6491_v24  ;;  %4172 = vmatprep.subr.bf16.mxu1 %v6492_v26  ;;  %v6545_v24 = vld [vmem:[#allocation2 + $0x100] ss:$16 sps:$4 sm:$0xff]   ;;  %v6546_v26 = vld [vmem:[#allocation2 + $0x108] ss:$16 sps:$4 sm:$0xff]  }
 0x271   : > { %4091 = vmatpush1.bf16.msra.mxu0 %v6493_v28  ;;  %4173 = vmatpush1.bf16.msra.mxu1 %v6494_v29  ;;  %v6547_v28 = vld [vmem:[#allocation2 + $0x124] ss:$16 sps:$4 sm:$0xff]   ;;  %v6548_v29 = vld [vmem:[#allocation2 + $0x12c] ss:$16 sps:$4 sm:$0xff]  }
 0x272   : > { %4092 = vmatprep.subr.bf16.mxu0 %v6495_v44  ;;  %4174 = vmatprep.subr.bf16.mxu1 %v6496_v30  ;;  %v6549_v44 = vld [vmem:[#allocation2 + $0x120] ss:$16 sps:$4 sm:$0xff]   ;;  %v6550_v30 = vld [vmem:[#allocation2 + $0x128] ss:$16 sps:$4 sm:$0xff]  }
 0x275   : > { %4093 = vmatpush1.bf16.msra.mxu0 %v6497_v31  ;;  %4175 = vmatpush1.bf16.msra.mxu1 %v6498_v33  ;;  %v6551_v31 = vld [vmem:[#allocation2 + $0x144] ss:$16 sps:$4 sm:$0xff]   ;;  %v6552_v33 = vld [vmem:[#allocation2 + $0x14c] ss:$16 sps:$4 sm:$0xff]  }
 0x276   : > { %4094 = vmatprep.subr.bf16.mxu0 %v6499_v34  ;;  %4176 = vmatprep.subr.bf16.mxu1 %v6500_v35  ;;  %v6553_v34 = vld [vmem:[#allocation2 + $0x140] ss:$16 sps:$4 sm:$0xff]   ;;  %v6554_v35 = vld [vmem:[#allocation2 + $0x148] ss:$16 sps:$4 sm:$0xff]  }
 0x279   : > { %4095 = vmatpush1.bf16.msra.mxu0 %v6501_v36  ;;  %4177 = vmatpush1.bf16.msra.mxu1 %v6502_v37  ;;  %v6555_v36 = vld [vmem:[#allocation2 + $0x164] ss:$16 sps:$4 sm:$0xff]   ;;  %v6556_v37 = vld [vmem:[#allocation2 + $0x16c] ss:$16 sps:$4 sm:$0xff]  }
 0x27a   : > { %4096 = vmatprep.subr.bf16.mxu0 %v6503_v38  ;;  %4178 = vmatprep.subr.bf16.mxu1 %v6504_v39  ;;  %v6557_v38 = vld [vmem:[#allocation2 + $0x160] ss:$16 sps:$4 sm:$0xff]   ;;  %v6558_v39 = vld [vmem:[#allocation2 + $0x168] ss:$16 sps:$4 sm:$0xff]  }
 0x27d   : > { %4097 = vmatpush1.bf16.msra.mxu0 %v6505_v40  ;;  %4179 = vmatpush1.bf16.msra.mxu1 %v6506_v41  ;;  %v6559_v40 = vld [vmem:[#allocation2 + $0x184] ss:$16 sps:$4 sm:$0xff]   ;;  %v6560_v41 = vld [vmem:[#allocation2 + $0x18c] ss:$16 sps:$4 sm:$0xff]  }
 0x27e   : > { %4098 = vmatprep.subr.bf16.mxu0 %v6507_v42  ;;  %4180 = vmatprep.subr.bf16.mxu1 %v6508_v43  ;;  %v6561_v42 = vld [vmem:[#allocation2 + $0x180] ss:$16 sps:$4 sm:$0xff]   ;;  %v6562_v43 = vld [vmem:[#allocation2 + $0x188] ss:$16 sps:$4 sm:$0xff]  }
 0x281   : > { %4099 = vmatpush1.bf16.msra.mxu0 %v6509_v45  ;;  %4181 = vmatpush1.bf16.msra.mxu1 %v6510_v46  ;;  %v6563_v45 = vld [vmem:[#allocation2 + $0x1a4] ss:$16 sps:$4 sm:$0xff]   ;;  %v6564_v46 = vld [vmem:[#allocation2 + $0x1ac] ss:$16 sps:$4 sm:$0xff]  }
 0x282   : > { %4207 = vmatprep.subr.bf16.mxu0 %v6511_v47  ;;  %4289 = vmatprep.subr.bf16.mxu1 %v6512_v49  ;;  %v6565_v47 = vld [vmem:[#allocation2 + $0x1a0] ss:$16 sps:$4 sm:$0xff]   ;;  %v6566_v49 = vld [vmem:[#allocation2 + $0x1a8] ss:$16 sps:$4 sm:$0xff]  }
 0x284   : > { %4117 = vmatmul.mubr.bf16.vlgmr.msra.gmra.mrb[4].mxu0 %v7151_v11  ;;  %4199 = vmatmul.mubr.bf16.vlgmr.msra.gmra.mrb[4].mxu1 %v7151_v11  ;;  %v6521_v11 = vld [vmem:[#allocation2 + $0x40] ss:$16 sps:$4 sm:$0xff]  }
 0x285   : > { %4208 = vmatpush1.bf16.msra.mxu0 %v6513_v50  ;;  %4290 = vmatpush1.bf16.msra.mxu1 %v6514_v51  ;;  %v6567_v50 = vld [vmem:[#allocation2 + $0x1c4] ss:$16 sps:$4 sm:$0xff]   ;;  %v6568_v51 = vld [vmem:[#allocation2 + $0x1cc] ss:$16 sps:$4 sm:$0xff]  }
 0x286   : > { %4209 = vmatprep.subr.bf16.mxu0 %v6515_v52  ;;  %4291 = vmatprep.subr.bf16.mxu1 %v6516_v53  ;;  %v6569_v52 = vld [vmem:[#allocation2 + $0x1c0] ss:$16 sps:$4 sm:$0xff]   ;;  %v6570_v53 = vld [vmem:[#allocation2 + $0x1c8] ss:$16 sps:$4 sm:$0xff]  }
 0x287   : > { %4239 = vmatprep.mubr.bf16.mxu0 %v7093_v48  ;;  %4321 = vmatprep.mubr.bf16.mxu1 %v7093_v48 }
 0x289   : > { %4210 = vmatpush1.bf16.msra.mxu0 %v6517_v54  ;;  %4292 = vmatpush1.bf16.msra.mxu1 %v6518_v57  ;;  %v6571_v54 = vld [vmem:[#allocation2 + $0x1e4] ss:$16 sps:$4 sm:$0xff]   ;;  %v6572_v57 = vld [vmem:[#allocation2 + $0x1ec] ss:$16 sps:$4 sm:$0xff]  }
 0x28a   : > { %4211 = vmatprep.subr.bf16.mxu0 %v6519_v58  ;;  %4293 = vmatprep.subr.bf16.mxu1 %v6520_v60  ;;  %v6573_v58 = vld [vmem:[#allocation2 + $0x1e0] ss:$16 sps:$4 sm:$0xff]   ;;  %v6574_v60 = vld [vmem:[#allocation2 + $0x1e8] ss:$16 sps:$4 sm:$0xff]  }
 0x28d   : > { %4212 = vmatpush1.bf16.msra.mxu0 %v6521_v11  ;;  %4294 = vmatpush1.bf16.msra.mxu1 %v6522_v61  ;;  %v6575_v11 = vld [vmem:[#allocation2 + $0x204] ss:$16 sps:$4 sm:$0xff]   ;;  %v6576_v61 = vld [vmem:[#allocation2 + $0x20c] ss:$16 sps:$4 sm:$0xff]  }
 0x28e   : > { %4213 = vmatprep.subr.bf16.mxu0 %v6523_v62  ;;  %4295 = vmatprep.subr.bf16.mxu1 %v6524_v63  ;;  %v6577_v62 = vld [vmem:[#allocation2 + $0x200] ss:$16 sps:$4 sm:$0xff]   ;;  %v6578_v63 = vld [vmem:[#allocation2 + $0x208] ss:$16 sps:$4 sm:$0xff]  }
 0x291   : > { %4214 = vmatpush1.bf16.msra.mxu0 %v6525_v0  ;;  %4296 = vmatpush1.bf16.msra.mxu1 %v6526_v1  ;;  %v6579_v0 = vld [vmem:[#allocation2 + $0x224] ss:$16 sps:$4 sm:$0xff]   ;;  %v6580_v1 = vld [vmem:[#allocation2 + $0x22c] ss:$16 sps:$4 sm:$0xff]  }
 0x292   : > { %4215 = vmatprep.subr.bf16.mxu0 %v6527_v2  ;;  %4297 = vmatprep.subr.bf16.mxu1 %v6528_v3  ;;  %v6581_v2 = vld [vmem:[#allocation2 + $0x220] ss:$16 sps:$4 sm:$0xff]   ;;  %v6582_v3 = vld [vmem:[#allocation2 + $0x228] ss:$16 sps:$4 sm:$0xff]  }
 0x295   : > { %4216 = vmatpush1.bf16.msra.mxu0 %v6529_v6  ;;  %4298 = vmatpush1.bf16.msra.mxu1 %v6530_v7  ;;  %v6583_v6 = vld [vmem:[#allocation2 + $0x244] ss:$16 sps:$4 sm:$0xff]   ;;  %v6584_v7 = vld [vmem:[#allocation2 + $0x24c] ss:$16 sps:$4 sm:$0xff]  }
 0x296   : > { %4217 = vmatprep.subr.bf16.mxu0 %v6531_v8  ;;  %4299 = vmatprep.subr.bf16.mxu1 %v6532_v9  ;;  %v6585_v8 = vld [vmem:[#allocation2 + $0x240] ss:$16 sps:$4 sm:$0xff]   ;;  %v6586_v9 = vld [vmem:[#allocation2 + $0x248] ss:$16 sps:$4 sm:$0xff]  }
 0x299   : > { %4218 = vmatpush1.bf16.msra.mxu0 %v6533_v12  ;;  %4300 = vmatpush1.bf16.msra.mxu1 %v6534_v14  ;;  %v6587_v12 = vld [vmem:[#allocation2 + $0x264] ss:$16 sps:$4 sm:$0xff]   ;;  %v6588_v14 = vld [vmem:[#allocation2 + $0x26c] ss:$16 sps:$4 sm:$0xff]  }
 0x29a   : > { %4219 = vmatprep.subr.bf16.mxu0 %v6535_v20  ;;  %4301 = vmatprep.subr.bf16.mxu1 %v6536_v15  ;;  %v6589_v20 = vld [vmem:[#allocation2 + $0x260] ss:$16 sps:$4 sm:$0xff]   ;;  %v6590_v15 = vld [vmem:[#allocation2 + $0x268] ss:$16 sps:$4 sm:$0xff]  }
 0x29d   : > { %4220 = vmatpush1.bf16.msra.mxu0 %v6537_v25  ;;  %4302 = vmatpush1.bf16.msra.mxu1 %v6538_v56  ;;  %v6591_v25 = vld [vmem:[#allocation2 + $0x284] ss:$16 sps:$4 sm:$0xff]   ;;  %v6592_v56 = vld [vmem:[#allocation2 + $0x28c] ss:$16 sps:$4 sm:$0xff]  }
 0x29e   : > { %4221 = vmatprep.subr.bf16.mxu0 %v6539_v17  ;;  %4303 = vmatprep.subr.bf16.mxu1 %v6540_v18  ;;  %v6593_v17 = vld [vmem:[#allocation2 + $0x280] ss:$16 sps:$4 sm:$0xff]   ;;  %v6594_v18 = vld [vmem:[#allocation2 + $0x288] ss:$16 sps:$4 sm:$0xff]  }
 0x2a1   : > { %4222 = vmatpush1.bf16.msra.mxu0 %v6541_v19  ;;  %4304 = vmatpush1.bf16.msra.mxu1 %v6542_v22  ;;  %v6595_v19 = vld [vmem:[#allocation2 + $0x2a4] ss:$16 sps:$4 sm:$0xff]   ;;  %v6596_v22 = vld [vmem:[#allocation2 + $0x2ac] ss:$16 sps:$4 sm:$0xff]  }
 0x2a2   : > { %4223 = vmatprep.subr.bf16.mxu0 %v6543_v32  ;;  %4305 = vmatprep.subr.bf16.mxu1 %v6544_v23  ;;  %v6597_v32 = vld [vmem:[#allocation2 + $0x2a0] ss:$16 sps:$4 sm:$0xff]   ;;  %v6598_v23 = vld [vmem:[#allocation2 + $0x2a8] ss:$16 sps:$4 sm:$0xff]  }
 0x2a5   : > { %4224 = vmatpush1.bf16.msra.mxu0 %v6545_v24  ;;  %4306 = vmatpush1.bf16.msra.mxu1 %v6546_v26  ;;  %v6599_v24 = vld [vmem:[#allocation2 + $0x2c4] ss:$16 sps:$4 sm:$0xff]   ;;  %v6600_v26 = vld [vmem:[#allocation2 + $0x2cc] ss:$16 sps:$4 sm:$0xff]  }
 0x2a6   : > { %4225 = vmatprep.subr.bf16.mxu0 %v6547_v28  ;;  %4307 = vmatprep.subr.bf16.mxu1 %v6548_v29  ;;  %v6601_v28 = vld [vmem:[#allocation2 + $0x2c0] ss:$16 sps:$4 sm:$0xff]   ;;  %v6602_v29 = vld [vmem:[#allocation2 + $0x2c8] ss:$16 sps:$4 sm:$0xff]  }
 0x2a9   : > { %4226 = vmatpush1.bf16.msra.mxu0 %v6549_v44  ;;  %4308 = vmatpush1.bf16.msra.mxu1 %v6550_v30  ;;  %v6603_v44 = vld [vmem:[#allocation2 + $0x2e4] ss:$16 sps:$4 sm:$0xff]   ;;  %v6604_v30 = vld [vmem:[#allocation2 + $0x2ec] ss:$16 sps:$4 sm:$0xff]  }
 0x2aa   : > { %4227 = vmatprep.subr.bf16.mxu0 %v6551_v31  ;;  %4309 = vmatprep.subr.bf16.mxu1 %v6552_v33  ;;  %v6605_v31 = vld [vmem:[#allocation2 + $0x2e0] ss:$16 sps:$4 sm:$0xff]   ;;  %v6606_v33 = vld [vmem:[#allocation2 + $0x2e8] ss:$16 sps:$4 sm:$0xff]  }
 0x2ad   : > { %4228 = vmatpush1.bf16.msra.mxu0 %v6553_v34  ;;  %4310 = vmatpush1.bf16.msra.mxu1 %v6554_v35  ;;  %v6607_v34 = vld [vmem:[#allocation2 + $0x604] ss:$16 sps:$4 sm:$0xff]   ;;  %v6608_v35 = vld [vmem:[#allocation2 + $0x60c] ss:$16 sps:$4 sm:$0xff]  }
 0x2ae   : > { %4229 = vmatprep.subr.bf16.mxu0 %v6555_v36  ;;  %4311 = vmatprep.subr.bf16.mxu1 %v6556_v37  ;;  %v6609_v36 = vld [vmem:[#allocation2 + $0x600] ss:$16 sps:$4 sm:$0xff]   ;;  %v6610_v37 = vld [vmem:[#allocation2 + $0x608] ss:$16 sps:$4 sm:$0xff]  }
 0x2b1   : > { %4230 = vmatpush1.bf16.msra.mxu0 %v6557_v38  ;;  %4312 = vmatpush1.bf16.msra.mxu1 %v6558_v39  ;;  %v6611_v38 = vld [vmem:[#allocation2 + $0x624] ss:$16 sps:$4 sm:$0xff]   ;;  %v6612_v39 = vld [vmem:[#allocation2 + $0x62c] ss:$16 sps:$4 sm:$0xff]  }
 0x2b2   : > { %4231 = vmatprep.subr.bf16.mxu0 %v6559_v40  ;;  %4313 = vmatprep.subr.bf16.mxu1 %v6560_v41  ;;  %v6613_v40 = vld [vmem:[#allocation2 + $0x620] ss:$16 sps:$4 sm:$0xff]   ;;  %v6614_v41 = vld [vmem:[#allocation2 + $0x628] ss:$16 sps:$4 sm:$0xff]  }
 0x2b5   : > { %4232 = vmatpush1.bf16.msra.mxu0 %v6561_v42  ;;  %4314 = vmatpush1.bf16.msra.mxu1 %v6562_v43  ;;  %v6615_v42 = vld [vmem:[#allocation2 + $0x644] ss:$16 sps:$4 sm:$0xff]   ;;  %v6616_v43 = vld [vmem:[#allocation2 + $0x64c] ss:$16 sps:$4 sm:$0xff]  }
 0x2b6   : > { %4233 = vmatprep.subr.bf16.mxu0 %v6563_v45  ;;  %4315 = vmatprep.subr.bf16.mxu1 %v6564_v46  ;;  %v6618_v45 = vld [vmem:[#allocation2 + $0x648] ss:$16 sps:$4 sm:$0xff]   ;;  %v6619_v46 = vld [vmem:[#allocation2 + $0x664] ss:$16 sps:$4 sm:$0xff]  }
 0x2b9   : > { %4234 = vmatpush1.bf16.msra.mxu0 %v6565_v47  ;;  %4316 = vmatpush1.bf16.msra.mxu1 %v6566_v49  ;;  %v6620_v47 = vld [vmem:[#allocation2 + $0x66c] ss:$16 sps:$4 sm:$0xff]   ;;  %v6621_v49 = vld [vmem:[#allocation2 + $0x660] ss:$16 sps:$4 sm:$0xff]  }
 0x2ba   : > { %4235 = vmatprep.subr.bf16.mxu0 %v6567_v50  ;;  %4317 = vmatprep.subr.bf16.mxu1 %v6568_v51  ;;  %v6622_v50 = vld [vmem:[#allocation2 + $0x668] ss:$16 sps:$4 sm:$0xff]   ;;  %v6624_v51 = vld [vmem:[#allocation2 + $0x68c] ss:$16 sps:$4 sm:$0xff]  }
 0x2bd   : > { %4236 = vmatpush1.bf16.msra.mxu0 %v6569_v52  ;;  %4318 = vmatpush1.bf16.msra.mxu1 %v6570_v53  ;;  %v6625_v52 = vld [vmem:[#allocation2 + $0x680] ss:$16 sps:$4 sm:$0xff]   ;;  %v6626_v53 = vld [vmem:[#allocation2 + $0x688] ss:$16 sps:$4 sm:$0xff]  }
 0x2be   : > { %4237 = vmatprep.subr.bf16.mxu0 %v6571_v54  ;;  %4319 = vmatprep.subr.bf16.mxu1 %v6572_v57  ;;  %v6627_v54 = vld [vmem:[#allocation2 + $0x6a4] ss:$16 sps:$4 sm:$0xff]   ;;  %v6628_v57 = vld [vmem:[#allocation2 + $0x6ac] ss:$16 sps:$4 sm:$0xff]  }
 0x2c1   : > { %4238 = vmatpush1.bf16.msra.mxu0 %v6573_v58  ;;  %4320 = vmatpush1.bf16.msra.mxu1 %v6574_v60 }
 0x2c2   : > { %4248 = vmatprep.subr.bf16.mxu0 %v6575_v11  ;;  %4330 = vmatprep.subr.bf16.mxu1 %v6576_v61 }
 0x2c4   : > { %4240 = vmatmul.mubr.bf16.vlgmr.msra.gmra.mrb[4].mxu0 %v7097_v5  ;;  %4322 = vmatmul.mubr.bf16.vlgmr.msra.gmra.mrb[4].mxu1 %v7097_v5 }
 0x2c5   : > { %4249 = vmatpush1.bf16.msra.mxu0 %v6577_v62  ;;  %4331 = vmatpush1.bf16.msra.mxu1 %v6578_v63 }
 0x2c6   : > { %4250 = vmatprep.subr.bf16.mxu0 %v6579_v0  ;;  %4332 = vmatprep.subr.bf16.mxu1 %v6580_v1  ;;  %v6629_v0 = vld [vmem:[#allocation2 + $0x6a0] ss:$16 sps:$4 sm:$0xff]   ;;  %v6630_v1 = vld [vmem:[#allocation2 + $0x6a8] ss:$16 sps:$4 sm:$0xff]  }
 0x2c7   : > { %4280 = vmatprep.mubr.bf16.mxu0 %v6972_v13  ;;  %4362 = vmatprep.mubr.bf16.mxu1 %v6972_v13 }
 0x2c9   : > { %4251 = vmatpush1.bf16.msra.mxu0 %v6581_v2  ;;  %4333 = vmatpush1.bf16.msra.mxu1 %v6582_v3 }
 0x2ca   : > { %4252 = vmatprep.subr.bf16.mxu0 %v6583_v6  ;;  %4334 = vmatprep.subr.bf16.mxu1 %v6584_v7  ;;  %v6631_v6 = vld [vmem:[#allocation2 + $0x6c4] ss:$16 sps:$4 sm:$0xff]   ;;  %v6632_v7 = vld [vmem:[#allocation2 + $0x6cc] ss:$16 sps:$4 sm:$0xff]  }
 0x2cd   : > { %4253 = vmatpush1.bf16.msra.mxu0 %v6585_v8  ;;  %4335 = vmatpush1.bf16.msra.mxu1 %v6586_v9  ;;  %v6633_v8 = vld [vmem:[#allocation2 + $0x6c0] ss:$16 sps:$4 sm:$0xff]   ;;  %v6634_v9 = vld [vmem:[#allocation2 + $0x6c8] ss:$16 sps:$4 sm:$0xff]  }
 0x2ce   : > { %4254 = vmatprep.subr.bf16.mxu0 %v6587_v12  ;;  %4336 = vmatprep.subr.bf16.mxu1 %v6588_v14  ;;  %v6635_v12 = vld [vmem:[#allocation2 + $0x6e4] ss:$16 sps:$4 sm:$0xff]   ;;  %v6636_v14 = vld [vmem:[#allocation2 + $0x6ec] ss:$16 sps:$4 sm:$0xff]  }
 0x2d1   : > { %4255 = vmatpush1.bf16.msra.mxu0 %v6589_v20  ;;  %4337 = vmatpush1.bf16.msra.mxu1 %v6590_v15  ;;  %v6637_v20 = vld [vmem:[#allocation2 + $0x6e0] ss:$16 sps:$4 sm:$0xff]   ;;  %v6638_v15 = vld [vmem:[#allocation2 + $0x6e8] ss:$16 sps:$4 sm:$0xff]  }
 0x2d2   : > { %4256 = vmatprep.subr.bf16.mxu0 %v6591_v25  ;;  %4338 = vmatprep.subr.bf16.mxu1 %v6592_v56  ;;  %v6639_v25 = vld [vmem:[#allocation2 + $0x704] ss:$16 sps:$4 sm:$0xff]   ;;  %v6640_v56 = vld [vmem:[#allocation2 + $0x70c] ss:$16 sps:$4 sm:$0xff]  }
 0x2d5   : > { %4257 = vmatpush1.bf16.msra.mxu0 %v6593_v17  ;;  %4339 = vmatpush1.bf16.msra.mxu1 %v6594_v18  ;;  %v6641_v17 = vld [vmem:[#allocation2 + $0x700] ss:$16 sps:$4 sm:$0xff]   ;;  %v6642_v18 = vld [vmem:[#allocation2 + $0x708] ss:$16 sps:$4 sm:$0xff]  }
 0x2d6   : > { %4258 = vmatprep.subr.bf16.mxu0 %v6595_v19  ;;  %4340 = vmatprep.subr.bf16.mxu1 %v6596_v22  ;;  %v6643_v19 = vld [vmem:[#allocation2 + $0x724] ss:$16 sps:$4 sm:$0xff]   ;;  %v6644_v22 = vld [vmem:[#allocation2 + $0x72c] ss:$16 sps:$4 sm:$0xff]  }
 0x2d9   : > { %4259 = vmatpush1.bf16.msra.mxu0 %v6597_v32  ;;  %4341 = vmatpush1.bf16.msra.mxu1 %v6598_v23  ;;  %v6645_v32 = vld [vmem:[#allocation2 + $0x720] ss:$16 sps:$4 sm:$0xff]   ;;  %v6646_v23 = vld [vmem:[#allocation2 + $0x728] ss:$16 sps:$4 sm:$0xff]  }
 0x2da   : > { %4260 = vmatprep.subr.bf16.mxu0 %v6599_v24  ;;  %4342 = vmatprep.subr.bf16.mxu1 %v6600_v26  ;;  %v6647_v24 = vld [vmem:[#allocation2 + $0x744] ss:$16 sps:$4 sm:$0xff]   ;;  %v6648_v26 = vld [vmem:[#allocation2 + $0x74c] ss:$16 sps:$4 sm:$0xff]  }
 0x2dd   : > { %4261 = vmatpush1.bf16.msra.mxu0 %v6601_v28  ;;  %4343 = vmatpush1.bf16.msra.mxu1 %v6602_v29  ;;  %v6649_v28 = vld [vmem:[#allocation2 + $0x740] ss:$16 sps:$4 sm:$0xff]   ;;  %v6650_v29 = vld [vmem:[#allocation2 + $0x748] ss:$16 sps:$4 sm:$0xff]  }
 0x2de   : > { %4262 = vmatprep.subr.bf16.mxu0 %v6603_v44  ;;  %4344 = vmatprep.subr.bf16.mxu1 %v6604_v30  ;;  %v6651_v44 = vld [vmem:[#allocation2 + $0x764] ss:$16 sps:$4 sm:$0xff]   ;;  %v6652_v30 = vld [vmem:[#allocation2 + $0x76c] ss:$16 sps:$4 sm:$0xff]  }
 0x2e1   : > { %4263 = vmatpush1.bf16.msra.mxu0 %v6605_v31  ;;  %4345 = vmatpush1.bf16.msra.mxu1 %v6606_v33  ;;  %v6653_v31 = vld [vmem:[#allocation2 + $0x760] ss:$16 sps:$4 sm:$0xff]   ;;  %v6654_v33 = vld [vmem:[#allocation2 + $0x768] ss:$16 sps:$4 sm:$0xff]  }
 0x2e2   : > { %4371 = vmatprep.subr.bf16.mxu0 %v6607_v34  ;;  %4453 = vmatprep.subr.bf16.mxu1 %v6608_v35  ;;  %v6655_v34 = vld [vmem:[#allocation2 + $0x784] ss:$16 sps:$4 sm:$0xff]   ;;  %v6656_v35 = vld [vmem:[#allocation2 + $0x78c] ss:$16 sps:$4 sm:$0xff]  }
 0x2e4   : > { %4281 = vmatmul.mubr.bf16.vlgmr.msra.gmra.mrb[4].mxu0 %v7168_v55  ;;  %4363 = vmatmul.mubr.bf16.vlgmr.msra.gmra.mrb[4].mxu1 %v7168_v55  ;;  %v6617_v55 = vld [vmem:[#allocation2 + $0x640] ss:$16 sps:$4 sm:$0xff]  }
 0x2e5   : > { %4372 = vmatpush1.bf16.msra.mxu0 %v6609_v36  ;;  %4454 = vmatpush1.bf16.msra.mxu1 %v6610_v37  ;;  %v6657_v36 = vld [vmem:[#allocation2 + $0x780] ss:$16 sps:$4 sm:$0xff]   ;;  %v6658_v37 = vld [vmem:[#allocation2 + $0x788] ss:$16 sps:$4 sm:$0xff]  }
 0x2e6   : > { %4373 = vmatprep.subr.bf16.mxu0 %v6611_v38  ;;  %4455 = vmatprep.subr.bf16.mxu1 %v6612_v39  ;;  %v6659_v38 = vld [vmem:[#allocation2 + $0x7a4] ss:$16 sps:$4 sm:$0xff]   ;;  %v6660_v39 = vld [vmem:[#allocation2 + $0x7ac] ss:$16 sps:$4 sm:$0xff]  }
 0x2e7   : > { %4403 = vmatprep.mubr.bf16.mxu0 %v7153_v16  ;;  %4485 = vmatprep.mubr.bf16.mxu1 %v7153_v16  ;;  %v6623_v16 = vld [vmem:[#allocation2 + $0x684] ss:$16 sps:$4 sm:$0xff]  }
 0x2e9   : > { %4374 = vmatpush1.bf16.msra.mxu0 %v6613_v40  ;;  %4456 = vmatpush1.bf16.msra.mxu1 %v6614_v41  ;;  %v6661_v40 = vld [vmem:[#allocation2 + $0x7a0] ss:$16 sps:$4 sm:$0xff]   ;;  %v6662_v41 = vld [vmem:[#allocation2 + $0x7a8] ss:$16 sps:$4 sm:$0xff]  }
 0x2ea   : > { %4375 = vmatprep.subr.bf16.mxu0 %v6615_v42  ;;  %4457 = vmatprep.subr.bf16.mxu1 %v6616_v43  ;;  %v6663_v42 = vld [vmem:[#allocation2 + $0x7c4] ss:$16 sps:$4 sm:$0xff]   ;;  %v6664_v43 = vld [vmem:[#allocation2 + $0x7cc] ss:$16 sps:$4 sm:$0xff]  }
 0x2ed   : > { %4376 = vmatpush1.bf16.msra.mxu0 %v6617_v55  ;;  %4458 = vmatpush1.bf16.msra.mxu1 %v6618_v45  ;;  %v6665_v55 = vld [vmem:[#allocation2 + $0x7c0] ss:$16 sps:$4 sm:$0xff]   ;;  %v6666_v45 = vld [vmem:[#allocation2 + $0x7c8] ss:$16 sps:$4 sm:$0xff]  }
 0x2ee   : > { %4377 = vmatprep.subr.bf16.mxu0 %v6619_v46  ;;  %4459 = vmatprep.subr.bf16.mxu1 %v6620_v47  ;;  %v6667_v46 = vld [vmem:[#allocation2 + $0x7e4] ss:$16 sps:$4 sm:$0xff]   ;;  %v6668_v47 = vld [vmem:[#allocation2 + $0x7ec] ss:$16 sps:$4 sm:$0xff]  }
 0x2f1   : > { %4378 = vmatpush1.bf16.msra.mxu0 %v6621_v49  ;;  %4460 = vmatpush1.bf16.msra.mxu1 %v6622_v50  ;;  %v6669_v49 = vld [vmem:[#allocation2 + $0x7e0] ss:$16 sps:$4 sm:$0xff]   ;;  %v6670_v50 = vld [vmem:[#allocation2 + $0x7e8] ss:$16 sps:$4 sm:$0xff]  }
 0x2f2   : > { %4379 = vmatprep.subr.bf16.mxu0 %v6623_v16  ;;  %4461 = vmatprep.subr.bf16.mxu1 %v6624_v51  ;;  %v6671_v16 = vld [vmem:[#allocation2 + $0x804] ss:$16 sps:$4 sm:$0xff]   ;;  %v6672_v51 = vld [vmem:[#allocation2 + $0x80c] ss:$16 sps:$4 sm:$0xff]  }
 0x2f5   : > { %4380 = vmatpush1.bf16.msra.mxu0 %v6625_v52  ;;  %4462 = vmatpush1.bf16.msra.mxu1 %v6626_v53  ;;  %v6673_v52 = vld [vmem:[#allocation2 + $0x800] ss:$16 sps:$4 sm:$0xff]   ;;  %v6674_v53 = vld [vmem:[#allocation2 + $0x808] ss:$16 sps:$4 sm:$0xff]  }
 0x2f6   : > { %4381 = vmatprep.subr.bf16.mxu0 %v6627_v54  ;;  %4463 = vmatprep.subr.bf16.mxu1 %v6628_v57  ;;  %v6675_v54 = vld [vmem:[#allocation2 + $0x824] ss:$16 sps:$4 sm:$0xff]   ;;  %v6676_v57 = vld [vmem:[#allocation2 + $0x82c] ss:$16 sps:$4 sm:$0xff]  }
 0x2f7   : > { %v7211_v58 = vpop.f32.mrb[0].mxu0  ;;  %v7213_v60 = vpop.f32.mrb[0].mxu1 }
 0x2f8   : > { %v7215_v11 = vpop.f32.mrb[1].mxu0  ;;  %v7217_v61 = vpop.f32.mrb[1].mxu1 }
 0x2f9   : > { %v3954_v62 = vpop.f32.mrb[2].mxu0  ;;  %v4036_v63 = vpop.f32.mrb[2].mxu1  ;;  %4382 = vmatpush1.bf16.msra.mxu0 %v6629_v0  ;;  %4464 = vmatpush1.bf16.msra.mxu1 %v6630_v1  ;;  %v6679_v0 = vld [vmem:[#allocation2 + $0x844] ss:$16 sps:$4 sm:$0xff]   ;;  %v6680_v1 = vld [vmem:[#allocation2 + $0x84c] ss:$16 sps:$4 sm:$0xff]  }
 0x2fa   : > { %v3955_v2 = vpop.f32.mrb[3].mxu0  ;;  %v4037_v3 = vpop.f32.mrb[3].mxu1  ;;  %4383 = vmatprep.subr.bf16.mxu0 %v6631_v6  ;;  %4465 = vmatprep.subr.bf16.mxu1 %v6632_v7  ;;  %v6677_v62 = vld [vmem:[#allocation2 + $0x820] ss:$16 sps:$4 sm:$0xff]   ;;  %v6678_v63 = vld [vmem:[#allocation2 + $0x828] ss:$16 sps:$4 sm:$0xff]  }
 0x2fb   : > { %v6682_v2 = vld [vmem:[#allocation2 + $0x848] ss:$16 sps:$4 sm:$0xff]   ;;  %v6683_v3 = vld [vmem:[#allocation2 + $0x864] ss:$16 sps:$4 sm:$0xff]   ;;  %v6684_v6 = vld [vmem:[#allocation2 + $0x86c] ss:$16 sps:$4 sm:$0xff]  }
 0x2fc   : > { %v6685_v7 = vld [vmem:[#allocation2 + $0x860] ss:$16 sps:$4 sm:$0xff]  }
 0x2fd   : > { %4384 = vmatpush1.bf16.msra.mxu0 %v6633_v8  ;;  %4466 = vmatpush1.bf16.msra.mxu1 %v6634_v9  ;;  %v6686_v8 = vld [vmem:[#allocation2 + $0x868] ss:$16 sps:$4 sm:$0xff]   ;;  %v6687_v9 = vld [vmem:[#allocation2 + $0x884] ss:$16 sps:$4 sm:$0xff]  }
 0x2fe   : > { %4385 = vmatprep.subr.bf16.mxu0 %v6635_v12  ;;  %4467 = vmatprep.subr.bf16.mxu1 %v6636_v14  ;;  %v6688_v12 = vld [vmem:[#allocation2 + $0x88c] ss:$16 sps:$4 sm:$0xff]   ;;  %v6689_v14 = vld [vmem:[#allocation2 + $0x880] ss:$16 sps:$4 sm:$0xff]  }
 0x301   : > { %4386 = vmatpush1.bf16.msra.mxu0 %v6637_v20  ;;  %4468 = vmatpush1.bf16.msra.mxu1 %v6638_v15  ;;  %v6690_v20 = vld [vmem:[#allocation2 + $0x888] ss:$16 sps:$4 sm:$0xff]   ;;  %v6691_v15 = vld [vmem:[#allocation2 + $0x8a4] ss:$16 sps:$4 sm:$0xff]  }
 0x302   : > { %4387 = vmatprep.subr.bf16.mxu0 %v6639_v25  ;;  %4469 = vmatprep.subr.bf16.mxu1 %v6640_v56  ;;  %v6692_v25 = vld [vmem:[#allocation2 + $0x8ac] ss:$16 sps:$4 sm:$0xff]   ;;  %v6693_v56 = vld [vmem:[#allocation2 + $0x8a0] ss:$16 sps:$4 sm:$0xff]  }
 0x305   : > { %4388 = vmatpush1.bf16.msra.mxu0 %v6641_v17  ;;  %4470 = vmatpush1.bf16.msra.mxu1 %v6642_v18  ;;  %v6694_v17 = vld [vmem:[#allocation2 + $0x8a8] ss:$16 sps:$4 sm:$0xff]   ;;  %v6695_v18 = vld [vmem:[#allocation2 + $0x8c4] ss:$16 sps:$4 sm:$0xff]  }
 0x306   : > { %4389 = vmatprep.subr.bf16.mxu0 %v6643_v19  ;;  %4471 = vmatprep.subr.bf16.mxu1 %v6644_v22  ;;  %v6696_v19 = vld [vmem:[#allocation2 + $0x8cc] ss:$16 sps:$4 sm:$0xff]   ;;  %v6697_v22 = vld [vmem:[#allocation2 + $0x8c0] ss:$16 sps:$4 sm:$0xff]  }
 0x309   : > { %4390 = vmatpush1.bf16.msra.mxu0 %v6645_v32  ;;  %4472 = vmatpush1.bf16.msra.mxu1 %v6646_v23  ;;  %v6698_v32 = vld [vmem:[#allocation2 + $0x8c8] ss:$16 sps:$4 sm:$0xff]   ;;  %v6699_v23 = vld [vmem:[#allocation2 + $0x8e4] ss:$16 sps:$4 sm:$0xff]  }
 0x30a   : > { %4391 = vmatprep.subr.bf16.mxu0 %v6647_v24  ;;  %4473 = vmatprep.subr.bf16.mxu1 %v6648_v26  ;;  %v6700_v24 = vld [vmem:[#allocation2 + $0x8ec] ss:$16 sps:$4 sm:$0xff]   ;;  %v6701_v26 = vld [vmem:[#allocation2 + $0x8e0] ss:$16 sps:$4 sm:$0xff]  }
 0x30d   : > { %4392 = vmatpush1.bf16.msra.mxu0 %v6649_v28  ;;  %4474 = vmatpush1.bf16.msra.mxu1 %v6650_v29  ;;  %v6702_v28 = vld [vmem:[#allocation2 + $0x8e8] ss:$16 sps:$4 sm:$0xff]   ;;  %v6703_v29 = vld [vmem:[#allocation2 + $0x904] ss:$16 sps:$4 sm:$0xff]  }
 0x30e   : > { %4393 = vmatprep.subr.bf16.mxu0 %v6651_v44  ;;  %4475 = vmatprep.subr.bf16.mxu1 %v6652_v30  ;;  %v6704_v44 = vld [vmem:[#allocation2 + $0x90c] ss:$16 sps:$4 sm:$0xff]   ;;  %v6705_v30 = vld [vmem:[#allocation2 + $0x900] ss:$16 sps:$4 sm:$0xff]  }
 0x311   : > { %4394 = vmatpush1.bf16.msra.mxu0 %v6653_v31  ;;  %4476 = vmatpush1.bf16.msra.mxu1 %v6654_v33  ;;  %v6706_v31 = vld [vmem:[#allocation2 + $0x908] ss:$16 sps:$4 sm:$0xff]   ;;  %v6707_v33 = vld [vmem:[#allocation2 + $0x924] ss:$16 sps:$4 sm:$0xff]  }
 0x312   : > { %4395 = vmatprep.subr.bf16.mxu0 %v6655_v34  ;;  %4477 = vmatprep.subr.bf16.mxu1 %v6656_v35  ;;  %v6708_v34 = vld [vmem:[#allocation2 + $0x92c] ss:$16 sps:$4 sm:$0xff]   ;;  %v6709_v35 = vld [vmem:[#allocation2 + $0x920] ss:$16 sps:$4 sm:$0xff]  }
 0x315   : > { %4396 = vmatpush1.bf16.msra.mxu0 %v6657_v36  ;;  %4478 = vmatpush1.bf16.msra.mxu1 %v6658_v37  ;;  %v6710_v36 = vld [vmem:[#allocation2 + $0x928] ss:$16 sps:$4 sm:$0xff]   ;;  %v6711_v37 = vld [vmem:[#allocation2 + $0x944] ss:$16 sps:$4 sm:$0xff]  }
 0x316   : > { %4397 = vmatprep.subr.bf16.mxu0 %v6659_v38  ;;  %4479 = vmatprep.subr.bf16.mxu1 %v6660_v39  ;;  %v6712_v38 = vld [vmem:[#allocation2 + $0x94c] ss:$16 sps:$4 sm:$0xff]   ;;  %v6714_v39 = vld [vmem:[#allocation2 + $0x948] ss:$16 sps:$4 sm:$0xff]  }
 0x319   : > { %4398 = vmatpush1.bf16.msra.mxu0 %v6661_v40  ;;  %4480 = vmatpush1.bf16.msra.mxu1 %v6662_v41  ;;  %v6715_v40 = vld [vmem:[#allocation2 + $0x964] ss:$16 sps:$4 sm:$0xff]   ;;  %v6716_v41 = vld [vmem:[#allocation2 + $0x96c] ss:$16 sps:$4 sm:$0xff]  }
 0x31a   : > { %4399 = vmatprep.subr.bf16.mxu0 %v6663_v42  ;;  %4481 = vmatprep.subr.bf16.mxu1 %v6664_v43  ;;  %v6717_v42 = vld [vmem:[#allocation2 + $0x960] ss:$16 sps:$4 sm:$0xff]   ;;  %v6718_v43 = vld [vmem:[#allocation2 + $0x968] ss:$16 sps:$4 sm:$0xff]  }
 0x31d   : > { %4400 = vmatpush1.bf16.msra.mxu0 %v6665_v55  ;;  %4482 = vmatpush1.bf16.msra.mxu1 %v6666_v45  ;;  %v6720_v55 = vld [vmem:[#allocation2 + $0x98c] ss:$16 sps:$4 sm:$0xff]   ;;  %v6721_v45 = vld [vmem:[#allocation2 + $0x980] ss:$16 sps:$4 sm:$0xff]  }
 0x31e   : > { %4401 = vmatprep.subr.bf16.mxu0 %v6667_v46  ;;  %4483 = vmatprep.subr.bf16.mxu1 %v6668_v47  ;;  %v6722_v46 = vld [vmem:[#allocation2 + $0x988] ss:$16 sps:$4 sm:$0xff]   ;;  %v6723_v47 = vld [vmem:[#allocation2 + $0x9a4] ss:$16 sps:$4 sm:$0xff]  }
 0x321   : > { %4402 = vmatpush1.bf16.msra.mxu0 %v6669_v49  ;;  %4484 = vmatpush1.bf16.msra.mxu1 %v6670_v50  ;;  %v6724_v49 = vld [vmem:[#allocation2 + $0x9ac] ss:$16 sps:$4 sm:$0xff]   ;;  %v6725_v50 = vld [vmem:[#allocation2 + $0x9a0] ss:$16 sps:$4 sm:$0xff]  }
 0x322   : > { %4412 = vmatprep.subr.bf16.mxu0 %v6671_v16  ;;  %4494 = vmatprep.subr.bf16.mxu1 %v6672_v51  ;;  %v6726_v16 = vld [vmem:[#allocation2 + $0x9a8] ss:$16 sps:$4 sm:$0xff]   ;;  %v6727_v51 = vld [vmem:[#allocation2 + $0x9c4] ss:$16 sps:$4 sm:$0xff]  }
 0x324   : > { %4404 = vmatmul.mubr.bf16.vlgmr.msra.gmra.mrb[4].mxu0 %v7161_v27  ;;  %4486 = vmatmul.mubr.bf16.vlgmr.msra.gmra.mrb[4].mxu1 %v7161_v27  ;;  %v6681_v27 = vld [vmem:[#allocation2 + $0x840] ss:$16 sps:$4 sm:$0xff]  }
 0x325   : > { %4413 = vmatpush1.bf16.msra.mxu0 %v6673_v52  ;;  %4495 = vmatpush1.bf16.msra.mxu1 %v6674_v53  ;;  %v6728_v52 = vld [vmem:[#allocation2 + $0x9cc] ss:$16 sps:$4 sm:$0xff]   ;;  %v6729_v53 = vld [vmem:[#allocation2 + $0x9c0] ss:$16 sps:$4 sm:$0xff]  }
 0x326   : > { %4414 = vmatprep.subr.bf16.mxu0 %v6675_v54  ;;  %4496 = vmatprep.subr.bf16.mxu1 %v6676_v57  ;;  %v6730_v54 = vld [vmem:[#allocation2 + $0x9c8] ss:$16 sps:$4 sm:$0xff]   ;;  %v6731_v57 = vld [vmem:[#allocation2 + $0x9e4] ss:$16 sps:$4 sm:$0xff]  }
 0x327   : > { %4444 = vmatprep.mubr.bf16.mxu0 %v6972_v13  ;;  %4526 = vmatprep.mubr.bf16.mxu1 %v6972_v13 }
 0x329   : > { %4415 = vmatpush1.bf16.msra.mxu0 %v6677_v62  ;;  %4497 = vmatpush1.bf16.msra.mxu1 %v6678_v63  ;;  %v6732_v62 = vld [vmem:[#allocation2 + $0x9ec] ss:$16 sps:$4 sm:$0xff]   ;;  %v6733_v63 = vld [vmem:[#allocation2 + $0x9e0] ss:$16 sps:$4 sm:$0xff]  }
 0x32a   : > { %4416 = vmatprep.subr.bf16.mxu0 %v6679_v0  ;;  %4498 = vmatprep.subr.bf16.mxu1 %v6680_v1  ;;  %v6734_v0 = vld [vmem:[#allocation2 + $0x9e8] ss:$16 sps:$4 sm:$0xff]   ;;  %v6735_v1 = vld [vmem:[#allocation2 + $0xa04] ss:$16 sps:$4 sm:$0xff]  }
 0x32d   : > { %4417 = vmatpush1.bf16.msra.mxu0 %v6681_v27  ;;  %4499 = vmatpush1.bf16.msra.mxu1 %v6682_v2  ;;  %v6736_v27 = vld [vmem:[#allocation2 + $0xa0c] ss:$16 sps:$4 sm:$0xff]   ;;  %v6737_v2 = vld [vmem:[#allocation2 + $0xa00] ss:$16 sps:$4 sm:$0xff]  }
 0x32e   : > { %4418 = vmatprep.subr.bf16.mxu0 %v6683_v3  ;;  %4500 = vmatprep.subr.bf16.mxu1 %v6684_v6  ;;  %v6738_v3 = vld [vmem:[#allocation2 + $0xa08] ss:$16 sps:$4 sm:$0xff]   ;;  %v6739_v6 = vld [vmem:[#allocation2 + $0xa24] ss:$16 sps:$4 sm:$0xff]  }
 0x331   : > { %4419 = vmatpush1.bf16.msra.mxu0 %v6685_v7  ;;  %4501 = vmatpush1.bf16.msra.mxu1 %v6686_v8  ;;  %v6740_v7 = vld [vmem:[#allocation2 + $0xa2c] ss:$16 sps:$4 sm:$0xff]   ;;  %v6741_v8 = vld [vmem:[#allocation2 + $0xa20] ss:$16 sps:$4 sm:$0xff]  }
 0x332   : > { %4420 = vmatprep.subr.bf16.mxu0 %v6687_v9  ;;  %4502 = vmatprep.subr.bf16.mxu1 %v6688_v12  ;;  %v6742_v9 = vld [vmem:[#allocation2 + $0xa28] ss:$16 sps:$4 sm:$0xff]   ;;  %v6743_v12 = vld [vmem:[#allocation2 + $0xa44] ss:$16 sps:$4 sm:$0xff]  }
 0x335   : > { %4421 = vmatpush1.bf16.msra.mxu0 %v6689_v14  ;;  %4503 = vmatpush1.bf16.msra.mxu1 %v6690_v20  ;;  %v6744_v14 = vld [vmem:[#allocation2 + $0xa4c] ss:$16 sps:$4 sm:$0xff]   ;;  %v6745_v20 = vld [vmem:[#allocation2 + $0xa40] ss:$16 sps:$4 sm:$0xff]  }
 0x336   : > { %4422 = vmatprep.subr.bf16.mxu0 %v6691_v15  ;;  %4504 = vmatprep.subr.bf16.mxu1 %v6692_v25  ;;  %v6746_v15 = vld [vmem:[#allocation2 + $0xa48] ss:$16 sps:$4 sm:$0xff]   ;;  %v6747_v25 = vld [vmem:[#allocation2 + $0xa64] ss:$16 sps:$4 sm:$0xff]  }
 0x339   : > { %4423 = vmatpush1.bf16.msra.mxu0 %v6693_v56  ;;  %4505 = vmatpush1.bf16.msra.mxu1 %v6694_v17  ;;  %v6748_v56 = vld [vmem:[#allocation2 + $0xa6c] ss:$16 sps:$4 sm:$0xff]   ;;  %v6749_v17 = vld [vmem:[#allocation2 + $0xa60] ss:$16 sps:$4 sm:$0xff]  }
 0x33a   : > { %4424 = vmatprep.subr.bf16.mxu0 %v6695_v18  ;;  %4506 = vmatprep.subr.bf16.mxu1 %v6696_v19  ;;  %v6750_v18 = vld [vmem:[#allocation2 + $0xa68] ss:$16 sps:$4 sm:$0xff]   ;;  %v6751_v19 = vld [vmem:[#allocation2 + $0xa84] ss:$16 sps:$4 sm:$0xff]  }
 0x33d   : > { %4425 = vmatpush1.bf16.msra.mxu0 %v6697_v22  ;;  %4507 = vmatpush1.bf16.msra.mxu1 %v6698_v32  ;;  %v6752_v22 = vld [vmem:[#allocation2 + $0xa8c] ss:$16 sps:$4 sm:$0xff]   ;;  %v6753_v32 = vld [vmem:[#allocation2 + $0xa80] ss:$16 sps:$4 sm:$0xff]  }
 0x33e   : > { %4426 = vmatprep.subr.bf16.mxu0 %v6699_v23  ;;  %4508 = vmatprep.subr.bf16.mxu1 %v6700_v24  ;;  %v6754_v23 = vld [vmem:[#allocation2 + $0xa88] ss:$16 sps:$4 sm:$0xff]   ;;  %v6755_v24 = vld [vmem:[#allocation2 + $0xaa4] ss:$16 sps:$4 sm:$0xff]  }
 0x341   : > { %4427 = vmatpush1.bf16.msra.mxu0 %v6701_v26  ;;  %4509 = vmatpush1.bf16.msra.mxu1 %v6702_v28  ;;  %v6756_v26 = vld [vmem:[#allocation2 + $0xaac] ss:$16 sps:$4 sm:$0xff]   ;;  %v6757_v28 = vld [vmem:[#allocation2 + $0xaa0] ss:$16 sps:$4 sm:$0xff]  }
 0x342   : > { %4539 = vmatprep.subr.bf16.mxu0 %v6703_v29  ;;  %4621 = vmatprep.subr.bf16.mxu1 %v6704_v44  ;;  %v6758_v29 = vld [vmem:[#allocation2 + $0xaa8] ss:$16 sps:$4 sm:$0xff]   ;;  %v6759_v44 = vld [vmem:[#allocation2 + $0xac4] ss:$16 sps:$4 sm:$0xff]  }
 0x344   : > { %4445 = vmatmul.mubr.bf16.vlgmr.msra.gmra.mrb[4].mxu0 %v7172_v4  ;;  %4527 = vmatmul.mubr.bf16.vlgmr.msra.gmra.mrb[4].mxu1 %v7172_v4  ;;  %v6713_v4 = vld [vmem:[#allocation2 + $0x940] ss:$16 sps:$4 sm:$0xff]  }
 0x345   : > { %4540 = vmatpush1.bf16.msra.mxu0 %v6705_v30  ;;  %4622 = vmatpush1.bf16.msra.mxu1 %v6706_v31  ;;  %v6760_v30 = vld [vmem:[#allocation2 + $0xacc] ss:$16 sps:$4 sm:$0xff]   ;;  %v6761_v31 = vld [vmem:[#allocation2 + $0xac0] ss:$16 sps:$4 sm:$0xff]  }
 0x346   : > { %4541 = vmatprep.subr.bf16.mxu0 %v6707_v33  ;;  %4623 = vmatprep.subr.bf16.mxu1 %v6708_v34  ;;  %v6762_v33 = vld [vmem:[#allocation2 + $0xac8] ss:$16 sps:$4 sm:$0xff]   ;;  %v6763_v34 = vld [vmem:[#allocation2 + $0xae4] ss:$16 sps:$4 sm:$0xff]  }
 0x347   : > { %4571 = vmatprep.mubr.bf16.mxu0 %v7175_v10  ;;  %4653 = vmatprep.mubr.bf16.mxu1 %v7175_v10  ;;  %v6719_v10 = vld [vmem:[#allocation2 + $0x984] ss:$16 sps:$4 sm:$0xff]  }
 0x349   : > { %4542 = vmatpush1.bf16.msra.mxu0 %v6709_v35  ;;  %4624 = vmatpush1.bf16.msra.mxu1 %v6710_v36  ;;  %v6764_v35 = vld [vmem:[#allocation2 + $0xaec] ss:$16 sps:$4 sm:$0xff]   ;;  %v6765_v36 = vld [vmem:[#allocation2 + $0xae0] ss:$16 sps:$4 sm:$0xff]  }
 0x34a   : > { %4543 = vmatprep.subr.bf16.mxu0 %v6711_v37  ;;  %4625 = vmatprep.subr.bf16.mxu1 %v6712_v38  ;;  %v6766_v37 = vld [vmem:[#allocation2 + $0xae8] ss:$16 sps:$4 sm:$0xff]   ;;  %v6767_v38 = vld [vmem:[#allocation2 + $0xb04] ss:$16 sps:$4 sm:$0xff]  }
 0x34d   : > { %4544 = vmatpush1.bf16.msra.mxu0 %v6713_v4  ;;  %4626 = vmatpush1.bf16.msra.mxu1 %v6714_v39  ;;  %v6768_v4 = vld [vmem:[#allocation2 + $0xb0c] ss:$16 sps:$4 sm:$0xff]   ;;  %v6769_v39 = vld [vmem:[#allocation2 + $0xb00] ss:$16 sps:$4 sm:$0xff]  }
 0x34e   : > { %4545 = vmatprep.subr.bf16.mxu0 %v6715_v40  ;;  %4627 = vmatprep.subr.bf16.mxu1 %v6716_v41  ;;  %v6770_v40 = vld [vmem:[#allocation2 + $0xb08] ss:$16 sps:$4 sm:$0xff]   ;;  %v6771_v41 = vld [vmem:[#allocation2 + $0xb24] ss:$16 sps:$4 sm:$0xff]  }
 0x351   : > { %4546 = vmatpush1.bf16.msra.mxu0 %v6717_v42  ;;  %4628 = vmatpush1.bf16.msra.mxu1 %v6718_v43  ;;  %v6772_v42 = vld [vmem:[#allocation2 + $0xb2c] ss:$16 sps:$4 sm:$0xff]   ;;  %v6773_v43 = vld [vmem:[#allocation2 + $0xb20] ss:$16 sps:$4 sm:$0xff]  }
 0x352   : > { %4547 = vmatprep.subr.bf16.mxu0 %v6719_v10  ;;  %4629 = vmatprep.subr.bf16.mxu1 %v6720_v55  ;;  %v6774_v10 = vld [vmem:[#allocation2 + $0xb28] ss:$16 sps:$4 sm:$0xff]   ;;  %v6775_v55 = vld [vmem:[#allocation2 + $0xb44] ss:$16 sps:$4 sm:$0xff]  }
 0x355   : > { %4548 = vmatpush1.bf16.msra.mxu0 %v6721_v45  ;;  %4630 = vmatpush1.bf16.msra.mxu1 %v6722_v46  ;;  %v6776_v45 = vld [vmem:[#allocation2 + $0xb4c] ss:$16 sps:$4 sm:$0xff]   ;;  %v6778_v46 = vld [vmem:[#allocation2 + $0xb48] ss:$16 sps:$4 sm:$0xff]  }
 0x356   : > { %4549 = vmatprep.subr.bf16.mxu0 %v6723_v47  ;;  %4631 = vmatprep.subr.bf16.mxu1 %v6724_v49  ;;  %v6779_v47 = vld [vmem:[#allocation2 + $0xb64] ss:$16 sps:$4 sm:$0xff]   ;;  %v6780_v49 = vld [vmem:[#allocation2 + $0xb6c] ss:$16 sps:$4 sm:$0xff]  }
 0x359   : > { %4550 = vmatpush1.bf16.msra.mxu0 %v6725_v50  ;;  %4632 = vmatpush1.bf16.msra.mxu1 %v6726_v16  ;;  %v6781_v50 = vld [vmem:[#allocation2 + $0xb60] ss:$16 sps:$4 sm:$0xff]   ;;  %v6782_v16 = vld [vmem:[#allocation2 + $0xb68] ss:$16 sps:$4 sm:$0xff]  }
 0x35a   : > { %4551 = vmatprep.subr.bf16.mxu0 %v6727_v51  ;;  %4633 = vmatprep.subr.bf16.mxu1 %v6728_v52  ;;  %v6783_v51 = vld [vmem:[#allocation2 + $0xb84] ss:$16 sps:$4 sm:$0xff]   ;;  %v6784_v52 = vld [vmem:[#allocation2 + $0xb8c] ss:$16 sps:$4 sm:$0xff]  }
 0x35d   : > { %4552 = vmatpush1.bf16.msra.mxu0 %v6729_v53  ;;  %4634 = vmatpush1.bf16.msra.mxu1 %v6730_v54  ;;  %v6785_v53 = vld [vmem:[#allocation2 + $0xb80] ss:$16 sps:$4 sm:$0xff]   ;;  %v6786_v54 = vld [vmem:[#allocation2 + $0xb88] ss:$16 sps:$4 sm:$0xff]  }
 0x35e   : > { %4553 = vmatprep.subr.bf16.mxu0 %v6731_v57  ;;  %4635 = vmatprep.subr.bf16.mxu1 %v6732_v62  ;;  %v6787_v57 = vld [vmem:[#allocation2 + $0xba4] ss:$16 sps:$4 sm:$0xff]   ;;  %v6788_v62 = vld [vmem:[#allocation2 + $0xbac] ss:$16 sps:$4 sm:$0xff]  }
 0x361   : > { %4554 = vmatpush1.bf16.msra.mxu0 %v6733_v63  ;;  %4636 = vmatpush1.bf16.msra.mxu1 %v6734_v0  ;;  %v6789_v63 = vld [vmem:[#allocation2 + $0xba0] ss:$16 sps:$4 sm:$0xff]   ;;  %v6790_v0 = vld [vmem:[#allocation2 + $0xba8] ss:$16 sps:$4 sm:$0xff]  }
 0x362   : > { %4555 = vmatprep.subr.bf16.mxu0 %v6735_v1  ;;  %4637 = vmatprep.subr.bf16.mxu1 %v6736_v27  ;;  %v6791_v1 = vld [vmem:[#allocation2 + $0xbc4] ss:$16 sps:$4 sm:$0xff]   ;;  %v6792_v27 = vld [vmem:[#allocation2 + $0xbcc] ss:$16 sps:$4 sm:$0xff]  }
 0x365   : > { %4556 = vmatpush1.bf16.msra.mxu0 %v6737_v2  ;;  %4638 = vmatpush1.bf16.msra.mxu1 %v6738_v3  ;;  %v6793_v2 = vld [vmem:[#allocation2 + $0xbc0] ss:$16 sps:$4 sm:$0xff]   ;;  %v6794_v3 = vld [vmem:[#allocation2 + $0xbc8] ss:$16 sps:$4 sm:$0xff]  }
 0x366   : > { %4557 = vmatprep.subr.bf16.mxu0 %v6739_v6  ;;  %4639 = vmatprep.subr.bf16.mxu1 %v6740_v7  ;;  %v6795_v6 = vld [vmem:[#allocation2 + $0xbe4] ss:$16 sps:$4 sm:$0xff]   ;;  %v6796_v7 = vld [vmem:[#allocation2 + $0xbec] ss:$16 sps:$4 sm:$0xff]  }
 0x369   : > { %4558 = vmatpush1.bf16.msra.mxu0 %v6741_v8  ;;  %4640 = vmatpush1.bf16.msra.mxu1 %v6742_v9  ;;  %v6797_v8 = vld [vmem:[#allocation2 + $0xbe0] ss:$16 sps:$4 sm:$0xff]   ;;  %v6798_v9 = vld [vmem:[#allocation2 + $0xbe8] ss:$16 sps:$4 sm:$0xff]  }
 0x36a   : > { %4559 = vmatprep.subr.bf16.mxu0 %v6743_v12  ;;  %4641 = vmatprep.subr.bf16.mxu1 %v6744_v14  ;;  %v6799_v12 = vld [vmem:[#allocation2 + $0xc04] ss:$16 sps:$4 sm:$0xff]   ;;  %v6800_v14 = vld [vmem:[#allocation2 + $0xc0c] ss:$16 sps:$4 sm:$0xff]  }
 0x36d   : > { %4560 = vmatpush1.bf16.msra.mxu0 %v6745_v20  ;;  %4642 = vmatpush1.bf16.msra.mxu1 %v6746_v15  ;;  %v4708_v20 = vrot.slane %v7093_v48, 1  ;;  %v6801_v15 = vld [vmem:[#allocation2 + $0xc00] ss:$16 sps:$4 sm:$0xff]   ;;  %v6808_v48 = vld [vmem:[#allocation2 + $0xc4c] ss:$16 sps:$4 sm:$0xff]  }
 0x36e   : > { %4561 = vmatprep.subr.bf16.mxu0 %v6747_v25  ;;  %4643 = vmatprep.subr.bf16.mxu1 %v6748_v56  ;;  %v6802_v25 = vld [vmem:[#allocation2 + $0xc08] ss:$16 sps:$4 sm:$0xff]   ;;  %v6803_v56 = vld [vmem:[#allocation2 + $0xc24] ss:$16 sps:$4 sm:$0xff]  }
 0x371   : > { %4562 = vmatpush1.bf16.msra.mxu0 %v6749_v17  ;;  %4644 = vmatpush1.bf16.msra.mxu1 %v6750_v18  ;;  %v6804_v17 = vld [vmem:[#allocation2 + $0xc2c] ss:$16 sps:$4 sm:$0xff]   ;;  %v6805_v18 = vld [vmem:[#allocation2 + $0xc20] ss:$16 sps:$4 sm:$0xff]  }
 0x372   : > { %4563 = vmatprep.subr.bf16.mxu0 %v6751_v19  ;;  %4645 = vmatprep.subr.bf16.mxu1 %v6752_v22  ;;  %v6806_v19 = vld [vmem:[#allocation2 + $0xc28] ss:$16 sps:$4 sm:$0xff]   ;;  %v6807_v22 = vld [vmem:[#allocation2 + $0xc44] ss:$16 sps:$4 sm:$0xff]  }
 0x375   : > { %4564 = vmatpush1.bf16.msra.mxu0 %v6753_v32  ;;  %4646 = vmatpush1.bf16.msra.mxu1 %v6754_v23  ;;  %v6809_v32 = vld [vmem:[#allocation2 + $0xc40] ss:$16 sps:$4 sm:$0xff]   ;;  %v6811_v23 = vld [vmem:[#allocation2 + $0xc64] ss:$16 sps:$4 sm:$0xff]  }
 0x376   : > { %4565 = vmatprep.subr.bf16.mxu0 %v6755_v24  ;;  %4647 = vmatprep.subr.bf16.mxu1 %v6756_v26  ;;  %v6812_v24 = vld [vmem:[#allocation2 + $0xc6c] ss:$16 sps:$4 sm:$0xff]   ;;  %v6813_v26 = vld [vmem:[#allocation2 + $0xc60] ss:$16 sps:$4 sm:$0xff]  }
 0x379   : > { %4566 = vmatpush1.bf16.msra.mxu0 %v6757_v28  ;;  %4648 = vmatpush1.bf16.msra.mxu1 %v6758_v29  ;;  %v6814_v28 = vld [vmem:[#allocation2 + $0xc68] ss:$16 sps:$4 sm:$0xff]   ;;  %v6815_v29 = vld [vmem:[#allocation2 + $0xc84] ss:$16 sps:$4 sm:$0xff]  }
 0x37a   : > { %4567 = vmatprep.subr.bf16.mxu0 %v6759_v44  ;;  %4649 = vmatprep.subr.bf16.mxu1 %v6760_v30  ;;  %v6816_v44 = vld [vmem:[#allocation2 + $0xc8c] ss:$16 sps:$4 sm:$0xff]   ;;  %v6817_v30 = vld [vmem:[#allocation2 + $0xc80] ss:$16 sps:$4 sm:$0xff]  }
 0x37d   : > { %4568 = vmatpush1.bf16.msra.mxu0 %v6761_v31  ;;  %4650 = vmatpush1.bf16.msra.mxu1 %v6762_v33  ;;  %v6818_v31 = vld [vmem:[#allocation2 + $0xc88] ss:$16 sps:$4 sm:$0xff]   ;;  %v6819_v33 = vld [vmem:[#allocation2 + $0xca4] ss:$16 sps:$4 sm:$0xff]  }
 0x37e   : > { %4569 = vmatprep.subr.bf16.mxu0 %v6763_v34  ;;  %4651 = vmatprep.subr.bf16.mxu1 %v6764_v35  ;;  %v6820_v34 = vld [vmem:[#allocation2 + $0xcac] ss:$16 sps:$4 sm:$0xff]   ;;  %v6821_v35 = vld [vmem:[#allocation2 + $0xca0] ss:$16 sps:$4 sm:$0xff]  }
 0x381   : > { %4570 = vmatpush1.bf16.msra.mxu0 %v6765_v36  ;;  %4652 = vmatpush1.bf16.msra.mxu1 %v6766_v37  ;;  %v6822_v36 = vld [vmem:[#allocation2 + $0xca8] ss:$16 sps:$4 sm:$0xff]   ;;  %v6823_v37 = vld [vmem:[#allocation2 + $0xcc4] ss:$16 sps:$4 sm:$0xff]  }
 0x382   : > { %4580 = vmatprep.subr.bf16.mxu0 %v6767_v38  ;;  %4662 = vmatprep.subr.bf16.mxu1 %v6768_v4  ;;  %v6824_v38 = vld [vmem:[#allocation2 + $0xccc] ss:$16 sps:$4 sm:$0xff]   ;;  %v6825_v4 = vld [vmem:[#allocation2 + $0xcc0] ss:$16 sps:$4 sm:$0xff]  }
 0x384   : > { %4572 = vmatmul.mubr.bf16.vlgmr.msra.gmra.mrb[4].mxu0 %v7182_v21  ;;  %4654 = vmatmul.mubr.bf16.vlgmr.msra.gmra.mrb[4].mxu1 %v7182_v21  ;;  %v6777_v21 = vld [vmem:[#allocation2 + $0xb40] ss:$16 sps:$4 sm:$0xff]  }
 0x385   : > { %4581 = vmatpush1.bf16.msra.mxu0 %v6769_v39  ;;  %4663 = vmatpush1.bf16.msra.mxu1 %v6770_v40  ;;  %v6826_v39 = vld [vmem:[#allocation2 + $0xcc8] ss:$16 sps:$4 sm:$0xff]   ;;  %v6827_v40 = vld [vmem:[#allocation2 + $0xce4] ss:$16 sps:$4 sm:$0xff]  }
 0x386   : > { %4582 = vmatprep.subr.bf16.mxu0 %v6771_v41  ;;  %4664 = vmatprep.subr.bf16.mxu1 %v6772_v42  ;;  %v6828_v41 = vld [vmem:[#allocation2 + $0xcec] ss:$16 sps:$4 sm:$0xff]   ;;  %v6829_v42 = vld [vmem:[#allocation2 + $0xce0] ss:$16 sps:$4 sm:$0xff]  }
 0x387   : > { %4612 = vmatprep.mubr.bf16.mxu0 %v6972_v13  ;;  %4694 = vmatprep.mubr.bf16.mxu1 %v6972_v13 }
 0x389   : > { %4583 = vmatpush1.bf16.msra.mxu0 %v6773_v43  ;;  %4665 = vmatpush1.bf16.msra.mxu1 %v6774_v10  ;;  %v6830_v43 = vld [vmem:[#allocation2 + $0xce8] ss:$16 sps:$4 sm:$0xff]   ;;  %v6831_v10 = vld [vmem:[#allocation2 + $0xd04] ss:$16 sps:$4 sm:$0xff]  }
 0x38a   : > { %4584 = vmatprep.subr.bf16.mxu0 %v6775_v55  ;;  %4666 = vmatprep.subr.bf16.mxu1 %v6776_v45  ;;  %v6832_v55 = vld [vmem:[#allocation2 + $0xd0c] ss:$16 sps:$4 sm:$0xff]   ;;  %v6833_v45 = vld [vmem:[#allocation2 + $0xd00] ss:$16 sps:$4 sm:$0xff]  }
 0x38d   : > { %4585 = vmatpush1.bf16.msra.mxu0 %v6777_v21  ;;  %4667 = vmatpush1.bf16.msra.mxu1 %v6778_v46  ;;  %v6834_v21 = vld [vmem:[#allocation2 + $0xd08] ss:$16 sps:$4 sm:$0xff]   ;;  %v6835_v46 = vld [vmem:[#allocation2 + $0xd24] ss:$16 sps:$4 sm:$0xff]  }
 0x38e   : > { %4586 = vmatprep.subr.bf16.mxu0 %v6779_v47  ;;  %4668 = vmatprep.subr.bf16.mxu1 %v6780_v49  ;;  %v6836_v47 = vld [vmem:[#allocation2 + $0xd2c] ss:$16 sps:$4 sm:$0xff]   ;;  %v6837_v49 = vld [vmem:[#allocation2 + $0xd20] ss:$16 sps:$4 sm:$0xff]  }
 0x391   : > { %4587 = vmatpush1.bf16.msra.mxu0 %v6781_v50  ;;  %4669 = vmatpush1.bf16.msra.mxu1 %v6782_v16  ;;  %v6838_v50 = vld [vmem:[#allocation2 + $0xd28] ss:$16 sps:$4 sm:$0xff]   ;;  %v6839_v16 = vld [vmem:[#allocation2 + $0xd44] ss:$16 sps:$4 sm:$0xff]  }
 0x392   : > { %4588 = vmatprep.subr.bf16.mxu0 %v6783_v51  ;;  %4670 = vmatprep.subr.bf16.mxu1 %v6784_v52  ;;  %v6840_v51 = vld [vmem:[#allocation2 + $0xd4c] ss:$16 sps:$4 sm:$0xff]   ;;  %v6841_v52 = vld [vmem:[#allocation2 + $0xd40] ss:$16 sps:$4 sm:$0xff]  }
 0x395   : > { %4589 = vmatpush1.bf16.msra.mxu0 %v6785_v53  ;;  %4671 = vmatpush1.bf16.msra.mxu1 %v6786_v54  ;;  %v6842_v53 = vld [vmem:[#allocation2 + $0xd48] ss:$16 sps:$4 sm:$0xff]   ;;  %v6843_v54 = vld [vmem:[#allocation2 + $0xd64] ss:$16 sps:$4 sm:$0xff]  }
 0x396   : > { %4590 = vmatprep.subr.bf16.mxu0 %v6787_v57  ;;  %4672 = vmatprep.subr.bf16.mxu1 %v6788_v62  ;;  %v6844_v57 = vld [vmem:[#allocation2 + $0xd6c] ss:$16 sps:$4 sm:$0xff]   ;;  %v6845_v62 = vld [vmem:[#allocation2 + $0xd60] ss:$16 sps:$4 sm:$0xff]  }
 0x399   : > { %4591 = vmatpush1.bf16.msra.mxu0 %v6789_v63  ;;  %4673 = vmatpush1.bf16.msra.mxu1 %v6790_v0  ;;  %v6846_v63 = vld [vmem:[#allocation2 + $0xd68] ss:$16 sps:$4 sm:$0xff]   ;;  %v6847_v0 = vld [vmem:[#allocation2 + $0xd84] ss:$16 sps:$4 sm:$0xff]  }
 0x39a   : > { %4592 = vmatprep.subr.bf16.mxu0 %v6791_v1  ;;  %4674 = vmatprep.subr.bf16.mxu1 %v6792_v27  ;;  %v6848_v1 = vld [vmem:[#allocation2 + $0xd8c] ss:$16 sps:$4 sm:$0xff]   ;;  %v6849_v27 = vld [vmem:[#allocation2 + $0xd80] ss:$16 sps:$4 sm:$0xff]  }
 0x39d   : > { %4593 = vmatpush1.bf16.msra.mxu0 %v6793_v2  ;;  %4675 = vmatpush1.bf16.msra.mxu1 %v6794_v3  ;;  %v6850_v2 = vld [vmem:[#allocation2 + $0xd88] ss:$16 sps:$4 sm:$0xff]   ;;  %v6851_v3 = vld [vmem:[#allocation2 + $0xda4] ss:$16 sps:$4 sm:$0xff]  }
 0x39e   : > { %4594 = vmatprep.subr.bf16.mxu0 %v6795_v6  ;;  %4676 = vmatprep.subr.bf16.mxu1 %v6796_v7  ;;  %v6852_v6 = vld [vmem:[#allocation2 + $0xdac] ss:$16 sps:$4 sm:$0xff]   ;;  %v6853_v7 = vld [vmem:[#allocation2 + $0xda0] ss:$16 sps:$4 sm:$0xff]  }
 0x3a1   : > { %4595 = vmatpush1.bf16.msra.mxu0 %v6797_v8  ;;  %4677 = vmatpush1.bf16.msra.mxu1 %v6798_v9  ;;  %v6854_v8 = vld [vmem:[#allocation2 + $0xda8] ss:$16 sps:$4 sm:$0xff]   ;;  %v6855_v9 = vld [vmem:[#allocation2 + $0xdc4] ss:$16 sps:$4 sm:$0xff]  }
 0x3a2   : > { %4713 = vmatprep.subr.bf16.mxu0 %v6799_v12  ;;  %4795 = vmatprep.subr.bf16.mxu1 %v6800_v14  ;;  %v6856_v12 = vld [vmem:[#allocation2 + $0xdcc] ss:$16 sps:$4 sm:$0xff]   ;;  %v6857_v14 = vld [vmem:[#allocation2 + $0xdc0] ss:$16 sps:$4 sm:$0xff]  }
 0x3a4   : > { %4613 = vmatmul.mubr.bf16.vlgmr.msra.gmra.mrb[4].mxu0 %v7189_v59  ;;  %4695 = vmatmul.mubr.bf16.vlgmr.msra.gmra.mrb[4].mxu1 %v7189_v59  ;;  %v6810_v59 = vld [vmem:[#allocation2 + $0xc48] ss:$16 sps:$4 sm:$0xff]  }
 0x3a5   : > { %4714 = vmatpush1.bf16.msra.mxu0 %v6801_v15  ;;  %4796 = vmatpush1.bf16.msra.mxu1 %v6802_v25  ;;  %v6859_v15 = vld [vmem:[#allocation2 + $0xde4] ss:$16 sps:$4 sm:$0xff]   ;;  %v6860_v25 = vld [vmem:[#allocation2 + $0xdec] ss:$16 sps:$4 sm:$0xff]  }
 0x3a6   : > { %4715 = vmatprep.subr.bf16.mxu0 %v6803_v56  ;;  %4797 = vmatprep.subr.bf16.mxu1 %v6804_v17  ;;  %v4707_v56 = vrot.slane %v7097_v5, 1  ;;  %v6861_v17 = vld [vmem:[#allocation2 + $0xde0] ss:$16 sps:$4 sm:$0xff]  }
 0x3a7   : > { %4745 = vmatprep.mubr.bf16.mxu0 %v4708_v20  ;;  %4827 = vmatprep.mubr.bf16.mxu1 %v4708_v20  ;;  %v6858_v20 = vld [vmem:[#allocation2 + $0xdc8] ss:$16 sps:$4 sm:$0xff]   ;;  %v6869_v5 = vld [vmem:[#allocation2 + $0xe20] ss:$16 sps:$4 sm:$0xff]  }
 0x3a9   : > { %4716 = vmatpush1.bf16.msra.mxu0 %v6805_v18  ;;  %4798 = vmatpush1.bf16.msra.mxu1 %v6806_v19  ;;  %v6862_v18 = vld [vmem:[#allocation2 + $0xde8] ss:$16 sps:$4 sm:$0xff]   ;;  %v6863_v19 = vld [vmem:[#allocation2 + $0xe04] ss:$16 sps:$4 sm:$0xff]  }
 0x3aa   : > { %4717 = vmatprep.subr.bf16.mxu0 %v6807_v22  ;;  %4799 = vmatprep.subr.bf16.mxu1 %v6808_v48  ;;  %v6864_v22 = vld [vmem:[#allocation2 + $0xe0c] ss:$16 sps:$4 sm:$0xff]   ;;  %v6865_v48 = vld [vmem:[#allocation2 + $0xe00] ss:$16 sps:$4 sm:$0xff]  }
 0x3ad   : > { %4718 = vmatpush1.bf16.msra.mxu0 %v6809_v32  ;;  %4800 = vmatpush1.bf16.msra.mxu1 %v6810_v59  ;;  %v6866_v32 = vld [vmem:[#allocation2 + $0xe08] ss:$16 sps:$4 sm:$0xff]   ;;  %v6867_v59 = vld [vmem:[#allocation2 + $0xe24] ss:$16 sps:$4 sm:$0xff]  }
 0x3ae   : > { %4719 = vmatprep.subr.bf16.mxu0 %v6811_v23  ;;  %4801 = vmatprep.subr.bf16.mxu1 %v6812_v24  ;;  %v6868_v23 = vld [vmem:[#allocation2 + $0xe2c] ss:$16 sps:$4 sm:$0xff]   ;;  %v6870_v24 = vld [vmem:[#allocation2 + $0xe28] ss:$16 sps:$4 sm:$0xff]  }
 0x3b1   : > { %4720 = vmatpush1.bf16.msra.mxu0 %v6813_v26  ;;  %4802 = vmatpush1.bf16.msra.mxu1 %v6814_v28  ;;  %v6871_v26 = vld [vmem:[#allocation2 + $0xe44] ss:$16 sps:$4 sm:$0xff]   ;;  %v6872_v28 = vld [vmem:[#allocation2 + $0xe4c] ss:$16 sps:$4 sm:$0xff]  }
 0x3b2   : > { %4721 = vmatprep.subr.bf16.mxu0 %v6815_v29  ;;  %4803 = vmatprep.subr.bf16.mxu1 %v6816_v44  ;;  %v6873_v29 = vld [vmem:[#allocation2 + $0xe40] ss:$16 sps:$4 sm:$0xff]   ;;  %v6874_v44 = vld [vmem:[#allocation2 + $0xe48] ss:$16 sps:$4 sm:$0xff]  }
 0x3b5   : > { %4722 = vmatpush1.bf16.msra.mxu0 %v6817_v30  ;;  %4804 = vmatpush1.bf16.msra.mxu1 %v6818_v31  ;;  %v6875_v30 = vld [vmem:[#allocation2 + $0xe64] ss:$16 sps:$4 sm:$0xff]   ;;  %v6876_v31 = vld [vmem:[#allocation2 + $0xe6c] ss:$16 sps:$4 sm:$0xff]  }
 0x3b6   : > { %4723 = vmatprep.subr.bf16.mxu0 %v6819_v33  ;;  %4805 = vmatprep.subr.bf16.mxu1 %v6820_v34  ;;  %v6877_v33 = vld [vmem:[#allocation2 + $0xe60] ss:$16 sps:$4 sm:$0xff]   ;;  %v6878_v34 = vld [vmem:[#allocation2 + $0xe68] ss:$16 sps:$4 sm:$0xff]  }
 0x3b9   : > { %4724 = vmatpush1.bf16.msra.mxu0 %v6821_v35  ;;  %4806 = vmatpush1.bf16.msra.mxu1 %v6822_v36  ;;  %v6880_v35 = vld [vmem:[#allocation2 + $0xe8c] ss:$16 sps:$4 sm:$0xff]   ;;  %v6881_v36 = vld [vmem:[#allocation2 + $0xe80] ss:$16 sps:$4 sm:$0xff]  }
 0x3ba   : > { %4725 = vmatprep.subr.bf16.mxu0 %v6823_v37  ;;  %4807 = vmatprep.subr.bf16.mxu1 %v6824_v38  ;;  %v6882_v37 = vld [vmem:[#allocation2 + $0xe88] ss:$16 sps:$4 sm:$0xff]   ;;  %v6883_v38 = vld [vmem:[#allocation2 + $0xea4] ss:$16 sps:$4 sm:$0xff]  }
 0x3bd   : > { %4726 = vmatpush1.bf16.msra.mxu0 %v6825_v4  ;;  %4808 = vmatpush1.bf16.msra.mxu1 %v6826_v39  ;;  %v6884_v4 = vld [vmem:[#allocation2 + $0xeac] ss:$16 sps:$4 sm:$0xff]   ;;  %v6885_v39 = vld [vmem:[#allocation2 + $0xea0] ss:$16 sps:$4 sm:$0xff]  }
 0x3be   : > { %4727 = vmatprep.subr.bf16.mxu0 %v6827_v40  ;;  %4809 = vmatprep.subr.bf16.mxu1 %v6828_v41  ;;  %v6886_v40 = vld [vmem:[#allocation2 + $0xea8] ss:$16 sps:$4 sm:$0xff]   ;;  %v6887_v41 = vld [vmem:[#allocation2 + $0xec4] ss:$16 sps:$4 sm:$0xff]  }
 0x3c1   : > { %4728 = vmatpush1.bf16.msra.mxu0 %v6829_v42  ;;  %4810 = vmatpush1.bf16.msra.mxu1 %v6830_v43  ;;  %v6888_v42 = vld [vmem:[#allocation2 + $0xecc] ss:$16 sps:$4 sm:$0xff]   ;;  %v6889_v43 = vld [vmem:[#allocation2 + $0xec0] ss:$16 sps:$4 sm:$0xff]  }
 0x3c2   : > { %4729 = vmatprep.subr.bf16.mxu0 %v6831_v10  ;;  %4811 = vmatprep.subr.bf16.mxu1 %v6832_v55  ;;  %v6890_v10 = vld [vmem:[#allocation2 + $0xec8] ss:$16 sps:$4 sm:$0xff]   ;;  %v6891_v55 = vld [vmem:[#allocation2 + $0xee4] ss:$16 sps:$4 sm:$0xff]  }
 0x3c5   : > { %4730 = vmatpush1.bf16.msra.mxu0 %v6833_v45  ;;  %4812 = vmatpush1.bf16.msra.mxu1 %v6834_v21  ;;  %v6892_v45 = vld [vmem:[#allocation2 + $0xeec] ss:$16 sps:$4 sm:$0xff]   ;;  %v6893_v21 = vld [vmem:[%s7090_s24 + $0x8] ss:$0 sps:$4 sm:$0x77]  }
 0x3c6   : > { %4731 = vmatprep.subr.bf16.mxu0 %v6835_v46  ;;  %4813 = vmatprep.subr.bf16.mxu1 %v6836_v47  ;;  %v4709_v46 = vrot.slane %v6893_v21, 1  ;;  %v6894_v47 = vld [vmem:[#allocation2 + $0xee0] ss:$16 sps:$4 sm:$0xff]  }
 0x3c9   : > { %4732 = vmatpush1.bf16.msra.mxu0 %v6837_v49  ;;  %4814 = vmatpush1.bf16.msra.mxu1 %v6838_v50  ;;  %v6895_v49 = vld [vmem:[#allocation2 + $0xee8] ss:$16 sps:$4 sm:$0xff]   ;;  %v4889_v50 = vlaneseq }
 0x3ca   : > { %4733 = vmatprep.subr.bf16.mxu0 %v6839_v16  ;;  %4815 = vmatprep.subr.bf16.mxu1 %v6840_v51 }
 0x3cb   : > { %v4890_v16 = vshrl.u32 %v4889_v50, 7 }
 0x3cd   : > { %4734 = vmatpush1.bf16.msra.mxu0 %v6841_v52  ;;  %4816 = vmatpush1.bf16.msra.mxu1 %v6842_v53  ;;  %v4891_v51 = vsub.s32 0, %v4890_v16  ;;  %v4887_v52 = vld [vmem:[#allocation4] sm:$0x3]  ;;  %v4895_v53 = vsub.s32 1, %v4890_v16 }
 0x3ce   : > { %4735 = vmatprep.subr.bf16.mxu0 %v6843_v54  ;;  %4817 = vmatprep.subr.bf16.mxu1 %v6844_v57 }
 0x3d1   : > { %4736 = vmatpush1.bf16.msra.mxu0 %v6845_v62  ;;  %4818 = vmatpush1.bf16.msra.mxu1 %v6846_v63 }
 0x3d2   : > { %4737 = vmatprep.subr.bf16.mxu0 %v6847_v0  ;;  %4819 = vmatprep.subr.bf16.mxu1 %v6848_v1  ;;  %v4892_v0 = vrot.slane %v4887_v52, %v4891_v51 }
 0x3d5   : > { %4738 = vmatpush1.bf16.msra.mxu0 %v6849_v27  ;;  %4820 = vmatpush1.bf16.msra.mxu1 %v6850_v2 }
 0x3d6   : > { %4739 = vmatprep.subr.bf16.mxu0 %v6851_v3  ;;  %4821 = vmatprep.subr.bf16.mxu1 %v6852_v6  ;;  %v4896_v6 = vrot.slane %v4887_v52, %v4895_v53 }
 0x3d9   : > { %4740 = vmatpush1.bf16.msra.mxu0 %v6853_v7  ;;  %4822 = vmatpush1.bf16.msra.mxu1 %v6854_v8 }
 0x3da   : > { %4741 = vmatprep.subr.bf16.mxu0 %v6855_v9  ;;  %4823 = vmatprep.subr.bf16.mxu1 %v6856_v12 }
 0x3dd   : > { %4742 = vmatpush1.bf16.msra.mxu0 %v6857_v14  ;;  %4824 = vmatpush1.bf16.msra.mxu1 %v6858_v20 }
 0x3de   : > { %4743 = vmatprep.subr.bf16.mxu0 %v6859_v15  ;;  %4825 = vmatprep.subr.bf16.mxu1 %v6860_v25 }
 0x3e1   : > { %4744 = vmatpush1.bf16.msra.mxu0 %v6861_v17  ;;  %4826 = vmatpush1.bf16.msra.mxu1 %v6862_v18 }
 0x3e2   : > { %4754 = vmatprep.subr.bf16.mxu0 %v6863_v19  ;;  %4836 = vmatprep.subr.bf16.mxu1 %v6864_v22 }
 0x3e4   : > { %4746 = vmatmul.mubr.bf16.vlgmr.msra.gmra.mrb[4].mxu0 %v4707_v56  ;;  %4828 = vmatmul.mubr.bf16.vlgmr.msra.gmra.mrb[4].mxu1 %v4707_v56 }
 0x3e5   : > { %4755 = vmatpush1.bf16.msra.mxu0 %v6865_v48  ;;  %4837 = vmatpush1.bf16.msra.mxu1 %v6866_v32 }
 0x3e6   : > { %4756 = vmatprep.subr.bf16.mxu0 %v6867_v59  ;;  %4838 = vmatprep.subr.bf16.mxu1 %v6868_v23 }
 0x3e7   : > { %4786 = vmatprep.mubr.bf16.mxu0 %v6972_v13  ;;  %4868 = vmatprep.mubr.bf16.mxu1 %v6972_v13  ;;  %v6879_v13 = vld [vmem:[#allocation2 + $0xe84] ss:$16 sps:$4 sm:$0xff]  }
 0x3e9   : > { %4757 = vmatpush1.bf16.msra.mxu0 %v6869_v5  ;;  %4839 = vmatpush1.bf16.msra.mxu1 %v6870_v24 }
 0x3ea   : > { %4758 = vmatprep.subr.bf16.mxu0 %v6871_v26  ;;  %4840 = vmatprep.subr.bf16.mxu1 %v6872_v28 }
 0x3ed   : > { %4759 = vmatpush1.bf16.msra.mxu0 %v6873_v29  ;;  %4841 = vmatpush1.bf16.msra.mxu1 %v6874_v44 }
 0x3ee   : > { %4760 = vmatprep.subr.bf16.mxu0 %v6875_v30  ;;  %4842 = vmatprep.subr.bf16.mxu1 %v6876_v31 }
 0x3f1   : > { %4761 = vmatpush1.bf16.msra.mxu0 %v6877_v33  ;;  %4843 = vmatpush1.bf16.msra.mxu1 %v6878_v34 }
 0x3f2   : > { %4762 = vmatprep.subr.bf16.mxu0 %v6879_v13  ;;  %4844 = vmatprep.subr.bf16.mxu1 %v6880_v35 }
 0x3f5   : > { %4763 = vmatpush1.bf16.msra.mxu0 %v6881_v36  ;;  %4845 = vmatpush1.bf16.msra.mxu1 %v6882_v37 }
 0x3f6   : > { %4764 = vmatprep.subr.bf16.mxu0 %v6883_v38  ;;  %4846 = vmatprep.subr.bf16.mxu1 %v6884_v4 }
 0x3f9   : > { %4765 = vmatpush1.bf16.msra.mxu0 %v6885_v39  ;;  %4847 = vmatpush1.bf16.msra.mxu1 %v6886_v40 }
 0x3fa   : > { %4766 = vmatprep.subr.bf16.mxu0 %v6887_v41  ;;  %4848 = vmatprep.subr.bf16.mxu1 %v6888_v42 }
 0x3fd   : > { %4767 = vmatpush1.bf16.msra.mxu0 %v6889_v43  ;;  %4849 = vmatpush1.bf16.msra.mxu1 %v6890_v10 }
 0x3fe   : > { %4768 = vmatprep.subr.bf16.mxu0 %v6891_v55  ;;  %4850 = vmatprep.subr.bf16.mxu1 %v6892_v45 }
 0x401   : > { %4769 = vmatpush1.bf16.msra.mxu0 %v6894_v47  ;;  %4851 = vmatpush1.bf16.msra.mxu1 %v6895_v49 }
 0x404   : > { %4787 = vmatmul.mubr.bf16.vlgmr.msra.gmra.mrb[4].mxu0 %v4709_v46  ;;  %4869 = vmatmul.mubr.bf16.vlgmr.msra.gmra.mrb[4].mxu1 %v4709_v46 }
 0x4d7   : > { %v4788_v54 = vpop.f32.mrb[4].mxu0  ;;  %v4870_v57 = vpop.f32.mrb[4].mxu1 }
 0x4d8   : > { %v4881_v62 = vmax.f32 %v7211_v58, %v4788_v54  ;;  %v4883_v63 = vmax.f32 %v7213_v60, %v4870_v57  ;;  %v4790_v1 = vpop.f32.mrb[5].mxu0  ;;  %v4872_v27 = vpop.f32.mrb[5].mxu1 }
 0x4d9   : > { %v4882_v2 = vmax.f32 %v7215_v11, %v4790_v1  ;;  %v4884_v3 = vmax.f32 %v7217_v61, %v4872_v27  ;;  %v4792_v7 = vpop.f32.mrb[6].mxu0  ;;  %v4874_v8 = vpop.f32.mrb[6].mxu1 }
 0x4da   : > { %v4885_v9 = vmax.f32 %v4881_v62, %v4883_v63  ;;  %v4793_v12 = vpop.f32.mrb[7].mxu0  ;;  %v4875_v14 = vpop.f32.mrb[7].mxu1 }
 0x4db   : > { %v4886_v20 = vmax.f32 %v4882_v2, %v4884_v3 }
 0x4dc   : > { %v4899_v15 = vadd.f32 %v4892_v0, %v4885_v9 }
 0x4dd   : > { %v4900_v25 = vadd.f32 %v4896_v6, %v4886_v20 }
 0x4de   : > { %v4901_v58 = vmax.f32 %v4899_v15, 0.0 }
 0x4df   : > { %v4902_v56 = vmax.f32 %v4900_v25, 0.0 }
 0x4e1   : > { %v5505_v60 = vpack.c.bf16 %v4902_v56, %v4901_v58 }
 0x4e3   : > { %5506 = vst.sshfl [vmem:[%s245_s5] sm:$0x33 pattern:$0x76325410] %v5505_v60 }
 0x4e4 PF: > { %s16_s15 = sadd.s32 1, %s6966_s15  }
 0x4e5   : > { %p13_p9 = scmp.ge.s32.totalorder %s16_s15, 4  }
 0x4e7   :  { %15 = sbr.rel (!%p13_p9) target bundleno = 2 (0x2), region = 82 }
 0x4ee   :  { %4938 = vsyncpa [#allocation3], 1 }
 0x4ef   :  { %4940 = vsyncpa [#allocation3 + $0x1], 1 }
 0x4f0   :  { %4941 = vsyncpa [#allocation5], 1 }

</bundles_post_ra>
